<compile_context>
chip_gen: v6e
topology: v6e:2x2x1
jax: 0.10.0
libtpu: 0.0.40
codegen_flags: <defaults>
</compile_context>

<pallas_src>
import functools

import numpy as np
import jax
import jax.numpy as jnp
from jax import lax
from jax.experimental import pallas as pl
from jax.experimental.pallas import tpu as pltpu


# ----------------------------------------------------------------------------
# Exact GELU (matches PyTorch F.gelu default approximate='none')
# ----------------------------------------------------------------------------
def _erf(x):
    a1, a2, a3, a4, a5 = (0.254829592, -0.284496736, 1.421413741,
                          -1.453152027, 1.061405429)
    p = 0.3275911
    s = jnp.where(x < 0.0, -1.0, 1.0)
    ax = jnp.abs(x)
    t = 1.0 / (1.0 + p * ax)
    poly = t * (a1 + t * (a2 + t * (a3 + t * (a4 + t * a5))))
    return s * (1.0 - poly * jnp.exp(-ax * ax))


def _gelu(x):
    return 0.5 * x * (1.0 + _erf(x * 0.7071067811865476))


# ----------------------------------------------------------------------------
# Static tap geometry: flat row shifts + boundary masks (built once, in numpy)
# ----------------------------------------------------------------------------
def _build_tap_geometry(D, H, W, K):
    pad = (K - 1) // 2
    P = D * H * W
    r = np.arange(P)
    d = r // (H * W)
    h = (r // W) % H
    w = r % W
    shifts, cols = [], []
    for kd in range(K):
        dd = kd - pad
        for kh in range(K):
            dh = kh - pad
            for kw in range(K):
                dw = kw - pad
                shifts.append(dd * H * W + dh * W + dw)
                valid = ((d + dd >= 0) & (d + dd < D) &
                         (h + dh >= 0) & (h + dh < H) &
                         (w + dw >= 0) & (w + dw < W))
                cols.append(valid.astype(np.float32))
    return tuple(shifts), np.stack(cols, axis=1)          # (P, K**3)


# ----------------------------------------------------------------------------
# Pallas kernel: whole TCN3d forward (layers=1, eval) for B_blk batch elements
# ----------------------------------------------------------------------------
def _tcn3d_kernel(im1_ref, mask_ref, w1_ref, sb1_ref, w2_ref, misc_ref,
                  wout_ref, sel_ref, out_ref, h1pad_ref, *,
                  shifts, t_center, spad, rc):
    M, nt = im1_ref.shape
    filters = w1_ref.shape[1]

    # ---- conv1 -> bn1 -> gelu, written into the haloed h1 scratch ----------
    # Halos are re-zeroed every step: masked tap reads land there, and a
    # 0 * uninitialised-NaN would otherwise poison the accumulation.
    zhalo = jnp.zeros((spad, filters), jnp.float32)
    h1pad_ref[0:spad, :] = zhalo
    h1pad_ref[spad + M:spad + M + spad, :] = zhalo
    for c0 in range(0, M, rc):
        h1c = jnp.dot(im1_ref[c0:c0 + rc, :], w1_ref[...],
                      preferred_element_type=jnp.float32)          # (rc, F)
        h1c = _gelu(h1c * sb1_ref[0:1, :] + sb1_ref[1:2, :])
        h1pad_ref[spad + c0:spad + c0 + rc, :] = h1c               # aligned rows

    # ---- conv2 (channel features-1 only) + bn2 + gelu + residual + head ----
    shift2 = misc_ref[0:1, 0:1]     # bn2 shift (bn2 scale folded into w2)
    w11_s = misc_ref[0:1, 1:2]      # conv_1x1 weight, channel features-1
    w11_b = misc_ref[0:1, 2:3]      # conv_1x1 bias,   channel features-1
    y = jnp.zeros(out_ref.shape, jnp.float32)
    for c0 in range(0, M, rc):
        # acc[i, f] = sum_t mask[c0+i, t] * h1[c0+i+shift_t, f] * w2[t, f]
        acc = None
        for t in range(nt):
            base = spad + c0 + shifts[t]
            h1s = h1pad_ref[base:base + rc, :]                     # rows r <- r+s
            term = h1s * mask_ref[c0:c0 + rc, t:t + 1] * w2_ref[t:t + 1, :]
            acc = term if acc is None else acc + term
        c2 = jnp.sum(acc, axis=1, keepdims=True)                   # (rc, 1)
        o = _gelu(c2 + shift2)
        # residual conv_1x1 (same channel), from the centre tap of the im2col
        res = im1_ref[c0:c0 + rc, t_center:t_center + 1] * w11_s + w11_b
        x_last = o + res                                           # (rc, 1)
        # head: x[:, -1].view(B,-1) @ W_out^T as one MXU dot per chunk against
        # a block-diagonal 0/1 selector (no per-batch sublane reductions).
        prod = x_last * wout_ref[c0:c0 + rc, :]                    # (rc, out)
        y = y + jnp.dot(sel_ref[:, c0:c0 + rc], prod,
                        preferred_element_type=jnp.float32)        # (B_blk, out)
    out_ref[...] = _gelu(y)                                        # single store


# ----------------------------------------------------------------------------
# Wrapper: parameter packing + pallas_call
# ----------------------------------------------------------------------------
def tcn3d_forward(x_ncdhw, p):
    N, cin, D, H, W = x_ncdhw.shape
    assert cin == 1
    P = D * H * W
    K = p['kernel_s']
    nt = K ** 3
    pad = (K - 1) // 2
    filters, features, output_size = p['filters'], p['features'], p['output_size']
    # Implied by x.view(N, -1) feeding nn.Linear(features, output_size):
    assert P == features

    # Batch blocking: target ~512 MXU rows per step; keep >= 2 "parallel" grid
    # steps when N >= 2 so both v7x TensorCores get work.
    TARGET_ROWS = 512
    B_blk = max(1, min(N, max(1, TARGET_ROWS // P)))
    grid_n = -(-N // B_blk)
    if grid_n == 1 and N >= 2:
        B_blk = -(-N // 2)
        grid_n = -(-N // B_blk)
    N_pad = grid_n * B_blk
    M = B_blk * P

    # Row-chunk size: bounds register pressure independently of M (one batch
    # element per chunk; split further for very large volumes).
    RC = P
    if P > 256:
        for cand in (256, 128, 64, 32, 16, 8):
            if P % cand == 0:
                RC = cand
                break
    assert M % RC == 0

    # ---- conv1 im2col built in the wrapper (layout plumbing, not compute) --
    xv = x_ncdhw.reshape(N, D, H, W).astype(jnp.float32)
    xp = jnp.pad(xv, ((0, 0), (pad, pad), (pad, pad), (pad, pad)))
    cols = []
    for kd in range(K):
        for kh in range(K):
            for kw in range(K):
                cols.append(xp[:, kd:kd + D, kh:kh + H, kw:kw + W].reshape(N, P))
    im1 = jnp.stack(cols, axis=-1)                          # (N, P, nt)
    if N_pad != N:
        im1 = jnp.concatenate(
            [im1, jnp.zeros((N_pad - N, P, nt), im1.dtype)], axis=0)
    im1 = im1.reshape(grid_n, M, nt)

    # ---- static tap geometry (conv2 shifts + boundary mask) ----------------
    shifts, mask_p = _build_tap_geometry(D, H, W, K)        # (P, nt)
    t_center = shifts.index(0)
    smax = max(abs(s) for s in shifts)
    SPAD = ((smax + 7) // 8) * 8 or 8                       # aligned halo rows
    mask = jnp.asarray(np.tile(mask_p, (B_blk, 1)))         # (M, nt)

    # ---- fold conv bias + eval-mode BatchNorm into per-channel scale/shift -
    eps = 1e-5
    scale1 = p['bn1_gamma'] * lax.rsqrt(p['bn1_var'] + eps)
    shift1 = p['bn1_beta'] + (p['b1'] - p['bn1_mean']) * scale1
    sb1 = jnp.stack([scale1, shift1], axis=0)               # (2, filters)

    c = features - 1     # the only channel that reaches x[:, -1] -> Linear
    scale2 = p['bn2_gamma'][c] * lax.rsqrt(p['bn2_var'][c] + eps)
    shift2 = p['bn2_beta'][c] + (p['b2'][c] - p['bn2_mean'][c]) * scale2

    # Conv weights in tap-major packing; conv2 / conv_1x1 sliced to channel c.
    w1 = jnp.transpose(p['w1'], (2, 3, 4, 1, 0)).reshape(nt, filters)
    w2l = jnp.transpose(p['w2'][c], (1, 2, 3, 0)).reshape(nt, filters) * scale2
    w11_s = p['w_1x1'].reshape(features)[c]
    w11_b = p['b_1x1'][c]
    misc = jnp.stack([shift2, w11_s, w11_b]).reshape(1, 3).astype(jnp.float32)

    wout_t = jnp.tile(p['w_out'].T, (B_blk, 1))             # (M, output_size)
    sel = jnp.asarray(np.kron(np.eye(B_blk, dtype=np.float32),
                              np.ones((1, P), np.float32)))  # (B_blk, M)

    kernel = functools.partial(_tcn3d_kernel, shifts=shifts, t_center=t_center,
                               spad=SPAD, rc=RC)

    out3 = pl.pallas_call(
        kernel,
        out_shape=jax.ShapeDtypeStruct((grid_n, B_blk, output_size), jnp.float32),
        grid_spec=pltpu.PrefetchScalarGridSpec(
            num_scalar_prefetch=0,
            grid=(grid_n,),
            in_specs=[
                pl.BlockSpec((None, M, nt), lambda n: (n, 0, 0)),   # conv1 im2col
                pl.BlockSpec((M, nt), lambda n: (0, 0)),            # tap mask
                pl.BlockSpec((nt, filters), lambda n: (0, 0)),      # w1 (tap-major)
                pl.BlockSpec((2, filters), lambda n: (0, 0)),       # bn1 scale/shift
                pl.BlockSpec((nt, filters), lambda n: (0, 0)),      # w2[:, c]*bn2scale
                pl.BlockSpec((1, 3), lambda n: (0, 0)),             # scalars
                pl.BlockSpec((M, output_size), lambda n: (0, 0)),   # tiled W_out^T
                pl.BlockSpec((B_blk, M), lambda n: (0, 0)),         # block-diag sel
            ],
            out_specs=pl.BlockSpec((None, B_blk, output_size),
                                   lambda n: (n, 0, 0)),
            scratch_shapes=[
                pltpu.VMEM((M + 2 * SPAD, filters), jnp.float32),   # haloed h1
            ],
        ),
        compiler_params=pltpu.CompilerParams(
            dimension_semantics=("parallel",)),
    )(im1, mask, w1, sb1, w2l, misc, wout_t, sel)
    return out3.reshape(N_pad, output_size)[:N]


# ----------------------------------------------------------------------------
# Pure-JAX reference (mirrors the PyTorch forward in eval mode, full channels)
# ----------------------------------------------------------------------------
def ref_forward(x_ncdhw, p):
    eps = 1e-5
    feats = p['features']
    pad = (p['kernel_s'] - 1) // 2
    x = jnp.transpose(x_ncdhw, (0, 2, 3, 4, 1))               # NDHWC

    def conv3d(inp, w_oidhw, b):
        w = jnp.transpose(w_oidhw, (2, 3, 4, 1, 0))           # DHWIO
        dn = lax.conv_dimension_numbers(inp.shape, w.shape,
                                        ('NDHWC', 'DHWIO', 'NDHWC'))
        y = lax.conv_general_dilated(inp, w, (1, 1, 1), [(pad, pad)] * 3,
                                     dimension_numbers=dn,
                                     precision=lax.Precision.HIGHEST)
        return y + b

    def bn(y, g, b_, m, v):
        return (y - m) * lax.rsqrt(v + eps) * g + b_

    res = x * p['w_1x1'].reshape(feats) + p['b_1x1']
    h = _gelu(bn(conv3d(x, p['w1'], p['b1']),
                 p['bn1_gamma'], p['bn1_beta'], p['bn1_mean'], p['bn1_var']))
    o = _gelu(bn(conv3d(h, p['w2'], p['b2']),
                 p['bn2_gamma'], p['bn2_beta'], p['bn2_mean'], p['bn2_var']))
    xo = o + res
    last = xo[..., feats - 1]                                 # (N, D, H, W)
    flat = last.reshape(last.shape[0], -1)                    # (N, features)
    return _gelu(jnp.matmul(flat, p['w_out'].T, precision=lax.Precision.HIGHEST))


# ----------------------------------------------------------------------------
if __name__ == "__main__":
    N, D, H, W = 4, 4, 4, 4
    K = 3
    filters = 16
    features = D * H * W    # must equal D*H*W for the module's Linear to work
    output_size = 8

    key = jax.random.PRNGKey(0)
    ks = jax.random.split(key, 16)

    def nrm(k, shape, scale=0.1):
        return scale * jax.random.normal(k, shape, dtype=jnp.float32)

    params = dict(
        features=features, filters=filters, output_size=output_size, kernel_s=K,
        w1=nrm(ks[0], (filters, 1, K, K, K)),
        b1=nrm(ks[1], (filters,)),
        w2=nrm(ks[2], (features, filters, K, K, K)),
        b2=nrm(ks[3], (features,)),
        w_1x1=nrm(ks[4], (features, 1, 1, 1, 1)),
        b_1x1=nrm(ks[5], (features,)),
        bn1_gamma=1.0 + nrm(ks[6], (filters,)),
        bn1_beta=nrm(ks[7], (filters,)),
        bn1_mean=nrm(ks[8], (filters,)),
        bn1_var=0.5 + jax.random.uniform(ks[9], (filters,), dtype=jnp.float32),
        bn2_gamma=1.0 + nrm(ks[10], (features,)),
        bn2_beta=nrm(ks[11], (features,)),
        bn2_mean=nrm(ks[12], (features,)),
        bn2_var=0.5 + jax.random.uniform(ks[13], (features,), dtype=jnp.float32),
        w_out=nrm(ks[14], (output_size, features)),
    )
    x = jax.random.normal(ks[15], (N, 1, D, H, W), dtype=jnp.float32)

    out = jax.block_until_ready(tcn3d_forward(x, params))
    assert out.shape == (N, output_size)

    ref = jax.block_until_ready(ref_forward(x, params))
    # Tolerance covers default-precision (bf16-input) MXU passes for the conv1
    # and head dots; the conv2 path is exact f32 VPU math.
    np.testing.assert_allclose(np.asarray(out), np.asarray(ref),
                               atol=5e-3, rtol=5e-3)
    print("KERNEL_OK")
</pallas_src>

<mosaic_0001>
module attributes {stable_mosaic.version = 11 : i64} {
  func.func @_tcn3d_kernel(%arg0: i32, %arg1: memref<1x128x27xf32, #tpu.memory_space<vmem>>, %arg2: memref<128x27xf32, #tpu.memory_space<vmem>>, %arg3: memref<27x16xf32, #tpu.memory_space<vmem>>, %arg4: memref<2x16xf32, #tpu.memory_space<vmem>>, %arg5: memref<27x16xf32, #tpu.memory_space<vmem>>, %arg6: memref<1x3xf32, #tpu.memory_space<vmem>>, %arg7: memref<128x8xf32, #tpu.memory_space<vmem>>, %arg8: memref<2x128xf32, #tpu.memory_space<vmem>>, %arg9: memref<1x2x8xf32, #tpu.memory_space<vmem>>, %arg10: memref<176x16xf32, #tpu.memory_space<vmem>>) attributes {dimension_semantics = [#tpu.dimension_semantics<parallel>], iteration_bounds = array<i64: 2>, scalar_prefetch = 0 : i64, scratch_operands = 1 : i64, tpu.core_type = #tpu.core_type<tc>, window_params = [{transform_indices = @transform_0, window_bounds = array<i64: 1, 128, 27>}, {pipeline_mode = #tpu.pipeline_mode<synchronous>, transform_indices = @transform_1, window_bounds = array<i64: 128, 27>}, {pipeline_mode = #tpu.pipeline_mode<synchronous>, transform_indices = @transform_2, window_bounds = array<i64: 27, 16>}, {pipeline_mode = #tpu.pipeline_mode<synchronous>, transform_indices = @transform_3, window_bounds = array<i64: 2, 16>}, {pipeline_mode = #tpu.pipeline_mode<synchronous>, transform_indices = @transform_4, window_bounds = array<i64: 27, 16>}, {pipeline_mode = #tpu.pipeline_mode<synchronous>, transform_indices = @transform_5, window_bounds = array<i64: 1, 3>}, {pipeline_mode = #tpu.pipeline_mode<synchronous>, transform_indices = @transform_6, window_bounds = array<i64: 128, 8>}, {pipeline_mode = #tpu.pipeline_mode<synchronous>, transform_indices = @transform_7, window_bounds = array<i64: 2, 128>}, {transform_indices = @transform_8, window_bounds = array<i64: 1, 2, 8>}]} {
    %cst = arith.constant 0.000000e+00 : f32
    %0 = vector.broadcast %cst : f32 to vector<24x16xf32>
    %c0 = arith.constant 0 : index
    %c0_0 = arith.constant 0 : index
    %1 = vector.load %arg10[%c0, %c0_0] : memref<176x16xf32, #tpu.memory_space<vmem>>, vector<24x16xf32>
    tpu.vector_store %arg10[%c0, %c0_0], %0 {strides = array<i32>} : memref<176x16xf32, #tpu.memory_space<vmem>>, vector<24x16xf32>,
    %c152 = arith.constant 152 : index
    %c0_1 = arith.constant 0 : index
    %2 = vector.load %arg10[%c152, %c0_1] : memref<176x16xf32, #tpu.memory_space<vmem>>, vector<24x16xf32>
    tpu.vector_store %arg10[%c152, %c0_1], %0 {strides = array<i32>} : memref<176x16xf32, #tpu.memory_space<vmem>>, vector<24x16xf32>,
    %c0_2 = arith.constant 0 : index
    %c0_3 = arith.constant 0 : index
    %c0_4 = arith.constant 0 : index
    %3 = vector.load %arg1[%c0_2, %c0_3, %c0_4] : memref<1x128x27xf32, #tpu.memory_space<vmem>>, vector<1x64x27xf32>
    %4 = vector.shape_cast %3 : vector<1x64x27xf32> to vector<64x27xf32>
    %c0_5 = arith.constant 0 : index
    %c0_6 = arith.constant 0 : index
    %5 = vector.load %arg3[%c0_5, %c0_6] : memref<27x16xf32, #tpu.memory_space<vmem>>, vector<27x16xf32>
    %cst_7 = arith.constant dense<0.000000e+00> : vector<64x16xf32>
    %6 = tpu.matmul %4, %5, %cst_7 {dimension_numbers = #tpu.dot_dimension_numbers<[1], [0], [0], [1], [0, 0, 1, 1], [], []>} : vector<64x27xf32>, vector<27x16xf32>, vector<64x16xf32> -> vector<64x16xf32>
    %c0_8 = arith.constant 0 : index
    %c0_9 = arith.constant 0 : index
    %7 = vector.load %arg4[%c0_8, %c0_9] : memref<2x16xf32, #tpu.memory_space<vmem>>, vector<1x16xf32>
    %8 = vector.broadcast %7 : vector<1x16xf32> to vector<64x16xf32>
    %9 = arith.mulf %6, %8 : vector<64x16xf32>
    %c1 = arith.constant 1 : index
    %c0_10 = arith.constant 0 : index
    %10 = vector.load %arg4[%c1, %c0_10] : memref<2x16xf32, #tpu.memory_space<vmem>>, vector<1x16xf32>
    %11 = vector.broadcast %10 : vector<1x16xf32> to vector<64x16xf32>
    %12 = arith.addf %9, %11 : vector<64x16xf32>
    %cst_11 = arith.constant 5.000000e-01 : f32
    %13 = vector.broadcast %cst_11 : f32 to vector<64x16xf32>
    %14 = arith.mulf %13, %12 : vector<64x16xf32>
    %cst_12 = arith.constant 0.707106769 : f32
    %15 = vector.broadcast %cst_12 : f32 to vector<64x16xf32>
    %16 = arith.mulf %12, %15 : vector<64x16xf32>
    %cst_13 = arith.constant 0.000000e+00 : f32
    %17 = vector.broadcast %cst_13 : f32 to vector<64x16xf32>
    %18 = arith.cmpf olt, %16, %17 : vector<64x16xf32>
    %cst_14 = arith.constant -1.000000e+00 : f32
    %cst_15 = arith.constant 1.000000e+00 : f32
    %19 = vector.broadcast %cst_14 : f32 to vector<64x16xf32>
    %20 = vector.broadcast %cst_15 : f32 to vector<64x16xf32>
    %21 = arith.select %18, %19, %20 : vector<64x16xi1>, vector<64x16xf32>
    %22 = math.absf %16 : vector<64x16xf32>
    %cst_16 = arith.constant 0.327591091 : f32
    %23 = vector.broadcast %cst_16 : f32 to vector<64x16xf32>
    %24 = arith.mulf %23, %22 : vector<64x16xf32>
    %cst_17 = arith.constant 1.000000e+00 : f32
    %25 = vector.broadcast %cst_17 : f32 to vector<64x16xf32>
    %26 = arith.addf %25, %24 : vector<64x16xf32>
    %cst_18 = arith.constant 1.000000e+00 : f32
    %27 = vector.broadcast %cst_18 : f32 to vector<64x16xf32>
    %28 = arith.divf %27, %26 : vector<64x16xf32>
    %cst_19 = arith.constant 1.06140542 : f32
    %29 = vector.broadcast %cst_19 : f32 to vector<64x16xf32>
    %30 = arith.mulf %28, %29 : vector<64x16xf32>
    %cst_20 = arith.constant -1.45315206 : f32
    %31 = vector.broadcast %cst_20 : f32 to vector<64x16xf32>
    %32 = arith.addf %31, %30 : vector<64x16xf32>
    %33 = arith.mulf %28, %32 : vector<64x16xf32>
    %cst_21 = arith.constant 1.42141378 : f32
    %34 = vector.broadcast %cst_21 : f32 to vector<64x16xf32>
    %35 = arith.addf %34, %33 : vector<64x16xf32>
    %36 = arith.mulf %28, %35 : vector<64x16xf32>
    %cst_22 = arith.constant -0.284496725 : f32
    %37 = vector.broadcast %cst_22 : f32 to vector<64x16xf32>
    %38 = arith.addf %37, %36 : vector<64x16xf32>
    %39 = arith.mulf %28, %38 : vector<64x16xf32>
    %cst_23 = arith.constant 0.254829586 : f32
    %40 = vector.broadcast %cst_23 : f32 to vector<64x16xf32>
    %41 = arith.addf %40, %39 : vector<64x16xf32>
    %42 = arith.mulf %28, %41 : vector<64x16xf32>
    %cst_24 = arith.constant 0.000000e+00 : f32
    %43 = vector.broadcast %cst_24 : f32 to vector<64x16xf32>
    %44 = arith.subf %43, %22 : vector<64x16xf32>
    %45 = arith.mulf %44, %22 : vector<64x16xf32>
    %46 = math.exp %45 : vector<64x16xf32>
    %47 = arith.mulf %42, %46 : vector<64x16xf32>
    %cst_25 = arith.constant 1.000000e+00 : f32
    %48 = vector.broadcast %cst_25 : f32 to vector<64x16xf32>
    %49 = arith.subf %48, %47 : vector<64x16xf32>
    %50 = arith.mulf %21, %49 : vector<64x16xf32>
    %cst_26 = arith.constant 1.000000e+00 : f32
    %51 = vector.broadcast %cst_26 : f32 to vector<64x16xf32>
    %52 = arith.addf %51, %50 : vector<64x16xf32>
    %53 = arith.mulf %14, %52 : vector<64x16xf32>
    %c24 = arith.constant 24 : index
    %c0_27 = arith.constant 0 : index
    %54 = vector.load %arg10[%c24, %c0_27] : memref<176x16xf32, #tpu.memory_space<vmem>>, vector<64x16xf32>
    tpu.vector_store %arg10[%c24, %c0_27], %53 {strides = array<i32>} : memref<176x16xf32, #tpu.memory_space<vmem>>, vector<64x16xf32>,
    %c0_28 = arith.constant 0 : index
    %c64 = arith.constant 64 : index
    %c0_29 = arith.constant 0 : index
    %55 = vector.load %arg1[%c0_28, %c64, %c0_29] : memref<1x128x27xf32, #tpu.memory_space<vmem>>, vector<1x64x27xf32>
    %56 = vector.shape_cast %55 : vector<1x64x27xf32> to vector<64x27xf32>
    %c0_30 = arith.constant 0 : index
    %c0_31 = arith.constant 0 : index
    %57 = vector.load %arg3[%c0_30, %c0_31] : memref<27x16xf32, #tpu.memory_space<vmem>>, vector<27x16xf32>
    %cst_32 = arith.constant dense<0.000000e+00> : vector<64x16xf32>
    %58 = tpu.matmul %56, %57, %cst_32 {dimension_numbers = #tpu.dot_dimension_numbers<[1], [0], [0], [1], [0, 0, 1, 1], [], []>} : vector<64x27xf32>, vector<27x16xf32>, vector<64x16xf32> -> vector<64x16xf32>
    %c0_33 = arith.constant 0 : index
    %c0_34 = arith.constant 0 : index
    %59 = vector.load %arg4[%c0_33, %c0_34] : memref<2x16xf32, #tpu.memory_space<vmem>>, vector<1x16xf32>
    %60 = vector.broadcast %59 : vector<1x16xf32> to vector<64x16xf32>
    %61 = arith.mulf %58, %60 : vector<64x16xf32>
    %c1_35 = arith.constant 1 : index
    %c0_36 = arith.constant 0 : index
    %62 = vector.load %arg4[%c1_35, %c0_36] : memref<2x16xf32, #tpu.memory_space<vmem>>, vector<1x16xf32>
    %63 = vector.broadcast %62 : vector<1x16xf32> to vector<64x16xf32>
    %64 = arith.addf %61, %63 : vector<64x16xf32>
    %cst_37 = arith.constant 5.000000e-01 : f32
    %65 = vector.broadcast %cst_37 : f32 to vector<64x16xf32>
    %66 = arith.mulf %65, %64 : vector<64x16xf32>
    %cst_38 = arith.constant 0.707106769 : f32
    %67 = vector.broadcast %cst_38 : f32 to vector<64x16xf32>
    %68 = arith.mulf %64, %67 : vector<64x16xf32>
    %cst_39 = arith.constant 0.000000e+00 : f32
    %69 = vector.broadcast %cst_39 : f32 to vector<64x16xf32>
    %70 = arith.cmpf olt, %68, %69 : vector<64x16xf32>
    %cst_40 = arith.constant -1.000000e+00 : f32
    %cst_41 = arith.constant 1.000000e+00 : f32
    %71 = vector.broadcast %cst_40 : f32 to vector<64x16xf32>
    %72 = vector.broadcast %cst_41 : f32 to vector<64x16xf32>
    %73 = arith.select %70, %71, %72 : vector<64x16xi1>, vector<64x16xf32>
    %74 = math.absf %68 : vector<64x16xf32>
    %cst_42 = arith.constant 0.327591091 : f32
    %75 = vector.broadcast %cst_42 : f32 to vector<64x16xf32>
    %76 = arith.mulf %75, %74 : vector<64x16xf32>
    %cst_43 = arith.constant 1.000000e+00 : f32
    %77 = vector.broadcast %cst_43 : f32 to vector<64x16xf32>
    %78 = arith.addf %77, %76 : vector<64x16xf32>
    %cst_44 = arith.constant 1.000000e+00 : f32
    %79 = vector.broadcast %cst_44 : f32 to vector<64x16xf32>
    %80 = arith.divf %79, %78 : vector<64x16xf32>
    %cst_45 = arith.constant 1.06140542 : f32
    %81 = vector.broadcast %cst_45 : f32 to vector<64x16xf32>
    %82 = arith.mulf %80, %81 : vector<64x16xf32>
    %cst_46 = arith.constant -1.45315206 : f32
    %83 = vector.broadcast %cst_46 : f32 to vector<64x16xf32>
    %84 = arith.addf %83, %82 : vector<64x16xf32>
    %85 = arith.mulf %80, %84 : vector<64x16xf32>
    %cst_47 = arith.constant 1.42141378 : f32
    %86 = vector.broadcast %cst_47 : f32 to vector<64x16xf32>
    %87 = arith.addf %86, %85 : vector<64x16xf32>
    %88 = arith.mulf %80, %87 : vector<64x16xf32>
    %cst_48 = arith.constant -0.284496725 : f32
    %89 = vector.broadcast %cst_48 : f32 to vector<64x16xf32>
    %90 = arith.addf %89, %88 : vector<64x16xf32>
    %91 = arith.mulf %80, %90 : vector<64x16xf32>
    %cst_49 = arith.constant 0.254829586 : f32
    %92 = vector.broadcast %cst_49 : f32 to vector<64x16xf32>
    %93 = arith.addf %92, %91 : vector<64x16xf32>
    %94 = arith.mulf %80, %93 : vector<64x16xf32>
    %cst_50 = arith.constant 0.000000e+00 : f32
    %95 = vector.broadcast %cst_50 : f32 to vector<64x16xf32>
    %96 = arith.subf %95, %74 : vector<64x16xf32>
    %97 = arith.mulf %96, %74 : vector<64x16xf32>
    %98 = math.exp %97 : vector<64x16xf32>
    %99 = arith.mulf %94, %98 : vector<64x16xf32>
    %cst_51 = arith.constant 1.000000e+00 : f32
    %100 = vector.broadcast %cst_51 : f32 to vector<64x16xf32>
    %101 = arith.subf %100, %99 : vector<64x16xf32>
    %102 = arith.mulf %73, %101 : vector<64x16xf32>
    %cst_52 = arith.constant 1.000000e+00 : f32
    %103 = vector.broadcast %cst_52 : f32 to vector<64x16xf32>
    %104 = arith.addf %103, %102 : vector<64x16xf32>
    %105 = arith.mulf %66, %104 : vector<64x16xf32>
    %c88 = arith.constant 88 : index
    %c0_53 = arith.constant 0 : index
    %106 = vector.load %arg10[%c88, %c0_53] : memref<176x16xf32, #tpu.memory_space<vmem>>, vector<64x16xf32>
    tpu.vector_store %arg10[%c88, %c0_53], %105 {strides = array<i32>} : memref<176x16xf32, #tpu.memory_space<vmem>>, vector<64x16xf32>,
    %c0_54 = arith.constant 0 : index
    %c0_55 = arith.constant 0 : index
    %107 = vector.load %arg6[%c0_54, %c0_55] : memref<1x3xf32, #tpu.memory_space<vmem>>, vector<1x1xf32>
    %c0_56 = arith.constant 0 : index
    %c1_57 = arith.constant 1 : index
    %108 = vector.load %arg6[%c0_56, %c1_57] : memref<1x3xf32, #tpu.memory_space<vmem>>, vector<1x1xf32>
    %c0_58 = arith.constant 0 : index
    %c2 = arith.constant 2 : index
    %109 = vector.load %arg6[%c0_58, %c2] : memref<1x3xf32, #tpu.memory_space<vmem>>, vector<1x1xf32>
    %cst_59 = arith.constant 0.000000e+00 : f32
    %110 = vector.broadcast %cst_59 : f32 to vector<2x8xf32>
    %c3 = arith.constant 3 : index
    %c0_60 = arith.constant 0 : index
    %111 = vector.load %arg10[%c3, %c0_60] : memref<176x16xf32, #tpu.memory_space<vmem>>, vector<64x16xf32>
    %c0_61 = arith.constant 0 : index
    %c0_62 = arith.constant 0 : index
    %112 = vector.load %arg2[%c0_61, %c0_62] : memref<128x27xf32, #tpu.memory_space<vmem>>, vector<64x1xf32>
    %113 = vector.broadcast %112 : vector<64x1xf32> to vector<64x16xf32>
    %114 = arith.mulf %111, %113 : vector<64x16xf32>
    %c0_63 = arith.constant 0 : index
    %c0_64 = arith.constant 0 : index
    %115 = vector.load %arg5[%c0_63, %c0_64] : memref<27x16xf32, #tpu.memory_space<vmem>>, vector<1x16xf32>
    %116 = vector.broadcast %115 : vector<1x16xf32> to vector<64x16xf32>
    %117 = arith.mulf %114, %116 : vector<64x16xf32>
    %c4 = arith.constant 4 : index
    %c0_65 = arith.constant 0 : index
    %118 = vector.load %arg10[%c4, %c0_65] : memref<176x16xf32, #tpu.memory_space<vmem>>, vector<64x16xf32>
    %c0_66 = arith.constant 0 : index
    %c1_67 = arith.constant 1 : index
    %119 = vector.load %arg2[%c0_66, %c1_67] : memref<128x27xf32, #tpu.memory_space<vmem>>, vector<64x1xf32>
    %120 = vector.broadcast %119 : vector<64x1xf32> to vector<64x16xf32>
    %121 = arith.mulf %118, %120 : vector<64x16xf32>
    %c1_68 = arith.constant 1 : index
    %c0_69 = arith.constant 0 : index
    %122 = vector.load %arg5[%c1_68, %c0_69] : memref<27x16xf32, #tpu.memory_space<vmem>>, vector<1x16xf32>
    %123 = vector.broadcast %122 : vector<1x16xf32> to vector<64x16xf32>
    %124 = arith.mulf %121, %123 : vector<64x16xf32>
    %125 = arith.addf %117, %124 : vector<64x16xf32>
    %c5 = arith.constant 5 : index
    %c0_70 = arith.constant 0 : index
    %126 = vector.load %arg10[%c5, %c0_70] : memref<176x16xf32, #tpu.memory_space<vmem>>, vector<64x16xf32>
    %c0_71 = arith.constant 0 : index
    %c2_72 = arith.constant 2 : index
    %127 = vector.load %arg2[%c0_71, %c2_72] : memref<128x27xf32, #tpu.memory_space<vmem>>, vector<64x1xf32>
    %128 = vector.broadcast %127 : vector<64x1xf32> to vector<64x16xf32>
    %129 = arith.mulf %126, %128 : vector<64x16xf32>
    %c2_73 = arith.constant 2 : index
    %c0_74 = arith.constant 0 : index
    %130 = vector.load %arg5[%c2_73, %c0_74] : memref<27x16xf32, #tpu.memory_space<vmem>>, vector<1x16xf32>
    %131 = vector.broadcast %130 : vector<1x16xf32> to vector<64x16xf32>
    %132 = arith.mulf %129, %131 : vector<64x16xf32>
    %133 = arith.addf %125, %132 : vector<64x16xf32>
    %c7 = arith.constant 7 : index
    %c0_75 = arith.constant 0 : index
    %134 = vector.load %arg10[%c7, %c0_75] : memref<176x16xf32, #tpu.memory_space<vmem>>, vector<64x16xf32>
    %c0_76 = arith.constant 0 : index
    %c3_77 = arith.constant 3 : index
    %135 = vector.load %arg2[%c0_76, %c3_77] : memref<128x27xf32, #tpu.memory_space<vmem>>, vector<64x1xf32>
    %136 = vector.broadcast %135 : vector<64x1xf32> to vector<64x16xf32>
    %137 = arith.mulf %134, %136 : vector<64x16xf32>
    %c3_78 = arith.constant 3 : index
    %c0_79 = arith.constant 0 : index
    %138 = vector.load %arg5[%c3_78, %c0_79] : memref<27x16xf32, #tpu.memory_space<vmem>>, vector<1x16xf32>
    %139 = vector.broadcast %138 : vector<1x16xf32> to vector<64x16xf32>
    %140 = arith.mulf %137, %139 : vector<64x16xf32>
    %141 = arith.addf %133, %140 : vector<64x16xf32>
    %c8 = arith.constant 8 : index
    %c0_80 = arith.constant 0 : index
    %142 = vector.load %arg10[%c8, %c0_80] : memref<176x16xf32, #tpu.memory_space<vmem>>, vector<64x16xf32>
    %c0_81 = arith.constant 0 : index
    %c4_82 = arith.constant 4 : index
    %143 = vector.load %arg2[%c0_81, %c4_82] : memref<128x27xf32, #tpu.memory_space<vmem>>, vector<64x1xf32>
    %144 = vector.broadcast %143 : vector<64x1xf32> to vector<64x16xf32>
    %145 = arith.mulf %142, %144 : vector<64x16xf32>
    %c4_83 = arith.constant 4 : index
    %c0_84 = arith.constant 0 : index
    %146 = vector.load %arg5[%c4_83, %c0_84] : memref<27x16xf32, #tpu.memory_space<vmem>>, vector<1x16xf32>
    %147 = vector.broadcast %146 : vector<1x16xf32> to vector<64x16xf32>
    %148 = arith.mulf %145, %147 : vector<64x16xf32>
    %149 = arith.addf %141, %148 : vector<64x16xf32>
    %c9 = arith.constant 9 : index
    %c0_85 = arith.constant 0 : index
    %150 = vector.load %arg10[%c9, %c0_85] : memref<176x16xf32, #tpu.memory_space<vmem>>, vector<64x16xf32>
    %c0_86 = arith.constant 0 : index
    %c5_87 = arith.constant 5 : index
    %151 = vector.load %arg2[%c0_86, %c5_87] : memref<128x27xf32, #tpu.memory_space<vmem>>, vector<64x1xf32>
    %152 = vector.broadcast %151 : vector<64x1xf32> to vector<64x16xf32>
    %153 = arith.mulf %150, %152 : vector<64x16xf32>
    %c5_88 = arith.constant 5 : index
    %c0_89 = arith.constant 0 : index
    %154 = vector.load %arg5[%c5_88, %c0_89] : memref<27x16xf32, #tpu.memory_space<vmem>>, vector<1x16xf32>
    %155 = vector.broadcast %154 : vector<1x16xf32> to vector<64x16xf32>
    %156 = arith.mulf %153, %155 : vector<64x16xf32>
    %157 = arith.addf %149, %156 : vector<64x16xf32>
    %c11 = arith.constant 11 : index
    %c0_90 = arith.constant 0 : index
    %158 = vector.load %arg10[%c11, %c0_90] : memref<176x16xf32, #tpu.memory_space<vmem>>, vector<64x16xf32>
    %c0_91 = arith.constant 0 : index
    %c6 = arith.constant 6 : index
    %159 = vector.load %arg2[%c0_91, %c6] : memref<128x27xf32, #tpu.memory_space<vmem>>, vector<64x1xf32>
    %160 = vector.broadcast %159 : vector<64x1xf32> to vector<64x16xf32>
    %161 = arith.mulf %158, %160 : vector<64x16xf32>
    %c6_92 = arith.constant 6 : index
    %c0_93 = arith.constant 0 : index
    %162 = vector.load %arg5[%c6_92, %c0_93] : memref<27x16xf32, #tpu.memory_space<vmem>>, vector<1x16xf32>
    %163 = vector.broadcast %162 : vector<1x16xf32> to vector<64x16xf32>
    %164 = arith.mulf %161, %163 : vector<64x16xf32>
    %165 = arith.addf %157, %164 : vector<64x16xf32>
    %c12 = arith.constant 12 : index
    %c0_94 = arith.constant 0 : index
    %166 = vector.load %arg10[%c12, %c0_94] : memref<176x16xf32, #tpu.memory_space<vmem>>, vector<64x16xf32>
    %c0_95 = arith.constant 0 : index
    %c7_96 = arith.constant 7 : index
    %167 = vector.load %arg2[%c0_95, %c7_96] : memref<128x27xf32, #tpu.memory_space<vmem>>, vector<64x1xf32>
    %168 = vector.broadcast %167 : vector<64x1xf32> to vector<64x16xf32>
    %169 = arith.mulf %166, %168 : vector<64x16xf32>
    %c7_97 = arith.constant 7 : index
    %c0_98 = arith.constant 0 : index
    %170 = vector.load %arg5[%c7_97, %c0_98] : memref<27x16xf32, #tpu.memory_space<vmem>>, vector<1x16xf32>
    %171 = vector.broadcast %170 : vector<1x16xf32> to vector<64x16xf32>
    %172 = arith.mulf %169, %171 : vector<64x16xf32>
    %173 = arith.addf %165, %172 : vector<64x16xf32>
    %c13 = arith.constant 13 : index
    %c0_99 = arith.constant 0 : index
    %174 = vector.load %arg10[%c13, %c0_99] : memref<176x16xf32, #tpu.memory_space<vmem>>, vector<64x16xf32>
    %c0_100 = arith.constant 0 : index
    %c8_101 = arith.constant 8 : index
    %175 = vector.load %arg2[%c0_100, %c8_101] : memref<128x27xf32, #tpu.memory_space<vmem>>, vector<64x1xf32>
    %176 = vector.broadcast %175 : vector<64x1xf32> to vector<64x16xf32>
    %177 = arith.mulf %174, %176 : vector<64x16xf32>
    %c8_102 = arith.constant 8 : index
    %c0_103 = arith.constant 0 : index
    %178 = vector.load %arg5[%c8_102, %c0_103] : memref<27x16xf32, #tpu.memory_space<vmem>>, vector<1x16xf32>
    %179 = vector.broadcast %178 : vector<1x16xf32> to vector<64x16xf32>
    %180 = arith.mulf %177, %179 : vector<64x16xf32>
    %181 = arith.addf %173, %180 : vector<64x16xf32>
    %c19 = arith.constant 19 : index
    %c0_104 = arith.constant 0 : index
    %182 = vector.load %arg10[%c19, %c0_104] : memref<176x16xf32, #tpu.memory_space<vmem>>, vector<64x16xf32>
    %c0_105 = arith.constant 0 : index
    %c9_106 = arith.constant 9 : index
    %183 = vector.load %arg2[%c0_105, %c9_106] : memref<128x27xf32, #tpu.memory_space<vmem>>, vector<64x1xf32>
    %184 = vector.broadcast %183 : vector<64x1xf32> to vector<64x16xf32>
    %185 = arith.mulf %182, %184 : vector<64x16xf32>
    %c9_107 = arith.constant 9 : index
    %c0_108 = arith.constant 0 : index
    %186 = vector.load %arg5[%c9_107, %c0_108] : memref<27x16xf32, #tpu.memory_space<vmem>>, vector<1x16xf32>
    %187 = vector.broadcast %186 : vector<1x16xf32> to vector<64x16xf32>
    %188 = arith.mulf %185, %187 : vector<64x16xf32>
    %189 = arith.addf %181, %188 : vector<64x16xf32>
    %c20 = arith.constant 20 : index
    %c0_109 = arith.constant 0 : index
    %190 = vector.load %arg10[%c20, %c0_109] : memref<176x16xf32, #tpu.memory_space<vmem>>, vector<64x16xf32>
    %c0_110 = arith.constant 0 : index
    %c10 = arith.constant 10 : index
    %191 = vector.load %arg2[%c0_110, %c10] : memref<128x27xf32, #tpu.memory_space<vmem>>, vector<64x1xf32>
    %192 = vector.broadcast %191 : vector<64x1xf32> to vector<64x16xf32>
    %193 = arith.mulf %190, %192 : vector<64x16xf32>
    %c10_111 = arith.constant 10 : index
    %c0_112 = arith.constant 0 : index
    %194 = vector.load %arg5[%c10_111, %c0_112] : memref<27x16xf32, #tpu.memory_space<vmem>>, vector<1x16xf32>
    %195 = vector.broadcast %194 : vector<1x16xf32> to vector<64x16xf32>
    %196 = arith.mulf %193, %195 : vector<64x16xf32>
    %197 = arith.addf %189, %196 : vector<64x16xf32>
    %c21 = arith.constant 21 : index
    %c0_113 = arith.constant 0 : index
    %198 = vector.load %arg10[%c21, %c0_113] : memref<176x16xf32, #tpu.memory_space<vmem>>, vector<64x16xf32>
    %c0_114 = arith.constant 0 : index
    %c11_115 = arith.constant 11 : index
    %199 = vector.load %arg2[%c0_114, %c11_115] : memref<128x27xf32, #tpu.memory_space<vmem>>, vector<64x1xf32>
    %200 = vector.broadcast %199 : vector<64x1xf32> to vector<64x16xf32>
    %201 = arith.mulf %198, %200 : vector<64x16xf32>
    %c11_116 = arith.constant 11 : index
    %c0_117 = arith.constant 0 : index
    %202 = vector.load %arg5[%c11_116, %c0_117] : memref<27x16xf32, #tpu.memory_space<vmem>>, vector<1x16xf32>
    %203 = vector.broadcast %202 : vector<1x16xf32> to vector<64x16xf32>
    %204 = arith.mulf %201, %203 : vector<64x16xf32>
    %205 = arith.addf %197, %204 : vector<64x16xf32>
    %c23 = arith.constant 23 : index
    %c0_118 = arith.constant 0 : index
    %206 = vector.load %arg10[%c23, %c0_118] : memref<176x16xf32, #tpu.memory_space<vmem>>, vector<64x16xf32>
    %c0_119 = arith.constant 0 : index
    %c12_120 = arith.constant 12 : index
    %207 = vector.load %arg2[%c0_119, %c12_120] : memref<128x27xf32, #tpu.memory_space<vmem>>, vector<64x1xf32>
    %208 = vector.broadcast %207 : vector<64x1xf32> to vector<64x16xf32>
    %209 = arith.mulf %206, %208 : vector<64x16xf32>
    %c12_121 = arith.constant 12 : index
    %c0_122 = arith.constant 0 : index
    %210 = vector.load %arg5[%c12_121, %c0_122] : memref<27x16xf32, #tpu.memory_space<vmem>>, vector<1x16xf32>
    %211 = vector.broadcast %210 : vector<1x16xf32> to vector<64x16xf32>
    %212 = arith.mulf %209, %211 : vector<64x16xf32>
    %213 = arith.addf %205, %212 : vector<64x16xf32>
    %c24_123 = arith.constant 24 : index
    %c0_124 = arith.constant 0 : index
    %214 = vector.load %arg10[%c24_123, %c0_124] : memref<176x16xf32, #tpu.memory_space<vmem>>, vector<64x16xf32>
    %c0_125 = arith.constant 0 : index
    %c13_126 = arith.constant 13 : index
    %215 = vector.load %arg2[%c0_125, %c13_126] : memref<128x27xf32, #tpu.memory_space<vmem>>, vector<64x1xf32>
    %216 = vector.broadcast %215 : vector<64x1xf32> to vector<64x16xf32>
    %217 = arith.mulf %214, %216 : vector<64x16xf32>
    %c13_127 = arith.constant 13 : index
    %c0_128 = arith.constant 0 : index
    %218 = vector.load %arg5[%c13_127, %c0_128] : memref<27x16xf32, #tpu.memory_space<vmem>>, vector<1x16xf32>
    %219 = vector.broadcast %218 : vector<1x16xf32> to vector<64x16xf32>
    %220 = arith.mulf %217, %219 : vector<64x16xf32>
    %221 = arith.addf %213, %220 : vector<64x16xf32>
    %c25 = arith.constant 25 : index
    %c0_129 = arith.constant 0 : index
    %222 = vector.load %arg10[%c25, %c0_129] : memref<176x16xf32, #tpu.memory_space<vmem>>, vector<64x16xf32>
    %c0_130 = arith.constant 0 : index
    %c14 = arith.constant 14 : index
    %223 = vector.load %arg2[%c0_130, %c14] : memref<128x27xf32, #tpu.memory_space<vmem>>, vector<64x1xf32>
    %224 = vector.broadcast %223 : vector<64x1xf32> to vector<64x16xf32>
    %225 = arith.mulf %222, %224 : vector<64x16xf32>
    %c14_131 = arith.constant 14 : index
    %c0_132 = arith.constant 0 : index
    %226 = vector.load %arg5[%c14_131, %c0_132] : memref<27x16xf32, #tpu.memory_space<vmem>>, vector<1x16xf32>
    %227 = vector.broadcast %226 : vector<1x16xf32> to vector<64x16xf32>
    %228 = arith.mulf %225, %227 : vector<64x16xf32>
    %229 = arith.addf %221, %228 : vector<64x16xf32>
    %c27 = arith.constant 27 : index
    %c0_133 = arith.constant 0 : index
    %230 = vector.load %arg10[%c27, %c0_133] : memref<176x16xf32, #tpu.memory_space<vmem>>, vector<64x16xf32>
    %c0_134 = arith.constant 0 : index
    %c15 = arith.constant 15 : index
    %231 = vector.load %arg2[%c0_134, %c15] : memref<128x27xf32, #tpu.memory_space<vmem>>, vector<64x1xf32>
    %232 = vector.broadcast %231 : vector<64x1xf32> to vector<64x16xf32>
    %233 = arith.mulf %230, %232 : vector<64x16xf32>
    %c15_135 = arith.constant 15 : index
    %c0_136 = arith.constant 0 : index
    %234 = vector.load %arg5[%c15_135, %c0_136] : memref<27x16xf32, #tpu.memory_space<vmem>>, vector<1x16xf32>
    %235 = vector.broadcast %234 : vector<1x16xf32> to vector<64x16xf32>
    %236 = arith.mulf %233, %235 : vector<64x16xf32>
    %237 = arith.addf %229, %236 : vector<64x16xf32>
    %c28 = arith.constant 28 : index
    %c0_137 = arith.constant 0 : index
    %238 = vector.load %arg10[%c28, %c0_137] : memref<176x16xf32, #tpu.memory_space<vmem>>, vector<64x16xf32>
    %c0_138 = arith.constant 0 : index
    %c16 = arith.constant 16 : index
    %239 = vector.load %arg2[%c0_138, %c16] : memref<128x27xf32, #tpu.memory_space<vmem>>, vector<64x1xf32>
    %240 = vector.broadcast %239 : vector<64x1xf32> to vector<64x16xf32>
    %241 = arith.mulf %238, %240 : vector<64x16xf32>
    %c16_139 = arith.constant 16 : index
    %c0_140 = arith.constant 0 : index
    %242 = vector.load %arg5[%c16_139, %c0_140] : memref<27x16xf32, #tpu.memory_space<vmem>>, vector<1x16xf32>
    %243 = vector.broadcast %242 : vector<1x16xf32> to vector<64x16xf32>
    %244 = arith.mulf %241, %243 : vector<64x16xf32>
    %245 = arith.addf %237, %244 : vector<64x16xf32>
    %c29 = arith.constant 29 : index
    %c0_141 = arith.constant 0 : index
    %246 = vector.load %arg10[%c29, %c0_141] : memref<176x16xf32, #tpu.memory_space<vmem>>, vector<64x16xf32>
    %c0_142 = arith.constant 0 : index
    %c17 = arith.constant 17 : index
    %247 = vector.load %arg2[%c0_142, %c17] : memref<128x27xf32, #tpu.memory_space<vmem>>, vector<64x1xf32>
    %248 = vector.broadcast %247 : vector<64x1xf32> to vector<64x16xf32>
    %249 = arith.mulf %246, %248 : vector<64x16xf32>
    %c17_143 = arith.constant 17 : index
    %c0_144 = arith.constant 0 : index
    %250 = vector.load %arg5[%c17_143, %c0_144] : memref<27x16xf32, #tpu.memory_space<vmem>>, vector<1x16xf32>
    %251 = vector.broadcast %250 : vector<1x16xf32> to vector<64x16xf32>
    %252 = arith.mulf %249, %251 : vector<64x16xf32>
    %253 = arith.addf %245, %252 : vector<64x16xf32>
    %c35 = arith.constant 35 : index
    %c0_145 = arith.constant 0 : index
    %254 = vector.load %arg10[%c35, %c0_145] : memref<176x16xf32, #tpu.memory_space<vmem>>, vector<64x16xf32>
    %c0_146 = arith.constant 0 : index
    %c18 = arith.constant 18 : index
    %255 = vector.load %arg2[%c0_146, %c18] : memref<128x27xf32, #tpu.memory_space<vmem>>, vector<64x1xf32>
    %256 = vector.broadcast %255 : vector<64x1xf32> to vector<64x16xf32>
    %257 = arith.mulf %254, %256 : vector<64x16xf32>
    %c18_147 = arith.constant 18 : index
    %c0_148 = arith.constant 0 : index
    %258 = vector.load %arg5[%c18_147, %c0_148] : memref<27x16xf32, #tpu.memory_space<vmem>>, vector<1x16xf32>
    %259 = vector.broadcast %258 : vector<1x16xf32> to vector<64x16xf32>
    %260 = arith.mulf %257, %259 : vector<64x16xf32>
    %261 = arith.addf %253, %260 : vector<64x16xf32>
    %c36 = arith.constant 36 : index
    %c0_149 = arith.constant 0 : index
    %262 = vector.load %arg10[%c36, %c0_149] : memref<176x16xf32, #tpu.memory_space<vmem>>, vector<64x16xf32>
    %c0_150 = arith.constant 0 : index
    %c19_151 = arith.constant 19 : index
    %263 = vector.load %arg2[%c0_150, %c19_151] : memref<128x27xf32, #tpu.memory_space<vmem>>, vector<64x1xf32>
    %264 = vector.broadcast %263 : vector<64x1xf32> to vector<64x16xf32>
    %265 = arith.mulf %262, %264 : vector<64x16xf32>
    %c19_152 = arith.constant 19 : index
    %c0_153 = arith.constant 0 : index
    %266 = vector.load %arg5[%c19_152, %c0_153] : memref<27x16xf32, #tpu.memory_space<vmem>>, vector<1x16xf32>
    %267 = vector.broadcast %266 : vector<1x16xf32> to vector<64x16xf32>
    %268 = arith.mulf %265, %267 : vector<64x16xf32>
    %269 = arith.addf %261, %268 : vector<64x16xf32>
    %c37 = arith.constant 37 : index
    %c0_154 = arith.constant 0 : index
    %270 = vector.load %arg10[%c37, %c0_154] : memref<176x16xf32, #tpu.memory_space<vmem>>, vector<64x16xf32>
    %c0_155 = arith.constant 0 : index
    %c20_156 = arith.constant 20 : index
    %271 = vector.load %arg2[%c0_155, %c20_156] : memref<128x27xf32, #tpu.memory_space<vmem>>, vector<64x1xf32>
    %272 = vector.broadcast %271 : vector<64x1xf32> to vector<64x16xf32>
    %273 = arith.mulf %270, %272 : vector<64x16xf32>
    %c20_157 = arith.constant 20 : index
    %c0_158 = arith.constant 0 : index
    %274 = vector.load %arg5[%c20_157, %c0_158] : memref<27x16xf32, #tpu.memory_space<vmem>>, vector<1x16xf32>
    %275 = vector.broadcast %274 : vector<1x16xf32> to vector<64x16xf32>
    %276 = arith.mulf %273, %275 : vector<64x16xf32>
    %277 = arith.addf %269, %276 : vector<64x16xf32>
    %c39 = arith.constant 39 : index
    %c0_159 = arith.constant 0 : index
    %278 = vector.load %arg10[%c39, %c0_159] : memref<176x16xf32, #tpu.memory_space<vmem>>, vector<64x16xf32>
    %c0_160 = arith.constant 0 : index
    %c21_161 = arith.constant 21 : index
    %279 = vector.load %arg2[%c0_160, %c21_161] : memref<128x27xf32, #tpu.memory_space<vmem>>, vector<64x1xf32>
    %280 = vector.broadcast %279 : vector<64x1xf32> to vector<64x16xf32>
    %281 = arith.mulf %278, %280 : vector<64x16xf32>
    %c21_162 = arith.constant 21 : index
    %c0_163 = arith.constant 0 : index
    %282 = vector.load %arg5[%c21_162, %c0_163] : memref<27x16xf32, #tpu.memory_space<vmem>>, vector<1x16xf32>
    %283 = vector.broadcast %282 : vector<1x16xf32> to vector<64x16xf32>
    %284 = arith.mulf %281, %283 : vector<64x16xf32>
    %285 = arith.addf %277, %284 : vector<64x16xf32>
    %c40 = arith.constant 40 : index
    %c0_164 = arith.constant 0 : index
    %286 = vector.load %arg10[%c40, %c0_164] : memref<176x16xf32, #tpu.memory_space<vmem>>, vector<64x16xf32>
    %c0_165 = arith.constant 0 : index
    %c22 = arith.constant 22 : index
    %287 = vector.load %arg2[%c0_165, %c22] : memref<128x27xf32, #tpu.memory_space<vmem>>, vector<64x1xf32>
    %288 = vector.broadcast %287 : vector<64x1xf32> to vector<64x16xf32>
    %289 = arith.mulf %286, %288 : vector<64x16xf32>
    %c22_166 = arith.constant 22 : index
    %c0_167 = arith.constant 0 : index
    %290 = vector.load %arg5[%c22_166, %c0_167] : memref<27x16xf32, #tpu.memory_space<vmem>>, vector<1x16xf32>
    %291 = vector.broadcast %290 : vector<1x16xf32> to vector<64x16xf32>
    %292 = arith.mulf %289, %291 : vector<64x16xf32>
    %293 = arith.addf %285, %292 : vector<64x16xf32>
    %c41 = arith.constant 41 : index
    %c0_168 = arith.constant 0 : index
    %294 = vector.load %arg10[%c41, %c0_168] : memref<176x16xf32, #tpu.memory_space<vmem>>, vector<64x16xf32>
    %c0_169 = arith.constant 0 : index
    %c23_170 = arith.constant 23 : index
    %295 = vector.load %arg2[%c0_169, %c23_170] : memref<128x27xf32, #tpu.memory_space<vmem>>, vector<64x1xf32>
    %296 = vector.broadcast %295 : vector<64x1xf32> to vector<64x16xf32>
    %297 = arith.mulf %294, %296 : vector<64x16xf32>
    %c23_171 = arith.constant 23 : index
    %c0_172 = arith.constant 0 : index
    %298 = vector.load %arg5[%c23_171, %c0_172] : memref<27x16xf32, #tpu.memory_space<vmem>>, vector<1x16xf32>
    %299 = vector.broadcast %298 : vector<1x16xf32> to vector<64x16xf32>
    %300 = arith.mulf %297, %299 : vector<64x16xf32>
    %301 = arith.addf %293, %300 : vector<64x16xf32>
    %c43 = arith.constant 43 : index
    %c0_173 = arith.constant 0 : index
    %302 = vector.load %arg10[%c43, %c0_173] : memref<176x16xf32, #tpu.memory_space<vmem>>, vector<64x16xf32>
    %c0_174 = arith.constant 0 : index
    %c24_175 = arith.constant 24 : index
    %303 = vector.load %arg2[%c0_174, %c24_175] : memref<128x27xf32, #tpu.memory_space<vmem>>, vector<64x1xf32>
    %304 = vector.broadcast %303 : vector<64x1xf32> to vector<64x16xf32>
    %305 = arith.mulf %302, %304 : vector<64x16xf32>
    %c24_176 = arith.constant 24 : index
    %c0_177 = arith.constant 0 : index
    %306 = vector.load %arg5[%c24_176, %c0_177] : memref<27x16xf32, #tpu.memory_space<vmem>>, vector<1x16xf32>
    %307 = vector.broadcast %306 : vector<1x16xf32> to vector<64x16xf32>
    %308 = arith.mulf %305, %307 : vector<64x16xf32>
    %309 = arith.addf %301, %308 : vector<64x16xf32>
    %c44 = arith.constant 44 : index
    %c0_178 = arith.constant 0 : index
    %310 = vector.load %arg10[%c44, %c0_178] : memref<176x16xf32, #tpu.memory_space<vmem>>, vector<64x16xf32>
    %c0_179 = arith.constant 0 : index
    %c25_180 = arith.constant 25 : index
    %311 = vector.load %arg2[%c0_179, %c25_180] : memref<128x27xf32, #tpu.memory_space<vmem>>, vector<64x1xf32>
    %312 = vector.broadcast %311 : vector<64x1xf32> to vector<64x16xf32>
    %313 = arith.mulf %310, %312 : vector<64x16xf32>
    %c25_181 = arith.constant 25 : index
    %c0_182 = arith.constant 0 : index
    %314 = vector.load %arg5[%c25_181, %c0_182] : memref<27x16xf32, #tpu.memory_space<vmem>>, vector<1x16xf32>
    %315 = vector.broadcast %314 : vector<1x16xf32> to vector<64x16xf32>
    %316 = arith.mulf %313, %315 : vector<64x16xf32>
    %317 = arith.addf %309, %316 : vector<64x16xf32>
    %c45 = arith.constant 45 : index
    %c0_183 = arith.constant 0 : index
    %318 = vector.load %arg10[%c45, %c0_183] : memref<176x16xf32, #tpu.memory_space<vmem>>, vector<64x16xf32>
    %c0_184 = arith.constant 0 : index
    %c26 = arith.constant 26 : index
    %319 = vector.load %arg2[%c0_184, %c26] : memref<128x27xf32, #tpu.memory_space<vmem>>, vector<64x1xf32>
    %320 = vector.broadcast %319 : vector<64x1xf32> to vector<64x16xf32>
    %321 = arith.mulf %318, %320 : vector<64x16xf32>
    %c26_185 = arith.constant 26 : index
    %c0_186 = arith.constant 0 : index
    %322 = vector.load %arg5[%c26_185, %c0_186] : memref<27x16xf32, #tpu.memory_space<vmem>>, vector<1x16xf32>
    %323 = vector.broadcast %322 : vector<1x16xf32> to vector<64x16xf32>
    %324 = arith.mulf %321, %323 : vector<64x16xf32>
    %325 = arith.addf %317, %324 : vector<64x16xf32>
    %cst_187 = arith.constant dense<0.000000e+00> : vector<64xf32>
    %326 = vector.multi_reduction <add>, %325, %cst_187 [1] : vector<64x16xf32> to vector<64xf32>
    %327 = vector.shape_cast %326 : vector<64xf32> to vector<64x1xf32>
    %328 = vector.broadcast %107 : vector<1x1xf32> to vector<64x1xf32>
    %329 = arith.addf %327, %328 : vector<64x1xf32>
    %cst_188 = arith.constant 5.000000e-01 : f32
    %330 = vector.broadcast %cst_188 : f32 to vector<64x1xf32>
    %331 = arith.mulf %330, %329 : vector<64x1xf32>
    %cst_189 = arith.constant 0.707106769 : f32
    %332 = vector.broadcast %cst_189 : f32 to vector<64x1xf32>
    %333 = arith.mulf %329, %332 : vector<64x1xf32>
    %cst_190 = arith.constant 0.000000e+00 : f32
    %334 = vector.broadcast %cst_190 : f32 to vector<64x1xf32>
    %335 = arith.cmpf olt, %333, %334 : vector<64x1xf32>
    %cst_191 = arith.constant -1.000000e+00 : f32
    %cst_192 = arith.constant 1.000000e+00 : f32
    %336 = vector.broadcast %cst_191 : f32 to vector<64x1xf32>
    %337 = vector.broadcast %cst_192 : f32 to vector<64x1xf32>
    %338 = arith.select %335, %336, %337 : vector<64x1xi1>, vector<64x1xf32>
    %339 = math.absf %333 : vector<64x1xf32>
    %cst_193 = arith.constant 0.327591091 : f32
    %340 = vector.broadcast %cst_193 : f32 to vector<64x1xf32>
    %341 = arith.mulf %340, %339 : vector<64x1xf32>
    %cst_194 = arith.constant 1.000000e+00 : f32
    %342 = vector.broadcast %cst_194 : f32 to vector<64x1xf32>
    %343 = arith.addf %342, %341 : vector<64x1xf32>
    %cst_195 = arith.constant 1.000000e+00 : f32
    %344 = vector.broadcast %cst_195 : f32 to vector<64x1xf32>
    %345 = arith.divf %344, %343 : vector<64x1xf32>
    %cst_196 = arith.constant 1.06140542 : f32
    %346 = vector.broadcast %cst_196 : f32 to vector<64x1xf32>
    %347 = arith.mulf %345, %346 : vector<64x1xf32>
    %cst_197 = arith.constant -1.45315206 : f32
    %348 = vector.broadcast %cst_197 : f32 to vector<64x1xf32>
    %349 = arith.addf %348, %347 : vector<64x1xf32>
    %350 = arith.mulf %345, %349 : vector<64x1xf32>
    %cst_198 = arith.constant 1.42141378 : f32
    %351 = vector.broadcast %cst_198 : f32 to vector<64x1xf32>
    %352 = arith.addf %351, %350 : vector<64x1xf32>
    %353 = arith.mulf %345, %352 : vector<64x1xf32>
    %cst_199 = arith.constant -0.284496725 : f32
    %354 = vector.broadcast %cst_199 : f32 to vector<64x1xf32>
    %355 = arith.addf %354, %353 : vector<64x1xf32>
    %356 = arith.mulf %345, %355 : vector<64x1xf32>
    %cst_200 = arith.constant 0.254829586 : f32
    %357 = vector.broadcast %cst_200 : f32 to vector<64x1xf32>
    %358 = arith.addf %357, %356 : vector<64x1xf32>
    %359 = arith.mulf %345, %358 : vector<64x1xf32>
    %cst_201 = arith.constant 0.000000e+00 : f32
    %360 = vector.broadcast %cst_201 : f32 to vector<64x1xf32>
    %361 = arith.subf %360, %339 : vector<64x1xf32>
    %362 = arith.mulf %361, %339 : vector<64x1xf32>
    %363 = math.exp %362 : vector<64x1xf32>
    %364 = arith.mulf %359, %363 : vector<64x1xf32>
    %cst_202 = arith.constant 1.000000e+00 : f32
    %365 = vector.broadcast %cst_202 : f32 to vector<64x1xf32>
    %366 = arith.subf %365, %364 : vector<64x1xf32>
    %367 = arith.mulf %338, %366 : vector<64x1xf32>
    %cst_203 = arith.constant 1.000000e+00 : f32
    %368 = vector.broadcast %cst_203 : f32 to vector<64x1xf32>
    %369 = arith.addf %368, %367 : vector<64x1xf32>
    %370 = arith.mulf %331, %369 : vector<64x1xf32>
    %c0_204 = arith.constant 0 : index
    %c0_205 = arith.constant 0 : index
    %c13_206 = arith.constant 13 : index
    %371 = vector.load %arg1[%c0_204, %c0_205, %c13_206] : memref<1x128x27xf32, #tpu.memory_space<vmem>>, vector<1x64x1xf32>
    %372 = vector.shape_cast %371 : vector<1x64x1xf32> to vector<64x1xf32>
    %373 = vector.broadcast %108 : vector<1x1xf32> to vector<64x1xf32>
    %374 = arith.mulf %372, %373 : vector<64x1xf32>
    %375 = vector.broadcast %109 : vector<1x1xf32> to vector<64x1xf32>
    %376 = arith.addf %374, %375 : vector<64x1xf32>
    %377 = arith.addf %370, %376 : vector<64x1xf32>
    %c0_207 = arith.constant 0 : index
    %c0_208 = arith.constant 0 : index
    %378 = vector.load %arg7[%c0_207, %c0_208] : memref<128x8xf32, #tpu.memory_space<vmem>>, vector<64x8xf32>
    %379 = vector.broadcast %377 : vector<64x1xf32> to vector<64x8xf32>
    %380 = arith.mulf %379, %378 : vector<64x8xf32>
    %c0_209 = arith.constant 0 : index
    %c0_210 = arith.constant 0 : index
    %381 = vector.load %arg8[%c0_209, %c0_210] : memref<2x128xf32, #tpu.memory_space<vmem>>, vector<2x64xf32>
    %cst_211 = arith.constant dense<0.000000e+00> : vector<2x8xf32>
    %382 = tpu.matmul %381, %380, %cst_211 {dimension_numbers = #tpu.dot_dimension_numbers<[1], [0], [0], [1], [0, 0, 1, 1], [], []>} : vector<2x64xf32>, vector<64x8xf32>, vector<2x8xf32> -> vector<2x8xf32>
    %383 = arith.addf %110, %382 : vector<2x8xf32>
    %c67 = arith.constant 67 : index
    %c0_212 = arith.constant 0 : index
    %384 = vector.load %arg10[%c67, %c0_212] : memref<176x16xf32, #tpu.memory_space<vmem>>, vector<64x16xf32>
    %c64_213 = arith.constant 64 : index
    %c0_214 = arith.constant 0 : index
    %385 = vector.load %arg2[%c64_213, %c0_214] : memref<128x27xf32, #tpu.memory_space<vmem>>, vector<64x1xf32>
    %386 = vector.broadcast %385 : vector<64x1xf32> to vector<64x16xf32>
    %387 = arith.mulf %384, %386 : vector<64x16xf32>
    %c0_215 = arith.constant 0 : index
    %c0_216 = arith.constant 0 : index
    %388 = vector.load %arg5[%c0_215, %c0_216] : memref<27x16xf32, #tpu.memory_space<vmem>>, vector<1x16xf32>
    %389 = vector.broadcast %388 : vector<1x16xf32> to vector<64x16xf32>
    %390 = arith.mulf %387, %389 : vector<64x16xf32>
    %c68 = arith.constant 68 : index
    %c0_217 = arith.constant 0 : index
    %391 = vector.load %arg10[%c68, %c0_217] : memref<176x16xf32, #tpu.memory_space<vmem>>, vector<64x16xf32>
    %c64_218 = arith.constant 64 : index
    %c1_219 = arith.constant 1 : index
    %392 = vector.load %arg2[%c64_218, %c1_219] : memref<128x27xf32, #tpu.memory_space<vmem>>, vector<64x1xf32>
    %393 = vector.broadcast %392 : vector<64x1xf32> to vector<64x16xf32>
    %394 = arith.mulf %391, %393 : vector<64x16xf32>
    %c1_220 = arith.constant 1 : index
    %c0_221 = arith.constant 0 : index
    %395 = vector.load %arg5[%c1_220, %c0_221] : memref<27x16xf32, #tpu.memory_space<vmem>>, vector<1x16xf32>
    %396 = vector.broadcast %395 : vector<1x16xf32> to vector<64x16xf32>
    %397 = arith.mulf %394, %396 : vector<64x16xf32>
    %398 = arith.addf %390, %397 : vector<64x16xf32>
    %c69 = arith.constant 69 : index
    %c0_222 = arith.constant 0 : index
    %399 = vector.load %arg10[%c69, %c0_222] : memref<176x16xf32, #tpu.memory_space<vmem>>, vector<64x16xf32>
    %c64_223 = arith.constant 64 : index
    %c2_224 = arith.constant 2 : index
    %400 = vector.load %arg2[%c64_223, %c2_224] : memref<128x27xf32, #tpu.memory_space<vmem>>, vector<64x1xf32>
    %401 = vector.broadcast %400 : vector<64x1xf32> to vector<64x16xf32>
    %402 = arith.mulf %399, %401 : vector<64x16xf32>
    %c2_225 = arith.constant 2 : index
    %c0_226 = arith.constant 0 : index
    %403 = vector.load %arg5[%c2_225, %c0_226] : memref<27x16xf32, #tpu.memory_space<vmem>>, vector<1x16xf32>
    %404 = vector.broadcast %403 : vector<1x16xf32> to vector<64x16xf32>
    %405 = arith.mulf %402, %404 : vector<64x16xf32>
    %406 = arith.addf %398, %405 : vector<64x16xf32>
    %c71 = arith.constant 71 : index
    %c0_227 = arith.constant 0 : index
    %407 = vector.load %arg10[%c71, %c0_227] : memref<176x16xf32, #tpu.memory_space<vmem>>, vector<64x16xf32>
    %c64_228 = arith.constant 64 : index
    %c3_229 = arith.constant 3 : index
    %408 = vector.load %arg2[%c64_228, %c3_229] : memref<128x27xf32, #tpu.memory_space<vmem>>, vector<64x1xf32>
    %409 = vector.broadcast %408 : vector<64x1xf32> to vector<64x16xf32>
    %410 = arith.mulf %407, %409 : vector<64x16xf32>
    %c3_230 = arith.constant 3 : index
    %c0_231 = arith.constant 0 : index
    %411 = vector.load %arg5[%c3_230, %c0_231] : memref<27x16xf32, #tpu.memory_space<vmem>>, vector<1x16xf32>
    %412 = vector.broadcast %411 : vector<1x16xf32> to vector<64x16xf32>
    %413 = arith.mulf %410, %412 : vector<64x16xf32>
    %414 = arith.addf %406, %413 : vector<64x16xf32>
    %c72 = arith.constant 72 : index
    %c0_232 = arith.constant 0 : index
    %415 = vector.load %arg10[%c72, %c0_232] : memref<176x16xf32, #tpu.memory_space<vmem>>, vector<64x16xf32>
    %c64_233 = arith.constant 64 : index
    %c4_234 = arith.constant 4 : index
    %416 = vector.load %arg2[%c64_233, %c4_234] : memref<128x27xf32, #tpu.memory_space<vmem>>, vector<64x1xf32>
    %417 = vector.broadcast %416 : vector<64x1xf32> to vector<64x16xf32>
    %418 = arith.mulf %415, %417 : vector<64x16xf32>
    %c4_235 = arith.constant 4 : index
    %c0_236 = arith.constant 0 : index
    %419 = vector.load %arg5[%c4_235, %c0_236] : memref<27x16xf32, #tpu.memory_space<vmem>>, vector<1x16xf32>
    %420 = vector.broadcast %419 : vector<1x16xf32> to vector<64x16xf32>
    %421 = arith.mulf %418, %420 : vector<64x16xf32>
    %422 = arith.addf %414, %421 : vector<64x16xf32>
    %c73 = arith.constant 73 : index
    %c0_237 = arith.constant 0 : index
    %423 = vector.load %arg10[%c73, %c0_237] : memref<176x16xf32, #tpu.memory_space<vmem>>, vector<64x16xf32>
    %c64_238 = arith.constant 64 : index
    %c5_239 = arith.constant 5 : index
    %424 = vector.load %arg2[%c64_238, %c5_239] : memref<128x27xf32, #tpu.memory_space<vmem>>, vector<64x1xf32>
    %425 = vector.broadcast %424 : vector<64x1xf32> to vector<64x16xf32>
    %426 = arith.mulf %423, %425 : vector<64x16xf32>
    %c5_240 = arith.constant 5 : index
    %c0_241 = arith.constant 0 : index
    %427 = vector.load %arg5[%c5_240, %c0_241] : memref<27x16xf32, #tpu.memory_space<vmem>>, vector<1x16xf32>
    %428 = vector.broadcast %427 : vector<1x16xf32> to vector<64x16xf32>
    %429 = arith.mulf %426, %428 : vector<64x16xf32>
    %430 = arith.addf %422, %429 : vector<64x16xf32>
    %c75 = arith.constant 75 : index
    %c0_242 = arith.constant 0 : index
    %431 = vector.load %arg10[%c75, %c0_242] : memref<176x16xf32, #tpu.memory_space<vmem>>, vector<64x16xf32>
    %c64_243 = arith.constant 64 : index
    %c6_244 = arith.constant 6 : index
    %432 = vector.load %arg2[%c64_243, %c6_244] : memref<128x27xf32, #tpu.memory_space<vmem>>, vector<64x1xf32>
    %433 = vector.broadcast %432 : vector<64x1xf32> to vector<64x16xf32>
    %434 = arith.mulf %431, %433 : vector<64x16xf32>
    %c6_245 = arith.constant 6 : index
    %c0_246 = arith.constant 0 : index
    %435 = vector.load %arg5[%c6_245, %c0_246] : memref<27x16xf32, #tpu.memory_space<vmem>>, vector<1x16xf32>
    %436 = vector.broadcast %435 : vector<1x16xf32> to vector<64x16xf32>
    %437 = arith.mulf %434, %436 : vector<64x16xf32>
    %438 = arith.addf %430, %437 : vector<64x16xf32>
    %c76 = arith.constant 76 : index
    %c0_247 = arith.constant 0 : index
    %439 = vector.load %arg10[%c76, %c0_247] : memref<176x16xf32, #tpu.memory_space<vmem>>, vector<64x16xf32>
    %c64_248 = arith.constant 64 : index
    %c7_249 = arith.constant 7 : index
    %440 = vector.load %arg2[%c64_248, %c7_249] : memref<128x27xf32, #tpu.memory_space<vmem>>, vector<64x1xf32>
    %441 = vector.broadcast %440 : vector<64x1xf32> to vector<64x16xf32>
    %442 = arith.mulf %439, %441 : vector<64x16xf32>
    %c7_250 = arith.constant 7 : index
    %c0_251 = arith.constant 0 : index
    %443 = vector.load %arg5[%c7_250, %c0_251] : memref<27x16xf32, #tpu.memory_space<vmem>>, vector<1x16xf32>
    %444 = vector.broadcast %443 : vector<1x16xf32> to vector<64x16xf32>
    %445 = arith.mulf %442, %444 : vector<64x16xf32>
    %446 = arith.addf %438, %445 : vector<64x16xf32>
    %c77 = arith.constant 77 : index
    %c0_252 = arith.constant 0 : index
    %447 = vector.load %arg10[%c77, %c0_252] : memref<176x16xf32, #tpu.memory_space<vmem>>, vector<64x16xf32>
    %c64_253 = arith.constant 64 : index
    %c8_254 = arith.constant 8 : index
    %448 = vector.load %arg2[%c64_253, %c8_254] : memref<128x27xf32, #tpu.memory_space<vmem>>, vector<64x1xf32>
    %449 = vector.broadcast %448 : vector<64x1xf32> to vector<64x16xf32>
    %450 = arith.mulf %447, %449 : vector<64x16xf32>
    %c8_255 = arith.constant 8 : index
    %c0_256 = arith.constant 0 : index
    %451 = vector.load %arg5[%c8_255, %c0_256] : memref<27x16xf32, #tpu.memory_space<vmem>>, vector<1x16xf32>
    %452 = vector.broadcast %451 : vector<1x16xf32> to vector<64x16xf32>
    %453 = arith.mulf %450, %452 : vector<64x16xf32>
    %454 = arith.addf %446, %453 : vector<64x16xf32>
    %c83 = arith.constant 83 : index
    %c0_257 = arith.constant 0 : index
    %455 = vector.load %arg10[%c83, %c0_257] : memref<176x16xf32, #tpu.memory_space<vmem>>, vector<64x16xf32>
    %c64_258 = arith.constant 64 : index
    %c9_259 = arith.constant 9 : index
    %456 = vector.load %arg2[%c64_258, %c9_259] : memref<128x27xf32, #tpu.memory_space<vmem>>, vector<64x1xf32>
    %457 = vector.broadcast %456 : vector<64x1xf32> to vector<64x16xf32>
    %458 = arith.mulf %455, %457 : vector<64x16xf32>
    %c9_260 = arith.constant 9 : index
    %c0_261 = arith.constant 0 : index
    %459 = vector.load %arg5[%c9_260, %c0_261] : memref<27x16xf32, #tpu.memory_space<vmem>>, vector<1x16xf32>
    %460 = vector.broadcast %459 : vector<1x16xf32> to vector<64x16xf32>
    %461 = arith.mulf %458, %460 : vector<64x16xf32>
    %462 = arith.addf %454, %461 : vector<64x16xf32>
    %c84 = arith.constant 84 : index
    %c0_262 = arith.constant 0 : index
    %463 = vector.load %arg10[%c84, %c0_262] : memref<176x16xf32, #tpu.memory_space<vmem>>, vector<64x16xf32>
    %c64_263 = arith.constant 64 : index
    %c10_264 = arith.constant 10 : index
    %464 = vector.load %arg2[%c64_263, %c10_264] : memref<128x27xf32, #tpu.memory_space<vmem>>, vector<64x1xf32>
    %465 = vector.broadcast %464 : vector<64x1xf32> to vector<64x16xf32>
    %466 = arith.mulf %463, %465 : vector<64x16xf32>
    %c10_265 = arith.constant 10 : index
    %c0_266 = arith.constant 0 : index
    %467 = vector.load %arg5[%c10_265, %c0_266] : memref<27x16xf32, #tpu.memory_space<vmem>>, vector<1x16xf32>
    %468 = vector.broadcast %467 : vector<1x16xf32> to vector<64x16xf32>
    %469 = arith.mulf %466, %468 : vector<64x16xf32>
    %470 = arith.addf %462, %469 : vector<64x16xf32>
    %c85 = arith.constant 85 : index
    %c0_267 = arith.constant 0 : index
    %471 = vector.load %arg10[%c85, %c0_267] : memref<176x16xf32, #tpu.memory_space<vmem>>, vector<64x16xf32>
    %c64_268 = arith.constant 64 : index
    %c11_269 = arith.constant 11 : index
    %472 = vector.load %arg2[%c64_268, %c11_269] : memref<128x27xf32, #tpu.memory_space<vmem>>, vector<64x1xf32>
    %473 = vector.broadcast %472 : vector<64x1xf32> to vector<64x16xf32>
    %474 = arith.mulf %471, %473 : vector<64x16xf32>
    %c11_270 = arith.constant 11 : index
    %c0_271 = arith.constant 0 : index
    %475 = vector.load %arg5[%c11_270, %c0_271] : memref<27x16xf32, #tpu.memory_space<vmem>>, vector<1x16xf32>
    %476 = vector.broadcast %475 : vector<1x16xf32> to vector<64x16xf32>
    %477 = arith.mulf %474, %476 : vector<64x16xf32>
    %478 = arith.addf %470, %477 : vector<64x16xf32>
    %c87 = arith.constant 87 : index
    %c0_272 = arith.constant 0 : index
    %479 = vector.load %arg10[%c87, %c0_272] : memref<176x16xf32, #tpu.memory_space<vmem>>, vector<64x16xf32>
    %c64_273 = arith.constant 64 : index
    %c12_274 = arith.constant 12 : index
    %480 = vector.load %arg2[%c64_273, %c12_274] : memref<128x27xf32, #tpu.memory_space<vmem>>, vector<64x1xf32>
    %481 = vector.broadcast %480 : vector<64x1xf32> to vector<64x16xf32>
    %482 = arith.mulf %479, %481 : vector<64x16xf32>
    %c12_275 = arith.constant 12 : index
    %c0_276 = arith.constant 0 : index
    %483 = vector.load %arg5[%c12_275, %c0_276] : memref<27x16xf32, #tpu.memory_space<vmem>>, vector<1x16xf32>
    %484 = vector.broadcast %483 : vector<1x16xf32> to vector<64x16xf32>
    %485 = arith.mulf %482, %484 : vector<64x16xf32>
    %486 = arith.addf %478, %485 : vector<64x16xf32>
    %c88_277 = arith.constant 88 : index
    %c0_278 = arith.constant 0 : index
    %487 = vector.load %arg10[%c88_277, %c0_278] : memref<176x16xf32, #tpu.memory_space<vmem>>, vector<64x16xf32>
    %c64_279 = arith.constant 64 : index
    %c13_280 = arith.constant 13 : index
    %488 = vector.load %arg2[%c64_279, %c13_280] : memref<128x27xf32, #tpu.memory_space<vmem>>, vector<64x1xf32>
    %489 = vector.broadcast %488 : vector<64x1xf32> to vector<64x16xf32>
    %490 = arith.mulf %487, %489 : vector<64x16xf32>
    %c13_281 = arith.constant 13 : index
    %c0_282 = arith.constant 0 : index
    %491 = vector.load %arg5[%c13_281, %c0_282] : memref<27x16xf32, #tpu.memory_space<vmem>>, vector<1x16xf32>
    %492 = vector.broadcast %491 : vector<1x16xf32> to vector<64x16xf32>
    %493 = arith.mulf %490, %492 : vector<64x16xf32>
    %494 = arith.addf %486, %493 : vector<64x16xf32>
    %c89 = arith.constant 89 : index
    %c0_283 = arith.constant 0 : index
    %495 = vector.load %arg10[%c89, %c0_283] : memref<176x16xf32, #tpu.memory_space<vmem>>, vector<64x16xf32>
    %c64_284 = arith.constant 64 : index
    %c14_285 = arith.constant 14 : index
    %496 = vector.load %arg2[%c64_284, %c14_285] : memref<128x27xf32, #tpu.memory_space<vmem>>, vector<64x1xf32>
    %497 = vector.broadcast %496 : vector<64x1xf32> to vector<64x16xf32>
    %498 = arith.mulf %495, %497 : vector<64x16xf32>
    %c14_286 = arith.constant 14 : index
    %c0_287 = arith.constant 0 : index
    %499 = vector.load %arg5[%c14_286, %c0_287] : memref<27x16xf32, #tpu.memory_space<vmem>>, vector<1x16xf32>
    %500 = vector.broadcast %499 : vector<1x16xf32> to vector<64x16xf32>
    %501 = arith.mulf %498, %500 : vector<64x16xf32>
    %502 = arith.addf %494, %501 : vector<64x16xf32>
    %c91 = arith.constant 91 : index
    %c0_288 = arith.constant 0 : index
    %503 = vector.load %arg10[%c91, %c0_288] : memref<176x16xf32, #tpu.memory_space<vmem>>, vector<64x16xf32>
    %c64_289 = arith.constant 64 : index
    %c15_290 = arith.constant 15 : index
    %504 = vector.load %arg2[%c64_289, %c15_290] : memref<128x27xf32, #tpu.memory_space<vmem>>, vector<64x1xf32>
    %505 = vector.broadcast %504 : vector<64x1xf32> to vector<64x16xf32>
    %506 = arith.mulf %503, %505 : vector<64x16xf32>
    %c15_291 = arith.constant 15 : index
    %c0_292 = arith.constant 0 : index
    %507 = vector.load %arg5[%c15_291, %c0_292] : memref<27x16xf32, #tpu.memory_space<vmem>>, vector<1x16xf32>
    %508 = vector.broadcast %507 : vector<1x16xf32> to vector<64x16xf32>
    %509 = arith.mulf %506, %508 : vector<64x16xf32>
    %510 = arith.addf %502, %509 : vector<64x16xf32>
    %c92 = arith.constant 92 : index
    %c0_293 = arith.constant 0 : index
    %511 = vector.load %arg10[%c92, %c0_293] : memref<176x16xf32, #tpu.memory_space<vmem>>, vector<64x16xf32>
    %c64_294 = arith.constant 64 : index
    %c16_295 = arith.constant 16 : index
    %512 = vector.load %arg2[%c64_294, %c16_295] : memref<128x27xf32, #tpu.memory_space<vmem>>, vector<64x1xf32>
    %513 = vector.broadcast %512 : vector<64x1xf32> to vector<64x16xf32>
    %514 = arith.mulf %511, %513 : vector<64x16xf32>
    %c16_296 = arith.constant 16 : index
    %c0_297 = arith.constant 0 : index
    %515 = vector.load %arg5[%c16_296, %c0_297] : memref<27x16xf32, #tpu.memory_space<vmem>>, vector<1x16xf32>
    %516 = vector.broadcast %515 : vector<1x16xf32> to vector<64x16xf32>
    %517 = arith.mulf %514, %516 : vector<64x16xf32>
    %518 = arith.addf %510, %517 : vector<64x16xf32>
    %c93 = arith.constant 93 : index
    %c0_298 = arith.constant 0 : index
    %519 = vector.load %arg10[%c93, %c0_298] : memref<176x16xf32, #tpu.memory_space<vmem>>, vector<64x16xf32>
    %c64_299 = arith.constant 64 : index
    %c17_300 = arith.constant 17 : index
    %520 = vector.load %arg2[%c64_299, %c17_300] : memref<128x27xf32, #tpu.memory_space<vmem>>, vector<64x1xf32>
    %521 = vector.broadcast %520 : vector<64x1xf32> to vector<64x16xf32>
    %522 = arith.mulf %519, %521 : vector<64x16xf32>
    %c17_301 = arith.constant 17 : index
    %c0_302 = arith.constant 0 : index
    %523 = vector.load %arg5[%c17_301, %c0_302] : memref<27x16xf32, #tpu.memory_space<vmem>>, vector<1x16xf32>
    %524 = vector.broadcast %523 : vector<1x16xf32> to vector<64x16xf32>
    %525 = arith.mulf %522, %524 : vector<64x16xf32>
    %526 = arith.addf %518, %525 : vector<64x16xf32>
    %c99 = arith.constant 99 : index
    %c0_303 = arith.constant 0 : index
    %527 = vector.load %arg10[%c99, %c0_303] : memref<176x16xf32, #tpu.memory_space<vmem>>, vector<64x16xf32>
    %c64_304 = arith.constant 64 : index
    %c18_305 = arith.constant 18 : index
    %528 = vector.load %arg2[%c64_304, %c18_305] : memref<128x27xf32, #tpu.memory_space<vmem>>, vector<64x1xf32>
    %529 = vector.broadcast %528 : vector<64x1xf32> to vector<64x16xf32>
    %530 = arith.mulf %527, %529 : vector<64x16xf32>
    %c18_306 = arith.constant 18 : index
    %c0_307 = arith.constant 0 : index
    %531 = vector.load %arg5[%c18_306, %c0_307] : memref<27x16xf32, #tpu.memory_space<vmem>>, vector<1x16xf32>
    %532 = vector.broadcast %531 : vector<1x16xf32> to vector<64x16xf32>
    %533 = arith.mulf %530, %532 : vector<64x16xf32>
    %534 = arith.addf %526, %533 : vector<64x16xf32>
    %c100 = arith.constant 100 : index
    %c0_308 = arith.constant 0 : index
    %535 = vector.load %arg10[%c100, %c0_308] : memref<176x16xf32, #tpu.memory_space<vmem>>, vector<64x16xf32>
    %c64_309 = arith.constant 64 : index
    %c19_310 = arith.constant 19 : index
    %536 = vector.load %arg2[%c64_309, %c19_310] : memref<128x27xf32, #tpu.memory_space<vmem>>, vector<64x1xf32>
    %537 = vector.broadcast %536 : vector<64x1xf32> to vector<64x16xf32>
    %538 = arith.mulf %535, %537 : vector<64x16xf32>
    %c19_311 = arith.constant 19 : index
    %c0_312 = arith.constant 0 : index
    %539 = vector.load %arg5[%c19_311, %c0_312] : memref<27x16xf32, #tpu.memory_space<vmem>>, vector<1x16xf32>
    %540 = vector.broadcast %539 : vector<1x16xf32> to vector<64x16xf32>
    %541 = arith.mulf %538, %540 : vector<64x16xf32>
    %542 = arith.addf %534, %541 : vector<64x16xf32>
    %c101 = arith.constant 101 : index
    %c0_313 = arith.constant 0 : index
    %543 = vector.load %arg10[%c101, %c0_313] : memref<176x16xf32, #tpu.memory_space<vmem>>, vector<64x16xf32>
    %c64_314 = arith.constant 64 : index
    %c20_315 = arith.constant 20 : index
    %544 = vector.load %arg2[%c64_314, %c20_315] : memref<128x27xf32, #tpu.memory_space<vmem>>, vector<64x1xf32>
    %545 = vector.broadcast %544 : vector<64x1xf32> to vector<64x16xf32>
    %546 = arith.mulf %543, %545 : vector<64x16xf32>
    %c20_316 = arith.constant 20 : index
    %c0_317 = arith.constant 0 : index
    %547 = vector.load %arg5[%c20_316, %c0_317] : memref<27x16xf32, #tpu.memory_space<vmem>>, vector<1x16xf32>
    %548 = vector.broadcast %547 : vector<1x16xf32> to vector<64x16xf32>
    %549 = arith.mulf %546, %548 : vector<64x16xf32>
    %550 = arith.addf %542, %549 : vector<64x16xf32>
    %c103 = arith.constant 103 : index
    %c0_318 = arith.constant 0 : index
    %551 = vector.load %arg10[%c103, %c0_318] : memref<176x16xf32, #tpu.memory_space<vmem>>, vector<64x16xf32>
    %c64_319 = arith.constant 64 : index
    %c21_320 = arith.constant 21 : index
    %552 = vector.load %arg2[%c64_319, %c21_320] : memref<128x27xf32, #tpu.memory_space<vmem>>, vector<64x1xf32>
    %553 = vector.broadcast %552 : vector<64x1xf32> to vector<64x16xf32>
    %554 = arith.mulf %551, %553 : vector<64x16xf32>
    %c21_321 = arith.constant 21 : index
    %c0_322 = arith.constant 0 : index
    %555 = vector.load %arg5[%c21_321, %c0_322] : memref<27x16xf32, #tpu.memory_space<vmem>>, vector<1x16xf32>
    %556 = vector.broadcast %555 : vector<1x16xf32> to vector<64x16xf32>
    %557 = arith.mulf %554, %556 : vector<64x16xf32>
    %558 = arith.addf %550, %557 : vector<64x16xf32>
    %c104 = arith.constant 104 : index
    %c0_323 = arith.constant 0 : index
    %559 = vector.load %arg10[%c104, %c0_323] : memref<176x16xf32, #tpu.memory_space<vmem>>, vector<64x16xf32>
    %c64_324 = arith.constant 64 : index
    %c22_325 = arith.constant 22 : index
    %560 = vector.load %arg2[%c64_324, %c22_325] : memref<128x27xf32, #tpu.memory_space<vmem>>, vector<64x1xf32>
    %561 = vector.broadcast %560 : vector<64x1xf32> to vector<64x16xf32>
    %562 = arith.mulf %559, %561 : vector<64x16xf32>
    %c22_326 = arith.constant 22 : index
    %c0_327 = arith.constant 0 : index
    %563 = vector.load %arg5[%c22_326, %c0_327] : memref<27x16xf32, #tpu.memory_space<vmem>>, vector<1x16xf32>
    %564 = vector.broadcast %563 : vector<1x16xf32> to vector<64x16xf32>
    %565 = arith.mulf %562, %564 : vector<64x16xf32>
    %566 = arith.addf %558, %565 : vector<64x16xf32>
    %c105 = arith.constant 105 : index
    %c0_328 = arith.constant 0 : index
    %567 = vector.load %arg10[%c105, %c0_328] : memref<176x16xf32, #tpu.memory_space<vmem>>, vector<64x16xf32>
    %c64_329 = arith.constant 64 : index
    %c23_330 = arith.constant 23 : index
    %568 = vector.load %arg2[%c64_329, %c23_330] : memref<128x27xf32, #tpu.memory_space<vmem>>, vector<64x1xf32>
    %569 = vector.broadcast %568 : vector<64x1xf32> to vector<64x16xf32>
    %570 = arith.mulf %567, %569 : vector<64x16xf32>
    %c23_331 = arith.constant 23 : index
    %c0_332 = arith.constant 0 : index
    %571 = vector.load %arg5[%c23_331, %c0_332] : memref<27x16xf32, #tpu.memory_space<vmem>>, vector<1x16xf32>
    %572 = vector.broadcast %571 : vector<1x16xf32> to vector<64x16xf32>
    %573 = arith.mulf %570, %572 : vector<64x16xf32>
    %574 = arith.addf %566, %573 : vector<64x16xf32>
    %c107 = arith.constant 107 : index
    %c0_333 = arith.constant 0 : index
    %575 = vector.load %arg10[%c107, %c0_333] : memref<176x16xf32, #tpu.memory_space<vmem>>, vector<64x16xf32>
    %c64_334 = arith.constant 64 : index
    %c24_335 = arith.constant 24 : index
    %576 = vector.load %arg2[%c64_334, %c24_335] : memref<128x27xf32, #tpu.memory_space<vmem>>, vector<64x1xf32>
    %577 = vector.broadcast %576 : vector<64x1xf32> to vector<64x16xf32>
    %578 = arith.mulf %575, %577 : vector<64x16xf32>
    %c24_336 = arith.constant 24 : index
    %c0_337 = arith.constant 0 : index
    %579 = vector.load %arg5[%c24_336, %c0_337] : memref<27x16xf32, #tpu.memory_space<vmem>>, vector<1x16xf32>
    %580 = vector.broadcast %579 : vector<1x16xf32> to vector<64x16xf32>
    %581 = arith.mulf %578, %580 : vector<64x16xf32>
    %582 = arith.addf %574, %581 : vector<64x16xf32>
    %c108 = arith.constant 108 : index
    %c0_338 = arith.constant 0 : index
    %583 = vector.load %arg10[%c108, %c0_338] : memref<176x16xf32, #tpu.memory_space<vmem>>, vector<64x16xf32>
    %c64_339 = arith.constant 64 : index
    %c25_340 = arith.constant 25 : index
    %584 = vector.load %arg2[%c64_339, %c25_340] : memref<128x27xf32, #tpu.memory_space<vmem>>, vector<64x1xf32>
    %585 = vector.broadcast %584 : vector<64x1xf32> to vector<64x16xf32>
    %586 = arith.mulf %583, %585 : vector<64x16xf32>
    %c25_341 = arith.constant 25 : index
    %c0_342 = arith.constant 0 : index
    %587 = vector.load %arg5[%c25_341, %c0_342] : memref<27x16xf32, #tpu.memory_space<vmem>>, vector<1x16xf32>
    %588 = vector.broadcast %587 : vector<1x16xf32> to vector<64x16xf32>
    %589 = arith.mulf %586, %588 : vector<64x16xf32>
    %590 = arith.addf %582, %589 : vector<64x16xf32>
    %c109 = arith.constant 109 : index
    %c0_343 = arith.constant 0 : index
    %591 = vector.load %arg10[%c109, %c0_343] : memref<176x16xf32, #tpu.memory_space<vmem>>, vector<64x16xf32>
    %c64_344 = arith.constant 64 : index
    %c26_345 = arith.constant 26 : index
    %592 = vector.load %arg2[%c64_344, %c26_345] : memref<128x27xf32, #tpu.memory_space<vmem>>, vector<64x1xf32>
    %593 = vector.broadcast %592 : vector<64x1xf32> to vector<64x16xf32>
    %594 = arith.mulf %591, %593 : vector<64x16xf32>
    %c26_346 = arith.constant 26 : index
    %c0_347 = arith.constant 0 : index
    %595 = vector.load %arg5[%c26_346, %c0_347] : memref<27x16xf32, #tpu.memory_space<vmem>>, vector<1x16xf32>
    %596 = vector.broadcast %595 : vector<1x16xf32> to vector<64x16xf32>
    %597 = arith.mulf %594, %596 : vector<64x16xf32>
    %598 = arith.addf %590, %597 : vector<64x16xf32>
    %cst_348 = arith.constant dense<0.000000e+00> : vector<64xf32>
    %599 = vector.multi_reduction <add>, %598, %cst_348 [1] : vector<64x16xf32> to vector<64xf32>
    %600 = vector.shape_cast %599 : vector<64xf32> to vector<64x1xf32>
    %601 = vector.broadcast %107 : vector<1x1xf32> to vector<64x1xf32>
    %602 = arith.addf %600, %601 : vector<64x1xf32>
    %cst_349 = arith.constant 5.000000e-01 : f32
    %603 = vector.broadcast %cst_349 : f32 to vector<64x1xf32>
    %604 = arith.mulf %603, %602 : vector<64x1xf32>
    %cst_350 = arith.constant 0.707106769 : f32
    %605 = vector.broadcast %cst_350 : f32 to vector<64x1xf32>
    %606 = arith.mulf %602, %605 : vector<64x1xf32>
    %cst_351 = arith.constant 0.000000e+00 : f32
    %607 = vector.broadcast %cst_351 : f32 to vector<64x1xf32>
    %608 = arith.cmpf olt, %606, %607 : vector<64x1xf32>
    %cst_352 = arith.constant -1.000000e+00 : f32
    %cst_353 = arith.constant 1.000000e+00 : f32
    %609 = vector.broadcast %cst_352 : f32 to vector<64x1xf32>
    %610 = vector.broadcast %cst_353 : f32 to vector<64x1xf32>
    %611 = arith.select %608, %609, %610 : vector<64x1xi1>, vector<64x1xf32>
    %612 = math.absf %606 : vector<64x1xf32>
    %cst_354 = arith.constant 0.327591091 : f32
    %613 = vector.broadcast %cst_354 : f32 to vector<64x1xf32>
    %614 = arith.mulf %613, %612 : vector<64x1xf32>
    %cst_355 = arith.constant 1.000000e+00 : f32
    %615 = vector.broadcast %cst_355 : f32 to vector<64x1xf32>
    %616 = arith.addf %615, %614 : vector<64x1xf32>
    %cst_356 = arith.constant 1.000000e+00 : f32
    %617 = vector.broadcast %cst_356 : f32 to vector<64x1xf32>
    %618 = arith.divf %617, %616 : vector<64x1xf32>
    %cst_357 = arith.constant 1.06140542 : f32
    %619 = vector.broadcast %cst_357 : f32 to vector<64x1xf32>
    %620 = arith.mulf %618, %619 : vector<64x1xf32>
    %cst_358 = arith.constant -1.45315206 : f32
    %621 = vector.broadcast %cst_358 : f32 to vector<64x1xf32>
    %622 = arith.addf %621, %620 : vector<64x1xf32>
    %623 = arith.mulf %618, %622 : vector<64x1xf32>
    %cst_359 = arith.constant 1.42141378 : f32
    %624 = vector.broadcast %cst_359 : f32 to vector<64x1xf32>
    %625 = arith.addf %624, %623 : vector<64x1xf32>
    %626 = arith.mulf %618, %625 : vector<64x1xf32>
    %cst_360 = arith.constant -0.284496725 : f32
    %627 = vector.broadcast %cst_360 : f32 to vector<64x1xf32>
    %628 = arith.addf %627, %626 : vector<64x1xf32>
    %629 = arith.mulf %618, %628 : vector<64x1xf32>
    %cst_361 = arith.constant 0.254829586 : f32
    %630 = vector.broadcast %cst_361 : f32 to vector<64x1xf32>
    %631 = arith.addf %630, %629 : vector<64x1xf32>
    %632 = arith.mulf %618, %631 : vector<64x1xf32>
    %cst_362 = arith.constant 0.000000e+00 : f32
    %633 = vector.broadcast %cst_362 : f32 to vector<64x1xf32>
    %634 = arith.subf %633, %612 : vector<64x1xf32>
    %635 = arith.mulf %634, %612 : vector<64x1xf32>
    %636 = math.exp %635 : vector<64x1xf32>
    %637 = arith.mulf %632, %636 : vector<64x1xf32>
    %cst_363 = arith.constant 1.000000e+00 : f32
    %638 = vector.broadcast %cst_363 : f32 to vector<64x1xf32>
    %639 = arith.subf %638, %637 : vector<64x1xf32>
    %640 = arith.mulf %611, %639 : vector<64x1xf32>
    %cst_364 = arith.constant 1.000000e+00 : f32
    %641 = vector.broadcast %cst_364 : f32 to vector<64x1xf32>
    %642 = arith.addf %641, %640 : vector<64x1xf32>
    %643 = arith.mulf %604, %642 : vector<64x1xf32>
    %c0_365 = arith.constant 0 : index
    %c64_366 = arith.constant 64 : index
    %c13_367 = arith.constant 13 : index
    %644 = vector.load %arg1[%c0_365, %c64_366, %c13_367] : memref<1x128x27xf32, #tpu.memory_space<vmem>>, vector<1x64x1xf32>
    %645 = vector.shape_cast %644 : vector<1x64x1xf32> to vector<64x1xf32>
    %646 = vector.broadcast %108 : vector<1x1xf32> to vector<64x1xf32>
    %647 = arith.mulf %645, %646 : vector<64x1xf32>
    %648 = vector.broadcast %109 : vector<1x1xf32> to vector<64x1xf32>
    %649 = arith.addf %647, %648 : vector<64x1xf32>
    %650 = arith.addf %643, %649 : vector<64x1xf32>
    %c64_368 = arith.constant 64 : index
    %c0_369 = arith.constant 0 : index
    %651 = vector.load %arg7[%c64_368, %c0_369] : memref<128x8xf32, #tpu.memory_space<vmem>>, vector<64x8xf32>
    %652 = vector.broadcast %650 : vector<64x1xf32> to vector<64x8xf32>
    %653 = arith.mulf %652, %651 : vector<64x8xf32>
    %c0_370 = arith.constant 0 : index
    %c64_371 = arith.constant 64 : index
    %654 = vector.load %arg8[%c0_370, %c64_371] : memref<2x128xf32, #tpu.memory_space<vmem>>, vector<2x64xf32>
    %cst_372 = arith.constant dense<0.000000e+00> : vector<2x8xf32>
    %655 = tpu.matmul %654, %653, %cst_372 {dimension_numbers = #tpu.dot_dimension_numbers<[1], [0], [0], [1], [0, 0, 1, 1], [], []>} : vector<2x64xf32>, vector<64x8xf32>, vector<2x8xf32> -> vector<2x8xf32>
    %656 = arith.addf %383, %655 : vector<2x8xf32>
    %cst_373 = arith.constant 5.000000e-01 : f32
    %657 = vector.broadcast %cst_373 : f32 to vector<2x8xf32>
    %658 = arith.mulf %657, %656 : vector<2x8xf32>
    %cst_374 = arith.constant 0.707106769 : f32
    %659 = vector.broadcast %cst_374 : f32 to vector<2x8xf32>
    %660 = arith.mulf %656, %659 : vector<2x8xf32>
    %cst_375 = arith.constant 0.000000e+00 : f32
    %661 = vector.broadcast %cst_375 : f32 to vector<2x8xf32>
    %662 = arith.cmpf olt, %660, %661 : vector<2x8xf32>
    %cst_376 = arith.constant -1.000000e+00 : f32
    %cst_377 = arith.constant 1.000000e+00 : f32
    %663 = vector.broadcast %cst_376 : f32 to vector<2x8xf32>
    %664 = vector.broadcast %cst_377 : f32 to vector<2x8xf32>
    %665 = arith.select %662, %663, %664 : vector<2x8xi1>, vector<2x8xf32>
    %666 = math.absf %660 : vector<2x8xf32>
    %cst_378 = arith.constant 0.327591091 : f32
    %667 = vector.broadcast %cst_378 : f32 to vector<2x8xf32>
    %668 = arith.mulf %667, %666 : vector<2x8xf32>
    %cst_379 = arith.constant 1.000000e+00 : f32
    %669 = vector.broadcast %cst_379 : f32 to vector<2x8xf32>
    %670 = arith.addf %669, %668 : vector<2x8xf32>
    %cst_380 = arith.constant 1.000000e+00 : f32
    %671 = vector.broadcast %cst_380 : f32 to vector<2x8xf32>
    %672 = arith.divf %671, %670 : vector<2x8xf32>
    %cst_381 = arith.constant 1.06140542 : f32
    %673 = vector.broadcast %cst_381 : f32 to vector<2x8xf32>
    %674 = arith.mulf %672, %673 : vector<2x8xf32>
    %cst_382 = arith.constant -1.45315206 : f32
    %675 = vector.broadcast %cst_382 : f32 to vector<2x8xf32>
    %676 = arith.addf %675, %674 : vector<2x8xf32>
    %677 = arith.mulf %672, %676 : vector<2x8xf32>
    %cst_383 = arith.constant 1.42141378 : f32
    %678 = vector.broadcast %cst_383 : f32 to vector<2x8xf32>
    %679 = arith.addf %678, %677 : vector<2x8xf32>
    %680 = arith.mulf %672, %679 : vector<2x8xf32>
    %cst_384 = arith.constant -0.284496725 : f32
    %681 = vector.broadcast %cst_384 : f32 to vector<2x8xf32>
    %682 = arith.addf %681, %680 : vector<2x8xf32>
    %683 = arith.mulf %672, %682 : vector<2x8xf32>
    %cst_385 = arith.constant 0.254829586 : f32
    %684 = vector.broadcast %cst_385 : f32 to vector<2x8xf32>
    %685 = arith.addf %684, %683 : vector<2x8xf32>
    %686 = arith.mulf %672, %685 : vector<2x8xf32>
    %cst_386 = arith.constant 0.000000e+00 : f32
    %687 = vector.broadcast %cst_386 : f32 to vector<2x8xf32>
    %688 = arith.subf %687, %666 : vector<2x8xf32>
    %689 = arith.mulf %688, %666 : vector<2x8xf32>
    %690 = math.exp %689 : vector<2x8xf32>
    %691 = arith.mulf %686, %690 : vector<2x8xf32>
    %cst_387 = arith.constant 1.000000e+00 : f32
    %692 = vector.broadcast %cst_387 : f32 to vector<2x8xf32>
    %693 = arith.subf %692, %691 : vector<2x8xf32>
    %694 = arith.mulf %665, %693 : vector<2x8xf32>
    %cst_388 = arith.constant 1.000000e+00 : f32
    %695 = vector.broadcast %cst_388 : f32 to vector<2x8xf32>
    %696 = arith.addf %695, %694 : vector<2x8xf32>
    %697 = arith.mulf %658, %696 : vector<2x8xf32>
    %c0_389 = arith.constant 0 : index
    %c0_390 = arith.constant 0 : index
    %c0_391 = arith.constant 0 : index
    %698 = vector.load %arg9[%c0_389, %c0_390, %c0_391] : memref<1x2x8xf32, #tpu.memory_space<vmem>>, vector<1x2x8xf32>
    %699 = vector.shape_cast %698 : vector<1x2x8xf32> to vector<2x8xf32>
    %700 = vector.shape_cast %697 : vector<2x8xf32> to vector<1x2x8xf32>
    tpu.vector_store %arg9[%c0_389, %c0_390, %c0_391], %700 {strides = array<i32>} : memref<1x2x8xf32, #tpu.memory_space<vmem>>, vector<1x2x8xf32>,
    return
  }
  func.func @transform_0(%arg0: i32) -> (i32, i32, i32) {
    %c0_i32 = arith.constant 0 : i32
    %c0_i32_0 = arith.constant 0 : i32
    %c0_i32_1 = arith.constant 0 : i32
    return %arg0, %c0_i32, %c0_i32_0 : i32, i32, i32
  }
  func.func @transform_1(%arg0: i32) -> (i32, i32) {
    %c0_i32 = arith.constant 0 : i32
    %c0_i32_0 = arith.constant 0 : i32
    %c0_i32_1 = arith.constant 0 : i32
    return %c0_i32, %c0_i32_0 : i32, i32
  }
  func.func @transform_2(%arg0: i32) -> (i32, i32) {
    %c0_i32 = arith.constant 0 : i32
    %c0_i32_0 = arith.constant 0 : i32
    %c0_i32_1 = arith.constant 0 : i32
    return %c0_i32, %c0_i32_0 : i32, i32
  }
  func.func @transform_3(%arg0: i32) -> (i32, i32) {
    %c0_i32 = arith.constant 0 : i32
    %c0_i32_0 = arith.constant 0 : i32
    %c0_i32_1 = arith.constant 0 : i32
    return %c0_i32, %c0_i32_0 : i32, i32
  }
  func.func @transform_4(%arg0: i32) -> (i32, i32) {
    %c0_i32 = arith.constant 0 : i32
    %c0_i32_0 = arith.constant 0 : i32
    %c0_i32_1 = arith.constant 0 : i32
    return %c0_i32, %c0_i32_0 : i32, i32
  }
  func.func @transform_5(%arg0: i32) -> (i32, i32) {
    %c0_i32 = arith.constant 0 : i32
    %c0_i32_0 = arith.constant 0 : i32
    %c0_i32_1 = arith.constant 0 : i32
    return %c0_i32, %c0_i32_0 : i32, i32
  }
  func.func @transform_6(%arg0: i32) -> (i32, i32) {
    %c0_i32 = arith.constant 0 : i32
    %c0_i32_0 = arith.constant 0 : i32
    %c0_i32_1 = arith.constant 0 : i32
    return %c0_i32, %c0_i32_0 : i32, i32
  }
  func.func @transform_7(%arg0: i32) -> (i32, i32) {
    %c0_i32 = arith.constant 0 : i32
    %c0_i32_0 = arith.constant 0 : i32
    %c0_i32_1 = arith.constant 0 : i32
    return %c0_i32, %c0_i32_0 : i32, i32
  }
  func.func @transform_8(%arg0: i32) -> (i32, i32, i32) {
    %c0_i32 = arith.constant 0 : i32
    %c0_i32_0 = arith.constant 0 : i32
    %c0_i32_1 = arith.constant 0 : i32
    return %arg0, %c0_i32, %c0_i32_0 : i32, i32, i32
  }
}

</mosaic_0001>

<bundles_post_ra>
// kernel: tpu_custom_call.1
= control target key start
LH: loop header
LB: loop body
LE: loop exit
PB: predicated region body
PF: predicated region fallthrough
CT: control target
= control target key end

     0   :  { %13 = vsyncpa [#allocation4], 0  ;;  %s10914_s0 = inlined_call_operand.vmem [shape: f32[2,128,27], index: 0, kind: input, shape index: {}]   ;;  %s10915_s1 = inlined_call_operand.vmem [shape: f32[128,27], index: 1, kind: input, shape index: {}]   ;;  %s10916_s2 = inlined_call_operand.vmem [shape: f32[27,16], index: 2, kind: input, shape index: {}]   ;;  %s10917_s3 = inlined_call_operand.vmem [shape: f32[2,16], index: 3, kind: input, shape index: {}]   ;;  %s10918_s4 = inlined_call_operand.vmem [shape: f32[27,16], index: 4, kind: input, shape index: {}]   ;;  %s10919_s5 = inlined_call_operand.vmem [shape: f32[1,3], index: 5, kind: input, shape index: {}]   ;;  %s10920_s6 = inlined_call_operand.vmem [shape: f32[128,8], index: 6, kind: input, shape index: {}]   ;;  %s10921_s7 = inlined_call_operand.vmem [shape: f32[2,128], index: 7, kind: input, shape index: {}]   ;;  %s10922_s8 = inlined_call_operand.hbm [shape: f32[2,2,8], index: 8, kind: output, shape index: {}]  }
   0x1   :  { %15 = vsyncpa [#allocation4 + $0x1], 0  ;;  %s6523_s27 = smov 0   ;;  %s6525_s28 = smov 0  }
   0x2   :  { %s6527_s29 = smov 0   ;;  %s6529_s30 = smov 0  }
   0x3 LB: > { %s6544_s9 = sadd.s32 4294967295, %s6441_s30   ;;  %s5708_s10 = sadd.s32 4294967294, %s6441_s30   ;;  %s6441_s30 = sphi %s6529_s30, %s11852_s30   ;;  %s6437_s29 = sphi %s6527_s29, %s11851_s29   ;;  %s6433_s28 = sphi %s6525_s28, %s11850_s28   ;;  %s6429_s27 = sphi %s6523_s27, %s11849_s27  }
   0x4   : > { %s6548_s11 = sadd.s32 1, %s6441_s30   ;;  %s201_s12 = sadd.s32 1, %s6437_s29 }
   0x5   : > { %s198_s13 = ssub.s32 %s6441_s30, %s6548_s11  ;;  %p211_p0 = scmp.ne.s32.totalorder %s6437_s29, %s6433_s28 }
   0x6   : > { %p199_p1 = scmp.eq.s32.totalorder %s198_s13, 0  ;;  %p212_p2 = scmp.eq.s32.totalorder %s6544_s9, 1 }
   0x7   : > { %p217_p3 = scmp.ne.s32.totalorder %s6433_s28, %s6429_s27  ;;  %p218_p4 = scmp.eq.s32.totalorder %s5708_s10, 1 }
   0x8   : > { %s6559_s14 = scalar_select %p199_p1, %s6437_s29, %s201_s12  }
   0x9   : > { %p6561_p5 = por %p212_p2, %p211_p0  ;;  %p6565_p6 = por %p218_p4, %p217_p3 }
   0xa   : > { %p5711_p7 = scmp.ge.s32.totalorder %s6441_s30, 1  ;;  %p265_p8 = scmp.lt.s32.totalorder %s6441_s30, 3 }
   0xc   : > { %p266_p9 = pnand %p5711_p7, %p265_p8 }
   0xe   : > { %269 = sbr.rel (%p266_p9) target bundleno = 2438 (0x986), region = 52 }
  0x13   : > { %v322_v0 = vld [vmem:[%s10916_s2 + $0x18] sm:$0x7]  ;;  %vm348_vm0 = vcmask 1042432   ;;  %v6577_v1 = vld [vmem:[%s10915_s1 + $0x10] sm:$0xff]  ;;  %v10945_v2 = vmov 1   ;;  %v10947_v3 = vmov 0  }
  0x14   : > { %5966 = vset.pattern.permute.xlu0 %v10945_v2  ;;  %5965 = vset.pattern.permute.xlu1 %v10947_v3  ;;  %v6584_v4 = vld [vmem:[%s10915_s1] sm:$0xff]  ;;  %v321_v5 = vld [vmem:[%s10916_s2 + $0x10] sm:$0xff]  ;;  %p299_p10 = scmp.lt.s32.totalorder %s6544_s9, 1  ;;  %v320_v6 = vld [vmem:[%s10916_s2 + $0x8] sm:$0xff]  ;;  %vm304_vm1 = vcmask 130048   ;;  %vm323_vm2 = vcmask 220160  }
  0x15   : > { %5814 = vmatprep.subr.msk.mxu0 %vm348_vm0, %v322_v0  ;;  %1130 = vperm.xlu1 %5965, %v6577_v1   ;;  %v6600_v7 = vld [vmem:[%s10915_s1 + $0x18] sm:$0xff]  ;;  %v319_v9 = vld [vmem:[%s10916_s2] sm:$0xff]  ;;  %v10927_v10 = vmov 0.0   ;;  %v6634_v13 = vld [vmem:[%s10915_s1 + $0x28] sm:$0xff]  ;;  %v10941_v22 = vmov 2   ;;  %v10939_v27 = vmov 3  }
  0x16   : > { %1188 = vperm.xlu0 %5966, %v6584_v4   ;;  %5815 = vmatpush3.msk.msra.mxu0 %vm348_vm0, %v322_v0  ;;  %s300_s13 = scalar_select %p299_p10, %s6544_s9, 1  ;;  %v718_v8 = vld [vmem:[%s10916_s2 + $0x18] sm:$0x7]  ;;  %306 = vst.msk [vmem:[#allocation2 + $0x8] sm:$0xff] %vm304_vm1, %v10927_v10  ;;  %307 = vst.msk [vmem:[#allocation2 + $0x10] sm:$0xff] %vm304_vm1, %v10927_v10  ;;  %v6653_v18 = vld [vmem:[%s10915_s1 + $0x8] sm:$0xff] }
  0x17   : > { %5816 = vmatprep.subr.mxu0 %v321_v5  ;;  %5834 = vmatprep.subr.msk.mxu1 %vm348_vm0, %v718_v8  ;;  %305 = vst.msk [vmem:[#allocation2] sm:$0xff] %vm304_vm1, %v10927_v10  ;;  %308 = vst.msk [vmem:[#allocation2 + $0x98] sm:$0xff] %vm304_vm1, %v10927_v10  ;;  %v6648_v17 = vld [vmem:[%s10915_s1 + $0x38] sm:$0xff]  ;;  %v6675_v25 = vld [vmem:[%s10915_s1 + $0x20] sm:$0xff]  ;;  %v10937_v28 = vmov 4   ;;  %v10935_v29 = vmov 5  }
  0x18   : > { %5817 = vmatpush3.msra.mxu0 %v321_v5  ;;  %s5771_s21 = sshll.u32 %s300_s13, 7  ;;  %309 = vst.msk [vmem:[#allocation2 + $0xa0] sm:$0xff] %vm304_vm1, %v10927_v10  ;;  %310 = vst.msk [vmem:[#allocation2 + $0xa8] sm:$0xff] %vm304_vm1, %v10927_v10  ;;  %5835 = vmatpush3.msk.msra.mxu1 %vm348_vm0, %v718_v8  ;;  %v6685_v26 = vld [vmem:[%s10915_s1 + $0x30] sm:$0xff]  ;;  %v10933_v30 = vmov 6   ;;  %v10931_v31 = vmov 7  }
  0x19   : > { %5818 = vmatprep.subr.mxu0 %v320_v6  ;;  %1135 = vperm.xlu1 %5965, %v6600_v7   ;;  %s6614_s24 = scalar_lea.vmem %s10914_s0, %s5771_s21  ;;  %v10929_v32 = vmov 8   ;;  %v10925_v33 = vmov 9   ;;  %v10923_v43 = vmov 10   ;;  %v10943_v51 = vmov 11   ;;  %s6472_s20 = smov 12  }
  0x1a   : > { %1200 = vperm.xlu0 %5966, %v6600_v7   ;;  %5819 = vmatpush3.msra.mxu0 %v320_v6  ;;  %v311_v11 = vld [vmem:[%s6614_s24] sm:$0xff]  ;;  %v312_v12 = vld [vmem:[%s6614_s24 + $0x8] sm:$0xff]  ;;  %v313_v14 = vld [vmem:[%s6614_s24 + $0x10] sm:$0xff]  ;;  %v10953_v59 = vmov 12   ;;  %v10951_v8 = vmov 13   ;;  %s6473_s21 = smov 11  }
  0x1b   : > { %5820 = vmatprep.subr.mxu0 %v319_v9  ;;  %5822 = vmatprep.mubr.msk.f32.mxu0 %vm323_vm2, %v311_v11  ;;  %v707_v15 = vld [vmem:[%s6614_s24 + $0x40] sm:$0xff]  ;;  %v314_v16 = vld [vmem:[%s6614_s24 + $0x18] sm:$0xff]  ;;  %v316_v20 = vld [vmem:[%s6614_s24 + $0x28] sm:$0xff]  ;;  %s6474_s22 = smov 115   ;;  %s296_s26 = sand.u32 1, %s6433_s28  }
  0x1c   : > { %5821 = vmatpush3.msra.mxu0 %v319_v9  ;;  %5836 = vmatprep.subr.mxu1 %v321_v5  ;;  %v315_v19 = vld [vmem:[%s6614_s24 + $0x20] sm:$0xff]  ;;  %v317_v21 = vld [vmem:[%s6614_s24 + $0x30] sm:$0xff]  ;;  %v318_v23 = vld [vmem:[%s6614_s24 + $0x38] sm:$0xff]  ;;  %s5712_s10 = sshll.u32 %s296_s26, 1  ;;  %s5768_s12 = sshll.u32 %s6544_s9, 5 }
  0x1d   : > { %5823 = vmatmul.mubr.msk.f32.vlgmr.msra.gmra.mxu0 %vm323_vm2, %v312_v12  ;;  %1145 = vperm.xlu1 %5965, %v6634_v13   ;;  %v708_v24 = vld [vmem:[%s6614_s24 + $0x48] sm:$0xff]  ;;  %v709_v34 = vld [vmem:[%s6614_s24 + $0x50] sm:$0xff]  ;;  %v710_v36 = vld [vmem:[%s6614_s24 + $0x58] sm:$0xff]  ;;  %s298_s13 = scalar_lea.vmem [#allocation3], %s5712_s10  ;;  %s5636_s19 = scalar_lea.sflag [#allocation4], %s296_s26 }
  0x1e   : > { %1208 = vperm.xlu0 %5966, %v6634_v13   ;;  %5825 = vmatprep.mubr.msk.f32.mxu0 %vm323_vm2, %v313_v14  ;;  %s5649_s17 = sshll.u32 %s298_s13, 4  ;;  %s5650_s17 = int_to_ptr.vmem [resolvable:$true] %s5649_s17 }
  0x1f   : > { %5842 = vmatprep.mubr.msk.f32.mxu1 %vm323_vm2, %v707_v15  ;;  %5837 = vmatpush3.msra.mxu1 %v321_v5 }
  0x20   : > { %5854 = vmatprep.subr.mxu0 %v10927_v10  ;;  %5838 = vmatprep.subr.mxu1 %v320_v6 }
  0x21   : > { %5826 = vmatmul.mubr.msk.f32.gmra.mxu0 %vm323_vm2, %v314_v16  ;;  %5967 = vset.pattern.permute.xlu1 %v10945_v2 }
  0x22   : > { %1216 = vperm.xlu0 %5966, %v6648_v17   ;;  %1192 = vperm.xlu1 %5967, %v6653_v18  }
  0x23   : > { %5828 = vmatprep.mubr.msk.f32.mxu0 %vm323_vm2, %v315_v19  ;;  %5839 = vmatpush3.msra.mxu1 %v320_v6 }
  0x24   : > { %5840 = vmatprep.subr.mxu1 %v319_v9 }
  0x25   : > { %5829 = vmatmul.mubr.msk.f32.gmra.mxu0 %vm323_vm2, %v316_v20  ;;  %5841 = vmatpush3.msra.mxu1 %v319_v9  ;;  %v10949_v20 = vmov 14  }
  0x26   : > { %5969 = vset.pattern.permute.xlu0 %v10941_v22  ;;  %1196 = vperm.xlu1 %5967, %v6577_v1  }
  0x27   : > { %1261 = vperm.xlu0 %5969, %v6653_v18   ;;  %5831 = vmatprep.mubr.msk.f32.mxu0 %vm323_vm2, %v317_v21 }
  0x28   : > { %5843 = vmatmul.mubr.msk.f32.vlgmr.msra.gmra.mxu1 %vm323_vm2, %v708_v24  ;;  %5873 = vmatprep.subr.mxu1 %v10927_v10 }
  0x29   : > { %5832 = vmatmul.mubr.msk.f32.gmra.mxu0 %vm323_vm2, %v318_v23  ;;  %5845 = vmatprep.mubr.msk.f32.mxu1 %vm323_vm2, %v709_v34  ;;  %v6870_v23 = vld [vmem:[%s10917_s3] ss:$0 sm:$0xff] }
  0x2a   : > { %1204 = vperm.xlu1 %5967, %v6675_v25  }
  0x2b   : > { %1273 = vperm.xlu0 %5969, %v6675_v25  }
  0x2c   : > { %5846 = vmatmul.mubr.msk.f32.gmra.mxu1 %vm323_vm2, %v710_v36  ;;  %v6877_v36 = vld [vmem:[%s10917_s3 + $0x1] ss:$0 sm:$0xff] }
  0x2e   : > { %1212 = vperm.xlu1 %5967, %v6685_v26  }
  0x2f   : > { %1281 = vperm.xlu0 %5969, %v6685_v26  }
  0x32   : > { %5968 = vset.pattern.permute.xlu1 %v10941_v22 }
  0x33   : > { %5970 = vset.pattern.permute.xlu0 %v10939_v27  ;;  %1257 = vperm.xlu1 %5968, %v6584_v4  }
  0x34   : > { %1326 = vperm.xlu0 %5970, %v6584_v4  }
  0x37   : > { %1265 = vperm.xlu1 %5968, %v6577_v1  }
  0x38   : > { %1338 = vperm.xlu0 %5970, %v6600_v7  }
  0x3b   : > { %1269 = vperm.xlu1 %5968, %v6600_v7  }
  0x3c   : > { %1346 = vperm.xlu0 %5970, %v6634_v13  }
  0x3f   : > { %1277 = vperm.xlu1 %5968, %v6634_v13  }
  0x40   : > { %1354 = vperm.xlu0 %5970, %v6648_v17  }
  0x43   : > { %1285 = vperm.xlu1 %5968, %v6648_v17  }
  0x44   : > { %5973 = vset.pattern.permute.xlu0 %v10937_v28 }
  0x45   : > { %1399 = vperm.xlu0 %5973, %v6653_v18  }
  0x47   : > { %5971 = vset.pattern.permute.xlu1 %v10939_v27 }
  0x48   : > { %1330 = vperm.xlu1 %5971, %v6653_v18  }
  0x49   : > { %1411 = vperm.xlu0 %5973, %v6675_v25  }
  0x4c   : > { %1334 = vperm.xlu1 %5971, %v6577_v1  }
  0x4d   : > { %1419 = vperm.xlu0 %5973, %v6685_v26  }
  0x50   : > { %1342 = vperm.xlu1 %5971, %v6675_v25  }
  0x51   : > { %5974 = vset.pattern.permute.xlu0 %v10935_v29 }
  0x52   : > { %1464 = vperm.xlu0 %5974, %v6584_v4  }
  0x54   : > { %1350 = vperm.xlu1 %5971, %v6685_v26  }
  0x56   : > { %1476 = vperm.xlu0 %5974, %v6600_v7  }
  0x58   : > { %5972 = vset.pattern.permute.xlu1 %v10937_v28 }
  0x59   : > { %1395 = vperm.xlu1 %5972, %v6584_v4  }
  0x5a   : > { %1484 = vperm.xlu0 %5974, %v6634_v13  }
  0x5d   : > { %1403 = vperm.xlu1 %5972, %v6577_v1  }
  0x5e   : > { %1492 = vperm.xlu0 %5974, %v6648_v17  }
  0x61   : > { %1407 = vperm.xlu1 %5972, %v6600_v7  }
  0x62   : > { %5977 = vset.pattern.permute.xlu0 %v10933_v30 }
  0x63   : > { %1537 = vperm.xlu0 %5977, %v6653_v18  }
  0x65   : > { %1415 = vperm.xlu1 %5972, %v6634_v13  }
  0x67   : > { %1549 = vperm.xlu0 %5977, %v6675_v25  }
  0x69   : > { %1423 = vperm.xlu1 %5972, %v6648_v17  }
  0x6b   : > { %1557 = vperm.xlu0 %5977, %v6685_v26  }
  0x6d   : > { %5975 = vset.pattern.permute.xlu1 %v10935_v29 }
  0x6e   : > { %1468 = vperm.xlu1 %5975, %v6653_v18  }
  0x6f   : > { %5978 = vset.pattern.permute.xlu0 %v10931_v31 }
  0x70   : > { %1602 = vperm.xlu0 %5978, %v6584_v4  }
  0x72   : > { %1472 = vperm.xlu1 %5975, %v6577_v1  }
  0x74   : > { %1614 = vperm.xlu0 %5978, %v6600_v7  }
  0x76   : > { %1480 = vperm.xlu1 %5975, %v6675_v25  }
  0x78   : > { %1622 = vperm.xlu0 %5978, %v6634_v13  }
  0x7a   : > { %1488 = vperm.xlu1 %5975, %v6685_v26  }
  0x7c   : > { %1630 = vperm.xlu0 %5978, %v6648_v17  }
  0x7e   : > { %5976 = vset.pattern.permute.xlu1 %v10933_v30 }
  0x7f   : > { %1533 = vperm.xlu1 %5976, %v6584_v4  }
  0x80   : > { %5981 = vset.pattern.permute.xlu0 %v10929_v32 }
  0x81   : > { %1675 = vperm.xlu0 %5981, %v6653_v18  }
  0x83   : > { %1541 = vperm.xlu1 %5976, %v6577_v1  }
  0x85   : > { %1687 = vperm.xlu0 %5981, %v6675_v25  }
  0x87   : > { %1545 = vperm.xlu1 %5976, %v6600_v7  }
  0x89   : > { %1695 = vperm.xlu0 %5981, %v6685_v26  }
  0x8b   : > { %1553 = vperm.xlu1 %5976, %v6634_v13  }
  0x8d   : > { %5982 = vset.pattern.permute.xlu0 %v10925_v33 }
  0x8e   : > { %1740 = vperm.xlu0 %5982, %v6584_v4  }
  0x8f   : > { %1561 = vperm.xlu1 %5976, %v6648_v17  }
  0x90   : > { %v6747_v35 = vpop.permute.xlu1 %1130 }
  0x91   : > { %v6751_v37 = vpop.permute.xlu0 %1188 }
  0x92   : > { %1752 = vperm.xlu0 %5982, %v6600_v7  }
  0x93   : > { %5979 = vset.pattern.permute.xlu1 %v10931_v31 }
  0x94   : > { %v6756_v38 = vpop.permute.xlu1 %1135  ;;  %1606 = vperm.xlu1 %5979, %v6653_v18  }
  0x95   : > { %v6759_v39 = vpop.permute.xlu0 %1200 }
  0x96   : > { %1760 = vperm.xlu0 %5982, %v6634_v13  }
  0x98   : > { %v6762_v40 = vpop.permute.xlu1 %1145  ;;  %1610 = vperm.xlu1 %5979, %v6577_v1  }
  0x99   : > { %v6765_v41 = vpop.permute.xlu0 %1208 }
  0x9a   : > { %1768 = vperm.xlu0 %5982, %v6648_v17  }
  0x9c   : > { %1618 = vperm.xlu1 %5979, %v6675_v25  }
  0x9d   : > { %v6769_v42 = vpop.permute.xlu1 %1192  ;;  %v6772_v44 = vpop.permute.xlu0 %1216 }
  0x9e   : > { %5985 = vset.pattern.permute.xlu0 %v10923_v43  ;;  %11059 = vst [vmem:[#allocation6_spill] sm:$0xff] %v6772_v44 }
  0x9f   : > { %1813 = vperm.xlu0 %5985, %v6653_v18  }
  0xa0   : > { %1626 = vperm.xlu1 %5979, %v6685_v26  }
  0xa1   : > { %v6776_v45 = vpop.permute.xlu1 %1196 }
  0xa2   : > { %v6778_v46 = vpop.permute.xlu0 %1261 }
  0xa3   : > { %1825 = vperm.xlu0 %5985, %v6675_v25  }
  0xa4   : > { %5980 = vset.pattern.permute.xlu1 %v10929_v32 }
  0xa5   : > { %v6782_v47 = vpop.permute.xlu1 %1204  ;;  %1671 = vperm.xlu1 %5980, %v6584_v4  }
  0xa6   : > { %11060 = vst [vmem:[#allocation7_spill] sm:$0xff] %v6782_v47  ;;  %v6785_v48 = vpop.permute.xlu0 %1273 }
  0xa7   : > { %11061 = vst [vmem:[#allocation8_spill] sm:$0xff] %v6785_v48  ;;  %1833 = vperm.xlu0 %5985, %v6685_v26  }
  0xa9   : > { %v6788_v49 = vpop.permute.xlu1 %1212  ;;  %1679 = vperm.xlu1 %5980, %v6577_v1  }
  0xaa   : > { %11062 = vst [vmem:[#allocation9_spill] sm:$0xff] %v6788_v49  ;;  %v6791_v50 = vpop.permute.xlu0 %1281 }
  0xab   : > { %11063 = vst [vmem:[#allocation10_spill] sm:$0xff] %v6791_v50  ;;  %5986 = vset.pattern.permute.xlu0 %v10943_v51 }
  0xac   : > { %1878 = vperm.xlu0 %5986, %v6584_v4  }
  0xad   : > { %1683 = vperm.xlu1 %5980, %v6600_v7  }
  0xae   : > { %v6796_v52 = vpop.permute.xlu1 %1257 }
  0xaf   : > { %11064 = vst [vmem:[#allocation11_spill] sm:$0xff] %v6796_v52  ;;  %v6798_v53 = vpop.permute.xlu0 %1326 }
  0xb0   : > { %11065 = vst [vmem:[#allocation12_spill] sm:$0xff] %v6798_v53  ;;  %1890 = vperm.xlu0 %5986, %v6600_v7  }
  0xb1   : > { %1691 = vperm.xlu1 %5980, %v6634_v13  }
  0xb2   : > { %v6802_v54 = vpop.permute.xlu1 %1265 }
  0xb3   : > { %11066 = vst [vmem:[#allocation13_spill] sm:$0xff] %v6802_v54  ;;  %v6804_v55 = vpop.permute.xlu0 %1338 }
  0xb4   : > { %11067 = vst [vmem:[#allocation14_spill] sm:$0xff] %v6804_v55  ;;  %1898 = vperm.xlu0 %5986, %v6634_v13  }
  0xb5   : > { %1699 = vperm.xlu1 %5980, %v6648_v17  }
  0xb6   : > { %v6808_v56 = vpop.permute.xlu1 %1269 }
  0xb7   : > { %v6810_v57 = vpop.permute.xlu0 %1346 }
  0xb8   : > { %11068 = vst [vmem:[#allocation15_spill] sm:$0xff] %v6810_v57  ;;  %1906 = vperm.xlu0 %5986, %v6648_v17  }
  0xb9   : > { %5983 = vset.pattern.permute.xlu1 %v10925_v33 }
  0xba   : > { %1744 = vperm.xlu1 %5983, %v6653_v18   ;;  %v6815_v58 = vpop.permute.xlu1 %1277 }
  0xbb   : > { %11069 = vst [vmem:[#allocation16_spill] sm:$0xff] %v6815_v58  ;;  %v6818_v60 = vpop.permute.xlu0 %1354 }
  0xbc   : > { %5989 = vset.pattern.permute.xlu0 %v10953_v59  ;;  %11070 = vst [vmem:[#allocation17_spill] sm:$0xff] %v6818_v60 }
  0xbd   : > { %1951 = vperm.xlu0 %5989, %v6653_v18  }
  0xbe   : > { %1748 = vperm.xlu1 %5983, %v6577_v1   ;;  %v6822_v61 = vpop.permute.xlu1 %1285 }
  0xbf   : > { %11071 = vst [vmem:[#allocation18_spill] sm:$0xff] %v6822_v61  ;;  %v10955_v61 = vmov 15  }
  0xc0   : > { %v6824_v62 = vpop.permute.xlu0 %1399 }
  0xc1   : > { %11072 = vst [vmem:[#allocation19_spill] sm:$0xff] %v6824_v62  ;;  %1963 = vperm.xlu0 %5989, %v6675_v25   ;;  %v11105_v62 = vmov 1.0  }
  0xc2   : > { %1756 = vperm.xlu1 %5983, %v6675_v25  }
  0xc3   : > { %v6828_v63 = vpop.permute.xlu1 %1330 }
  0xc4   : > { %11073 = vst [vmem:[#allocation20_spill] sm:$0xff] %v6828_v63  ;;  %v6830_v0 = vpop.permute.xlu0 %1411 }
  0xc5   : > { %11074 = vst [vmem:[#allocation21_spill] sm:$0xff] %v6830_v0  ;;  %1971 = vperm.xlu0 %5989, %v6685_v26  }
  0xc6   : > { %1764 = vperm.xlu1 %5983, %v6685_v26  }
  0xc7   : > { %v6834_v5 = vpop.permute.xlu1 %1334 }
  0xc8   : > { %11075 = vst [vmem:[#allocation22_spill] sm:$0xff] %v6834_v5  ;;  %v6836_v6 = vpop.permute.xlu0 %1419 }
  0xc9   : > { %11076 = vst [vmem:[#allocation23_spill] sm:$0xff] %v6836_v6  ;;  %5990 = vset.pattern.permute.xlu0 %v10951_v8 }
  0xca   : > { %2016 = vperm.xlu0 %5990, %v6584_v4   ;;  %5984 = vset.pattern.permute.xlu1 %v10923_v43 }
  0xcb   : > { %1809 = vperm.xlu1 %5984, %v6584_v4   ;;  %v6842_v9 = vpop.permute.xlu1 %1342 }
  0xcc   : > { %11077 = vst [vmem:[#allocation24_spill] sm:$0xff] %v6842_v9 }
  0xcd   : > { %v6844_v11 = vpop.permute.xlu0 %1464 }
  0xce   : > { %11078 = vst [vmem:[#allocation25_spill] sm:$0xff] %v6844_v11  ;;  %2028 = vperm.xlu0 %5990, %v6600_v7  }
  0xcf   : > { %1817 = vperm.xlu1 %5984, %v6577_v1   ;;  %v6848_v12 = vpop.permute.xlu1 %1350 }
  0xd0   : > { %11079 = vst [vmem:[#allocation26_spill] sm:$0xff] %v6848_v12 }
  0xd1   : > { %v6850_v14 = vpop.permute.xlu0 %1476 }
  0xd2   : > { %11080 = vst [vmem:[#allocation27_spill] sm:$0xff] %v6850_v14  ;;  %2036 = vperm.xlu0 %5990, %v6634_v13  }
  0xd3   : > { %1821 = vperm.xlu1 %5984, %v6600_v7  }
  0xd4   : > { %v6854_v15 = vpop.permute.xlu1 %1395 }
  0xd5   : > { %11081 = vst [vmem:[#allocation28_spill] sm:$0xff] %v6854_v15  ;;  %v6856_v16 = vpop.permute.xlu0 %1484 }
  0xd6   : > { %11082 = vst [vmem:[#allocation29_spill] sm:$0xff] %v6856_v16  ;;  %2044 = vperm.xlu0 %5990, %v6648_v17  }
  0xd7   : > { %1829 = vperm.xlu1 %5984, %v6634_v13  }
  0xd8   : > { %v6860_v19 = vpop.permute.xlu1 %1403 }
  0xd9   : > { %11083 = vst [vmem:[#allocation30_spill] sm:$0xff] %v6860_v19  ;;  %v6863_v21 = vpop.permute.xlu0 %1492 }
  0xda   : > { %5993 = vset.pattern.permute.xlu0 %v10949_v20  ;;  %11084 = vst [vmem:[#allocation31_spill] sm:$0xff] %v6863_v21 }
  0xdb   : > { %2089 = vperm.xlu0 %5993, %v6653_v18   ;;  %1837 = vperm.xlu1 %5984, %v6648_v17  }
  0xdc   : > { %v6872_v24 = vpop.permute.xlu1 %1407 }
  0xdd   : > { %11085 = vst [vmem:[#allocation32_spill] sm:$0xff] %v6872_v24  ;;  %v5824_v34 = vpop.f32.mrf.mxu0 }
  0xde   : > { %v463_v43 = vmul.f32 %v5824_v34, %v6870_v23  ;;  %v6880_v33 = vpop.permute.xlu0 %1537 }
  0xdf   : > { %11086 = vst [vmem:[#allocation33_spill] sm:$0xff] %v6880_v33  ;;  %2101 = vperm.xlu0 %5993, %v6675_v25   ;;  %v418_v10 = vpop.f32.mrf.mxu0  ;;  %5987 = vset.pattern.permute.xlu1 %v10943_v51 }
  0xe0   : > { %v6885_v32 = vadd.f32 %v6877_v36, %v463_v43  ;;  %v462_v31 = vmul.f32 %v6870_v23, %v418_v10  ;;  %1882 = vperm.xlu1 %5987, %v6653_v18   ;;  %v6889_v30 = vpop.permute.xlu1 %1415 }
  0xe1   : > { %11087 = vst [vmem:[#allocation34_spill] sm:$0xff] %v6889_v30  ;;  %v5827_v29 = vpop.f32.mrf.mxu0 }
  0xe2   : > { %v6892_v28 = vmul.f32 0.70710677, %v6885_v32  ;;  %v6895_v34 = vadd.f32 %v6877_v36, %v462_v31  ;;  %v465_v27 = vmul.f32 %v5827_v29, %v6870_v23  ;;  %v6898_v22 = vpop.permute.xlu0 %1549  ;;  %v6994_v15 = vmul.f32 0.5, %v6885_v32 }
  0xe3   : > { %11088 = vst [vmem:[#allocation35_spill] sm:$0xff] %v6898_v22  ;;  %2109 = vperm.xlu0 %5993, %v6685_v26   ;;  %v428_v43 = vpop.f32.mrf.mxu0 }
  0xe4   : > { %v516_v10 = vand.u32 2147483647, %v6892_v28  ;;  %v6903_v51 = vmul.f32 0.70710677, %v6895_v34  ;;  %1886 = vperm.xlu1 %5987, %v6577_v1   ;;  %v6906_v2 = vpop.permute.xlu1 %1423  ;;  %v6909_v3 = vadd.f32 %v6877_v36, %v465_v27  ;;  %v464_v31 = vmul.f32 %v6870_v23, %v428_v43 }
  0xe5   : > { %11089 = vst [vmem:[#allocation36_spill] sm:$0xff] %v6906_v2  ;;  %v5830_v29 = vpop.f32.mrf.mxu0  ;;  %vm500_vm3 = vcmp.lt.f32.partialorder %v6892_v28, 0.0 }
  0xe6   : > { %v524_v20 = vmul.f32 0.3275911, %v516_v10  ;;  %v515_v8 = vand.u32 2147483647, %v6903_v51  ;;  %v6913_v59 = vpop.permute.xlu0 %1557  ;;  %v6916_v21 = vmul.f32 0.70710677, %v6909_v3  ;;  %v6919_v60 = vadd.f32 %v6877_v36, %v464_v31 }
  0xe7   : > { %11090 = vst [vmem:[#allocation37_spill] sm:$0xff] %v6913_v59  ;;  %5994 = vset.pattern.permute.xlu0 %v10955_v61  ;;  %v438_v44 = vpop.f32.mrf.mxu0  ;;  %v628_v31 = vsub.f32 0.0, %v516_v10  ;;  %v467_v50 = vmul.f32 %v5830_v29, %v6870_v23  ;;  %vm499_vm4 = vcmp.lt.f32.partialorder %v6903_v51, 0.0 }
  0xe8   : > { %v532_v2 = vadd.f32 1.0, %v524_v20  ;;  %v523_v27 = vmul.f32 0.3275911, %v515_v8  ;;  %2154 = vperm.xlu0 %5994, %v6584_v4   ;;  %1894 = vperm.xlu1 %5987, %v6675_v25   ;;  %v518_v43 = vand.u32 2147483647, %v6916_v21  ;;  %vm502_vm5 = vcmp.lt.f32.partialorder %v6916_v21, 0.0 }
  0xe9   : > { %v6926_v59 = vmul.f32 0.70710677, %v6919_v60  ;;  %v6928_v22 = vpop.permute.xlu1 %1468  ;;  %v5833_v61 = vpop.f32.mrf.mxu0  ;;  %v636_v0 = vmul.f32 %v628_v31, %v516_v10  ;;  %v6940_v9 = vadd.f32 %v6877_v36, %v467_v50  ;;  %v11095_v10 = vmov 12  }
  0xea   : > { %11091 = vst [vmem:[#allocation38_spill] sm:$0xff] %v6928_v22  ;;  %6133 = vrcp.f32 %v532_v2  ;;  %v531_v33 = vadd.f32 1.0, %v523_v27  ;;  %v526_v6 = vmul.f32 0.3275911, %v518_v43  ;;  %v627_v2 = vsub.f32 0.0, %v515_v8 }
  0xeb   : > { %v6930_v12 = vpop.permute.xlu0 %1602  ;;  %v517_v20 = vand.u32 2147483647, %v6926_v59  ;;  %v466_v27 = vmul.f32 %v6870_v23, %v438_v44  ;;  %v469_v48 = vmul.f32 %v5833_v61, %v6870_v23  ;;  %v6951_v29 = vmul.f32 0.70710677, %v6940_v9 }
  0xec   : > { %11092 = vst [vmem:[#allocation39_spill] sm:$0xff] %v6930_v12  ;;  %2166 = vperm.xlu0 %5994, %v6600_v7   ;;  %1902 = vperm.xlu1 %5987, %v6685_v26   ;;  %6135 = vrcp.f32 %v531_v33  ;;  %v534_v16 = vadd.f32 1.0, %v526_v6  ;;  %v448_v6 = vpop.f32.mrf.mxu0  ;;  %v645_v61 = vmul.f32 1.442695, %v636_v0  ;;  %v630_v31 = vsub.f32 0.0, %v518_v43 }
  0xed   : > { %v6936_v49 = vpop.permute.xlu1 %1472  ;;  %v525_v19 = vmul.f32 0.3275911, %v517_v20  ;;  %v6946_v33 = vadd.f32 %v6877_v36, %v466_v27  ;;  %v6954_v44 = vadd.f32 %v6877_v36, %v469_v48  ;;  %v6963_v27 = vand.u32 2147483647, %v6951_v29 }
  0xee   : > { %11093 = vst [vmem:[#allocation40_spill] sm:$0xff] %v6936_v49  ;;  %6137 = vrcp.f32 %v534_v16  ;;  %v635_v16 = vmul.f32 %v627_v2, %v515_v8  ;;  %v468_v48 = vmul.f32 %v6870_v23, %v448_v6  ;;  %v629_v49 = vsub.f32 0.0, %v517_v20 }
  0xef   : > { %v6943_v47 = vpop.permute.xlu0 %1614  ;;  %v533_v14 = vadd.f32 1.0, %v525_v19  ;;  %v6960_v19 = vmul.f32 0.70710677, %v6946_v33  ;;  %v528_v0 = vmul.f32 0.3275911, %v6963_v27  ;;  %v10957_v12 = vmov 16  }
  0xf0   : > { %11094 = vst [vmem:[#allocation41_spill] sm:$0xff] %v6943_v47  ;;  %2174 = vperm.xlu0 %5994, %v6634_v13   ;;  %5988 = vset.pattern.permute.xlu1 %v11095_v10  ;;  %v6966_v10 = vmul.f32 0.70710677, %v6954_v44  ;;  %v643_v6 = vmul.f32 1.442695, %v635_v16  ;;  %v6986_v30 = vadd.f32 %v6877_v36, %v468_v48  ;;  %v637_v24 = vmul.f32 %v629_v49, %v517_v20 }
  0xf1   : > { %1947 = vperm.xlu1 %5988, %v6584_v4   ;;  %v6957_v50 = vpop.permute.xlu1 %1480  ;;  %6139 = vrcp.f32 %v533_v14  ;;  %v536_v22 = vadd.f32 1.0, %v528_v0  ;;  %v7002_v49 = vmul.f32 0.5, %v6895_v34  ;;  %v10959_v48 = vmov 1.0  }
  0xf2   : > { %11096 = vst [vmem:[#allocation42_spill] sm:$0xff] %v6957_v50  ;;  %v6972_v50 = vand.u32 2147483647, %v6960_v19  ;;  %6141 = vpow2.f32 %v645_v61  ;;  %v6981_v2 = vand.u32 2147483647, %v6966_v10  ;;  %v7013_v0 = vsel %vm500_vm3, -1.0, %v10959_v48 }
  0xf3   : > { %v6969_v47 = vpop.permute.xlu0 %1622  ;;  %6143 = vrcp.f32 %v536_v22  ;;  %v7008_v28 = vmul.f32 0.70710677, %v6986_v30  ;;  %v647_v34 = vmul.f32 1.442695, %v637_v24  ;;  %v7063_v51 = vsel %vm502_vm5, -1.0, %v11105_v62 }
  0xf4   : > { %11097 = vst [vmem:[#allocation43_spill] sm:$0xff] %v6969_v47  ;;  %2182 = vperm.xlu0 %5994, %v6648_v17   ;;  %v527_v14 = vmul.f32 0.3275911, %v6972_v50  ;;  %v638_v47 = vmul.f32 %v630_v31, %v518_v43  ;;  %v530_v61 = vmul.f32 0.3275911, %v6981_v2  ;;  %v631_v48 = vsub.f32 0.0, %v6972_v50 }
  0xf5   : > { %1955 = vperm.xlu1 %5988, %v6577_v1   ;;  %v6977_v8 = vpop.permute.xlu1 %1488  ;;  %vm501_vm6 = vcmp.lt.f32.partialorder %v6926_v59, 0.0  ;;  %vm504_vm7 = vcmp.lt.f32.partialorder %v6951_v29, 0.0  ;;  %vm503_vm8 = vcmp.lt.f32.partialorder %v6960_v19, 0.0  ;;  %vm506_vm9 = vcmp.lt.f32.partialorder %v6966_v10, 0.0 }
  0xf6   : > { %11098 = vst [vmem:[#allocation44_spill] sm:$0xff] %v6977_v8  ;;  %v535_v8 = vadd.f32 1.0, %v527_v14  ;;  %v538_v20 = vadd.f32 1.0, %v530_v61  ;;  %v649_v31 = vmul.f32 1.442695, %v638_v47  ;;  %v632_v47 = vsub.f32 0.0, %v6963_v27 }
  0xf7   : > { %v6983_v23 = vpop.eup %6133  ;;  %v6988_v5 = vpop.permute.xlu0 %1630  ;;  %vm505_vm10 = vcmp.lt.f32.partialorder %v7008_v28, 0.0 }
  0xf8   : > { %11099 = vst [vmem:[#allocation45_spill] sm:$0xff] %v6988_v5  ;;  %v556_v57 = vmul.f32 1.0614054, %v6983_v23  ;;  %5997 = vset.pattern.permute.xlu0 %v10957_v12  ;;  %6145 = vrcp.f32 %v535_v8 }
  0xf9   : > { %2227 = vperm.xlu0 %5997, %v6653_v18   ;;  %1959 = vperm.xlu1 %5988, %v6600_v7   ;;  %v6999_v36 = vpop.eup %6135  ;;  %6147 = vpow2.f32 %v643_v6  ;;  %v7025_v6 = vand.u32 2147483647, %v7008_v28 }
  0xfa   : > { %v564_v43 = vadd.f32 -1.4531521, %v556_v57  ;;  %v7004_v16 = vpop.permute.xlu1 %1533  ;;  %v555_v32 = vmul.f32 1.0614054, %v6999_v36  ;;  %6149 = vrcp.f32 %v538_v20 }
  0xfb   : > { %11100 = vst [vmem:[#allocation46_spill] sm:$0xff] %v7004_v16  ;;  %v7010_v22 = vpop.eup %6137  ;;  %6151 = vpow2.f32 %v649_v31  ;;  %v529_v16 = vmul.f32 0.3275911, %v7025_v6 }
  0xfc   : > { %v572_v57 = vmul.f32 %v6983_v23, %v564_v43  ;;  %v7016_v8 = vpop.permute.xlu0 %1675  ;;  %v563_v14 = vadd.f32 -1.4531521, %v555_v32  ;;  %v558_v61 = vmul.f32 1.0614054, %v7010_v22  ;;  %6153 = vpow2.f32 %v647_v34 }
  0xfd   : > { %11101 = vst [vmem:[#allocation47_spill] sm:$0xff] %v7016_v8  ;;  %2239 = vperm.xlu0 %5997, %v6675_v25   ;;  %1967 = vperm.xlu1 %5988, %v6634_v13   ;;  %v634_v8 = vsub.f32 0.0, %v6981_v2  ;;  %v537_v55 = vadd.f32 1.0, %v529_v16 }
  0xfe   : > { %v580_v12 = vadd.f32 1.4214138, %v572_v57  ;;  %v7027_v24 = vpop.permute.xlu1 %1541  ;;  %v7029_v43 = vpop.eup %6139  ;;  %v571_v32 = vmul.f32 %v6999_v36, %v563_v14  ;;  %v566_v20 = vadd.f32 -1.4531521, %v558_v61  ;;  %v640_v14 = vmul.f32 %v632_v47, %v6963_v27 }
  0xff   : > { %11102 = vst [vmem:[#allocation48_spill] sm:$0xff] %v7027_v24  ;;  %v557_v57 = vmul.f32 1.0614054, %v7029_v43  ;;  %v639_v61 = vmul.f32 %v631_v48, %v6972_v50  ;;  %v6142_v63 = vpop.eup %6141  ;;  %v7053_v27 = vmul.f32 0.5, %v6909_v3  ;;  %v642_v50 = vmul.f32 %v634_v8, %v6981_v2 }
 0x100   : > { %v588_v5 = vmul.f32 %v6983_v23, %v580_v12  ;;  %v7037_v54 = vpop.permute.xlu0 %1687  ;;  %v579_v58 = vadd.f32 1.4214138, %v571_v32  ;;  %v574_v24 = vmul.f32 %v7010_v22, %v566_v20  ;;  %v7049_v32 = vsel %vm499_vm4, -1.0, %v11105_v62 }
 0x101   : > { %11103 = vst [vmem:[#allocation49_spill] sm:$0xff] %v7037_v54  ;;  %2247 = vperm.xlu0 %5997, %v6685_v26   ;;  %1975 = vperm.xlu1 %5988, %v6648_v17   ;;  %v565_v12 = vadd.f32 -1.4531521, %v557_v57  ;;  %6155 = vrcp.f32 %v537_v55  ;;  %v653_v3 = vmul.f32 1.442695, %v640_v14  ;;  %v10961_v57 = vmov 17  }
 0x102   : > { %v596_v31 = vadd.f32 -0.28449672, %v588_v5  ;;  %v7044_v11 = vpop.permute.xlu1 %1545  ;;  %v587_v34 = vmul.f32 %v6999_v36, %v579_v58  ;;  %v582_v47 = vadd.f32 1.4214138, %v574_v24  ;;  %v11107_v24 = vmov 13  }
 0x103   : > { %11104 = vst [vmem:[#allocation50_spill] sm:$0xff] %v7044_v11  ;;  %v573_v20 = vmul.f32 %v7029_v43, %v565_v12  ;;  %v651_v8 = vmul.f32 1.442695, %v639_v61  ;;  %6157 = vpow2.f32 %v653_v3 }
 0x104   : > { %v604_v5 = vmul.f32 %v6983_v23, %v596_v31  ;;  %v7058_v16 = vpop.permute.xlu0 %1695  ;;  %v595_v48 = vadd.f32 -0.28449672, %v587_v34  ;;  %v590_v58 = vmul.f32 %v7010_v22, %v582_v47  ;;  %v7068_v31 = vpop.eup %6143 }
 0x105   : > { %11106 = vst [vmem:[#allocation51_spill] sm:$0xff] %v7058_v16  ;;  %5998 = vset.pattern.permute.xlu0 %v10961_v57  ;;  %5991 = vset.pattern.permute.xlu1 %v11107_v24  ;;  %v581_v55 = vadd.f32 1.4214138, %v573_v20  ;;  %v7074_v12 = vpop.eup %6145  ;;  %v560_v47 = vmul.f32 1.0614054, %v7068_v31  ;;  %6159 = vpow2.f32 %v651_v8 }
 0x106   : > { %v612_v2 = vadd.f32 0.2548296, %v604_v5  ;;  %2292 = vperm.xlu0 %5998, %v6584_v4   ;;  %2020 = vperm.xlu1 %5991, %v6653_v18   ;;  %v7072_v21 = vpop.permute.xlu1 %1553  ;;  %v603_v14 = vmul.f32 %v6999_v36, %v595_v48  ;;  %v598_v34 = vadd.f32 -0.28449672, %v590_v58  ;;  %v559_v61 = vmul.f32 1.0614054, %v7074_v12  ;;  %v6148_v24 = vpop.eup %6147 }
 0x107   : > { %11108 = vst [vmem:[#allocation52_spill] sm:$0xff] %v7072_v21  ;;  %v589_v5 = vmul.f32 %v7029_v43, %v581_v55  ;;  %v657_v20 = vmul.f32 1.442695, %v642_v50  ;;  %v568_v21 = vadd.f32 -1.4531521, %v560_v47  ;;  %v7085_v48 = vpop.eup %6149 }
 0x108   : > { %v620_v57 = vmul.f32 %v6983_v23, %v612_v2  ;;  %v611_v16 = vadd.f32 0.2548296, %v603_v14  ;;  %v606_v54 = vmul.f32 %v7010_v22, %v598_v34  ;;  %v567_v52 = vadd.f32 -1.4531521, %v559_v61  ;;  %v6152_v14 = vpop.eup %6151 }
 0x109   : > { %v7083_v11 = vpop.permute.xlu0 %1740  ;;  %v597_v53 = vadd.f32 -0.28449672, %v589_v5  ;;  %v576_v55 = vmul.f32 %v7068_v31, %v568_v21  ;;  %v562_v3 = vmul.f32 1.0614054, %v7085_v48  ;;  %6161 = vpow2.f32 %v657_v20 }
 0x10a   : > { %v660_v58 = vmul.f32 %v6142_v63, %v620_v57  ;;  %2304 = vperm.xlu0 %5998, %v6600_v7   ;;  %2024 = vperm.xlu1 %5991, %v6577_v1   ;;  %v7089_v23 = vpop.permute.xlu1 %1561  ;;  %v619_v50 = vmul.f32 %v6999_v36, %v611_v16  ;;  %v614_v2 = vadd.f32 0.2548296, %v606_v54  ;;  %v575_v57 = vmul.f32 %v7074_v12, %v567_v52  ;;  %v6154_v36 = vpop.eup %6153 }
 0x10b   : > { %11109 = vst [vmem:[#allocation53_spill] sm:$0xff] %v7089_v23  ;;  %v605_v63 = vmul.f32 %v7029_v43, %v597_v53  ;;  %v584_v1 = vadd.f32 1.4214138, %v576_v55  ;;  %v570_v47 = vadd.f32 -1.4531521, %v562_v3  ;;  %v509_v16 = vsel %vm501_vm6, -1.0, %v11105_v62 }
 0x10c   : > { %v668_v34 = vsub.f32 1.0, %v660_v58  ;;  %v659_v8 = vmul.f32 %v6148_v24, %v619_v50  ;;  %v622_v7 = vmul.f32 %v7010_v22, %v614_v2  ;;  %v583_v61 = vadd.f32 1.4214138, %v575_v57 }
 0x10d   : > { %v7097_v5 = vpop.permute.xlu0 %1752  ;;  %v613_v21 = vadd.f32 0.2548296, %v605_v63  ;;  %v592_v22 = vmul.f32 %v7068_v31, %v584_v1  ;;  %v578_v24 = vmul.f32 %v7085_v48, %v570_v47  ;;  %v633_v50 = vsub.f32 0.0, %v7025_v6 }
 0x10e   : > { %v676_v54 = vmul.f32 %v668_v34, %v7013_v0  ;;  %2312 = vperm.xlu0 %5998, %v6634_v13   ;;  %2032 = vperm.xlu1 %5991, %v6675_v25   ;;  %v667_v52 = vsub.f32 1.0, %v659_v8  ;;  %v662_v53 = vmul.f32 %v6152_v14, %v622_v7  ;;  %v591_v59 = vmul.f32 %v7074_v12, %v583_v61  ;;  %v7112_v2 = vpop.eup %6155 }
 0x10f   : > { %v7107_v20 = vpop.permute.xlu1 %1606  ;;  %v621_v0 = vmul.f32 %v7029_v43, %v613_v21  ;;  %v600_v3 = vadd.f32 -0.28449672, %v592_v22  ;;  %v586_v14 = vadd.f32 1.4214138, %v578_v24  ;;  %v561_v7 = vmul.f32 1.0614054, %v7112_v2 }
 0x110   : > { %v684_v58 = vadd.f32 1.0, %v676_v54  ;;  %v675_v13 = vmul.f32 %v667_v52, %v7049_v32  ;;  %v670_v55 = vsub.f32 1.0, %v662_v53  ;;  %v599_v8 = vadd.f32 -0.28449672, %v591_v59  ;;  %v6158_v24 = vpop.eup %6157 }
 0x111   : > { %v7115_v34 = vpop.permute.xlu0 %1760  ;;  %v661_v57 = vmul.f32 %v6154_v36, %v621_v0  ;;  %v608_v32 = vmul.f32 %v7068_v31, %v600_v3  ;;  %v594_v47 = vmul.f32 %v7085_v48, %v586_v14  ;;  %v569_v21 = vadd.f32 -1.4531521, %v561_v7 }
 0x112   : > { %v692_v63 = vmul.f32 %v684_v58, %v6994_v15  ;;  %2320 = vperm.xlu0 %5998, %v6648_v17   ;;  %2040 = vperm.xlu1 %5991, %v6685_v26   ;;  %v683_v43 = vadd.f32 1.0, %v675_v13  ;;  %v678_v1 = vmul.f32 %v670_v55, %v7063_v51  ;;  %v607_v36 = vmul.f32 %v7074_v12, %v599_v8 }
 0x113   : > { %v7124_v54 = vpop.permute.xlu1 %1610  ;;  %v669_v15 = vsub.f32 1.0, %v661_v57  ;;  %v641_v61 = vmul.f32 %v633_v50, %v7025_v6  ;;  %v616_v53 = vadd.f32 0.2548296, %v608_v32  ;;  %v602_v22 = vadd.f32 -0.28449672, %v594_v47  ;;  %v6160_v6 = vpop.eup %6159 }
 0x114   : > { %700 = vst.msk [vmem:[#allocation2 + $0x20] sm:$0xff] %vm304_vm1, %v692_v63  ;;  %v691_v17 = vmul.f32 %v683_v43, %v7002_v49  ;;  %v686_v52 = vadd.f32 1.0, %v678_v1  ;;  %v485_v58 = vmul.f32 0.5, %v6919_v60  ;;  %v615_v59 = vadd.f32 0.2548296, %v607_v36 }
 0x115   : > { %v7130_v51 = vpop.permute.xlu0 %1768  ;;  %v677_v0 = vmul.f32 %v669_v15, %v509_v16  ;;  %v577_v13 = vmul.f32 %v7112_v2, %v569_v21  ;;  %v10967_v55 = vmov 18   ;;  %v11111_v3 = vmov 14   ;;  %v7160_v15 = vld [vmem:[%s10915_s1 + $0x10] sm:$0xff]  ;;  %v5844_v21 = vpop.f32.mrf.mxu1 }
 0x116   : > { %11110 = vst [vmem:[#allocation54_spill] sm:$0xff] %v7130_v51  ;;  %6001 = vset.pattern.permute.xlu0 %v10967_v55  ;;  %5992 = vset.pattern.permute.xlu1 %v11111_v3  ;;  %699 = vst.msk [vmem:[#allocation2 + $0x18] sm:$0xff] %vm304_vm1, %v691_v17  ;;  %v694_v49 = vmul.f32 %v686_v52, %v7053_v27  ;;  %v624_v50 = vmul.f32 %v7068_v31, %v616_v53  ;;  %v6162_v8 = vpop.eup %6161  ;;  %v655_v31 = vmul.f32 1.442695, %v641_v61 }
 0x117   : > { %v610_v60 = vmul.f32 %v7085_v48, %v602_v22  ;;  %2365 = vperm.xlu0 %6001, %v6653_v18   ;;  %2085 = vperm.xlu1 %5992, %v6584_v4   ;;  %v7143_v16 = vpop.permute.xlu1 %1618  ;;  %v685_v14 = vadd.f32 1.0, %v677_v0  ;;  %v623_v63 = vmul.f32 %v7074_v12, %v615_v59  ;;  %v585_v57 = vadd.f32 1.4214138, %v577_v13  ;;  %v7182_v59 = vld [vmem:[%s10915_s1 + $0x18] sm:$0xff] }
 0x118   : > { %702 = vst.msk [vmem:[#allocation2 + $0x30] sm:$0xff] %vm304_vm1, %v694_v49  ;;  %v664_v27 = vmul.f32 %v6158_v24, %v624_v50  ;;  %v512_v18 = vsel %vm504_vm7, -1.0, %v11105_v62  ;;  %v511_v12 = vsel %vm503_vm8, -1.0, %v11105_v62  ;;  %6163 = vpow2.f32 %v655_v31 }
 0x119   : > { %v618_v7 = vadd.f32 0.2548296, %v610_v60  ;;  %v693_v43 = vmul.f32 %v685_v14, %v485_v58  ;;  %v663_v4 = vmul.f32 %v6160_v6, %v623_v63  ;;  %v593_v1 = vmul.f32 %v7112_v2, %v585_v57 }
 0x11a   : > { %v7152_v32 = vpop.permute.xlu0 %1813  ;;  %v672_v19 = vsub.f32 1.0, %v664_v27  ;;  %v488_v52 = vmul.f32 0.5, %v6940_v9  ;;  %v487_v53 = vmul.f32 0.5, %v6946_v33  ;;  %v514_v0 = vsel %vm506_vm9, -1.0, %v11105_v62  ;;  %v7190_v33 = vld [vmem:[%s10917_s3 + $0x1] ss:$0 sm:$0xff] }
 0x11b   : > { %v626_v47 = vmul.f32 %v7085_v48, %v618_v7  ;;  %2377 = vperm.xlu0 %6001, %v6675_v25   ;;  %2093 = vperm.xlu1 %5992, %v7160_v15   ;;  %v7163_v29 = vpop.permute.xlu1 %1626  ;;  %701 = vst.msk [vmem:[#allocation2 + $0x28] sm:$0xff] %vm304_vm1, %v693_v43  ;;  %v671_v36 = vsub.f32 1.0, %v663_v4  ;;  %v7170_v48 = vld [vmem:[%s10917_s3] ss:$0 sm:$0xff]  ;;  %v601_v24 = vadd.f32 -0.28449672, %v593_v1 }
 0x11c   : > { %v680_v25 = vmul.f32 %v672_v19, %v512_v18  ;;  %v857_v17 = vmul.f32 %v5844_v21, %v7170_v48  ;;  %v10965_v57 = vmov 19   ;;  %v7210_v27 = vld [vmem:[%s10915_s1] sm:$0xff]  ;;  %v490_v31 = vmul.f32 0.5, %v6954_v44  ;;  %v7222_v1 = vld [vmem:[%s10915_s1 + $0x38] sm:$0xff] }
 0x11d   : > { %v666_v61 = vmul.f32 %v6162_v8, %v626_v47  ;;  %v679_v22 = vmul.f32 %v671_v36, %v511_v12  ;;  %v609_v14 = vmul.f32 %v7112_v2, %v601_v24  ;;  %v7202_v8 = vld [vmem:[%s10915_s1 + $0x28] sm:$0xff]  ;;  %v513_v24 = vsel %vm505_vm10, -1.0, %v11105_v62 }
 0x11e   : > { %v7175_v58 = vpop.permute.xlu0 %1825  ;;  %v688_v10 = vadd.f32 1.0, %v680_v25  ;;  %v7193_v49 = vadd.f32 %v7190_v33, %v857_v17  ;;  %v11114_v25 = vmov 15  }
 0x11f   : > { %2385 = vperm.xlu0 %6001, %v6685_v26   ;;  %2097 = vperm.xlu1 %5992, %v7182_v59   ;;  %v687_v13 = vadd.f32 1.0, %v679_v22  ;;  %v674_v9 = vsub.f32 1.0, %v666_v61  ;;  %v617_v18 = vadd.f32 0.2548296, %v609_v14  ;;  %v10963_v14 = vmov 20  }
 0x120   : > { %v7185_v6 = vpop.permute.xlu1 %1671  ;;  %v696_v26 = vmul.f32 %v688_v10, %v488_v52  ;;  %v7217_v4 = vmul.f32 0.70710677, %v7193_v49 }
 0x121   : > { %v695_v50 = vmul.f32 %v687_v13, %v487_v53  ;;  %v682_v60 = vmul.f32 %v674_v9, %v514_v0  ;;  %v625_v36 = vmul.f32 %v7112_v2, %v617_v18  ;;  %v7243_v53 = vld [vmem:[%s10915_s1 + $0x8] sm:$0xff]  ;;  %v812_v0 = vpop.f32.mrf.mxu1  ;;  %v489_v9 = vmul.f32 0.5, %v6986_v30 }
 0x122   : > { %v7196_v63 = vpop.permute.xlu0 %1833  ;;  %704 = vst.msk [vmem:[#allocation2 + $0x40] sm:$0xff] %vm304_vm1, %v696_v26  ;;  %v910_v21 = vand.u32 2147483647, %v7217_v4  ;;  %vm894_vm11 = vcmp.lt.f32.partialorder %v7217_v4, 0.0 }
 0x123   : > { %11112 = vst [vmem:[#allocation55_spill] sm:$0xff] %v7196_v63  ;;  %6002 = vset.pattern.permute.xlu0 %v10965_v57  ;;  %2105 = vperm.xlu1 %5992, %v7202_v8   ;;  %703 = vst.msk [vmem:[#allocation2 + $0x38] sm:$0xff] %vm304_vm1, %v695_v50  ;;  %v690_v43 = vadd.f32 1.0, %v682_v60  ;;  %v856_v60 = vmul.f32 %v7170_v48, %v812_v0  ;;  %v11122_v0 = vmov 16  }
 0x124   : > { %2430 = vperm.xlu0 %6002, %v7210_v27   ;;  %v7213_v7 = vpop.permute.xlu1 %1679  ;;  %v918_v2 = vmul.f32 0.3275911, %v910_v21 }
 0x125   : > { %v698_v47 = vmul.f32 %v690_v43, %v490_v31  ;;  %v6164_v44 = vpop.eup %6163  ;;  %v7261_v43 = vld [vmem:[%s10915_s1 + $0x20] sm:$0xff] }
 0x126   : > { %v665_v52 = vmul.f32 %v6164_v44, %v625_v36  ;;  %v926_v28 = vadd.f32 1.0, %v918_v2  ;;  %v7276_v36 = vld [vmem:[%s10915_s1 + $0x30] sm:$0xff] }
 0x127   : > { %2113 = vperm.xlu1 %5992, %v7222_v1   ;;  %v7225_v19 = vpop.permute.xlu0 %1878  ;;  %706 = vst.msk [vmem:[#allocation2 + $0x50] sm:$0xff] %vm304_vm1, %v698_v47  ;;  %v7268_v47 = vadd.f32 %v7190_v33, %v856_v60 }
 0x128   : > { %11113 = vst [vmem:[#allocation56_spill] sm:$0xff] %v7225_v19  ;;  %2442 = vperm.xlu0 %6002, %v7182_v59   ;;  %v7228_v12 = vpop.permute.xlu1 %1683  ;;  %v673_v13 = vsub.f32 1.0, %v665_v52  ;;  %6165 = vrcp.f32 %v926_v28  ;;  %v1022_v28 = vsub.f32 0.0, %v910_v21  ;;  %v11244_v19 = vld [vmem:[#allocation46_spill] sm:$0xff] }
 0x129   : > { %v7283_v2 = vmul.f32 0.70710677, %v7268_v47 }
 0x12a   : > { %v681_v26 = vmul.f32 %v673_v13, %v513_v24 }
 0x12b   : > { %5995 = vset.pattern.permute.xlu1 %v11114_v25  ;;  %v7234_v61 = vpop.permute.xlu0 %1890  ;;  %vm893_vm12 = vcmp.lt.f32.partialorder %v7283_v2, 0.0 }
 0x12c   : > { %11115 = vst [vmem:[#allocation57_spill] sm:$0xff] %v7234_v61  ;;  %2450 = vperm.xlu0 %6002, %v7202_v8   ;;  %v7237_v17 = vpop.permute.xlu1 %1691  ;;  %2158 = vperm.xlu1 %5995, %v7243_v53   ;;  %v689_v31 = vadd.f32 1.0, %v681_v26  ;;  %v11237_v61 = vld [vmem:[#allocation32_spill] sm:$0xff] }
 0x12e   : > { %v697_v30 = vmul.f32 %v689_v31, %v489_v9  ;;  %v909_v9 = vand.u32 2147483647, %v7283_v2  ;;  %v10969_v31 = vmov 21  }
 0x12f   : > { %v7246_v22 = vpop.permute.xlu0 %1898 }
 0x130   : > { %11116 = vst [vmem:[#allocation58_spill] sm:$0xff] %v7246_v22  ;;  %2458 = vperm.xlu0 %6002, %v7222_v1   ;;  %v7250_v10 = vpop.permute.xlu1 %1699  ;;  %2162 = vperm.xlu1 %5995, %v7160_v15   ;;  %705 = vst.msk [vmem:[#allocation2 + $0x48] sm:$0xff] %vm304_vm1, %v697_v30  ;;  %v1030_v30 = vmul.f32 %v1022_v28, %v910_v21  ;;  %v917_v57 = vmul.f32 0.3275911, %v909_v9  ;;  %v1021_v23 = vsub.f32 0.0, %v909_v9 }
 0x131   : > { %11117 = vst [vmem:[#allocation59_spill] sm:$0xff] %v7250_v10 }
 0x132   : > { %v1039_v3 = vmul.f32 1.442695, %v1030_v30 }
 0x133   : > { %v7254_v50 = vpop.permute.xlu0 %1906 }
 0x134   : > { %11118 = vst [vmem:[#allocation60_spill] sm:$0xff] %v7254_v50  ;;  %6005 = vset.pattern.permute.xlu0 %v10963_v14  ;;  %2170 = vperm.xlu1 %5995, %v7261_v43   ;;  %v925_v50 = vadd.f32 1.0, %v917_v57  ;;  %6167 = vpow2.f32 %v1039_v3 }
 0x135   : > { %2503 = vperm.xlu0 %6005, %v7243_v53   ;;  %v7265_v18 = vpop.permute.xlu1 %1744  ;;  %v6166_v14 = vpop.eup %6165 }
 0x136   : > { %11119 = vst [vmem:[#allocation61_spill] sm:$0xff] %v7265_v18  ;;  %6169 = vrcp.f32 %v925_v50  ;;  %v11246_v18 = vld [vmem:[#allocation38_spill] sm:$0xff] }
 0x138   : > { %v7270_v44 = vpop.permute.xlu0 %1951  ;;  %2178 = vperm.xlu1 %5995, %v7276_v36  }
 0x139   : > { %11120 = vst [vmem:[#allocation62_spill] sm:$0xff] %v7270_v44  ;;  %v7279_v52 = vpop.permute.xlu1 %1748  ;;  %2515 = vperm.xlu0 %6005, %v7261_v43  }
 0x13c   : > { %v7285_v24 = vpop.permute.xlu0 %1963  ;;  %5996 = vset.pattern.permute.xlu1 %v11122_v0  ;;  %v950_v0 = vmul.f32 1.0614054, %v6166_v14 }
 0x13d   : > { %11121 = vst [vmem:[#allocation63_spill] sm:$0xff] %v7285_v24  ;;  %v7288_v13 = vpop.permute.xlu1 %1756  ;;  %2523 = vperm.xlu0 %6005, %v7276_v36   ;;  %2223 = vperm.xlu1 %5996, %v7210_v27  }
 0x13e   : > { %11123 = vst [vmem:[#allocation64_spill] sm:$0xff] %v7288_v13  ;;  %v958_v21 = vadd.f32 -1.4531521, %v950_v0  ;;  %v5847_v0 = vpop.f32.mrf.mxu1 }
 0x140   : > { %v7293_v26 = vpop.permute.xlu0 %1971  ;;  %v822_v24 = vpop.f32.mrf.mxu1 }
 0x141   : > { %11124 = vst [vmem:[#allocation65_spill] sm:$0xff] %v7293_v26  ;;  %v7295_v60 = vpop.permute.xlu1 %1764  ;;  %6006 = vset.pattern.permute.xlu0 %v10969_v31  ;;  %2231 = vperm.xlu1 %5996, %v7160_v15   ;;  %v966_v31 = vmul.f32 %v6166_v14, %v958_v21  ;;  %v1029_v21 = vmul.f32 %v1021_v23, %v909_v9  ;;  %v11134_v26 = vmov 17   ;;  %v6168_v9 = vpop.eup %6167 }
 0x142   : > { %11125 = vst [vmem:[#allocation66_spill] sm:$0xff] %v7295_v60  ;;  %2568 = vperm.xlu0 %6006, %v7210_v27   ;;  %v858_v23 = vmul.f32 %v7170_v48, %v822_v24  ;;  %v902_v24 = vsel %vm894_vm11, -1.0, %v11105_v62 }
 0x143   : > { %v974_v10 = vadd.f32 1.4214138, %v966_v31  ;;  %v10971_v31 = vmov 22  }
 0x145   : > { %v7300_v55 = vpop.permute.xlu0 %2016  ;;  %2235 = vperm.xlu1 %5996, %v7182_v59  }
 0x146   : > { %11126 = vst [vmem:[#allocation67_spill] sm:$0xff] %v7300_v55  ;;  %v7302_v25 = vpop.permute.xlu1 %1809  ;;  %2580 = vperm.xlu0 %6006, %v7182_v59   ;;  %v982_v55 = vmul.f32 %v6166_v14, %v974_v10  ;;  %v859_v10 = vmul.f32 %v5847_v0, %v7170_v48  ;;  %v7338_v0 = vadd.f32 %v7190_v33, %v858_v23 }
 0x147   : > { %11127 = vst [vmem:[#allocation68_spill] sm:$0xff] %v7302_v25  ;;  %v6170_v25 = vpop.eup %6169 }
 0x148   : > { %v990_v50 = vadd.f32 -0.28449672, %v982_v55 }
 0x149   : > { %v7306_v51 = vpop.permute.xlu0 %2028  ;;  %2243 = vperm.xlu1 %5996, %v7202_v8  }
 0x14a   : > { %11128 = vst [vmem:[#allocation69_spill] sm:$0xff] %v7306_v51  ;;  %v7308_v28 = vpop.permute.xlu1 %1817  ;;  %2588 = vperm.xlu0 %6006, %v7202_v8  }
 0x14b   : > { %11129 = vst [vmem:[#allocation70_spill] sm:$0xff] %v7308_v28  ;;  %v10973_v28 = vmov 23  }
 0x14d   : > { %v7312_v30 = vpop.permute.xlu0 %2036  ;;  %2251 = vperm.xlu1 %5996, %v7222_v1  }
 0x14e   : > { %11130 = vst [vmem:[#allocation71_spill] sm:$0xff] %v7312_v30  ;;  %v7314_v57 = vpop.permute.xlu1 %1821  ;;  %2596 = vperm.xlu0 %6006, %v7222_v1   ;;  %v998_v30 = vmul.f32 %v6166_v14, %v990_v50  ;;  %v7333_v50 = vadd.f32 %v7190_v33, %v859_v10  ;;  %v878_v10 = vmul.f32 0.5, %v7193_v49 }
 0x14f   : > { %11131 = vst [vmem:[#allocation72_spill] sm:$0xff] %v7314_v57 }
 0x150   : > { %v1006_v44 = vadd.f32 0.2548296, %v998_v30  ;;  %v949_v30 = vmul.f32 1.0614054, %v6170_v25  ;;  %v7344_v48 = vmul.f32 0.70710677, %v7333_v50 }
 0x151   : > { %v7318_v3 = vpop.permute.xlu0 %2044  ;;  %5999 = vset.pattern.permute.xlu1 %v11134_v26  ;;  %v1037_v26 = vmul.f32 1.442695, %v1029_v21 }
 0x152   : > { %11132 = vst [vmem:[#allocation73_spill] sm:$0xff] %v7318_v3  ;;  %v7320_v51 = vpop.permute.xlu1 %1829  ;;  %6009 = vset.pattern.permute.xlu0 %v10971_v31  ;;  %2296 = vperm.xlu1 %5999, %v7243_v53   ;;  %v1014_v31 = vmul.f32 %v6166_v14, %v1006_v44  ;;  %v957_v21 = vadd.f32 -1.4531521, %v949_v30  ;;  %v7350_v14 = vmul.f32 0.70710677, %v7338_v0  ;;  %vm896_vm13 = vcmp.lt.f32.partialorder %v7344_v48, 0.0 }
 0x153   : > { %11133 = vst [vmem:[#allocation74_spill] sm:$0xff] %v7320_v51  ;;  %2641 = vperm.xlu0 %6009, %v7243_v53   ;;  %6171 = vpow2.f32 %v1037_v26  ;;  %v912_v44 = vand.u32 2147483647, %v7344_v48 }
 0x154   : > { %vm895_vm14 = vcmp.lt.f32.partialorder %v7350_v14, 0.0 }
 0x155   : > { %v920_v30 = vmul.f32 0.3275911, %v912_v44 }
 0x156   : > { %v7327_v3 = vpop.permute.xlu1 %1837  ;;  %v7329_v55 = vpop.permute.xlu0 %2089  ;;  %2300 = vperm.xlu1 %5999, %v7160_v15  }
 0x157   : > { %11135 = vst [vmem:[#allocation75_spill] sm:$0xff] %v7327_v3  ;;  %11136 = vst [vmem:[#allocation76_spill] sm:$0xff] %v7329_v55  ;;  %2653 = vperm.xlu0 %6009, %v7261_v43   ;;  %v1054_v3 = vmul.f32 %v6168_v9, %v1014_v31  ;;  %v965_v31 = vmul.f32 %v6170_v25, %v957_v21 }
 0x159   : > { %v1062_v33 = vsub.f32 1.0, %v1054_v3  ;;  %v973_v26 = vadd.f32 1.4214138, %v965_v31  ;;  %v928_v3 = vadd.f32 1.0, %v920_v30 }
 0x15a   : > { %v7341_v55 = vpop.permute.xlu0 %2101  ;;  %2308 = vperm.xlu1 %5999, %v7261_v43  }
 0x15b   : > { %11137 = vst [vmem:[#allocation77_spill] sm:$0xff] %v7341_v55  ;;  %v7347_v4 = vpop.permute.xlu1 %1882  ;;  %2661 = vperm.xlu0 %6009, %v7276_v36   ;;  %v1070_v23 = vmul.f32 %v1062_v33, %v902_v24  ;;  %v981_v22 = vmul.f32 %v6170_v25, %v973_v26  ;;  %6173 = vrcp.f32 %v928_v3 }
 0x15c   : > { %11138 = vst [vmem:[#allocation78_spill] sm:$0xff] %v7347_v4  ;;  %v911_v4 = vand.u32 2147483647, %v7350_v14  ;;  %v712_v14 = vld [vmem:[%s6614_s24 + $0x68] sm:$0xff] }
 0x15d   : > { %v1078_v60 = vadd.f32 1.0, %v1070_v23  ;;  %v989_v49 = vadd.f32 -0.28449672, %v981_v22  ;;  %v11143_v23 = vmov 18  }
 0x15e   : > { %v7356_v9 = vpop.permute.xlu0 %2109  ;;  %2316 = vperm.xlu1 %5999, %v7276_v36   ;;  %v919_v21 = vmul.f32 0.3275911, %v911_v4 }
 0x15f   : > { %11139 = vst [vmem:[#allocation79_spill] sm:$0xff] %v7356_v9  ;;  %v7358_v55 = vpop.permute.xlu1 %1886  ;;  %6010 = vset.pattern.permute.xlu0 %v10973_v28  ;;  %v1086_v51 = vmul.f32 %v1078_v60, %v878_v10  ;;  %v997_v30 = vmul.f32 %v6170_v25, %v989_v49  ;;  %v1024_v60 = vsub.f32 0.0, %v912_v44  ;;  %v1023_v49 = vsub.f32 0.0, %v911_v4  ;;  %v11219_v9 = vld [vmem:[#allocation19_spill] sm:$0xff] }
 0x160   : > { %11140 = vst [vmem:[#allocation80_spill] sm:$0xff] %v7358_v55  ;;  %2706 = vperm.xlu0 %6010, %v7210_v27   ;;  %v927_v31 = vadd.f32 1.0, %v919_v21  ;;  %v6172_v3 = vpop.eup %6171  ;;  %v7622_v55 = vld [vmem:[#allocation2 + $0x2d] sm:$0xff] }
 0x161   : > { %1094 = vst.msk [vmem:[#allocation2 + $0x60] sm:$0xff] %vm304_vm1, %v1086_v51  ;;  %v1005_v10 = vadd.f32 0.2548296, %v997_v30  ;;  %v1032_v51 = vmul.f32 %v1024_v60, %v912_v44 }
 0x162   : > { %6000 = vset.pattern.permute.xlu1 %v11143_v23  ;;  %6175 = vrcp.f32 %v927_v31  ;;  %v901_v23 = vsel %vm893_vm12, -1.0, %v11105_v62 }
 0x163   : > { %v7364_v24 = vpop.permute.xlu1 %1894  ;;  %v7366_v33 = vpop.permute.xlu0 %2154  ;;  %2361 = vperm.xlu1 %6000, %v7210_v27   ;;  %v1013_v21 = vmul.f32 %v6170_v25, %v1005_v10  ;;  %v1043_v2 = vmul.f32 1.442695, %v1032_v51  ;;  %v1031_v25 = vmul.f32 %v1023_v49, %v911_v4 }
 0x164   : > { %11141 = vst [vmem:[#allocation81_spill] sm:$0xff] %v7364_v24  ;;  %11142 = vst [vmem:[#allocation82_spill] sm:$0xff] %v7366_v33  ;;  %2718 = vperm.xlu0 %6010, %v7182_v59   ;;  %v11218_v24 = vld [vmem:[#allocation12_spill] sm:$0xff] }
 0x165   : > { %v1053_v28 = vmul.f32 %v6172_v3, %v1013_v21  ;;  %6177 = vpow2.f32 %v1043_v2  ;;  %v1041_v51 = vmul.f32 1.442695, %v1031_v25 }
 0x167   : > { %v7372_v26 = vpop.permute.xlu1 %1902  ;;  %v7374_v22 = vpop.permute.xlu0 %2166  ;;  %2369 = vperm.xlu1 %6000, %v7160_v15   ;;  %v1061_v33 = vsub.f32 1.0, %v1053_v28  ;;  %v10975_v28 = vmov 24   ;;  %6179 = vpow2.f32 %v1041_v51 }
 0x168   : > { %11144 = vst [vmem:[#allocation83_spill] sm:$0xff] %v7372_v26  ;;  %11145 = vst [vmem:[#allocation84_spill] sm:$0xff] %v7374_v22  ;;  %2726 = vperm.xlu0 %6010, %v7202_v8   ;;  %v6174_v10 = vpop.eup %6173  ;;  %v877_v22 = vmul.f32 0.5, %v7268_v47 }
 0x169   : > { %v1069_v26 = vmul.f32 %v1061_v33, %v901_v23  ;;  %v952_v3 = vmul.f32 1.0614054, %v6174_v10 }
 0x16b   : > { %v7379_v31 = vpop.permute.xlu0 %2174  ;;  %2373 = vperm.xlu1 %6000, %v7182_v59   ;;  %v1077_v21 = vadd.f32 1.0, %v1069_v26 }
 0x16c   : > { %11146 = vst [vmem:[#allocation85_spill] sm:$0xff] %v7379_v31  ;;  %v7382_v30 = vpop.permute.xlu1 %1947  ;;  %2734 = vperm.xlu0 %6010, %v7222_v1   ;;  %v960_v31 = vadd.f32 -1.4531521, %v952_v3 }
 0x16d   : > { %11147 = vst [vmem:[#allocation86_spill] sm:$0xff] %v7382_v30  ;;  %v1085_v4 = vmul.f32 %v1077_v21, %v877_v22  ;;  %v11154_v21 = vmov 19  }
 0x16e   : > { %v968_v49 = vmul.f32 %v6174_v10, %v960_v31 }
 0x16f   : > { %v7387_v44 = vpop.permute.xlu0 %2182  ;;  %2381 = vperm.xlu1 %6000, %v7202_v8   ;;  %v6176_v30 = vpop.eup %6175  ;;  %1093 = vst.msk [vmem:[#allocation2 + $0x58] sm:$0xff] %vm304_vm1, %v1085_v4 }
 0x170   : > { %11148 = vst [vmem:[#allocation87_spill] sm:$0xff] %v7387_v44  ;;  %v7389_v60 = vpop.permute.xlu1 %1955  ;;  %6013 = vset.pattern.permute.xlu0 %v10975_v28  ;;  %v951_v47 = vmul.f32 1.0614054, %v6176_v30  ;;  %v976_v44 = vadd.f32 1.4214138, %v968_v49 }
 0x171   : > { %11149 = vst [vmem:[#allocation88_spill] sm:$0xff] %v7389_v60  ;;  %2779 = vperm.xlu0 %6013, %v7243_v53  }
 0x172   : > { %v959_v26 = vadd.f32 -1.4531521, %v951_v47  ;;  %v984_v3 = vmul.f32 %v6174_v10, %v976_v44  ;;  %v10977_v44 = vmov 25  }
 0x173   : > { %2389 = vperm.xlu1 %6000, %v7222_v1  }
 0x174   : > { %v7394_v33 = vpop.permute.xlu1 %1959  ;;  %v7396_v23 = vpop.permute.xlu0 %2227  ;;  %v967_v2 = vmul.f32 %v6176_v30, %v959_v26  ;;  %v992_v31 = vadd.f32 -0.28449672, %v984_v3 }
 0x175   : > { %11150 = vst [vmem:[#allocation89_spill] sm:$0xff] %v7394_v33  ;;  %11151 = vst [vmem:[#allocation90_spill] sm:$0xff] %v7396_v23  ;;  %2791 = vperm.xlu0 %6013, %v7261_v43   ;;  %v1320_v33 = vld [vmem:[#allocation2 + $0x1f] sm:$0xff] }
 0x176   : > { %v975_v28 = vadd.f32 1.4214138, %v967_v2  ;;  %v1000_v49 = vmul.f32 %v6174_v10, %v992_v31 }
 0x177   : > { %6003 = vset.pattern.permute.xlu1 %v11154_v21 }
 0x178   : > { %v7401_v25 = vpop.permute.xlu1 %1967  ;;  %v7403_v22 = vpop.permute.xlu0 %2239  ;;  %2434 = vperm.xlu1 %6003, %v7243_v53   ;;  %v983_v4 = vmul.f32 %v6176_v30, %v975_v28  ;;  %v1008_v26 = vadd.f32 0.2548296, %v1000_v49 }
 0x179   : > { %11152 = vst [vmem:[#allocation91_spill] sm:$0xff] %v7401_v25  ;;  %11153 = vst [vmem:[#allocation92_spill] sm:$0xff] %v7403_v22  ;;  %2799 = vperm.xlu0 %6013, %v7276_v36   ;;  %v6178_v22 = vpop.eup %6177  ;;  %v1318_v25 = vld [vmem:[#allocation2 + $0xf] sm:$0xff] }
 0x17a   : > { %v991_v23 = vadd.f32 -0.28449672, %v983_v4  ;;  %v1016_v2 = vmul.f32 %v6174_v10, %v1008_v26  ;;  %v6180_v4 = vpop.eup %6179 }
 0x17c   : > { %v7408_v47 = vpop.permute.xlu1 %1975  ;;  %v7410_v51 = vpop.permute.xlu0 %2247  ;;  %2438 = vperm.xlu1 %6003, %v7160_v15   ;;  %v999_v3 = vmul.f32 %v6176_v30, %v991_v23  ;;  %v1056_v31 = vmul.f32 %v6178_v22, %v1016_v2  ;;  %v880_v23 = vmul.f32 0.5, %v7333_v50  ;;  %v711_v2 = vld [vmem:[%s6614_s24 + $0x60] sm:$0xff]  ;;  %v879_v50 = vmul.f32 0.5, %v7338_v0 }
 0x17d   : > { %11155 = vst [vmem:[#allocation93_spill] sm:$0xff] %v7408_v47  ;;  %11156 = vst [vmem:[#allocation94_spill] sm:$0xff] %v7410_v51  ;;  %6014 = vset.pattern.permute.xlu0 %v10977_v44  ;;  %v904_v47 = vsel %vm896_vm13, -1.0, %v11105_v62  ;;  %5848 = vmatprep.mubr.msk.f32.mxu1 %vm323_vm2, %v711_v2 }
 0x17e   : > { %2844 = vperm.xlu0 %6014, %v7210_v27   ;;  %v1007_v49 = vadd.f32 0.2548296, %v999_v3  ;;  %v1064_v44 = vsub.f32 1.0, %v1056_v31  ;;  %5849 = vmatmul.mubr.msk.f32.gmra.mxu1 %vm323_vm2, %v712_v14 }
 0x180   : > { %2446 = vperm.xlu1 %6003, %v7261_v43   ;;  %v1015_v51 = vmul.f32 %v6176_v30, %v1007_v49  ;;  %v1072_v22 = vmul.f32 %v1064_v44, %v904_v47  ;;  %v903_v30 = vsel %vm895_vm14, -1.0, %v11105_v62 }
 0x181   : > { %v7416_v28 = vpop.permute.xlu1 %2020  ;;  %v7418_v21 = vpop.permute.xlu0 %2292 }
 0x182   : > { %11157 = vst [vmem:[#allocation95_spill] sm:$0xff] %v7416_v28  ;;  %11158 = vst [vmem:[#allocation96_spill] sm:$0xff] %v7418_v21  ;;  %2856 = vperm.xlu0 %6014, %v7182_v59   ;;  %v1055_v26 = vmul.f32 %v6180_v4, %v1015_v51  ;;  %v1080_v3 = vadd.f32 1.0, %v1072_v22  ;;  %v11163_v21 = vmov 20  }
 0x184   : > { %2454 = vperm.xlu1 %6003, %v7276_v36   ;;  %v1063_v31 = vsub.f32 1.0, %v1055_v26  ;;  %v1088_v28 = vmul.f32 %v1080_v3, %v880_v23  ;;  %v10979_v23 = vmov 26  }
 0x185   : > { %v7423_v48 = vpop.permute.xlu1 %2024  ;;  %v7425_v10 = vpop.permute.xlu0 %2304 }
 0x186   : > { %11159 = vst [vmem:[#allocation97_spill] sm:$0xff] %v7423_v48  ;;  %11160 = vst [vmem:[#allocation98_spill] sm:$0xff] %v7425_v10  ;;  %2864 = vperm.xlu0 %6014, %v7202_v8   ;;  %v1071_v47 = vmul.f32 %v1063_v31, %v903_v30  ;;  %v11172_v31 = vmov 0  }
 0x187   : > { %1096 = vst.msk [vmem:[#allocation2 + $0x70] sm:$0xff] %vm304_vm1, %v1088_v28 }
 0x188   : > { %6004 = vset.pattern.permute.xlu1 %v11163_v21  ;;  %v1079_v4 = vadd.f32 1.0, %v1071_v47 }
 0x189   : > { %v7434_v49 = vpop.permute.xlu1 %2032  ;;  %v7436_v10 = vpop.permute.xlu0 %2312  ;;  %2499 = vperm.xlu1 %6004, %v7210_v27  }
 0x18a   : > { %11161 = vst [vmem:[#allocation99_spill] sm:$0xff] %v7434_v49  ;;  %11162 = vst [vmem:[#allocation100_spill] sm:$0xff] %v7436_v10  ;;  %2872 = vperm.xlu0 %6014, %v7222_v1   ;;  %v1087_v22 = vmul.f32 %v1079_v4, %v879_v50  ;;  %v11174_v50 = vmov 21   ;;  %v1317_v10 = vld [vmem:[#allocation2 + $0x7] sm:$0xff] }
 0x18c   : > { %1095 = vst.msk [vmem:[#allocation2 + $0x68] sm:$0xff] %vm304_vm1, %v1087_v22 }
 0x18d   : > { %v7445_v51 = vpop.permute.xlu1 %2040  ;;  %v7447_v44 = vpop.permute.xlu0 %2320  ;;  %2507 = vperm.xlu1 %6004, %v7160_v15  }
 0x18e   : > { %11164 = vst [vmem:[#allocation101_spill] sm:$0xff] %v7445_v51  ;;  %11165 = vst [vmem:[#allocation102_spill] sm:$0xff] %v7447_v44  ;;  %6017 = vset.pattern.permute.xlu0 %v10979_v23  ;;  %v1387_v51 = vld [vmem:[#allocation2 + $0x10] sm:$0xff] }
 0x18f   : > { %2917 = vperm.xlu0 %6017, %v7243_v53  }
 0x191   : > { %2511 = vperm.xlu1 %6004, %v7182_v59  }
 0x192   : > { %v7453_v0 = vpop.permute.xlu1 %2085  ;;  %v7455_v26 = vpop.permute.xlu0 %2365 }
 0x193   : > { %11166 = vst [vmem:[#allocation103_spill] sm:$0xff] %v7453_v0  ;;  %11167 = vst [vmem:[#allocation104_spill] sm:$0xff] %v7455_v26  ;;  %2929 = vperm.xlu0 %6017, %v7261_v43   ;;  %v1180_v26 = vld [vmem:[#allocation2 + $0xc] sm:$0xff] }
 0x195   : > { %2519 = vperm.xlu1 %6004, %v7202_v8  }
 0x196   : > { %v7459_v28 = vpop.permute.xlu1 %2093  ;;  %v7461_v2 = vpop.permute.xlu0 %2377 }
 0x197   : > { %11168 = vst [vmem:[#allocation105_spill] sm:$0xff] %v7459_v28  ;;  %11169 = vst [vmem:[#allocation106_spill] sm:$0xff] %v7461_v2  ;;  %2937 = vperm.xlu0 %6017, %v7276_v36  }
 0x199   : > { %2527 = vperm.xlu1 %6004, %v7222_v1  }
 0x19a   : > { %v7465_v3 = vpop.permute.xlu1 %2097  ;;  %v7467_v30 = vpop.permute.xlu0 %2385 }
 0x19b   : > { %11170 = vst [vmem:[#allocation107_spill] sm:$0xff] %v7465_v3  ;;  %11171 = vst [vmem:[#allocation108_spill] sm:$0xff] %v7467_v30  ;;  %6018 = vset.pattern.permute.xlu0 %v11172_v31  ;;  %v7579_v30 = vld [vmem:[#allocation2 + $0x2b] sm:$0xff] }
 0x19c   : > { %1120 = vperm.xlu0 %6018, %v7210_v27   ;;  %v1163_v49 = vmul.f32 %v6762_v40, %v7579_v30  ;;  %v1593_v31 = vld [vmem:[#allocation2 + $0xc] sm:$0xff] }
 0x19d   : > { %6007 = vset.pattern.permute.xlu1 %v11174_v50 }
 0x19e   : > { %v7472_v14 = vpop.permute.xlu1 %2105  ;;  %2572 = vperm.xlu1 %6007, %v7243_v53  }
 0x19f   : > { %11173 = vst [vmem:[#allocation109_spill] sm:$0xff] %v7472_v14  ;;  %v7475_v47 = vpop.permute.xlu0 %2430  ;;  %v1249_v14 = vld [vmem:[#allocation2 + $0xd] sm:$0xff] }
 0x1a0   : > { %11175 = vst [vmem:[#allocation110_spill] sm:$0xff] %v7475_v47  ;;  %1125 = vperm.xlu0 %6018, %v7243_v53   ;;  %v1289_v40 = vmul.f32 %v6778_v46, %v1249_v14  ;;  %v7629_v46 = vld [vmem:[%s10918_s4 + $0x2] ss:$0 sm:$0xff]  ;;  %v1386_v14 = vld [vmem:[#allocation2 + $0x8] sm:$0xff] }
 0x1a2   : > { %v7479_v4 = vpop.permute.xlu1 %2113  ;;  %2576 = vperm.xlu1 %6007, %v7160_v15  }
 0x1a3   : > { %11176 = vst [vmem:[#allocation111_spill] sm:$0xff] %v7479_v4  ;;  %v7481_v22 = vpop.permute.xlu0 %2442  ;;  %v11182_v4 = vmov 22  }
 0x1a4   : > { %11177 = vst [vmem:[#allocation112_spill] sm:$0xff] %v7481_v22  ;;  %1140 = vperm.xlu0 %6018, %v7261_v43  }
 0x1a6   : > { %2584 = vperm.xlu1 %6007, %v7261_v43  }
 0x1a7   : > { %v7485_v23 = vpop.permute.xlu0 %2450  ;;  %v7488_v21 = vpop.permute.xlu1 %2158 }
 0x1a8   : > { %11178 = vst [vmem:[#allocation113_spill] sm:$0xff] %v7485_v23  ;;  %11179 = vst [vmem:[#allocation114_spill] sm:$0xff] %v7488_v21  ;;  %1150 = vperm.xlu0 %6018, %v7276_v36  }
 0x1aa   : > { %2592 = vperm.xlu1 %6007, %v7276_v36  }
 0x1ab   : > { %v7491_v50 = vpop.permute.xlu0 %2458  ;;  %v7494_v44 = vpop.permute.xlu1 %2162 }
 0x1ac   : > { %11180 = vst [vmem:[#allocation115_spill] sm:$0xff] %v7491_v50  ;;  %11181 = vst [vmem:[#allocation116_spill] sm:$0xff] %v7494_v44  ;;  %v11193_v44 = vmov 23  }
 0x1ae   : > { %6008 = vset.pattern.permute.xlu1 %v11182_v4 }
 0x1af   : > { %v7497_v62 = vpop.permute.xlu1 %2170  ;;  %2637 = vperm.xlu1 %6008, %v7210_v27  }
 0x1b0   : > { %11183 = vst [vmem:[#allocation117_spill] sm:$0xff] %v7497_v62  ;;  %v7499_v22 = vpop.permute.xlu0 %2503 }
 0x1b1   : > { %11184 = vst [vmem:[#allocation118_spill] sm:$0xff] %v7499_v22 }
 0x1b3   : > { %v7502_v23 = vpop.permute.xlu1 %2178  ;;  %2645 = vperm.xlu1 %6008, %v7160_v15  }
 0x1b4   : > { %11185 = vst [vmem:[#allocation119_spill] sm:$0xff] %v7502_v23  ;;  %v7505_v21 = vpop.permute.xlu0 %2515 }
 0x1b5   : > { %11186 = vst [vmem:[#allocation120_spill] sm:$0xff] %v7505_v21 }
 0x1b7   : > { %2649 = vperm.xlu1 %6008, %v7182_v59  }
 0x1b8   : > { %v7508_v50 = vpop.permute.xlu0 %2523  ;;  %v7510_v47 = vpop.permute.xlu1 %2223 }
 0x1b9   : > { %11187 = vst [vmem:[#allocation121_spill] sm:$0xff] %v7508_v50  ;;  %11188 = vst [vmem:[#allocation122_spill] sm:$0xff] %v7510_v47 }
 0x1bb   : > { %2657 = vperm.xlu1 %6008, %v7202_v8  }
 0x1bc   : > { %v7513_v4 = vpop.permute.xlu1 %2231 }
 0x1bd   : > { %11189 = vst [vmem:[#allocation123_spill] sm:$0xff] %v7513_v4  ;;  %v7515_v62 = vpop.permute.xlu0 %2568 }
 0x1be   : > { %11190 = vst [vmem:[#allocation124_spill] sm:$0xff] %v7515_v62 }
 0x1bf   : > { %2665 = vperm.xlu1 %6008, %v7222_v1  }
 0x1c0   : > { %v7518_v22 = vpop.permute.xlu1 %2235 }
 0x1c1   : > { %11191 = vst [vmem:[#allocation125_spill] sm:$0xff] %v7518_v22  ;;  %v7520_v23 = vpop.permute.xlu0 %2580 }
 0x1c2   : > { %11192 = vst [vmem:[#allocation126_spill] sm:$0xff] %v7520_v23 }
 0x1c3   : > { %6011 = vset.pattern.permute.xlu1 %v11193_v44 }
 0x1c4   : > { %2710 = vperm.xlu1 %6011, %v7243_v53   ;;  %v7524_v21 = vpop.permute.xlu1 %2243 }
 0x1c5   : > { %11194 = vst [vmem:[#allocation127_spill] sm:$0xff] %v7524_v21  ;;  %v7526_v50 = vpop.permute.xlu0 %2588  ;;  %v11202_v21 = vmov 24  }
 0x1c6   : > { %11195 = vst [vmem:[#allocation128_spill] sm:$0xff] %v7526_v50 }
 0x1c8   : > { %2714 = vperm.xlu1 %6011, %v7160_v15   ;;  %v7529_v47 = vpop.permute.xlu1 %2251 }
 0x1c9   : > { %11196 = vst [vmem:[#allocation129_spill] sm:$0xff] %v7529_v47  ;;  %v7531_v4 = vpop.permute.xlu0 %2596 }
 0x1ca   : > { %11197 = vst [vmem:[#allocation130_spill] sm:$0xff] %v7531_v4 }
 0x1cc   : > { %2722 = vperm.xlu1 %6011, %v7261_v43  }
 0x1cd   : > { %v7534_v62 = vpop.permute.xlu1 %2296 }
 0x1ce   : > { %11198 = vst [vmem:[#allocation131_spill] sm:$0xff] %v7534_v62  ;;  %v7536_v22 = vpop.permute.xlu0 %2641 }
 0x1cf   : > { %11199 = vst [vmem:[#allocation132_spill] sm:$0xff] %v7536_v22 }
 0x1d0   : > { %2730 = vperm.xlu1 %6011, %v7276_v36  }
 0x1d1   : > { %v7539_v44 = vpop.permute.xlu1 %2300 }
 0x1d2   : > { %11200 = vst [vmem:[#allocation133_spill] sm:$0xff] %v7539_v44  ;;  %v7541_v23 = vpop.permute.xlu0 %2653 }
 0x1d3   : > { %11201 = vst [vmem:[#allocation134_spill] sm:$0xff] %v7541_v23  ;;  %v7559_v23 = vld [vmem:[#allocation2 + $0x1b] sm:$0xff] }
 0x1d4   : > { %6012 = vset.pattern.permute.xlu1 %v11202_v21  ;;  %v7561_v21 = vld [vmem:[#allocation2 + $0x1c] sm:$0xff] }
 0x1d5   : > { %2775 = vperm.xlu1 %6012, %v7210_v27   ;;  %v7545_v50 = vpop.permute.xlu1 %2308 }
 0x1d6   : > { %11203 = vst [vmem:[#allocation135_spill] sm:$0xff] %v7545_v50  ;;  %v7547_v47 = vpop.permute.xlu0 %2661 }
 0x1d7   : > { %11204 = vst [vmem:[#allocation136_spill] sm:$0xff] %v7547_v47  ;;  %v1179_v47 = vld [vmem:[#allocation2 + $0x4] sm:$0xff] }
 0x1d9   : > { %2783 = vperm.xlu1 %6012, %v7160_v15   ;;  %v7550_v4 = vpop.permute.xlu1 %2316 }
 0x1da   : > { %11205 = vst [vmem:[#allocation137_spill] sm:$0xff] %v7550_v4  ;;  %v1161_v4 = vmul.f32 %v6756_v38, %v7559_v23  ;;  %v7589_v38 = vld [vmem:[%s10918_s4 + $0x1] ss:$0 sm:$0xff] }
 0x1db   : > { %v7552_v62 = vpop.permute.xlu0 %2706 }
 0x1dc   : > { %11206 = vst [vmem:[#allocation138_spill] sm:$0xff] %v7552_v62  ;;  %v1222_v62 = vmul.f32 %v6759_v39, %v7561_v21  ;;  %v1219_v39 = vmul.f32 %v6751_v37, %v1179_v47 }
 0x1dd   : > { %2787 = vperm.xlu1 %6012, %v7182_v59  }
 0x1de   : > { %v7555_v22 = vpop.permute.xlu1 %2361  ;;  %v1235_v0 = vmul.f32 %v7589_v38, %v1222_v62  ;;  %v7613_v48 = vmul.f32 %v7589_v38, %v1219_v39 }
 0x1df   : > { %11207 = vst [vmem:[#allocation139_spill] sm:$0xff] %v7555_v22  ;;  %v7557_v44 = vpop.permute.xlu0 %2718  ;;  %v7577_v22 = vld [vmem:[#allocation2 + $0x13] sm:$0xff] }
 0x1e0   : > { %11208 = vst [vmem:[#allocation140_spill] sm:$0xff] %v7557_v44  ;;  %v7575_v44 = vld [vmem:[%s10918_s4] ss:$0 sm:$0xff]  ;;  %v1160_v47 = vmul.f32 %v6747_v35, %v7577_v22  ;;  %11215 = vst [vmem:[#allocation146_spill] sm:$0xff] %v7613_v48 }
 0x1e1   : > { %2795 = vperm.xlu1 %6012, %v7202_v8   ;;  %11211 = vst [vmem:[#allocation143_spill] sm:$0xff] %v7575_v44  ;;  %v7581_v8 = vld [vmem:[#allocation2 + $0x2c] sm:$0xff]  ;;  %v1174_v28 = vmul.f32 %v7575_v44, %v1161_v4  ;;  %v11214_v4 = vmov 25  }
 0x1e2   : > { %v7564_v50 = vpop.permute.xlu1 %2369  ;;  %v1224_v37 = vmul.f32 %v6765_v41, %v7581_v8  ;;  %v1455_v41 = vld [vmem:[#allocation2 + $0x9] sm:$0xff] }
 0x1e3   : > { %11209 = vst [vmem:[#allocation141_spill] sm:$0xff] %v7564_v50  ;;  %v7570_v59 = vpop.permute.xlu0 %2726  ;;  %v7583_v50 = vld [vmem:[#allocation2 + $0x14] sm:$0xff] }
 0x1e4   : > { %11210 = vst [vmem:[#allocation142_spill] sm:$0xff] %v7570_v59  ;;  %v7592_v59 = vld [vmem:[#allocation2 + $0x1d] sm:$0xff]  ;;  %v1237_v39 = vmul.f32 %v7589_v38, %v1224_v37 }
 0x1e5   : > { %2803 = vperm.xlu1 %6012, %v7222_v1   ;;  %v1248_v1 = vld [vmem:[#allocation2 + $0x5] sm:$0xff]  ;;  %v1291_v62 = vmul.f32 %v6808_v56, %v7592_v59  ;;  %v1357_v56 = vmul.f32 %v11218_v24, %v1317_v10 }
 0x1e6   : > { %v7594_v2 = vpop.permute.xlu1 %2373  ;;  %v11221_v10 = vld [vmem:[#allocation20_spill] sm:$0xff] }
 0x1e7   : > { %11212 = vst [vmem:[#allocation144_spill] sm:$0xff] %v7594_v2  ;;  %v7598_v3 = vpop.permute.xlu0 %2734  ;;  %v1221_v2 = vmul.f32 %v6776_v45, %v7583_v50  ;;  %v11217_v45 = vld [vmem:[#allocation11_spill] sm:$0xff] }
 0x1e8   : > { %11213 = vst [vmem:[#allocation145_spill] sm:$0xff] %v7598_v3  ;;  %v1220_v3 = vmul.f32 %v6769_v42, %v1180_v26  ;;  %v1288_v60 = vmul.f32 %v11217_v45, %v1248_v1  ;;  %v1243_v42 = vadd.f32 %v1235_v0, %v1174_v28  ;;  %v7624_v26 = vld [vmem:[#allocation2 + $0x15] sm:$0xff]  ;;  %v1173_v1 = vmul.f32 %v7575_v44, %v1160_v47  ;;  %v11222_v0 = vld [vmem:[#allocation25_spill] sm:$0xff]  ;;  %v1389_v37 = vld [vmem:[#allocation2 + $0x20] sm:$0xff] }
 0x1e9   : > { %6015 = vset.pattern.permute.xlu1 %v11214_v4  ;;  %v1427_v4 = vmul.f32 %v11219_v9, %v1387_v51  ;;  %v1234_v24 = vmul.f32 %v7589_v38, %v1221_v2  ;;  %v1358_v51 = vmul.f32 %v11221_v10, %v1318_v25  ;;  %v1495_v28 = vmul.f32 %v11222_v0, %v1455_v41  ;;  %v7650_v2 = vld [vmem:[%s10918_s4 + $0x3] ss:$0 sm:$0xff]  ;;  %v7655_v25 = vld [vmem:[%s10918_s4 + $0x5] ss:$0 sm:$0xff]  ;;  %v7673_v10 = vld [vmem:[%s10918_s4 + $0x4] ss:$0 sm:$0xff] }
 0x1ea   : > { %2848 = vperm.xlu1 %6015, %v7243_v53   ;;  %v7617_v35 = vpop.permute.xlu1 %2381  ;;  %v1176_v53 = vmul.f32 %v7575_v44, %v1163_v49  ;;  %v1304_v45 = vmul.f32 %v7629_v46, %v1291_v62  ;;  %v7642_v13 = vmul.f32 %v7589_v38, %v1220_v3  ;;  %v7645_v49 = vmul.f32 %v7629_v46, %v1289_v40  ;;  %v11227_v3 = vld [vmem:[#allocation13_spill] sm:$0xff]  ;;  %v11231_v0 = vld [vmem:[#allocation28_spill] sm:$0xff] }
 0x1eb   : > { %11216 = vst [vmem:[#allocation147_spill] sm:$0xff] %v7617_v35  ;;  %v11223_v35 = vld [vmem:[#allocation14_spill] sm:$0xff]  ;;  %v1290_v62 = vmul.f32 %v11227_v3, %v7624_v26  ;;  %v7665_v41 = vmul.f32 %v7629_v46, %v1288_v60  ;;  %v7685_v57 = vmul.f32 %v7650_v2, %v1358_v51 }
 0x1ec   : > { %v7635_v9 = vpop.permute.xlu0 %2779  ;;  %v1360_v48 = vmul.f32 %v11223_v35, %v1320_v33  ;;  %11224 = vst [vmem:[#allocation12_spill] sm:$0xff] %v7642_v13  ;;  %11225 = vst [vmem:[#allocation19_spill] sm:$0xff] %v7645_v49  ;;  %v11226_v33 = vld [vmem:[#allocation16_spill] sm:$0xff]  ;;  %v7668_v35 = vmul.f32 %v7650_v2, %v1357_v56  ;;  %v1312_v49 = vadd.f32 %v1304_v45, %v1243_v42  ;;  %v7676_v3 = vld [vmem:[#allocation2 + $0x17] sm:$0xff] }
 0x1ed   : > { %11220 = vst [vmem:[#allocation11_spill] sm:$0xff] %v7635_v9  ;;  %v1293_v47 = vmul.f32 %v11226_v33, %v7622_v55  ;;  %11229 = vst [vmem:[#allocation25_spill] sm:$0xff] %v7665_v41  ;;  %v1426_v33 = vmul.f32 %v11231_v0, %v1386_v14  ;;  %v1322_v9 = vld [vmem:[#allocation2 + $0x2f] sm:$0xff]  ;;  %v1245_v60 = vadd.f32 %v1237_v39, %v1176_v53  ;;  %v11234_v56 = vld [vmem:[#allocation39_spill] sm:$0xff] }
 0x1ee   : > { %2852 = vperm.xlu1 %6015, %v7160_v15   ;;  %v7662_v40 = vpop.permute.xlu1 %2389  ;;  %11230 = vst [vmem:[#allocation14_spill] sm:$0xff] %v7668_v35  ;;  %11232 = vst [vmem:[#allocation16_spill] sm:$0xff] %v7676_v3  ;;  %v7679_v15 = vmul.f32 %v7673_v10, %v1427_v4  ;;  %v1242_v13 = vadd.f32 %v1234_v24, %v1173_v1  ;;  %v1524_v41 = vld [vmem:[#allocation2 + $0xb] sm:$0xff]  ;;  %v1633_v35 = vmul.f32 %v11234_v56, %v1593_v31  ;;  %v7695_v53 = vld [vmem:[%s10918_s4 + $0x7] ss:$0 sm:$0xff] }
 0x1ef   : > { %11228 = vst [vmem:[#allocation20_spill] sm:$0xff] %v7662_v40  ;;  %v1391_v40 = vld [vmem:[#allocation2 + $0x30] sm:$0xff]  ;;  %11236 = vst [vmem:[#allocation39_spill] sm:$0xff] %v7685_v57  ;;  %v1429_v14 = vmul.f32 %v11237_v61, %v1389_v37  ;;  %v7689_v42 = vmul.f32 %v7655_v25, %v1495_v28  ;;  %v1373_v45 = vmul.f32 %v7650_v2, %v1360_v48  ;;  %v7697_v39 = vld [vmem:[#allocation2 + $0x24] sm:$0xff] }
 0x1f0   : > { %11233 = vst [vmem:[#allocation13_spill] sm:$0xff] %v7679_v15  ;;  %v7682_v44 = vpop.permute.xlu0 %2791  ;;  %v1456_v4 = vld [vmem:[#allocation2 + $0x11] sm:$0xff]  ;;  %v7699_v31 = vld [vmem:[#allocation2 + $0x25] sm:$0xff]  ;;  %v11239_v24 = vld [vmem:[#allocation15_spill] sm:$0xff]  ;;  %v1306_v61 = vmul.f32 %v7629_v46, %v1293_v47  ;;  %v1303_v28 = vmul.f32 %v7629_v46, %v1290_v62  ;;  %v7708_v0 = vmul.f32 %v7673_v10, %v1426_v33 }
 0x1f1   : > { %11235 = vst [vmem:[#allocation28_spill] sm:$0xff] %v7682_v44  ;;  %11238 = vst [vmem:[#allocation32_spill] sm:$0xff] %v7689_v42  ;;  %v1458_v1 = vld [vmem:[#allocation2 + $0x21] sm:$0xff]  ;;  %v1362_v51 = vmul.f32 %v11239_v24, %v1322_v9  ;;  %v11240_v37 = vld [vmem:[#allocation22_spill] sm:$0xff]  ;;  %v1381_v15 = vadd.f32 %v1373_v45, %v1312_v49  ;;  %v1564_v9 = vmul.f32 %v11244_v19, %v1524_v41 }
 0x1f2   : > { %v1359_v48 = vmul.f32 %v11240_v37, %v7676_v3  ;;  %2860 = vperm.xlu1 %6015, %v7261_v43   ;;  %11241 = vst [vmem:[#allocation15_spill] sm:$0xff] %v7708_v0  ;;  %v11242_v56 = vld [vmem:[#allocation34_spill] sm:$0xff]  ;;  %v1321_v42 = vld [vmem:[#allocation2 + $0x27] sm:$0xff]  ;;  %v1314_v62 = vadd.f32 %v1306_v61, %v1245_v60  ;;  %v1496_v63 = vmul.f32 %v11246_v18, %v1456_v4  ;;  %v7720_v43 = vld [vmem:[%s10918_s4 + $0x6] ss:$0 sm:$0xff] }
 0x1f3   : > { %v1431_v44 = vmul.f32 %v11242_v56, %v1391_v40  ;;  %v7711_v57 = vld [vmem:[#allocation2 + $0x18] sm:$0xff]  ;;  %v7714_v24 = vpop.permute.xlu1 %2434  ;;  %v1390_v47 = vld [vmem:[#allocation2 + $0x28] sm:$0xff]  ;;  %v1311_v37 = vadd.f32 %v1303_v28, %v1242_v13  ;;  %v7723_v40 = vmul.f32 %v7695_v53, %v1633_v35  ;;  %v1442_v33 = vmul.f32 %v7673_v10, %v1429_v14 }
 0x1f4   : > { %11243 = vst [vmem:[#allocation22_spill] sm:$0xff] %v7711_v57  ;;  %11245 = vst [vmem:[#allocation34_spill] sm:$0xff] %v7714_v24  ;;  %v7725_v49 = vpop.permute.xlu0 %2799  ;;  %v11249_v19 = vld [vmem:[#allocation27_spill] sm:$0xff]  ;;  %v11251_v18 = vld [vmem:[#allocation8_spill] sm:$0xff]  ;;  %v1375_v56 = vmul.f32 %v7650_v2, %v1362_v51 }
 0x1f5   : > { %11247 = vst [vmem:[#allocation46_spill] sm:$0xff] %v7723_v40  ;;  %11248 = vst [vmem:[#allocation38_spill] sm:$0xff] %v7725_v49  ;;  %v1498_v41 = vmul.f32 %v11249_v19, %v1458_v1  ;;  %v11250_v45 = vld [vmem:[#allocation7_spill] sm:$0xff]  ;;  %v1292_v13 = vmul.f32 %v11251_v18, %v7699_v31  ;;  %v7733_v4 = vld [vmem:[#allocation2 + $0x34] sm:$0xff]  ;;  %v1372_v49 = vmul.f32 %v7650_v2, %v1359_v48 }
 0x1f6   : > { %v1223_v60 = vmul.f32 %v11250_v45, %v7697_v39  ;;  %v11252_v61 = vld [vmem:[#allocation24_spill] sm:$0xff]  ;;  %v7737_v35 = vld [vmem:[#allocation2 + $0x35] sm:$0xff]  ;;  %2868 = vperm.xlu1 %6015, %v7276_v36   ;;  %v1444_v1 = vmul.f32 %v7673_v10, %v1431_v44  ;;  %v1450_v19 = vadd.f32 %v1442_v33, %v1381_v15  ;;  %v11254_v45 = vld [vmem:[#allocation21_spill] sm:$0xff]  ;;  %v7755_v36 = vmul.f32 %v7655_v25, %v1496_v63 }
 0x1f7   : > { %v1361_v28 = vmul.f32 %v11252_v61, %v1321_v42  ;;  %v11253_v14 = vld [vmem:[#allocation30_spill] sm:$0xff]  ;;  %v1430_v18 = vmul.f32 %v11254_v45, %v1390_v47  ;;  %v7746_v42 = vmul.f32 %v7720_v43, %v1564_v9  ;;  %v7748_v51 = vpop.permute.xlu1 %2438  ;;  %v1383_v61 = vadd.f32 %v1375_v56, %v1314_v62  ;;  %v1459_v56 = vld [vmem:[#allocation2 + $0x29] sm:$0xff] }
 0x1f8   : > { %v1428_v24 = vmul.f32 %v11253_v14, %v7711_v57  ;;  %v1460_v40 = vld [vmem:[#allocation2 + $0x31] sm:$0xff]  ;;  %v1457_v0 = vld [vmem:[#allocation2 + $0x19] sm:$0xff]  ;;  %11256 = vst [vmem:[#allocation7_spill] sm:$0xff] %v7748_v51  ;;  %11258 = vst [vmem:[#allocation8_spill] sm:$0xff] %v7755_v36  ;;  %v1380_v44 = vadd.f32 %v1372_v49, %v1311_v37  ;;  %v1511_v15 = vmul.f32 %v7655_v25, %v1498_v41 }
 0x1f9   : > { %11255 = vst [vmem:[#allocation27_spill] sm:$0xff] %v7746_v42  ;;  %v7750_v3 = vld [vmem:[#allocation2 + $0x37] sm:$0xff]  ;;  %v11257_v14 = vld [vmem:[#allocation9_spill] sm:$0xff]  ;;  %v7759_v47 = vmul.f32 %v7589_v38, %v1223_v60  ;;  %v7762_v9 = vmul.f32 %v7629_v46, %v1292_v13  ;;  %v7766_v45 = vpop.permute.xlu0 %2844  ;;  %v11264_v49 = vld [vmem:[#allocation40_spill] sm:$0xff]  ;;  %v11265_v42 = vmov 26   ;;  %v7778_v36 = vmul.f32 %v7673_v10, %v1430_v18 }
 0x1fa   : > { %v1392_v48 = vld [vmem:[#allocation2 + $0x38] sm:$0xff]  ;;  %v1225_v57 = vmul.f32 %v11257_v14, %v7733_v4  ;;  %11261 = vst [vmem:[#allocation30_spill] sm:$0xff] %v7766_v45  ;;  %v7769_v14 = vmul.f32 %v7650_v2, %v1361_v28  ;;  %v11263_v63 = vld [vmem:[#allocation29_spill] sm:$0xff]  ;;  %v1441_v37 = vmul.f32 %v7673_v10, %v1428_v24  ;;  %v1497_v41 = vmul.f32 %v11264_v49, %v1457_v0  ;;  %v7792_v18 = vld [vmem:[#allocation2 + $0x23] sm:$0xff] }
 0x1fb   : > { %11259 = vst [vmem:[#allocation24_spill] sm:$0xff] %v7762_v9  ;;  %v11260_v62 = vld [vmem:[#allocation10_spill] sm:$0xff]  ;;  %v1500_v51 = vmul.f32 %v11263_v63, %v1460_v40  ;;  %6016 = vset.pattern.permute.xlu1 %v11265_v42  ;;  %v1519_v13 = vadd.f32 %v1511_v15, %v1450_v19  ;;  %v11267_v9 = vld [vmem:[#allocation23_spill] sm:$0xff]  ;;  %v7786_v24 = vpop.permute.xlu1 %2446  ;;  %v1452_v0 = vadd.f32 %v1444_v1, %v1383_v61 }
 0x1fc   : > { %v1294_v33 = vmul.f32 %v11260_v62, %v7737_v35  ;;  %11262 = vst [vmem:[#allocation21_spill] sm:$0xff] %v7769_v14  ;;  %v7774_v60 = vld [vmem:[#allocation2 + $0x39] sm:$0xff]  ;;  %v1432_v28 = vmul.f32 %v11267_v9, %v1392_v48  ;;  %2913 = vperm.xlu1 %6016, %v7210_v27   ;;  %11268 = vst [vmem:[#allocation9_spill] sm:$0xff] %v7786_v24  ;;  %v7789_v40 = vmul.f32 %v7589_v38, %v1225_v57  ;;  %v11270_v48 = vld [vmem:[#allocation33_spill] sm:$0xff] }
 0x1fd   : > { %v11266_v62 = vld [vmem:[#allocation26_spill] sm:$0xff]  ;;  %v1449_v63 = vadd.f32 %v1441_v37, %v1380_v44  ;;  %v1565_v9 = vmul.f32 %v11270_v48, %v7577_v22  ;;  %v11272_v42 = vld [vmem:[#allocation35_spill] sm:$0xff]  ;;  %v7803_v61 = vpop.permute.xlu0 %2856  ;;  %v1513_v57 = vmul.f32 %v7655_v25, %v1500_v51  ;;  %v1510_v38 = vmul.f32 %v7655_v25, %v1497_v41  ;;  %v11274_v44 = vld [vmem:[#allocation37_spill] sm:$0xff] }
 0x1fe   : > { %v1363_v45 = vmul.f32 %v11266_v62, %v7750_v3  ;;  %v7783_v14 = vld [vmem:[#allocation2 + $0x3b] sm:$0xff]  ;;  %v7795_v49 = vmul.f32 %v7629_v46, %v1294_v33  ;;  %v11271_v62 = vld [vmem:[#allocation44_spill] sm:$0xff]  ;;  %v1568_v1 = vmul.f32 %v11272_v42, %v7579_v30  ;;  %11273 = vst [vmem:[#allocation10_spill] sm:$0xff] %v7803_v61  ;;  %v7811_v37 = vld [vmem:[#allocation2 + $0x33] sm:$0xff]  ;;  %v7817_v48 = vmul.f32 %v7673_v10, %v1432_v28 }
 0x1ff   : > { %v11269_v19 = vld [vmem:[#allocation42_spill] sm:$0xff]  ;;  %v1501_v27 = vmul.f32 %v11271_v62, %v7774_v60  ;;  %v11275_v46 = vld [vmem:[#allocation48_spill] sm:$0xff]  ;;  %v11277_v42 = vld [vmem:[#allocation41_spill] sm:$0xff]  ;;  %v1521_v61 = vadd.f32 %v1513_v57, %v1452_v0  ;;  %v1518_v24 = vadd.f32 %v1510_v38, %v1449_v63 }
 0x200   : > { %v1499_v15 = vmul.f32 %v11269_v19, %v1459_v56  ;;  %v1570_v56 = vmul.f32 %v11274_v44, %v7783_v14  ;;  %v1566_v33 = vmul.f32 %v11275_v46, %v7559_v23  ;;  %v7814_v19 = vmul.f32 %v7650_v2, %v1363_v45  ;;  %11276 = vst [vmem:[#allocation29_spill] sm:$0xff] %v7817_v48  ;;  %v11278_v51 = vld [vmem:[#allocation50_spill] sm:$0xff]  ;;  %v7826_v46 = vpop.permute.xlu1 %2454  ;;  %v11280_v10 = vld [vmem:[#allocation43_spill] sm:$0xff]  ;;  %v11283_v0 = vld [vmem:[#allocation52_spill] sm:$0xff] }
 0x201   : > { %v1636_v62 = vmul.f32 %v11277_v42, %v7697_v39  ;;  %v1567_v41 = vmul.f32 %v11278_v51, %v7792_v18  ;;  %v6273_v44 = vld [vmem:[%s10915_s1 + $0x10] sm:$0xff]  ;;  %11279 = vst [vmem:[#allocation40_spill] sm:$0xff] %v7826_v46  ;;  %v1638_v45 = vmul.f32 %v11280_v10, %v7733_v4  ;;  %v7833_v28 = vld [vmem:[#allocation2 + $0x3d] sm:$0xff]  ;;  %v7836_v39 = vmul.f32 %v7720_v43, %v1565_v9  ;;  %v7846_v57 = vpop.permute.xlu0 %2864 }
 0x202   : > { %2921 = vperm.xlu1 %6016, %v6273_v44   ;;  %v7829_v2 = vmul.f32 %v7655_v25, %v1499_v15  ;;  %v7839_v42 = vmul.f32 %v7655_v25, %v1501_v27  ;;  %v7842_v51 = vmul.f32 %v7720_v43, %v1568_v1  ;;  %v1569_v63 = vmul.f32 %v11283_v0, %v7811_v37  ;;  %v7848_v15 = vld [vmem:[#allocation2 + $0x3c] sm:$0xff]  ;;  %v5745_v0 = vld [vmem:[%s10918_s4 + $0x8] ss:$0 sm:$0xff]  ;;  %v1662_v46 = vld [vmem:[#allocation2 + $0xd] sm:$0xff] }
 0x203   : > { %11284 = vst [vmem:[#allocation42_spill] sm:$0xff] %v7846_v57  ;;  %v7851_v38 = vmul.f32 %v7720_v43, %v1570_v56  ;;  %v1579_v44 = vmul.f32 %v7720_v43, %v1566_v33  ;;  %v11286_v9 = vld [vmem:[#allocation47_spill] sm:$0xff]  ;;  %v1635_v25 = vmul.f32 %v7124_v54, %v7561_v21  ;;  %v1649_v27 = vmul.f32 %v7695_v53, %v1636_v62  ;;  %v11287_v57 = vld [vmem:[#allocation49_spill] sm:$0xff] }
 0x204   : > { %11281 = vst [vmem:[#allocation26_spill] sm:$0xff] %v7839_v42  ;;  %11282 = vst [vmem:[#allocation23_spill] sm:$0xff] %v7842_v51  ;;  %v1703_v10 = vmul.f32 %v11286_v9, %v7624_v26  ;;  %v1580_v1 = vmul.f32 %v7720_v43, %v1567_v41  ;;  %v1634_v56 = vmul.f32 %v7107_v20, %v7583_v50  ;;  %v6274_v9 = vld [vmem:[%s10915_s1 + $0x18] sm:$0xff]  ;;  %v7875_v48 = vpop.permute.xlu1 %2499 }
 0x205   : > { %11285 = vst [vmem:[#allocation33_spill] sm:$0xff] %v7851_v38  ;;  %v1706_v33 = vmul.f32 %v11287_v57, %v7622_v55  ;;  %v1587_v54 = vadd.f32 %v1579_v44, %v1518_v24  ;;  %v1651_v62 = vmul.f32 %v7695_v53, %v1638_v45  ;;  %v11288_v41 = vld [vmem:[#allocation51_spill] sm:$0xff]  ;;  %v1637_v42 = vmul.f32 %v7143_v16, %v7581_v8  ;;  %v7884_v45 = vpop.permute.xlu0 %2872  ;;  %v7892_v8 = vld [vmem:[%s10918_s4 + $0x9] ss:$0 sm:$0xff] }
 0x206   : > { %2925 = vperm.xlu1 %6016, %v6274_v9   ;;  %v1708_v38 = vmul.f32 %v11288_v41, %v7833_v28  ;;  %11289 = vst [vmem:[#allocation44_spill] sm:$0xff] %v7875_v48  ;;  %v1582_v20 = vmul.f32 %v7720_v43, %v1569_v63  ;;  %v1771_v57 = vmul.f32 %v7083_v11, %v7577_v22  ;;  %11290 = vst [vmem:[#allocation35_spill] sm:$0xff] %v7884_v45  ;;  %v2077_v45 = vld [vmem:[#allocation2 + $0x21] sm:$0xff] }
 0x207   : > { %v1639_v51 = vmul.f32 %v7163_v29, %v7848_v15  ;;  %v1774_v24 = vmul.f32 %v7097_v5, %v7579_v30  ;;  %v1588_v44 = vadd.f32 %v1580_v1, %v1519_v13  ;;  %v7886_v9 = vmul.f32 %v5745_v0, %v1703_v10  ;;  %v6275_v30 = vld [vmem:[%s10915_s1 + $0x28] sm:$0xff] }
 0x208   : > { %v1648_v16 = vmul.f32 %v7695_v53, %v1635_v25  ;;  %v1702_v11 = vmul.f32 %v7185_v6, %v1662_v46  ;;  %v1590_v22 = vadd.f32 %v1582_v20, %v1521_v61  ;;  %v7896_v29 = vmul.f32 %v7695_v53, %v1634_v56  ;;  %v7912_v61 = vpop.permute.xlu1 %2507  ;;  %v1600_v25 = vld [vmem:[#allocation2 + $0x44] sm:$0xff]  ;;  %v7929_v56 = vld [vmem:[#allocation2 + $0x2c] sm:$0xff] }
 0x209   : > { %v7898_v43 = vmul.f32 %v5745_v0, %v1706_v33  ;;  %v1704_v5 = vmul.f32 %v7213_v7, %v7592_v59  ;;  %v7905_v63 = vmul.f32 %v5745_v0, %v1708_v38  ;;  %v7908_v10 = vmul.f32 %v7695_v53, %v1637_v42  ;;  %11291 = vst [vmem:[#allocation37_spill] sm:$0xff] %v7912_v61  ;;  %v1103_v61 = vld [vmem:[#allocation2 + $0xb] sm:$0xff] }
 0x20a   : > { %2933 = vperm.xlu1 %6016, %v6275_v30   ;;  %v1656_v13 = vadd.f32 %v1648_v16, %v1587_v54  ;;  %v1776_v6 = vmul.f32 %v7115_v34, %v7783_v14  ;;  %v7915_v46 = vmul.f32 %v7892_v8, %v1771_v57  ;;  %v7918_v7 = vmul.f32 %v7695_v53, %v1639_v51  ;;  %v7931_v33 = vpop.permute.xlu0 %2917  ;;  %v7954_v57 = vld [vmem:[%s10918_s4 + $0xb] ss:$0 sm:$0xff]  ;;  %v11302_v30 = vld [vmem:[#allocation74_spill] sm:$0xff] }
 0x20b   : > { %v1787_v59 = vmul.f32 %v7892_v8, %v1774_v24  ;;  %v1705_v38 = vmul.f32 %v7228_v12, %v7699_v31  ;;  %v7923_v1 = vmul.f32 %v5745_v0, %v1702_v11  ;;  %v1657_v42 = vadd.f32 %v1649_v27, %v1588_v44  ;;  %11293 = vst [vmem:[#allocation41_spill] sm:$0xff] %v7929_v56  ;;  %v11295_v31 = vld [vmem:[#allocation55_spill] sm:$0xff]  ;;  %v11296_v27 = vld [vmem:[#allocation61_spill] sm:$0xff]  ;;  %v7958_v16 = vld [vmem:[#allocation2 + $0x24] sm:$0xff] }
 0x20c   : > { %11292 = vst [vmem:[#allocation48_spill] sm:$0xff] %v7915_v46  ;;  %v1707_v34 = vmul.f32 %v7237_v17, %v7737_v35  ;;  %v1773_v14 = vmul.f32 %v7279_v52, %v7792_v18  ;;  %11294 = vst [vmem:[#allocation50_spill] sm:$0xff] %v7931_v33  ;;  %v1717_v53 = vmul.f32 %v5745_v0, %v1704_v5  ;;  %v6276_v17 = vld [vmem:[%s10915_s1 + $0x38] sm:$0xff]  ;;  %v5747_v35 = vld [vmem:[%s10918_s4 + $0xa] ss:$0 sm:$0xff] }
 0x20d   : > { %v1841_v51 = vmul.f32 %v7152_v32, %v7561_v21  ;;  %v1844_v12 = vmul.f32 %v7175_v58, %v7733_v4  ;;  %v1846_v54 = vmul.f32 %v11295_v31, %v1600_v25  ;;  %v1789_v52 = vmul.f32 %v7892_v8, %v1776_v6  ;;  %v11297_v21 = vld [vmem:[#allocation56_spill] sm:$0xff]  ;;  %v7949_v4 = vpop.permute.xlu1 %2511  ;;  %v11299_v24 = vld [vmem:[#allocation57_spill] sm:$0xff] }
 0x20e   : > { %2941 = vperm.xlu1 %6016, %v6276_v17   ;;  %v1659_v18 = vadd.f32 %v1651_v62, %v1590_v22  ;;  %v1772_v32 = vmul.f32 %v11296_v27, %v7559_v23  ;;  %v1909_v58 = vmul.f32 %v11297_v21, %v7624_v26  ;;  %11298 = vst [vmem:[#allocation43_spill] sm:$0xff] %v7949_v4  ;;  %v11300_v62 = vld [vmem:[#allocation72_spill] sm:$0xff]  ;;  %v7967_v6 = vpop.permute.xlu0 %2929  ;;  %v11305_v31 = vmov 0   ;;  %v11309_v21 = vld [vmem:[#allocation58_spill] sm:$0xff]  ;;  %v11316_v33 = vld [vmem:[#allocation65_spill] sm:$0xff] }
 0x20f   : > { %v1725_v41 = vadd.f32 %v1717_v53, %v1656_v13  ;;  %v1718_v20 = vmul.f32 %v5745_v0, %v1705_v38  ;;  %v1912_v44 = vmul.f32 %v11299_v24, %v7622_v55  ;;  %v1843_v23 = vmul.f32 %v11300_v62, %v7929_v56  ;;  %v11301_v22 = vld [vmem:[#allocation64_spill] sm:$0xff]  ;;  %11303 = vst [vmem:[#allocation52_spill] sm:$0xff] %v7967_v6  ;;  %v7993_v62 = vld [vmem:[#allocation2 + $0x30] sm:$0xff] }
 0x210   : > { %v1720_v11 = vmul.f32 %v5745_v0, %v1707_v34  ;;  %v1786_v26 = vmul.f32 %v7892_v8, %v1773_v14  ;;  %v1775_v5 = vmul.f32 %v11301_v22, %v7811_v37  ;;  %v1845_v13 = vmul.f32 %v11302_v30, %v7848_v15  ;;  %v7976_v0 = vld [vmem:[#allocation2 + $0x43] sm:$0xff]  ;;  %11311 = vst [vmem:[#allocation55_spill] sm:$0xff] %v7993_v62  ;;  %v11314_v6 = vld [vmem:[#allocation62_spill] sm:$0xff] }
 0x211   : > { %v1726_v38 = vadd.f32 %v1718_v20, %v1657_v42  ;;  %v7969_v25 = vmul.f32 %v5747_v35, %v1841_v51  ;;  %v7971_v55 = vmul.f32 %v5747_v35, %v1844_v12  ;;  %v7973_v53 = vmul.f32 %v5747_v35, %v1846_v54  ;;  %v1939_v15 = vld [vmem:[#allocation2 + $0x1f] sm:$0xff]  ;;  %v11307_v42 = vld [vmem:[#allocation70_spill] sm:$0xff]  ;;  %v1944_v27 = vld [vmem:[#allocation2 + $0x47] sm:$0xff]  ;;  %v7986_v12 = vpop.permute.xlu1 %2519 }
 0x212   : > { %6019 = vset.pattern.permute.xlu1 %v11305_v31  ;;  %v1728_v34 = vadd.f32 %v1720_v11, %v1659_v18  ;;  %v7979_v14 = vmul.f32 %v7892_v8, %v1772_v32  ;;  %v7982_v17 = vmul.f32 %v7954_v57, %v1909_v58  ;;  %v1842_v51 = vmul.f32 %v11307_v42, %v7958_v16  ;;  %v11310_v18 = vld [vmem:[#allocation66_spill] sm:$0xff]  ;;  %v11312_v22 = vld [vmem:[#allocation68_spill] sm:$0xff] }
 0x213   : > { %11304 = vst [vmem:[#allocation47_spill] sm:$0xff] %v7973_v53  ;;  %11308 = vst [vmem:[#allocation51_spill] sm:$0xff] %v7986_v12  ;;  %v1925_v54 = vmul.f32 %v7954_v57, %v1912_v44  ;;  %v1914_v20 = vmul.f32 %v11309_v21, %v7833_v28  ;;  %v1777_v24 = vmul.f32 %v11310_v18, %v7976_v0  ;;  %v2012_v31 = vld [vmem:[#allocation2 + $0x40] sm:$0xff]  ;;  %v8000_v44 = vpop.permute.xlu0 %2937 }
 0x214   : > { %11306 = vst [vmem:[#allocation49_spill] sm:$0xff] %v7982_v17  ;;  %v1856_v32 = vmul.f32 %v5747_v35, %v1843_v23  ;;  %v1794_v58 = vadd.f32 %v1786_v26, %v1725_v41  ;;  %v7996_v11 = vmul.f32 %v7892_v8, %v1775_v5  ;;  %v1840_v30 = vmul.f32 %v11312_v22, %v7583_v50  ;;  %v11315_v21 = vld [vmem:[#allocation63_spill] sm:$0xff]  ;;  %v8009_v41 = vld [vmem:[%s10918_s4 + $0xc] ss:$0 sm:$0xff]  ;;  %v11317_v5 = vld [vmem:[#allocation22_spill] sm:$0xff] }
 0x215   : > { %v1858_v42 = vmul.f32 %v5747_v35, %v1845_v13  ;;  %11313 = vst [vmem:[#allocation61_spill] sm:$0xff] %v8000_v44  ;;  %v1979_v28 = vmul.f32 %v11314_v6, %v1939_v15  ;;  %v1982_v18 = vmul.f32 %v11315_v21, %v7750_v3  ;;  %v1795_v23 = vadd.f32 %v1787_v59, %v1726_v38  ;;  %v11318_v13 = vld [vmem:[#allocation67_spill] sm:$0xff]  ;;  %v11319_v44 = vld [vmem:[#allocation69_spill] sm:$0xff]  ;;  %v8017_v15 = vpop.permute.xlu1 %2527  ;;  %v11370_v46 = vld [vmem:[#allocation96_spill] sm:$0xff] }
 0x216   : > { %v1984_v12 = vmul.f32 %v11316_v33, %v1944_v27  ;;  %v1855_v26 = vmul.f32 %v5747_v35, %v1842_v51  ;;  %v1797_v50 = vadd.f32 %v1789_v52, %v1728_v34  ;;  %v2047_v22 = vmul.f32 %v11318_v13, %v11317_v5  ;;  %v8015_v6 = vld [vmem:[#allocation2 + $0x25] sm:$0xff]  ;;  %11321 = vst [vmem:[#allocation57_spill] sm:$0xff] %v8017_v15  ;;  %v8023_v33 = vld [vmem:[%s10918_s4 + $0xd] ss:$0 sm:$0xff]  ;;  %v11322_v38 = vld [vmem:[#allocation71_spill] sm:$0xff] }
 0x217   : > { %v2050_v48 = vmul.f32 %v11319_v44, %v7993_v62  ;;  %11320 = vst [vmem:[#allocation56_spill] sm:$0xff] %v8015_v6  ;;  %v1927_v3 = vmul.f32 %v7954_v57, %v1914_v20  ;;  %v1864_v59 = vadd.f32 %v1856_v32, %v1795_v23  ;;  %v2052_v52 = vmul.f32 %v11322_v38, %v2012_v31  ;;  %v11323_v34 = vld [vmem:[#allocation76_spill] sm:$0xff]  ;;  %v8037_v20 = vld [vmem:[%s10918_s4 + $0xe] ss:$0 sm:$0xff] }
 0x218   : > { %v2117_v51 = vmul.f32 %v11323_v34, %v2077_v45  ;;  %v1102_v27 = vld [vmem:[#allocation2 + $0x3] sm:$0xff]  ;;  %v8028_v21 = vmul.f32 %v7892_v8, %v1777_v24  ;;  %v8030_v44 = vmul.f32 %v5747_v35, %v1840_v30  ;;  %v1866_v5 = vadd.f32 %v1858_v42, %v1797_v50  ;;  %v11326_v32 = vld [vmem:[#allocation77_spill] sm:$0xff]  ;;  %v1121_v42 = vpop.permute.xlu0 %1120 }
 0x219   : > { %v8032_v13 = vld [vmem:[#allocation2 + $0x1d] sm:$0xff]  ;;  %v2120_v23 = vmul.f32 %v11326_v32, %v7774_v60  ;;  %v8042_v31 = vmul.f32 %v8009_v41, %v1979_v28  ;;  %v8045_v45 = vmul.f32 %v8009_v41, %v1982_v18  ;;  %v8048_v8 = vmul.f32 %v8009_v41, %v1984_v12  ;;  %v2082_v30 = vld [vmem:[#allocation2 + $0x49] sm:$0xff]  ;;  %v8058_v28 = vld [vmem:[#allocation2 + $0x35] sm:$0xff] }
 0x21a   : > { %11324 = vst [vmem:[#allocation72_spill] sm:$0xff] %v8028_v21  ;;  %11325 = vst [vmem:[#allocation64_spill] sm:$0xff] %v8030_v44  ;;  %v11330_v35 = vld [vmem:[#allocation80_spill] sm:$0xff]  ;;  %v1863_v50 = vadd.f32 %v1855_v26, %v1794_v58  ;;  %v8053_v38 = vmul.f32 %v8023_v33, %v2047_v22  ;;  %v8056_v60 = vmul.f32 %v8023_v33, %v2050_v48  ;;  %v8062_v18 = vld [vmem:[#allocation2 + $0x2f] sm:$0xff]  ;;  %v8072_v48 = vpop.permute.xlu1 %2572 }
 0x21b   : > { %11327 = vst [vmem:[#allocation74_spill] sm:$0xff] %v8042_v31  ;;  %11328 = vst [vmem:[#allocation70_spill] sm:$0xff] %v8045_v45  ;;  %v1911_v24 = vmul.f32 %v11330_v35, %v8015_v6  ;;  %v8060_v34 = vld [vmem:[#allocation2 + $0x27] sm:$0xff]  ;;  %v1158_v12 = vmul.f32 %v1121_v42, %v1102_v27  ;;  %v8065_v32 = vmul.f32 %v8023_v33, %v2052_v52  ;;  %v11334_v35 = vld [vmem:[#allocation78_spill] sm:$0xff] }
 0x21c   : > { %11329 = vst [vmem:[#allocation58_spill] sm:$0xff] %v8048_v8  ;;  %11331 = vst [vmem:[#allocation66_spill] sm:$0xff] %v8053_v38  ;;  %v1910_v15 = vmul.f32 %v11334_v35, %v8032_v13  ;;  %v8070_v58 = vmul.f32 %v8037_v20, %v2117_v51  ;;  %v2145_v26 = vld [vmem:[#allocation2 + $0x1b] sm:$0xff]  ;;  %v1933_v22 = vadd.f32 %v1925_v54, %v1864_v59  ;;  %v8081_v6 = vld [vmem:[#allocation2 + $0x45] sm:$0xff]  ;;  %v1126_v17 = vpop.permute.xlu0 %1125 }
 0x21d   : > { %11332 = vst [vmem:[#allocation68_spill] sm:$0xff] %v8060_v34  ;;  %11333 = vst [vmem:[#allocation62_spill] sm:$0xff] %v8062_v18  ;;  %v8075_v4 = vmul.f32 %v8037_v20, %v2120_v23  ;;  %v11338_v38 = vld [vmem:[#allocation79_spill] sm:$0xff]  ;;  %v1935_v27 = vadd.f32 %v1927_v3, %v1866_v5  ;;  %v1924_v51 = vmul.f32 %v7954_v57, %v1911_v24  ;;  %v11341_v35 = vld [vmem:[#allocation81_spill] sm:$0xff] }
 0x21e   : > { %11335 = vst [vmem:[#allocation63_spill] sm:$0xff] %v8070_v58  ;;  %11336 = vst [vmem:[#allocation65_spill] sm:$0xff] %v8072_v48  ;;  %v2122_v8 = vmul.f32 %v11338_v38, %v2082_v30  ;;  %v8078_v42 = vld [vmem:[#allocation2 + $0x3f] sm:$0xff]  ;;  %v1913_v54 = vmul.f32 %v11341_v35, %v8058_v28  ;;  %v11343_v23 = vld [vmem:[#allocation89_spill] sm:$0xff]  ;;  %v1159_v45 = vmul.f32 %v1126_v17, %v1103_v61 }
 0x21f   : > { %11337 = vst [vmem:[#allocation22_spill] sm:$0xff] %v8075_v4  ;;  %11339 = vst [vmem:[#allocation67_spill] sm:$0xff] %v8078_v42  ;;  %v11340_v52 = vld [vmem:[#allocation143_spill] sm:$0xff]  ;;  %v11342_v59 = vld [vmem:[#allocation88_spill] sm:$0xff]  ;;  %v1981_v4 = vmul.f32 %v11343_v23, %v8062_v18  ;;  %v8095_v24 = vmul.f32 %v7954_v57, %v1910_v15  ;;  %v1932_v56 = vadd.f32 %v1924_v51, %v1863_v50 }
 0x220   : > { %v1171_v62 = vmul.f32 %v11340_v52, %v1158_v12  ;;  %v1980_v48 = vmul.f32 %v11342_v59, %v8060_v34  ;;  %v11344_v3 = vld [vmem:[#allocation83_spill] sm:$0xff]  ;;  %v11345_v30 = vld [vmem:[#allocation82_spill] sm:$0xff]  ;;  %v8100_v35 = vld [vmem:[%s10918_s4 + $0xf] ss:$0 sm:$0xff]  ;;  %v8111_v61 = vmul.f32 %v8037_v20, %v2122_v8  ;;  %v1172_v53 = vmul.f32 %v11340_v52, %v1159_v45 }
 0x221   : > { %v1915_v5 = vmul.f32 %v11344_v3, %v8081_v6  ;;  %v2185_v38 = vmul.f32 %v11345_v30, %v2145_v26  ;;  %v11346_v12 = vld [vmem:[#allocation146_spill] sm:$0xff]  ;;  %v11347_v59 = vld [vmem:[#allocation84_spill] sm:$0xff]  ;;  %v11348_v18 = vld [vmem:[#allocation85_spill] sm:$0xff]  ;;  %v8108_v30 = vpop.permute.xlu1 %2576 }
 0x222   : > { %v1240_v58 = vadd.f32 %v11346_v12, %v1171_v62  ;;  %v2188_v23 = vmul.f32 %v11347_v59, %v7811_v37  ;;  %v2190_v34 = vmul.f32 %v11348_v18, %v7976_v0  ;;  %v11349_v3 = vld [vmem:[#allocation91_spill] sm:$0xff]  ;;  %11350 = vst [vmem:[#allocation69_spill] sm:$0xff] %v8108_v30  ;;  %11351 = vst [vmem:[#allocation71_spill] sm:$0xff] %v8111_v61  ;;  %v11352_v17 = vld [vmem:[#allocation16_spill] sm:$0xff]  ;;  %v1141_v30 = vpop.permute.xlu0 %1140 }
 0x223   : > { %v1983_v26 = vmul.f32 %v11349_v3, %v8078_v42  ;;  %v11353_v62 = vld [vmem:[#allocation86_spill] sm:$0xff]  ;;  %v11354_v12 = vld [vmem:[#allocation25_spill] sm:$0xff]  ;;  %v8118_v37 = vmul.f32 %v7954_v57, %v1913_v54  ;;  %v1993_v18 = vmul.f32 %v8009_v41, %v1980_v48  ;;  %v1994_v59 = vmul.f32 %v8009_v41, %v1981_v4  ;;  %v8122_v3 = vld [vmem:[#allocation2 + $0x23] sm:$0xff] }
 0x224   : > { %v1978_v15 = vmul.f32 %v11353_v62, %v11352_v17  ;;  %v1309_v44 = vadd.f32 %v11354_v12, %v1240_v58  ;;  %v8125_v8 = vmul.f32 %v7954_v57, %v1915_v5  ;;  %v8128_v17 = vmul.f32 %v8100_v35, %v2185_v38  ;;  %v8130_v58 = vld [vmem:[#allocation2 + $0x3c] sm:$0xff]  ;;  %v11358_v45 = vld [vmem:[#allocation12_spill] sm:$0xff]  ;;  %v11360_v57 = vld [vmem:[#allocation14_spill] sm:$0xff] }
 0x225   : > { %11355 = vst [vmem:[#allocation76_spill] sm:$0xff] %v8118_v37  ;;  %v1241_v50 = vadd.f32 %v11358_v45, %v1172_v53  ;;  %v1162_v51 = vmul.f32 %v8122_v3, %v1141_v30  ;;  %v8135_v54 = vmul.f32 %v8100_v35, %v2188_v23  ;;  %v8138_v4 = vmul.f32 %v8100_v35, %v2190_v34  ;;  %v2009_v62 = vld [vmem:[#allocation2 + $0x28] sm:$0xff]  ;;  %v8142_v12 = vpop.permute.xlu1 %2584  ;;  %v11363_v53 = vld [vmem:[#allocation90_spill] sm:$0xff]  ;;  %v2008_v23 = vld [vmem:[#allocation2 + $0x20] sm:$0xff] }
 0x226   : > { %11356 = vst [vmem:[#allocation77_spill] sm:$0xff] %v8125_v8  ;;  %11357 = vst [vmem:[#allocation80_spill] sm:$0xff] %v8128_v17  ;;  %v1996_v48 = vmul.f32 %v8009_v41, %v1983_v26  ;;  %v1378_v5 = vadd.f32 %v11360_v57, %v1309_v44  ;;  %v8144_v38 = vld [vmem:[#allocation2 + $0x4c] sm:$0xff]  ;;  %v8147_v17 = vmul.f32 %v8009_v41, %v1978_v15  ;;  %v11364_v45 = vld [vmem:[#allocation19_spill] sm:$0xff] }
 0x227   : > { %11359 = vst [vmem:[#allocation78_spill] sm:$0xff] %v8138_v4  ;;  %11361 = vst [vmem:[#allocation79_spill] sm:$0xff] %v8142_v12  ;;  %v2255_v30 = vmul.f32 %v11363_v53, %v7958_v16  ;;  %v1310_v61 = vadd.f32 %v11364_v45, %v1241_v50  ;;  %v1175_v34 = vmul.f32 %v11340_v52, %v1162_v51  ;;  %v8156_v44 = vld [vmem:[%s10918_s4 + $0x10] ss:$0 sm:$0xff]  ;;  %v11365_v57 = vld [vmem:[#allocation92_spill] sm:$0xff]  ;;  %v1151_v53 = vpop.permute.xlu0 %1150 }
 0x228   : > { %11362 = vst [vmem:[#allocation143_spill] sm:$0xff] %v8147_v17  ;;  %v2001_v8 = vadd.f32 %v1993_v18, %v1932_v56  ;;  %v2002_v26 = vadd.f32 %v1994_v59, %v1933_v22  ;;  %v2258_v12 = vmul.f32 %v11365_v57, %v8130_v58  ;;  %v11366_v41 = vld [vmem:[#allocation94_spill] sm:$0xff]  ;;  %v11367_v42 = vld [vmem:[#allocation97_spill] sm:$0xff]  ;;  %v11368_v45 = vld [vmem:[#allocation39_spill] sm:$0xff]  ;;  %v2004_v18 = vadd.f32 %v1996_v48, %v1935_v27 }
 0x229   : > { %v2260_v15 = vmul.f32 %v11366_v41, %v8144_v38  ;;  %v8162_v17 = vld [vmem:[#allocation2 + $0x33] sm:$0xff]  ;;  %v2049_v50 = vmul.f32 %v11367_v42, %v2009_v62  ;;  %v1379_v51 = vadd.f32 %v11368_v45, %v1310_v61  ;;  %v1244_v56 = vadd.f32 %v7759_v47, %v1175_v34  ;;  %v11369_v59 = vld [vmem:[#allocation95_spill] sm:$0xff]  ;;  %v8172_v41 = vpop.permute.xlu1 %2592  ;;  %v8180_v42 = vld [vmem:[%s10918_s4 + $0x11] ss:$0 sm:$0xff] }
 0x22a   : > { %v1164_v22 = vmul.f32 %v8162_v17, %v1151_v53  ;;  %v2048_v37 = vmul.f32 %v11369_v59, %v2008_v23  ;;  %v2323_v57 = vmul.f32 %v11370_v46, %v8032_v13  ;;  %v11371_v4 = vld [vmem:[#allocation15_spill] sm:$0xff]  ;;  %11372 = vst [vmem:[#allocation81_spill] sm:$0xff] %v8172_v41  ;;  %v8175_v21 = vmul.f32 %v8156_v44, %v2255_v30  ;;  %v11373_v47 = vld [vmem:[#allocation13_spill] sm:$0xff]  ;;  %v11374_v27 = vld [vmem:[#allocation24_spill] sm:$0xff] }
 0x22b   : > { %v1447_v31 = vadd.f32 %v11371_v4, %v1378_v5  ;;  %v1448_v61 = vadd.f32 %v11373_v47, %v1379_v51  ;;  %v1313_v48 = vadd.f32 %v11374_v27, %v1244_v56  ;;  %v8186_v46 = vmul.f32 %v8156_v44, %v2258_v12  ;;  %v2011_v4 = vld [vmem:[#allocation2 + $0x38] sm:$0xff]  ;;  %v8195_v53 = vld [vmem:[#allocation2 + $0x48] sm:$0xff] }
 0x22c   : > { %v1177_v62 = vmul.f32 %v11340_v52, %v1164_v22  ;;  %v8189_v13 = vmul.f32 %v8156_v44, %v2260_v15  ;;  %v11375_v5 = vld [vmem:[#allocation98_spill] sm:$0xff]  ;;  %v2071_v23 = vadd.f32 %v8056_v60, %v2002_v26  ;;  %v2062_v34 = vmul.f32 %v8023_v33, %v2049_v50  ;;  %v11376_v51 = vld [vmem:[#allocation8_spill] sm:$0xff]  ;;  %v11377_v52 = vld [vmem:[#allocation21_spill] sm:$0xff] }
 0x22d   : > { %v2326_v30 = vmul.f32 %v11375_v5, %v8058_v28  ;;  %v2079_v45 = vld [vmem:[#allocation2 + $0x31] sm:$0xff]  ;;  %v1517_v56 = vadd.f32 %v11376_v51, %v1448_v61  ;;  %v1382_v22 = vadd.f32 %v11377_v52, %v1313_v48  ;;  %v8201_v15 = vmul.f32 %v8023_v33, %v2048_v37  ;;  %v11379_v60 = vld [vmem:[#allocation32_spill] sm:$0xff]  ;;  %v11380_v50 = vld [vmem:[#allocation99_spill] sm:$0xff] }
 0x22e   : > { %v1246_v12 = vadd.f32 %v7789_v40, %v1177_v62  ;;  %v8204_v59 = vmul.f32 %v8180_v42, %v2323_v57  ;;  %v2073_v47 = vadd.f32 %v8065_v32, %v2004_v18  ;;  %v1516_v26 = vadd.f32 %v11379_v60, %v1447_v31  ;;  %v2076_v5 = vld [vmem:[#allocation2 + $0x19] sm:$0xff]  ;;  %v8209_v41 = vld [vmem:[#allocation2 + $0x29] sm:$0xff]  ;;  %v8211_v61 = vld [vmem:[#allocation2 + $0x41] sm:$0xff]  ;;  %v8216_v62 = vpop.permute.xlu1 %2637 }
 0x22f   : > { %v2051_v27 = vmul.f32 %v11380_v50, %v2011_v4  ;;  %v1586_v48 = vadd.f32 %v7836_v39, %v1517_v56  ;;  %v1451_v40 = vadd.f32 %v7778_v36, %v1382_v22  ;;  %11381 = vst [vmem:[#allocation89_spill] sm:$0xff] %v8216_v62  ;;  %v11382_v57 = vld [vmem:[#allocation101_spill] sm:$0xff]  ;;  %v8221_v31 = vmul.f32 %v8180_v42, %v2326_v30  ;;  %v11383_v18 = vld [vmem:[#allocation100_spill] sm:$0xff]  ;;  %v11384_v51 = vld [vmem:[#allocation107_spill] sm:$0xff] }
 0x230   : > { %11378 = vst [vmem:[#allocation88_spill] sm:$0xff] %v8204_v59  ;;  %v1315_v37 = vadd.f32 %v7795_v49, %v1246_v12  ;;  %v2053_v32 = vmul.f32 %v11382_v57, %v8195_v53  ;;  %v2328_v4 = vmul.f32 %v11383_v18, %v8081_v6  ;;  %v2119_v52 = vmul.f32 %v11384_v51, %v2079_v45  ;;  %v11385_v56 = vld [vmem:[#allocation103_spill] sm:$0xff]  ;;  %v11386_v12 = vld [vmem:[#allocation105_spill] sm:$0xff] }
 0x231   : > { %v2070_v60 = vadd.f32 %v2062_v34, %v2001_v8  ;;  %v1655_v39 = vadd.f32 %v7896_v29, %v1586_v48  ;;  %v1520_v36 = vadd.f32 %v7829_v2, %v1451_v40  ;;  %v2116_v22 = vmul.f32 %v11385_v56, %v2076_v5  ;;  %v11387_v30 = vld [vmem:[#allocation109_spill] sm:$0xff]  ;;  %v11388_v62 = vld [vmem:[#allocation27_spill] sm:$0xff] }
 0x232   : > { %v1384_v49 = vadd.f32 %v7814_v19, %v1315_v37  ;;  %v2118_v50 = vmul.f32 %v11386_v12, %v8209_v41  ;;  %v2121_v57 = vmul.f32 %v11387_v30, %v8211_v61  ;;  %v1585_v59 = vadd.f32 %v11388_v62, %v1516_v26  ;;  %v2353_v8 = vld [vmem:[#allocation2 + $0x2b] sm:$0xff]  ;;  %v11389_v34 = vld [vmem:[#allocation23_spill] sm:$0xff]  ;;  %v8241_v48 = vpop.permute.xlu1 %2645  ;;  %v11394_v62 = vld [vmem:[#allocation106_spill] sm:$0xff] }
 0x233   : > { %v8236_v18 = vmul.f32 %v8023_v33, %v2051_v27  ;;  %v1724_v29 = vadd.f32 %v7886_v9, %v1655_v39  ;;  %v1589_v2 = vadd.f32 %v11389_v34, %v1520_v36  ;;  %v11390_v45 = vld [vmem:[#allocation29_spill] sm:$0xff]  ;;  %11391 = vst [vmem:[#allocation83_spill] sm:$0xff] %v8241_v48  ;;  %v8244_v5 = vmul.f32 %v8023_v33, %v2053_v32  ;;  %v11392_v37 = vld [vmem:[#allocation104_spill] sm:$0xff]  ;;  %v11395_v32 = vld [vmem:[#allocation26_spill] sm:$0xff] }
 0x234   : > { %v1453_v19 = vadd.f32 %v11390_v45, %v1384_v49  ;;  %v8247_v40 = vmul.f32 %v8180_v42, %v2328_v4  ;;  %v2132_v26 = vmul.f32 %v8037_v20, %v2119_v52  ;;  %v2393_v27 = vmul.f32 %v11392_v37, %v2353_v8  ;;  %v8254_v9 = vld [vmem:[%s10918_s4 + $0x12] ss:$0 sm:$0xff]  ;;  %v8261_v4 = vld [vmem:[#allocation2 + $0x53] sm:$0xff]  ;;  %v11398_v34 = vld [vmem:[#allocation108_spill] sm:$0xff] }
 0x235   : > { %11393 = vst [vmem:[#allocation82_spill] sm:$0xff] %v8254_v9  ;;  %v2396_v51 = vmul.f32 %v11394_v62, %v7976_v0  ;;  %v1793_v39 = vadd.f32 %v7979_v14, %v1724_v29  ;;  %v1658_v33 = vadd.f32 %v7908_v10, %v1589_v2  ;;  %11396 = vst [vmem:[#allocation146_spill] sm:$0xff] %v8261_v4  ;;  %v11397_v12 = vld [vmem:[#allocation46_spill] sm:$0xff]  ;;  %v11399_v29 = vld [vmem:[#allocation33_spill] sm:$0xff] }
 0x236   : > { %v1522_v36 = vadd.f32 %v11395_v32, %v1453_v19  ;;  %v8264_v52 = vmul.f32 %v8037_v20, %v2116_v22  ;;  %v2131_v49 = vmul.f32 %v8037_v20, %v2118_v50  ;;  %v2134_v56 = vmul.f32 %v8037_v20, %v2121_v57  ;;  %v8274_v45 = vpop.permute.xlu1 %2649  ;;  %v11401_v50 = vld [vmem:[#allocation110_spill] sm:$0xff]  ;;  %v11402_v57 = vld [vmem:[#allocation116_spill] sm:$0xff] }
 0x237   : > { %v1654_v30 = vadd.f32 %v11397_v12, %v1585_v59  ;;  %v2398_v0 = vmul.f32 %v11398_v34, %v8261_v4  ;;  %v1862_v14 = vadd.f32 %v7969_v25, %v1793_v39  ;;  %v1727_v10 = vadd.f32 %v7898_v43, %v1658_v33  ;;  %11400 = vst [vmem:[#allocation84_spill] sm:$0xff] %v8274_v45  ;;  %v8288_v43 = vld [vmem:[%s10918_s4 + $0x13] ss:$0 sm:$0xff]  ;;  %v8290_v25 = vld [vmem:[#allocation2 + $0x34] sm:$0xff] }
 0x238   : > { %v1591_v2 = vadd.f32 %v11399_v29, %v1522_v36  ;;  %v2140_v19 = vadd.f32 %v2132_v26, %v2071_v23  ;;  %v8277_v22 = vmul.f32 %v8254_v9, %v2393_v27  ;;  %v2461_v20 = vmul.f32 %v11401_v50, %v7958_v16  ;;  %11403 = vst [vmem:[#allocation85_spill] sm:$0xff] %v8288_v43  ;;  %v11405_v36 = vld [vmem:[#allocation114_spill] sm:$0xff]  ;;  %v11440_v45 = vld [vmem:[#allocation133_spill] sm:$0xff] }
 0x239   : > { %v2187_v59 = vmul.f32 %v2353_v8, %v11402_v57  ;;  %v8283_v37 = vmul.f32 %v8254_v9, %v2396_v51  ;;  %v1931_v23 = vadd.f32 %v8095_v24, %v1862_v14  ;;  %v1796_v26 = vadd.f32 %v7996_v11, %v1727_v10  ;;  %v11404_v8 = vld [vmem:[#allocation112_spill] sm:$0xff]  ;;  %v11406_v24 = vld [vmem:[#allocation113_spill] sm:$0xff]  ;;  %v8307_v34 = vld [vmem:[#allocation2 + $0x3b] sm:$0xff] }
 0x23a   : > { %v1660_v27 = vadd.f32 %v7918_v7, %v1591_v2  ;;  %v2139_v62 = vadd.f32 %v2131_v49, %v2070_v60  ;;  %v2142_v16 = vadd.f32 %v2134_v56, %v2073_v47  ;;  %v2464_v39 = vmul.f32 %v11404_v8, %v8130_v58  ;;  %v8297_v51 = vld [vmem:[#allocation2 + $0x44] sm:$0xff]  ;;  %11407 = vst [vmem:[#allocation91_spill] sm:$0xff] %v8307_v34  ;;  %v8310_v47 = vpop.permute.xlu1 %2657  ;;  %v2491_v60 = vld [vmem:[#allocation2 + $0x2d] sm:$0xff] }
 0x23b   : > { %v1723_v33 = vadd.f32 %v7923_v1, %v1654_v30  ;;  %v8301_v32 = vmul.f32 %v8254_v9, %v2398_v0  ;;  %v2186_v12 = vmul.f32 %v11405_v36, %v8122_v3  ;;  %v2466_v11 = vmul.f32 %v11406_v24, %v8144_v38  ;;  %11408 = vst [vmem:[#allocation16_spill] sm:$0xff] %v8310_v47  ;;  %v11410_v56 = vld [vmem:[#allocation125_spill] sm:$0xff]  ;;  %v11411_v0 = vld [vmem:[#allocation127_spill] sm:$0xff]  ;;  %v11412_v10 = vld [vmem:[#allocation72_spill] sm:$0xff] }
 0x23c   : > { %v1729_v7 = vadd.f32 %v7905_v63, %v1660_v27  ;;  %v8313_v58 = vmul.f32 %v8288_v43, %v2461_v20  ;;  %v2200_v1 = vmul.f32 %v8100_v35, %v2187_v59  ;;  %v2209_v49 = vadd.f32 %v8135_v54, %v2140_v19  ;;  %v11413_v29 = vld [vmem:[#allocation74_spill] sm:$0xff]  ;;  %v11414_v20 = vld [vmem:[#allocation117_spill] sm:$0xff]  ;;  %v11416_v19 = vld [vmem:[#allocation48_spill] sm:$0xff] }
 0x23d   : > { %v2257_v30 = vmul.f32 %v11410_v56, %v8290_v25  ;;  %v2259_v38 = vmul.f32 %v11411_v0, %v8297_v51  ;;  %v1865_v14 = vadd.f32 %v7971_v55, %v1796_v26  ;;  %v2000_v2 = vadd.f32 %v11413_v29, %v1931_v23  ;;  %v11415_v59 = vld [vmem:[#allocation78_spill] sm:$0xff]  ;;  %v8331_v8 = vld [vmem:[#allocation2 + $0x4b] sm:$0xff]  ;;  %v2214_v23 = vld [vmem:[#allocation2 + $0x1c] sm:$0xff] }
 0x23e   : > { %11409 = vst [vmem:[#allocation86_spill] sm:$0xff] %v8313_v58  ;;  %v1798_v63 = vadd.f32 %v11412_v10, %v1729_v7  ;;  %v8325_v50 = vmul.f32 %v8288_v43, %v2464_v39  ;;  %v2189_v57 = vmul.f32 %v11414_v20, %v8307_v34  ;;  %v2211_v54 = vadd.f32 %v11415_v59, %v2142_v16  ;;  %v11418_v26 = vld [vmem:[#allocation118_spill] sm:$0xff]  ;;  %v11419_v7 = vld [vmem:[#allocation41_spill] sm:$0xff]  ;;  %v11420_v39 = vld [vmem:[#allocation123_spill] sm:$0xff]  ;;  %v8340_v0 = vpop.permute.xlu1 %2665 }
 0x23f   : > { %v1792_v27 = vadd.f32 %v11416_v19, %v1723_v33  ;;  %11417 = vst [vmem:[#allocation25_spill] sm:$0xff] %v8331_v8  ;;  %v2199_v36 = vmul.f32 %v8100_v35, %v2186_v12  ;;  %v8335_v55 = vmul.f32 %v8288_v43, %v2466_v11  ;;  %v2531_v24 = vmul.f32 %v11418_v26, %v2491_v60  ;;  %v11422_v16 = vld [vmem:[#allocation119_spill] sm:$0xff]  ;;  %v8347_v33 = vld [vmem:[%s10918_s4 + $0x14] ss:$0 sm:$0xff]  ;;  %v11425_v19 = vld [vmem:[#allocation120_spill] sm:$0xff] }
 0x240   : > { %v2256_v56 = vmul.f32 %v11420_v39, %v11419_v7  ;;  %11421 = vst [vmem:[#allocation12_spill] sm:$0xff] %v8340_v0  ;;  %v2208_v10 = vadd.f32 %v2200_v1, %v2139_v62  ;;  %v2191_v29 = vmul.f32 %v11422_v16, %v8331_v8  ;;  %v2270_v12 = vmul.f32 %v8156_v44, %v2257_v30  ;;  %v11423_v11 = vld [vmem:[#allocation47_spill] sm:$0xff]  ;;  %v11426_v62 = vld [vmem:[#allocation76_spill] sm:$0xff]  ;;  %v11427_v4 = vld [vmem:[#allocation122_spill] sm:$0xff] }
 0x241   : > { %v1867_v20 = vadd.f32 %v11423_v11, %v1798_v63  ;;  %v8351_v59 = vld [vmem:[#allocation2 + $0x55] sm:$0xff]  ;;  %v2534_v26 = vmul.f32 %v11425_v19, %v8081_v6  ;;  %v2272_v39 = vmul.f32 %v8156_v44, %v2259_v38  ;;  %v1934_v1 = vadd.f32 %v11426_v62, %v1865_v14  ;;  %v11428_v30 = vld [vmem:[#allocation121_spill] sm:$0xff]  ;;  %v11429_v63 = vld [vmem:[#allocation64_spill] sm:$0xff] }
 0x242   : > { %11424 = vst [vmem:[#allocation14_spill] sm:$0xff] %v8351_v59  ;;  %v2069_v16 = vadd.f32 %v8201_v15, %v2000_v2  ;;  %v8359_v0 = vmul.f32 %v8100_v35, %v2189_v57  ;;  %v2254_v8 = vmul.f32 %v11427_v4, %v2214_v23  ;;  %v2536_v47 = vmul.f32 %v11428_v30, %v8351_v59  ;;  %v8365_v48 = vld [vmem:[#allocation2 + $0x4f] sm:$0xff]  ;;  %v11431_v14 = vld [vmem:[#allocation68_spill] sm:$0xff]  ;;  %v11433_v2 = vld [vmem:[#allocation67_spill] sm:$0xff]  ;;  %v8386_v59 = vpop.permute.xlu1 %2710 }
 0x243   : > { %v1861_v11 = vadd.f32 %v11429_v63, %v1792_v27  ;;  %11430 = vst [vmem:[#allocation90_spill] sm:$0xff] %v8365_v48  ;;  %v8368_v6 = vmul.f32 %v8347_v33, %v2531_v24  ;;  %v2269_v38 = vmul.f32 %v8156_v44, %v2256_v56  ;;  %v11432_v19 = vld [vmem:[#allocation124_spill] sm:$0xff]  ;;  %v11434_v57 = vld [vmem:[#allocation126_spill] sm:$0xff]  ;;  %v8376_v4 = vmul.f32 %v8100_v35, %v2191_v29  ;;  %v11436_v63 = vld [vmem:[#allocation77_spill] sm:$0xff] }
 0x244   : > { %v2599_v15 = vmul.f32 %v11432_v19, %v11431_v14  ;;  %v2602_v62 = vmul.f32 %v11434_v57, %v11433_v2  ;;  %v2278_v23 = vadd.f32 %v2270_v12, %v2209_v49  ;;  %v8381_v27 = vld [vmem:[%s10918_s4 + $0x15] ss:$0 sm:$0xff]  ;;  %v11435_v24 = vld [vmem:[#allocation128_spill] sm:$0xff]  ;;  %v1936_v56 = vadd.f32 %v11436_v63, %v1867_v20  ;;  %v11438_v29 = vld [vmem:[#allocation63_spill] sm:$0xff] }
 0x245   : > { %v2604_v30 = vmul.f32 %v11435_v24, %v8365_v48  ;;  %v8389_v14 = vmul.f32 %v8347_v33, %v2534_v26  ;;  %v2280_v19 = vadd.f32 %v2272_v39, %v2211_v54  ;;  %v11437_v2 = vld [vmem:[#allocation70_spill] sm:$0xff]  ;;  %v2138_v49 = vadd.f32 %v11438_v29, %v2069_v16  ;;  %v11441_v48 = vld [vmem:[#allocation49_spill] sm:$0xff]  ;;  %v11443_v26 = vld [vmem:[#allocation56_spill] sm:$0xff] }
 0x246   : > { %v2003_v35 = vadd.f32 %v11437_v2, %v1934_v1  ;;  %v8394_v12 = vmul.f32 %v8156_v44, %v2254_v8  ;;  %v8397_v57 = vmul.f32 %v8347_v33, %v2536_v47  ;;  %v2325_v24 = vmul.f32 %v2491_v60, %v11440_v45  ;;  %v11444_v39 = vld [vmem:[#allocation131_spill] sm:$0xff]  ;;  %v11448_v8 = vld [vmem:[#allocation132_spill] sm:$0xff] }
 0x247   : > { %v1930_v20 = vadd.f32 %v11441_v48, %v1861_v11  ;;  %v2277_v63 = vadd.f32 %v2269_v38, %v2208_v10  ;;  %v8402_v58 = vmul.f32 %v8381_v27, %v2599_v15  ;;  %v8405_v54 = vmul.f32 %v8381_v27, %v2602_v62  ;;  %v8409_v16 = vld [vmem:[#allocation2 + $0x3d] sm:$0xff]  ;;  %v2357_v10 = vld [vmem:[#allocation2 + $0x4b] sm:$0xff]  ;;  %v11449_v11 = vld [vmem:[#allocation58_spill] sm:$0xff]  ;;  %v8418_v15 = vpop.permute.xlu1 %2714 }
 0x248   : > { %11439 = vst [vmem:[#allocation19_spill] sm:$0xff] %v8397_v57  ;;  %v2324_v1 = vmul.f32 %v11444_v39, %v11443_v26  ;;  %11445 = vst [vmem:[#allocation94_spill] sm:$0xff] %v8409_v16  ;;  %v8412_v44 = vmul.f32 %v8381_v27, %v2604_v30  ;;  %v11447_v47 = vld [vmem:[#allocation55_spill] sm:$0xff]  ;;  %v2347_v48 = vadd.f32 %v8221_v31, %v2278_v23  ;;  %v8423_v62 = vld [vmem:[%s10918_s4 + $0x16] ss:$0 sm:$0xff] }
 0x249   : > { %11442 = vst [vmem:[#allocation92_spill] sm:$0xff] %v8402_v58  ;;  %v2669_v45 = vmul.f32 %v11448_v8, %v11447_v47  ;;  %v2634_v60 = vld [vmem:[#allocation2 + $0x58] sm:$0xff]  ;;  %v2005_v38 = vadd.f32 %v11449_v11, %v1936_v56  ;;  %11450 = vst [vmem:[#allocation39_spill] sm:$0xff] %v8418_v15  ;;  %v11451_v2 = vld [vmem:[#allocation144_spill] sm:$0xff]  ;;  %v2349_v29 = vadd.f32 %v8247_v40, %v2280_v19 }
 0x24a   : > { %11446 = vst [vmem:[#allocation97_spill] sm:$0xff] %v8412_v44  ;;  %v2395_v30 = vmul.f32 %v11451_v2, %v8307_v34  ;;  %v2072_v39 = vadd.f32 %v8236_v18, %v2003_v35  ;;  %v2207_v47 = vadd.f32 %v2199_v36, %v2138_v49  ;;  %v8429_v8 = vld [vmem:[#allocation2 + $0x4d] sm:$0xff]  ;;  %v2338_v31 = vmul.f32 %v8180_v42, %v2325_v24  ;;  %v11453_v23 = vld [vmem:[#allocation135_spill] sm:$0xff]  ;;  %v11457_v19 = vld [vmem:[#allocation136_spill] sm:$0xff] }
 0x24b   : > { %11452 = vst [vmem:[#allocation95_spill] sm:$0xff] %v8429_v8  ;;  %v2327_v56 = vmul.f32 %v11453_v23, %v8409_v16  ;;  %v11454_v11 = vld [vmem:[#allocation134_spill] sm:$0xff]  ;;  %v11455_v15 = vld [vmem:[#allocation143_spill] sm:$0xff]  ;;  %v2337_v57 = vmul.f32 %v8180_v42, %v2324_v1  ;;  %v11456_v2 = vld [vmem:[#allocation137_spill] sm:$0xff]  ;;  %v2674_v18 = vmul.f32 %v11457_v19, %v2634_v60  ;;  %v8443_v49 = vmul.f32 %v8423_v62, %v2669_v45 }
 0x24c   : > { %v2672_v44 = vmul.f32 %v11454_v11, %v8195_v53  ;;  %v1999_v58 = vadd.f32 %v11455_v15, %v1930_v20  ;;  %v2329_v40 = vmul.f32 %v11456_v2, %v8429_v8  ;;  %v11458_v36 = vld [vmem:[#allocation147_spill] sm:$0xff]  ;;  %v11460_v34 = vld [vmem:[#allocation138_spill] sm:$0xff]  ;;  %v2074_v20 = vadd.f32 %v8244_v5, %v2005_v38  ;;  %v8450_v15 = vpop.permute.xlu1 %2722  ;;  %v11461_v60 = vld [vmem:[#allocation141_spill] sm:$0xff] }
 0x24d   : > { %v2397_v35 = vmul.f32 %v11458_v36, %v2357_v10  ;;  %v11459_v24 = vld [vmem:[#allocation139_spill] sm:$0xff]  ;;  %v2737_v53 = vmul.f32 %v11460_v34, %v8209_v41  ;;  %v8455_v1 = vld [vmem:[%s10918_s4 + $0x17] ss:$0 sm:$0xff]  ;;  %v2394_v11 = vmul.f32 %v11461_v60, %v8162_v17  ;;  %v2408_v45 = vmul.f32 %v8254_v9, %v2395_v30  ;;  %v11464_v30 = vld [vmem:[#allocation140_spill] sm:$0xff] }
 0x24e   : > { %v2392_v23 = vmul.f32 %v11459_v24, %v8122_v3  ;;  %v11462_v2 = vld [vmem:[#allocation22_spill] sm:$0xff]  ;;  %v2276_v3 = vadd.f32 %v8175_v21, %v2207_v47  ;;  %v2346_v36 = vadd.f32 %v2338_v31, %v2277_v63  ;;  %v2340_v41 = vmul.f32 %v8180_v42, %v2327_v56  ;;  %v5850_v24 = vpop.f32.mrf.mxu1  ;;  %v11465_v47 = vld [vmem:[#allocation71_spill] sm:$0xff] }
 0x24f   : > { %v2141_v19 = vadd.f32 %v11462_v2, %v2072_v39  ;;  %v8464_v5 = vmul.f32 %v8423_v62, %v2672_v44  ;;  %v11463_v34 = vld [vmem:[#allocation66_spill] sm:$0xff]  ;;  %v8468_v8 = vmul.f32 %v8180_v42, %v2329_v40  ;;  %v8471_v60 = vmul.f32 %v8423_v62, %v2674_v18  ;;  %v6277_v42 = vld [vmem:[%s10917_s3] ss:$0 sm:$0xff] }
 0x250   : > { %v2068_v38 = vadd.f32 %v11463_v34, %v1999_v58  ;;  %v2740_v39 = vmul.f32 %v11464_v30, %v8211_v61  ;;  %v2410_v21 = vmul.f32 %v8254_v9, %v2397_v35  ;;  %v8477_v63 = vmul.f32 %v8254_v9, %v2392_v23  ;;  %v8483_v31 = vpop.permute.xlu1 %2730  ;;  %v832_v40 = vpop.f32.mrf.mxu1  ;;  %v11466_v2 = vld [vmem:[#allocation11_spill] sm:$0xff] }
 0x251   : > { %v8480_v44 = vmul.f32 %v8455_v1, %v2737_v53  ;;  %v2143_v58 = vadd.f32 %v11465_v47, %v2074_v20  ;;  %v861_v56 = vmul.f32 %v6277_v42, %v5850_v24  ;;  %v2407_v61 = vmul.f32 %v8254_v9, %v2394_v11  ;;  %v6278_v20 = vld [vmem:[%s10917_s3 + $0x1] ss:$0 sm:$0xff] }
 0x252   : > { %v2416_v18 = vadd.f32 %v2408_v45, %v2347_v48  ;;  %v2210_v35 = vadd.f32 %v8359_v0, %v2141_v19  ;;  %v2345_v23 = vadd.f32 %v2337_v57, %v2276_v3  ;;  %v2807_v53 = vmul.f32 %v11466_v2, %v8162_v17  ;;  %v8504_v0 = vld [vmem:[%s10918_s4 + $0x18] ss:$0 sm:$0xff]  ;;  %v11467_v57 = vld [vmem:[#allocation28_spill] sm:$0xff]  ;;  %v11470_v19 = vld [vmem:[#allocation7_spill] sm:$0xff] }
 0x253   : > { %v2137_v34 = vadd.f32 %v8264_v52, %v2068_v38  ;;  %v8496_v30 = vadd.f32 %v6278_v20, %v861_v56  ;;  %v860_v47 = vmul.f32 %v6277_v42, %v832_v40  ;;  %v8499_v24 = vmul.f32 %v8455_v1, %v2740_v39  ;;  %v11468_v52 = vld [vmem:[#allocation34_spill] sm:$0xff] }
 0x254   : > { %v2418_v11 = vadd.f32 %v2410_v21, %v2349_v29  ;;  %v2810_v17 = vmul.f32 %v11467_v57, %v2357_v10  ;;  %v2462_v48 = vmul.f32 %v11468_v52, %v11419_v7  ;;  %v8509_v45 = vld [vmem:[#allocation2 + $0x51] sm:$0xff]  ;;  %v2463_v3 = vmul.f32 %v11470_v19, %v8290_v25  ;;  %v8525_v40 = vpop.permute.xlu1 %2775  ;;  %v8527_v2 = vld [vmem:[#allocation2 + $0x5b] sm:$0xff] }
 0x255   : > { %11469 = vst [vmem:[#allocation96_spill] sm:$0xff] %v8509_v45  ;;  %v2212_v38 = vadd.f32 %v8376_v4, %v2143_v58  ;;  %v8515_v39 = vmul.f32 0.70710677, %v8496_v30  ;;  %v8517_v29 = vadd.f32 %v6278_v20, %v860_v47  ;;  %v2415_v21 = vadd.f32 %v2407_v61, %v2346_v36  ;;  %v11472_v42 = vld [vmem:[#allocation142_spill] sm:$0xff]  ;;  %11474 = vst [vmem:[#allocation24_spill] sm:$0xff] %v8527_v2  ;;  %v2835_v58 = vld [vmem:[#allocation2 + $0x2c] sm:$0xff] }
 0x256   : > { %v8521_v56 = vmul.f32 %v11472_v42, %v8509_v45  ;;  %v2279_v10 = vadd.f32 %v8186_v46, %v2210_v35  ;;  %v2414_v7 = vadd.f32 %v8277_v22, %v2345_v23  ;;  %v8530_v4 = vmul.f32 %v8504_v0, %v2807_v53  ;;  %v11475_v47 = vld [vmem:[#allocation80_spill] sm:$0xff]  ;;  %v11476_v46 = vld [vmem:[#allocation38_spill] sm:$0xff] }
 0x257   : > { %11471 = vst [vmem:[#allocation15_spill] sm:$0xff] %v8517_v29  ;;  %v2485_v20 = vadd.f32 %v8325_v50, %v2416_v18  ;;  %v2206_v36 = vadd.f32 %v11475_v47, %v2137_v34  ;;  %v8535_v61 = vand.u32 2147483647, %v8515_v39  ;;  %v2475_v57 = vmul.f32 %v8288_v43, %v2462_v48  ;;  %v11477_v52 = vld [vmem:[#allocation30_spill] sm:$0xff] }
 0x258   : > { %11473 = vst [vmem:[#allocation13_spill] sm:$0xff] %v8521_v56  ;;  %v2812_v22 = vmul.f32 %v11476_v46, %v8527_v2  ;;  %v8541_v35 = vadd.f32 %v8335_v55, %v2418_v11  ;;  %v8544_v23 = vmul.f32 0.70710677, %v8517_v29  ;;  %v8547_v53 = vmul.f32 %v8504_v0, %v2810_v17  ;;  %v8553_v47 = vpop.permute.xlu1 %2783  ;;  %v11478_v11 = vld [vmem:[#allocation9_spill] sm:$0xff]  ;;  %v11479_v17 = vld [vmem:[#allocation43_spill] sm:$0xff]  ;;  %v11485_v2 = vld [vmem:[#allocation44_spill] sm:$0xff] }
 0x259   : > { %v2476_v50 = vmul.f32 %v8288_v43, %v2463_v3  ;;  %v2281_v18 = vadd.f32 %v8189_v13, %v2212_v38  ;;  %v922_v34 = vmul.f32 0.3275911, %v8535_v61  ;;  %v2875_v48 = vmul.f32 %v11477_v52, %v2835_v58  ;;  %v8563_v38 = vld [vmem:[#allocation2 + $0x54] sm:$0xff]  ;;  %v11483_v52 = vld [vmem:[#allocation65_spill] sm:$0xff] }
 0x25a   : > { %v2348_v19 = vadd.f32 %v2340_v41, %v2279_v10  ;;  %v2483_v42 = vadd.f32 %v2475_v57, %v2414_v7  ;;  %v8556_v55 = vand.u32 2147483647, %v8544_v23  ;;  %v2465_v46 = vmul.f32 %v11478_v11, %v8297_v51  ;;  %11480 = vst [vmem:[#allocation98_spill] sm:$0xff] %v8563_v38  ;;  %v8571_v41 = vld [vmem:[%s10918_s4 + $0x19] ss:$0 sm:$0xff]  ;;  %v11481_v10 = vld [vmem:[#allocation37_spill] sm:$0xff] }
 0x25b   : > { %v2533_v9 = vmul.f32 %v11479_v17, %v8409_v16  ;;  %v2275_v3 = vadd.f32 %v8394_v12, %v2206_v36  ;;  %v930_v13 = vadd.f32 1.0, %v922_v34  ;;  %v8566_v58 = vmul.f32 %v8504_v0, %v2812_v22  ;;  %v11482_v57 = vld [vmem:[#allocation62_spill] sm:$0xff]  ;;  %v11484_v36 = vld [vmem:[#allocation40_spill] sm:$0xff] }
 0x25c   : > { %v2532_v7 = vmul.f32 %v11481_v10, %v8058_v28  ;;  %v2600_v11 = vmul.f32 %v11483_v52, %v11482_v57  ;;  %v921_v17 = vmul.f32 0.3275911, %v8556_v55  ;;  %v2484_v12 = vadd.f32 %v2476_v50, %v2415_v21  ;;  %v2908_v29 = vld [vmem:[#allocation2 + $0x4d] sm:$0xff]  ;;  %v8585_v16 = vpop.permute.xlu1 %2787 }
 0x25d   : > { %v2467_v34 = vmul.f32 %v11484_v36, %v8563_v38  ;;  %v2350_v22 = vadd.f32 %v8468_v8, %v2281_v18  ;;  %6181 = vrcp.f32 %v930_v13  ;;  %v2530_v45 = vmul.f32 %v11485_v2, %v11443_v26  ;;  %v11486_v8 = vld [vmem:[#allocation88_spill] sm:$0xff]  ;;  %v11487_v13 = vld [vmem:[#allocation10_spill] sm:$0xff] }
 0x25e   : > { %v2417_v56 = vadd.f32 %v8283_v37, %v2348_v19  ;;  %v2552_v10 = vadd.f32 %v8368_v6, %v2483_v42  ;;  %v929_v57 = vadd.f32 1.0, %v921_v17  ;;  %v8588_v52 = vmul.f32 %v8571_v41, %v2875_v48  ;;  %v11488_v19 = vld [vmem:[#allocation51_spill] sm:$0xff]  ;;  %v11489_v17 = vld [vmem:[#allocation69_spill] sm:$0xff] }
 0x25f   : > { %v2478_v21 = vmul.f32 %v8288_v43, %v2465_v46  ;;  %v2546_v50 = vmul.f32 %v8347_v33, %v2533_v9  ;;  %v2344_v18 = vadd.f32 %v11486_v8, %v2275_v3  ;;  %v8595_v26 = vmul.f32 %v11487_v13, %v8297_v51  ;;  %v2561_v42 = vld [vmem:[#allocation2 + $0x37] sm:$0xff] }
 0x260   : > { %v2545_v37 = vmul.f32 %v8347_v33, %v2532_v7  ;;  %v2613_v6 = vmul.f32 %v8381_v27, %v2600_v11  ;;  %6183 = vrcp.f32 %v929_v57  ;;  %v2480_v2 = vmul.f32 %v8288_v43, %v2467_v34  ;;  %v8605_v13 = vpop.permute.xlu1 %2795  ;;  %v11490_v7 = vld [vmem:[#allocation50_spill] sm:$0xff]  ;;  %v11491_v34 = vld [vmem:[#allocation52_spill] sm:$0xff] }
 0x261   : > { %v2535_v48 = vmul.f32 %v2908_v29, %v11488_v19  ;;  %v2419_v46 = vadd.f32 %v8301_v32, %v2350_v22  ;;  %v1026_v9 = vsub.f32 0.0, %v8535_v61  ;;  %v2543_v3 = vmul.f32 %v8347_v33, %v2530_v45  ;;  %v2563_v19 = vld [vmem:[#allocation2 + $0x47] sm:$0xff]  ;;  %v2698_v32 = vld [vmem:[#allocation2 + $0x31] sm:$0xff]  ;;  %v8614_v45 = vld [vmem:[%s10918_s4 + $0x1a] ss:$0 sm:$0xff] }
 0x262   : > { %v2601_v36 = vmul.f32 %v11489_v17, %v2561_v42  ;;  %v2486_v51 = vadd.f32 %v2478_v21, %v2417_v56  ;;  %v2621_v8 = vadd.f32 %v2613_v6, %v2552_v10  ;;  %v2945_v11 = vmul.f32 %v11490_v7, %v8058_v28  ;;  %v8616_v56 = vld [vmem:[#allocation2 + $0x5d] sm:$0xff]  ;;  %v11494_v17 = vld [vmem:[#allocation81_spill] sm:$0xff] }
 0x263   : > { %v2554_v57 = vadd.f32 %v2546_v50, %v2485_v20  ;;  %v2948_v43 = vmul.f32 %v11491_v34, %v2908_v29  ;;  %v2413_v38 = vadd.f32 %v8477_v63, %v2344_v18  ;;  %v2553_v22 = vadd.f32 %v2545_v37, %v2484_v12  ;;  %v11492_v10 = vld [vmem:[#allocation79_spill] sm:$0xff]  ;;  %v11493_v20 = vld [vmem:[#allocation61_spill] sm:$0xff] }
 0x264   : > { %v2603_v21 = vmul.f32 %v11492_v10, %v2563_v19  ;;  %v2738_v6 = vmul.f32 %v8386_v59, %v2698_v32  ;;  %v1025_v28 = vsub.f32 0.0, %v8556_v55  ;;  %v2548_v29 = vmul.f32 %v8347_v33, %v2535_v48  ;;  %v2565_v12 = vld [vmem:[#allocation2 + $0x57] sm:$0xff]  ;;  %v8629_v59 = vpop.permute.xlu1 %2803 }
 0x265   : > { %v2950_v63 = vmul.f32 %v11493_v20, %v8616_v56  ;;  %v2488_v50 = vadd.f32 %v2480_v2, %v2419_v46  ;;  %v1034_v18 = vmul.f32 %v1026_v9, %v8535_v61  ;;  %v2614_v37 = vmul.f32 %v8381_v27, %v2601_v36  ;;  %v11495_v32 = vld [vmem:[#allocation86_spill] sm:$0xff]  ;;  %v2631_v61 = vld [vmem:[#allocation2 + $0x40] sm:$0xff] }
 0x266   : > { %v2555_v42 = vadd.f32 %v8389_v14, %v2486_v51  ;;  %v2605_v7 = vmul.f32 %v11494_v17, %v2565_v12  ;;  %v2690_v34 = vadd.f32 %v8443_v49, %v2621_v8  ;;  %v2958_v19 = vmul.f32 %v8614_v45, %v2945_v11  ;;  %v11496_v36 = vld [vmem:[#allocation84_spill] sm:$0xff]  ;;  %v2630_v17 = vld [vmem:[#allocation2 + $0x38] sm:$0xff] }
 0x267   : > { %v8633_v48 = vmul.f32 %v8614_v45, %v2948_v43  ;;  %v2482_v2 = vadd.f32 %v11495_v32, %v2413_v38  ;;  %v2623_v46 = vadd.f32 %v8405_v54, %v2554_v57  ;;  %v2616_v9 = vmul.f32 %v8381_v27, %v2603_v21  ;;  %v11497_v43 = vld [vmem:[#allocation19_spill] sm:$0xff]  ;;  %v2628_v12 = vld [vmem:[#allocation2 + $0x28] sm:$0xff] }
 0x268   : > { %v2671_v14 = vmul.f32 %v11496_v36, %v2631_v61  ;;  %v2751_v51 = vmul.f32 %v8455_v1, %v2738_v6  ;;  %v1033_v49 = vmul.f32 %v1025_v28, %v8556_v55  ;;  %v2556_v8 = vadd.f32 %v2548_v29, %v8541_v35  ;;  %v11498_v61 = vld [vmem:[#allocation89_spill] sm:$0xff]  ;;  %v11499_v28 = vld [vmem:[#allocation83_spill] sm:$0xff] }
 0x269   : > { %v8643_v11 = vmul.f32 %v8614_v45, %v2950_v63  ;;  %v2557_v10 = vadd.f32 %v11497_v43, %v2488_v50  ;;  %v1047_v20 = vmul.f32 1.442695, %v1034_v18  ;;  %v2622_v54 = vadd.f32 %v2614_v37, %v2553_v22  ;;  %v2701_v29 = vld [vmem:[#allocation2 + $0x49] sm:$0xff]  ;;  %v2849_v63 = vpop.permute.xlu1 %2848  ;;  %v2703_v43 = vld [vmem:[#allocation2 + $0x59] sm:$0xff] }
 0x26a   : > { %v8646_v38 = vpop.eup %6181  ;;  %v2624_v57 = vadd.f32 %v2616_v9, %v2555_v42  ;;  %v2618_v21 = vmul.f32 %v8381_v27, %v2605_v7  ;;  %v2759_v32 = vadd.f32 %v2751_v51, %v2690_v34  ;;  %v2551_v6 = vadd.f32 %v2543_v3, %v2482_v2  ;;  %v2633_v18 = vld [vmem:[#allocation2 + $0x50] sm:$0xff]  ;;  %v11500_v3 = vld [vmem:[#allocation16_spill] sm:$0xff] }
 0x26b   : > { %v2668_v55 = vmul.f32 %v11498_v61, %v2628_v12  ;;  %v2670_v35 = vmul.f32 %v11499_v28, %v2630_v17  ;;  %v954_v36 = vmul.f32 1.0614054, %v8646_v38  ;;  %v2684_v50 = vmul.f32 %v8423_v62, %v2671_v14 }
 0x26c   : > { %v2741_v22 = vmul.f32 %v8450_v15, %v2701_v29  ;;  %v2876_v37 = vmul.f32 %v2849_v63, %v8290_v25  ;;  %v1045_v42 = vmul.f32 1.442695, %v1033_v49  ;;  %v2626_v34 = vadd.f32 %v2618_v21, %v2557_v10  ;;  %v11501_v15 = vld [vmem:[#allocation92_spill] sm:$0xff]  ;;  %v2699_v63 = vld [vmem:[#allocation2 + $0x39] sm:$0xff] }
 0x26d   : > { %v8655_v7 = vpop.eup %6183  ;;  %v2673_v2 = vmul.f32 %v11500_v3, %v2633_v18  ;;  %v962_v9 = vadd.f32 -1.4531521, %v954_v36  ;;  %6185 = vpow2.f32 %v1047_v20  ;;  %v2693_v51 = vadd.f32 %v8464_v5, %v2624_v57  ;;  %v2853_v10 = vpop.permute.xlu1 %2852  ;;  %v2766_v36 = vld [vmem:[#allocation2 + $0x2b] sm:$0xff] }
 0x26e   : > { %v2889_v12 = vmul.f32 %v8571_v41, %v2876_v37  ;;  %v2828_v14 = vadd.f32 %v8530_v4, %v2759_v32  ;;  %v953_v17 = vmul.f32 1.0614054, %v8655_v7  ;;  %v2620_v61 = vadd.f32 %v11501_v15, %v2551_v6  ;;  %v11502_v37 = vld [vmem:[#allocation39_spill] sm:$0xff] }
 0x26f   : > { %v2681_v25 = vmul.f32 %v8423_v62, %v2668_v55  ;;  %v2743_v49 = vmul.f32 %v8483_v31, %v2703_v43  ;;  %v970_v21 = vmul.f32 %v8646_v38, %v962_v9  ;;  %v2754_v20 = vmul.f32 %v8455_v1, %v2741_v22  ;;  %v11503_v43 = vld [vmem:[#allocation97_spill] sm:$0xff] }
 0x270   : > { %v2897_v28 = vadd.f32 %v2889_v12, %v2828_v14  ;;  %v961_v5 = vadd.f32 -1.4531521, %v953_v17  ;;  %6187 = vpow2.f32 %v1045_v42  ;;  %v2683_v57 = vmul.f32 %v8423_v62, %v2670_v35  ;;  %v2839_v35 = vld [vmem:[#allocation2 + $0x4c] sm:$0xff] }
 0x271   : > { %v2692_v29 = vadd.f32 %v2684_v50, %v2623_v46  ;;  %v2695_v4 = vadd.f32 %v8471_v60, %v2626_v34  ;;  %v978_v32 = vadd.f32 1.4214138, %v970_v21  ;;  %v2686_v6 = vmul.f32 %v8423_v62, %v2673_v2  ;;  %v2861_v9 = vpop.permute.xlu1 %2860 }
 0x272   : > { %v2762_v55 = vadd.f32 %v2754_v20, %v2693_v51  ;;  %v2966_v31 = vadd.f32 %v2958_v19, %v2897_v28  ;;  %v969_v18 = vmul.f32 %v8655_v7, %v961_v5  ;;  %v2739_v3 = vmul.f32 %v11502_v37, %v2699_v63  ;;  %v2841_v20 = vld [vmem:[#allocation2 + $0x5c] sm:$0xff] }
 0x273   : > { %v2756_v22 = vmul.f32 %v8455_v1, %v2743_v49  ;;  %v2806_v42 = vmul.f32 %v8525_v40, %v2766_v36  ;;  %v986_v46 = vmul.f32 %v8646_v38, %v978_v32  ;;  %v2689_v60 = vadd.f32 %v2681_v25, %v2620_v61  ;;  %v2837_v36 = vld [vmem:[#allocation2 + $0x3c] sm:$0xff] }
 0x274   : > { %v2879_v50 = vmul.f32 %v2861_v9, %v2839_v35  ;;  %v2976_v34 = vsel %vm304_vm1, %v2966_v31, 0.0  ;;  %v977_v2 = vadd.f32 1.4214138, %v969_v18  ;;  %v2691_v51 = vadd.f32 %v2683_v57, %v2622_v54 }
 0x275   : > { %v2625_v19 = vadd.f32 %v11503_v43, %v2556_v8  ;;  %v2764_v12 = vadd.f32 %v2756_v22, %v2695_v4  ;;  %2977 = vadd.xlane.f32.xlu1 %v2976_v34  ;;  %v994_v14 = vadd.f32 -0.28449672, %v986_v46  ;;  %v2761_v17 = vadd.f32 %v8499_v24, %v2692_v29  ;;  %v2869_v54 = vpop.permute.xlu1 %2868  ;;  %v11504_v29 = vld [vmem:[#allocation91_spill] sm:$0xff]  ;;  %v2771_v34 = vld [vmem:[#allocation2 + $0x53] sm:$0xff] }
 0x276   : > { %v2892_v15 = vmul.f32 %v8571_v41, %v2879_v50  ;;  %v2831_v40 = vadd.f32 %v8547_v53, %v2762_v55  ;;  %v985_v49 = vmul.f32 %v8655_v7, %v977_v2  ;;  %v2752_v61 = vmul.f32 %v8455_v1, %v2739_v3  ;;  %v2769_v4 = vld [vmem:[#allocation2 + $0x43] sm:$0xff] }
 0x277   : > { %v8681_v21 = vadd.f32 %v2686_v6, %v2625_v19  ;;  %v2819_v25 = vmul.f32 %v8504_v0, %v2806_v42  ;;  %v1002_v8 = vmul.f32 %v8646_v38, %v994_v14  ;;  %v2758_v28 = vadd.f32 %v8480_v44, %v2689_v60 }
 0x278   : > { %v2881_v5 = vmul.f32 %v2869_v54, %v2841_v20  ;;  %v2900_v24 = vadd.f32 %v2892_v15, %v2831_v40  ;;  %v993_v57 = vadd.f32 -0.28449672, %v985_v49  ;;  %v2808_v53 = vmul.f32 %v8553_v47, %v11504_v29  ;;  %v11506_v54 = vld [vmem:[#allocation94_spill] sm:$0xff] }
 0x279   : > { %v2833_v32 = vadd.f32 %v8566_v58, %v2764_v12  ;;  %vm898_vm15 = vcmp.lt.f32.partialorder %v8515_v39, 0.0  ;;  %v1010_v6 = vadd.f32 0.2548296, %v1002_v8  ;;  %v2809_v55 = vmul.f32 %v8585_v16, %v2769_v4  ;;  %v2914_v42 = vpop.permute.xlu1 %2913  ;;  %v2904_v58 = vld [vmem:[#allocation2 + $0x2d] sm:$0xff] }
 0x27a   : > { %v6186_v63 = vpop.eup %6185  ;;  %v2894_v31 = vmul.f32 %v8571_v41, %v2881_v5  ;;  %v2969_v44 = vadd.f32 %v8633_v48, %v2900_v24  ;;  %v1001_v18 = vmul.f32 %v8655_v7, %v993_v57  ;;  %v2760_v37 = vadd.f32 %v2752_v61, %v2691_v51  ;;  %v11507_v8 = vld [vmem:[#allocation13_spill] sm:$0xff] }
 0x27b   : > { %v2827_v3 = vadd.f32 %v2819_v25, %v2758_v28  ;;  %v2877_v22 = vmul.f32 %v2853_v10, %v2837_v36  ;;  %v1018_v47 = vmul.f32 %v8646_v38, %v1010_v6  ;;  %v11505_v46 = vmov 1.0   ;;  %v11509_v6 = vld [vmem:[#allocation42_spill] sm:$0xff]  ;;  %v2907_v36 = vld [vmem:[#allocation2 + $0x45] sm:$0xff] }
 0x27c   : > { %v2985_v9 = vsel %vm304_vm1, %v2969_v44, 0.0  ;;  %v2902_v35 = vadd.f32 %v2894_v31, %v2833_v32  ;;  %v906_v16 = vsel %vm898_vm15, -1.0, %v11505_v46  ;;  %v1009_v60 = vadd.f32 0.2548296, %v1001_v18  ;;  %v11508_v32 = vld [vmem:[#allocation98_spill] sm:$0xff]  ;;  %v11510_v31 = vld [vmem:[#allocation15_spill] sm:$0xff] }
 0x27d   : > { %v6188_v50 = vpop.eup %6187  ;;  %v2821_v48 = vmul.f32 %v8504_v0, %v2808_v53  ;;  %v2944_v2 = vmul.f32 %v2914_v42, %v2904_v58  ;;  %2986 = vadd.xlane.f32.xlu1 %v2985_v9  ;;  %v1058_v51 = vmul.f32 %v6186_v63, %v1018_v47  ;;  %vm897_vm0 = vcmp.lt.f32.partialorder %v8544_v23, 0.0  ;;  %v2922_v40 = vpop.permute.xlu1 %2921 }
 0x27e   : > { %v2822_v38 = vmul.f32 %v8504_v0, %v2809_v55  ;;  %v2811_v10 = vmul.f32 %v8605_v13, %v2771_v34  ;;  %v2971_v43 = vadd.f32 %v8643_v11, %v2902_v35  ;;  %v1017_v19 = vmul.f32 %v8655_v7, %v1009_v60 }
 0x27f   : > { %v2890_v39 = vmul.f32 %v8571_v41, %v2877_v22  ;;  %v2957_v12 = vmul.f32 %v8614_v45, %v2944_v2  ;;  %v2896_v14 = vadd.f32 %v8588_v52, %v2827_v3  ;;  %v1066_v15 = vsub.f32 1.0, %v1058_v51 }
 0x280   : > { %v2991_v49 = vsel %vm304_vm1, %v2971_v43, 0.0  ;;  %v882_v23 = vmul.f32 0.5, %v8496_v30  ;;  %v905_v61 = vsel %vm897_vm0, -1.0, %v11505_v46  ;;  %v1057_v25 = vmul.f32 %v6188_v50, %v1017_v19  ;;  %v6279_v43 = vld [vmem:[%s10915_s1 + $0x38] sm:$0xff]  ;;  %v8738_v19 = vld [vmem:[%s10919_s5] ss:$0 sm:$0xff] }
 0x281   : > { %v2829_v13 = vadd.f32 %v2821_v48, %v2760_v37  ;;  %v2946_v11 = vmul.f32 %v2922_v40, %v11506_v54  ;;  %2992 = vadd.xlane.f32.xlu1 %v2991_v49  ;;  %v2965_v7 = vadd.f32 %v2957_v12, %v2896_v14  ;;  %v1074_v20 = vmul.f32 %v1066_v15, %v906_v16  ;;  %v2926_v55 = vpop.permute.xlu1 %2925  ;;  %v2909_v16 = vld [vmem:[#allocation2 + $0x55] sm:$0xff]  ;;  %v6281_v54 = vld [vmem:[#allocation2 + $0x3d] sm:$0xff] }
 0x282   : > { %v2755_v28 = vmul.f32 %v8455_v1, %v11507_v8  ;;  %v2830_v5 = vadd.f32 %v2822_v38, %v2761_v17  ;;  %v2824_v52 = vmul.f32 %v8504_v0, %v2811_v10  ;;  %v1065_v24 = vsub.f32 1.0, %v1057_v25  ;;  %v6280_v40 = vld [vmem:[#allocation2 + $0x3c] sm:$0xff]  ;;  %v11511_v49 = vld [vmem:[#allocation6_spill] sm:$0xff] }
 0x283   : > { %v2959_v57 = vmul.f32 %v8614_v45, %v2946_v11  ;;  %v2973_v30 = vsel %vm304_vm1, %v2965_v7, 0.0  ;;  %v2898_v29 = vadd.f32 %v2890_v39, %v2829_v13  ;;  %v1082_v53 = vadd.f32 1.0, %v1074_v20  ;;  %v1324_v25 = vld [vmem:[#allocation2 + $0x3f] sm:$0xff]  ;;  %v11512_v11 = vld [vmem:[#allocation18_spill] sm:$0xff] }
 0x284   : > { %v2891_v4 = vmul.f32 %v8571_v41, %v8595_v26  ;;  %v2880_v63 = vmul.f32 %v11509_v6, %v11508_v32  ;;  %2974 = vadd.xlane.f32.xlu0 %v2973_v30  ;;  %v881_v17 = vmul.f32 0.5, %v11510_v31  ;;  %v1073_v44 = vmul.f32 %v1065_v24, %v905_v61  ;;  %v1109_v13 = vld [vmem:[#allocation2 + $0x3b] sm:$0xff] }
 0x285   : > { %v2763_v18 = vadd.f32 %v2755_v28, %v8681_v21  ;;  %v2947_v37 = vmul.f32 %v2926_v55, %v2907_v36  ;;  %v2967_v3 = vadd.f32 %v2959_v57, %v2898_v29  ;;  %v1090_v22 = vmul.f32 %v1082_v53, %v882_v23  ;;  %v2934_v35 = vpop.permute.xlu1 %2933  ;;  %v1393_v8 = vld [vmem:[#allocation2 + $0x40] sm:$0xff]  ;;  %v11513_v28 = vld [vmem:[#allocation17_spill] sm:$0xff] }
 0x286   : > { %v1081_v47 = vadd.f32 1.0, %v1073_v44  ;;  %v2899_v9 = vadd.f32 %v2891_v4, %v2830_v5  ;;  %v2893_v50 = vmul.f32 %v8571_v41, %v2880_v63  ;;  %v2949_v48 = vmul.f32 %v2934_v35, %v2909_v16  ;;  %v6283_v57 = vld [vmem:[%s10918_s4] ss:$0 sm:$0xff]  ;;  %v1462_v29 = vld [vmem:[#allocation2 + $0x41] sm:$0xff]  ;;  %v11517_v16 = vld [vmem:[#allocation45_spill] sm:$0xff] }
 0x287   : > { %v2832_v42 = vadd.f32 %v2824_v52, %v2763_v18  ;;  %v2960_v58 = vmul.f32 %v8614_v45, %v2947_v37  ;;  %v2979_v26 = vsel %vm304_vm1, %v2967_v3, 0.0  ;;  %1098 = vst.msk [vmem:[#allocation2 + $0x80] sm:$0xff] %vm304_vm1, %v1090_v22  ;;  %v1226_v23 = vmul.f32 %v6280_v40, %v11511_v49  ;;  %v6282_v52 = vld [vmem:[%s10918_s4 + $0x1] ss:$0 sm:$0xff]  ;;  %v11514_v53 = vld [vmem:[#allocation36_spill] sm:$0xff]  ;;  %v11519_v40 = vld [vmem:[#allocation25_spill] sm:$0xff] }
 0x288   : > { %2980 = vadd.xlane.f32.xlu0 %v2979_v26  ;;  %v1089_v60 = vmul.f32 %v1081_v47, %v881_v17  ;;  %v2962_v34 = vmul.f32 %v8614_v45, %v2949_v48  ;;  %v1295_v7 = vmul.f32 %v6281_v54, %v11512_v11  ;;  %v1364_v5 = vmul.f32 %v11513_v28, %v1324_v25  ;;  %v6284_v6 = vld [vmem:[%s10918_s4 + $0x2] ss:$0 sm:$0xff]  ;;  %v6285_v36 = vld [vmem:[%s10918_s4 + $0x3] ss:$0 sm:$0xff]  ;;  %v6286_v37 = vld [vmem:[%s10918_s4 + $0x4] ss:$0 sm:$0xff] }
 0x289   : > { %v2968_v21 = vadd.f32 %v2960_v58, %v2899_v9  ;;  %v2901_v51 = vadd.f32 %v2893_v50, %v2832_v42  ;;  %v8741_v39 = vpop.permute.xlu1 %2941  ;;  %v1239_v24 = vmul.f32 %v6282_v52, %v1226_v23  ;;  %v1433_v4 = vmul.f32 %v11514_v53, %v1393_v8  ;;  %v11515_v17 = vld [vmem:[#allocation31_spill] sm:$0xff]  ;;  %v11516_v47 = vld [vmem:[#allocation53_spill] sm:$0xff]  ;;  %v6288_v26 = vld [vmem:[%s10918_s4 + $0x5] ss:$0 sm:$0xff] }
 0x28a   : > { %1097 = vst.msk [vmem:[#allocation2 + $0x78] sm:$0xff] %vm304_vm1, %v1089_v60  ;;  %v1308_v63 = vmul.f32 %v6284_v6, %v1295_v7  ;;  %v1377_v31 = vmul.f32 %v6285_v36, %v1364_v5  ;;  %v1502_v44 = vmul.f32 %v11515_v17, %v1462_v29  ;;  %v6287_v22 = vld [vmem:[#allocation2 + $0x43] sm:$0xff]  ;;  %v11520_v49 = vld [vmem:[#allocation54_spill] sm:$0xff]  ;;  %v6294_v54 = vld [vmem:[#allocation2 + $0x4c] sm:$0xff] }
 0x28b   : > { %v2982_v2 = vsel %vm304_vm1, %v2968_v21, 0.0  ;;  %v2970_v38 = vadd.f32 %v2962_v34, %v2901_v51  ;;  %v1446_v3 = vmul.f32 %v6286_v37, %v1433_v4  ;;  %v1571_v42 = vmul.f32 %v6287_v22, %v11516_v47  ;;  %v6289_v35 = vld [vmem:[#allocation2 + $0x44] sm:$0xff]  ;;  %v11521_v11 = vld [vmem:[#allocation75_spill] sm:$0xff]  ;;  %v11524_v4 = vld [vmem:[#allocation90_spill] sm:$0xff] }
 0x28c   : > { %2983 = vadd.xlane.f32.xlu0 %v2982_v2  ;;  %v1515_v9 = vmul.f32 %v6288_v26, %v1502_v44  ;;  %v1640_v60 = vmul.f32 %v6289_v35, %v11517_v16  ;;  %v6290_v48 = vld [vmem:[%s10918_s4 + $0x6] ss:$0 sm:$0xff]  ;;  %v11518_v2 = vld [vmem:[#allocation59_spill] sm:$0xff]  ;;  %v1778_v23 = vmul.f32 %v11520_v49, %v11519_v40  ;;  %v6293_v25 = vld [vmem:[%s10918_s4 + $0x8] ss:$0 sm:$0xff]  ;;  %v1847_v7 = vmul.f32 %v6294_v54, %v11521_v11 }
 0x28d   : > { %v2988_v10 = vsel %vm304_vm1, %v2970_v38, 0.0  ;;  %v1584_v21 = vmul.f32 %v6290_v48, %v1571_v42  ;;  %v6291_v34 = vld [vmem:[#allocation2 + $0x45] sm:$0xff]  ;;  %v11522_v5 = vld [vmem:[#allocation95_spill] sm:$0xff]  ;;  %v6299_v26 = vld [vmem:[%s10918_s4 + $0xd] ss:$0 sm:$0xff] }
 0x28e   : > { %v1709_v51 = vmul.f32 %v6291_v34, %v11518_v2  ;;  %v6295_v8 = vld [vmem:[%s10918_s4 + $0x9] ss:$0 sm:$0xff]  ;;  %v6296_v29 = vld [vmem:[%s10918_s4 + $0xa] ss:$0 sm:$0xff]  ;;  %v11525_v6 = vld [vmem:[#allocation93_spill] sm:$0xff] }
 0x28f   : > { %v1791_v28 = vmul.f32 %v6295_v8, %v1778_v23  ;;  %v11523_v52 = vld [vmem:[#allocation60_spill] sm:$0xff]  ;;  %v1860_v53 = vmul.f32 %v6296_v29, %v1847_v7  ;;  %v11526_v17 = vld [vmem:[#allocation73_spill] sm:$0xff]  ;;  %v11528_v47 = vld [vmem:[#allocation111_spill] sm:$0xff] }
 0x290   : > { %2989 = vadd.xlane.f32.xlu0 %v2988_v10  ;;  %v6292_v10 = vld [vmem:[%s10918_s4 + $0x7] ss:$0 sm:$0xff]  ;;  %v6297_v36 = vld [vmem:[%s10918_s4 + $0xb] ss:$0 sm:$0xff]  ;;  %v6298_v37 = vld [vmem:[%s10918_s4 + $0xc] ss:$0 sm:$0xff] }
 0x291   : > { %v11527_v22 = vld [vmem:[#allocation96_spill] sm:$0xff]  ;;  %v11529_v35 = vld [vmem:[#allocation146_spill] sm:$0xff]  ;;  %v11530_v16 = vld [vmem:[#allocation87_spill] sm:$0xff] }
 0x292   : > { %1155 = vperm.xlu1 %6019, %v6279_v43   ;;  %v1653_v43 = vmul.f32 %v6292_v10, %v1640_v60  ;;  %v2123_v42 = vmul.f32 %v11528_v47, %v11527_v22  ;;  %v2192_v60 = vmul.f32 %v11530_v16, %v11529_v35  ;;  %v6300_v48 = vld [vmem:[%s10918_s4 + $0xe] ss:$0 sm:$0xff]  ;;  %v11533_v40 = vld [vmem:[#allocation102_spill] sm:$0xff]  ;;  %v11534_v54 = vld [vmem:[#allocation24_spill] sm:$0xff] }
 0x293   : > { %v11531_v34 = vld [vmem:[#allocation129_spill] sm:$0xff]  ;;  %v11535_v11 = vld [vmem:[#allocation20_spill] sm:$0xff] }
 0x294   : > { %v2261_v2 = vmul.f32 %v11531_v34, %v11508_v32  ;;  %v2399_v7 = vmul.f32 %v11535_v11, %v11534_v54  ;;  %v11538_v29 = vld [vmem:[#allocation57_spill] sm:$0xff] }
 0x295   : > { %v2911_v34 = vld [vmem:[#allocation2 + $0x65] sm:$0xff] }
 0x296   : > { %3235 = vrot.lane.b32.xlu1 %v8738_v19, %s6472_s20  ;;  %s6475_s20 = smov 64  }
 0x2fe   : > { %v8743_v12 = vpop.xlane.xlu1 %2977 }
 0x306   : > { %v8745_v14 = vpop.xlane.xlu1 %2986 }
 0x30a   : > { %v8747_v15 = vpop.xlane.xlu1 %2992 }
 0x30e   : > { %v1156_v61 = vpop.permute.xlu1 %1155 }
 0x30f   : > { %v1165_v20 = vmul.f32 %v1156_v61, %v1109_v13  ;;  %v1722_v13 = vmul.f32 %v6293_v25, %v1709_v51  ;;  %v6302_v25 = vld [vmem:[%s10918_s4 + $0x10] ss:$0 sm:$0xff] }
 0x311   : > { %v1178_v30 = vmul.f32 %v6283_v57, %v1165_v20 }
 0x313   : > { %v1247_v55 = vadd.f32 %v1239_v24, %v1178_v30  ;;  %v1916_v24 = vmul.f32 %v11523_v52, %v11522_v5  ;;  %v2014_v30 = vld [vmem:[#allocation2 + $0x50] sm:$0xff] }
 0x314   : > { %v2054_v44 = vmul.f32 %v11526_v17, %v2014_v30  ;;  %v2704_v17 = vld [vmem:[#allocation2 + $0x61] sm:$0xff] }
 0x315   : > { %v1316_v18 = vadd.f32 %v1308_v63, %v1247_v55  ;;  %v1985_v63 = vmul.f32 %v11525_v6, %v11524_v4  ;;  %v11539_v6 = vld [vmem:[#allocation85_spill] sm:$0xff] }
 0x317   : > { %v1385_v58 = vadd.f32 %v1377_v31, %v1316_v18  ;;  %v1929_v31 = vmul.f32 %v6297_v36, %v1916_v24  ;;  %v2566_v24 = vld [vmem:[#allocation2 + $0x5f] sm:$0xff] }
 0x319   : > { %v1454_v50 = vadd.f32 %v1446_v3, %v1385_v58  ;;  %v1998_v3 = vmul.f32 %v6298_v37, %v1985_v63  ;;  %v11541_v37 = vld [vmem:[#allocation12_spill] sm:$0xff] }
 0x31b   : > { %v1523_v38 = vadd.f32 %v1515_v9, %v1454_v50  ;;  %v2067_v9 = vmul.f32 %v6299_v26, %v2054_v44  ;;  %v2635_v44 = vld [vmem:[#allocation2 + $0x60] sm:$0xff] }
 0x31d   : > { %v1592_v61 = vadd.f32 %v1584_v21, %v1523_v38  ;;  %v2136_v21 = vmul.f32 %v6300_v48, %v2123_v42  ;;  %v6301_v38 = vld [vmem:[%s10918_s4 + $0xf] ss:$0 sm:$0xff]  ;;  %v11543_v48 = vld [vmem:[#allocation35_spill] sm:$0xff] }
 0x31e   : > { %v2205_v10 = vmul.f32 %v6301_v38, %v2192_v60  ;;  %v11542_v42 = vld [vmem:[#allocation145_spill] sm:$0xff] }
 0x31f   : > { %v1661_v20 = vadd.f32 %v1653_v43, %v1592_v61  ;;  %v11532_v43 = vld [vmem:[#allocation14_spill] sm:$0xff]  ;;  %v2428_v61 = vld [vmem:[#allocation2 + $0x5c] sm:$0xff] }
 0x320   : > { %v2330_v49 = vmul.f32 %v11533_v40, %v11532_v43 }
 0x321   : > { %v1730_v57 = vadd.f32 %v1722_v13, %v1661_v20  ;;  %v2274_v13 = vmul.f32 %v6302_v25, %v2261_v2  ;;  %v6303_v20 = vld [vmem:[%s10918_s4 + $0x11] ss:$0 sm:$0xff]  ;;  %v2951_v2 = vmul.f32 %v8741_v39, %v2911_v34  ;;  %v714_v39 = vld [vmem:[%s6614_s24 + $0x78] sm:$0xff]  ;;  %v3227_v25 = vld [vmem:[%s6614_s24] sm:$0xff] }
 0x322   : > { %v2343_v8 = vmul.f32 %v6303_v20, %v2330_v49 }
 0x323   : > { %v1799_v55 = vadd.f32 %v1791_v28, %v1730_v57  ;;  %v11536_v28 = vld [vmem:[#allocation115_spill] sm:$0xff]  ;;  %v11537_v57 = vld [vmem:[#allocation82_spill] sm:$0xff] }
 0x324   : > { %v2468_v5 = vmul.f32 %v11536_v28, %v2428_v61  ;;  %v2412_v30 = vmul.f32 %v11537_v57, %v2399_v7  ;;  %v3229_v61 = vld [vmem:[%s6614_s24 + $0x10] sm:$0xff]  ;;  %v3231_v7 = vld [vmem:[%s6614_s24 + $0x20] sm:$0xff]  ;;  %v3230_v57 = vld [vmem:[%s6614_s24 + $0x18] sm:$0xff] }
 0x325   : > { %v1868_v18 = vadd.f32 %v1860_v53, %v1799_v55  ;;  %v2537_v53 = vmul.f32 %v8616_v56, %v11538_v29  ;;  %v11540_v55 = vld [vmem:[#allocation130_spill] sm:$0xff]  ;;  %v2773_v56 = vld [vmem:[#allocation2 + $0x63] sm:$0xff] }
 0x326   : > { %v2481_v63 = vmul.f32 %v11539_v6, %v2468_v5  ;;  %v2606_v36 = vmul.f32 %v11540_v55, %v2566_v24  ;;  %v2813_v16 = vmul.f32 %v8629_v59, %v2773_v56  ;;  %v3233_v24 = vld [vmem:[%s6614_s24 + $0x30] sm:$0xff]  ;;  %v3232_v6 = vld [vmem:[%s6614_s24 + $0x28] sm:$0xff] }
 0x327   : > { %v1937_v58 = vadd.f32 %v1929_v31, %v1868_v18  ;;  %v2550_v18 = vmul.f32 %v8347_v33, %v2537_v53 }
 0x328   : > { %v2619_v47 = vmul.f32 %v8381_v27, %v2606_v36  ;;  %v2826_v27 = vmul.f32 %v8504_v0, %v2813_v16  ;;  %v713_v0 = vld [vmem:[%s6614_s24 + $0x70] sm:$0xff] }
 0x329   : > { %v2006_v50 = vadd.f32 %v1998_v3, %v1937_v58  ;;  %v2675_v3 = vmul.f32 %v11541_v37, %v2635_v44  ;;  %v2744_v58 = vmul.f32 %v11542_v42, %v2704_v17  ;;  %5851 = vmatprep.mubr.msk.f32.mxu1 %vm323_vm2, %v713_v0 }
 0x32a   : > { %5852 = vmatmul.mubr.msk.f32.gmra.mxu1 %vm323_vm2, %v714_v39 }
 0x32b   : > { %v2075_v51 = vadd.f32 %v2067_v9, %v2006_v50  ;;  %v2842_v9 = vld [vmem:[#allocation2 + $0x64] sm:$0xff]  ;;  %v2688_v35 = vmul.f32 %v8423_v62, %v2675_v3  ;;  %v2757_v50 = vmul.f32 %v8455_v1, %v2744_v58  ;;  %v2964_v62 = vmul.f32 %v8614_v45, %v2951_v2 }
 0x32c   : > { %v2882_v33 = vmul.f32 %v11543_v48, %v2842_v9  ;;  %v8894_v3 = vadd.f32 %v8738_v19, %v8743_v12  ;;  %v8916_v12 = vadd.f32 %v8738_v19, %v8745_v14  ;;  %v8934_v14 = vadd.f32 %v8738_v19, %v8747_v15 }
 0x32d   : > { %v2144_v23 = vadd.f32 %v2136_v21, %v2075_v51 }
 0x32e   : > { %v2895_v38 = vmul.f32 %v8571_v41, %v2882_v33  ;;  %v2975_v41 = vpop.xlane.xlu0 %2974  ;;  %v8930_v48 = vmul.f32 0.70710677, %v8916_v12  ;;  %v8952_v15 = vmul.f32 0.70710677, %v8934_v14 }
 0x32f   : > { %v2213_v32 = vadd.f32 %v2205_v10, %v2144_v23  ;;  %v8853_v23 = vpop.permute.xlu1 %3235  ;;  %v8890_v37 = vadd.f32 %v8738_v19, %v2975_v41 }
 0x330   : > { %11544 = vst [vmem:[#allocation8_spill] sm:$0xff] %v8853_v23  ;;  %v3240_v54 = vmul.f32 %v8853_v23, %v3229_v61  ;;  %v3238_v11 = vmul.f32 %v8853_v23, %v3227_v25  ;;  %v3242_v5 = vmul.f32 %v8853_v23, %v3231_v7  ;;  %v3244_v53 = vmul.f32 %v8853_v23, %v3233_v24 }
 0x331   : > { %v2282_v52 = vadd.f32 %v2274_v13, %v2213_v32  ;;  %v3228_v32 = vld [vmem:[%s6614_s24 + $0x8] sm:$0xff]  ;;  %v3243_v36 = vmul.f32 %v8853_v23, %v3232_v6  ;;  %vm3031_vm6 = vcmp.lt.f32.partialorder %v8930_v48, 0.0  ;;  %vm3033_vm8 = vcmp.lt.f32.partialorder %v8952_v15, 0.0 }
 0x332   : > { %v2981_v45 = vpop.xlane.xlu0 %2980 }
 0x333   : > { %v2351_v4 = vadd.f32 %v2343_v8, %v2282_v52  ;;  %v3239_v52 = vmul.f32 %v8853_v23, %v3228_v32  ;;  %v8903_v42 = vadd.f32 %v8738_v19, %v2981_v45 }
 0x335   : > { %v2420_v31 = vadd.f32 %v2412_v30, %v2351_v4  ;;  %v3241_v4 = vmul.f32 %v8853_v23, %v3230_v57  ;;  %v8919_v56 = vmul.f32 0.70710677, %v8903_v42 }
 0x336   : > { %v2984_v40 = vpop.xlane.xlu0 %2983 }
 0x337   : > { %v2489_v22 = vadd.f32 %v2481_v63, %v2420_v31  ;;  %v3234_v31 = vld [vmem:[%s6614_s24 + $0x38] sm:$0xff]  ;;  %v8937_v33 = vand.u32 2147483647, %v8919_v56  ;;  %vm3029_vm4 = vcmp.lt.f32.partialorder %v8919_v56, 0.0 }
 0x338   : > { %v3245_v44 = vmul.f32 %v8853_v23, %v3234_v31  ;;  %v3037_v56 = vsel %vm3029_vm4, -1.0, %v11505_v46  ;;  %vm6476_vm4 = vmmov 0  }
 0x339   : > { %v2558_v26 = vadd.f32 %v2550_v18, %v2489_v22  ;;  %v8897_v22 = vmul.f32 0.70710677, %v8890_v37 }
 0x33a   : > { %v2990_v49 = vpop.xlane.xlu0 %2989 }
 0x33b   : > { %v2627_v60 = vadd.f32 %v2619_v47, %v2558_v26  ;;  %v8900_v47 = vmul.f32 0.70710677, %v8894_v3  ;;  %v8906_v58 = vand.u32 2147483647, %v8897_v22  ;;  %v8909_v26 = vadd.f32 %v8738_v19, %v2984_v40 }
 0x33c   : > { %vm3027_vm2 = vcmp.lt.f32.partialorder %v8897_v22, 0.0 }
 0x33d   : > { %v2696_v21 = vadd.f32 %v2688_v35, %v2627_v60  ;;  %v8912_v9 = vand.u32 2147483647, %v8900_v47  ;;  %v3051_v35 = vmul.f32 0.3275911, %v8906_v58  ;;  %v8923_v16 = vmul.f32 0.70710677, %v8909_v26 }
 0x33e   : > { %v8926_v60 = vadd.f32 %v8738_v19, %v2990_v49  ;;  %v3155_v6 = vsub.f32 0.0, %v8906_v58  ;;  %vm3028_vm3 = vcmp.lt.f32.partialorder %v8900_v47, 0.0 }
 0x33f   : > { %v2765_v51 = vadd.f32 %v2757_v50, %v2696_v21  ;;  %v3052_v50 = vmul.f32 0.3275911, %v8912_v9  ;;  %v3059_v21 = vadd.f32 1.0, %v3051_v35  ;;  %v8940_v34 = vand.u32 2147483647, %v8923_v16 }
 0x340   : > { %vm3030_vm5 = vcmp.lt.f32.partialorder %v8923_v16, 0.0 }
 0x341   : > { %v2834_v10 = vadd.f32 %v2826_v27, %v2765_v51  ;;  %v8943_v27 = vmul.f32 0.70710677, %v8926_v60  ;;  %v3060_v51 = vadd.f32 1.0, %v3052_v50  ;;  %6189 = vrcp.f32 %v3059_v21 }
 0x342   : > { %v3156_v50 = vsub.f32 0.0, %v8912_v9  ;;  %v3163_v21 = vmul.f32 %v3155_v6, %v8906_v58  ;;  %v3158_v58 = vsub.f32 0.0, %v8940_v34  ;;  %v3038_v16 = vsel %vm3030_vm5, -1.0, %v11505_v46 }
 0x343   : > { %v2903_v59 = vadd.f32 %v2895_v38, %v2834_v10  ;;  %v8949_v38 = vand.u32 2147483647, %v8930_v48  ;;  %v3053_v10 = vmul.f32 0.3275911, %v8937_v33  ;;  %6191 = vrcp.f32 %v3060_v51 }
 0x344   : > { %vm3032_vm7 = vcmp.lt.f32.partialorder %v8943_v27, 0.0  ;;  %v3041_v48 = vsel %vm3033_vm8, -1.0, %v11505_v46  ;;  %vm5461_vm5 = vcmask 523264  }
 0x345   : > { %v2972_v1 = vadd.f32 %v2964_v62, %v2903_v59  ;;  %v3054_v62 = vmul.f32 0.3275911, %v8940_v34  ;;  %v8957_v59 = vand.u32 2147483647, %v8943_v27  ;;  %v3061_v0 = vadd.f32 1.0, %v3053_v10 }
 0x346   : > { %v3159_v6 = vsub.f32 0.0, %v8949_v38  ;;  %v3040_v27 = vsel %vm3032_vm7, -1.0, %v11505_v46  ;;  %vm5633_vm7 = vcmask 58368  }
 0x347   : > { %v2994_v43 = vsel %vm304_vm1, %v2972_v1, 0.0  ;;  %v3062_v39 = vadd.f32 1.0, %v3054_v62  ;;  %v3056_v41 = vmul.f32 0.3275911, %v8957_v59  ;;  %6193 = vrcp.f32 %v3061_v0 }
 0x348   : > { %2995 = vadd.xlane.f32.xlu0 %v2994_v43  ;;  %v8964_v43 = vand.u32 2147483647, %v8952_v15  ;;  %v3014_v15 = vmul.f32 0.5, %v8909_v26 }
 0x349   : > { %6195 = vrcp.f32 %v3062_v39  ;;  %v3064_v61 = vadd.f32 1.0, %v3056_v41 }
 0x34a   : > { %v3057_v49 = vmul.f32 0.3275911, %v8964_v43 }
 0x35e   : > { %3246 = vrot.lane.b32.xlu0 %v8738_v19, %s6473_s21  ;;  %s6477_s21 = smov [#allocation3]  }
 0x35f   : > { %s6385_s9 = sshll.u32 %s6477_s21, 4  ;;  %s6386_s9 = int_to_ptr.vmem [resolvable:$false] %s6385_s9 }
 0x360   : > { %s6387_s23 = scalar_lea.vmem %s6386_s9, 64  ;;  %p6388_p0 = scmp.lt.s32.totalorder %s5650_s17, %s6386_s9 }
 0x3d1   : > { %v2996_v13 = vpop.xlane.xlu0 %2995 }
 0x3d2   : > { %v8946_v2 = vadd.f32 %v8738_v19, %v2996_v13  ;;  %v3055_v19 = vmul.f32 0.3275911, %v8949_v38  ;;  %v3065_v13 = vadd.f32 1.0, %v3057_v49  ;;  %v3164_v49 = vmul.f32 %v3156_v50, %v8912_v9 }
 0x3d4   : > { %v8960_v1 = vmul.f32 0.70710677, %v8946_v2  ;;  %v3063_v40 = vadd.f32 1.0, %v3055_v19 }
 0x3d5   : > { %v8861_v20 = vpop.permute.xlu0 %3246 }
 0x3d6   : > { %11545 = vst [vmem:[#allocation21_spill] sm:$0xff] %v8861_v20  ;;  %v3251_v8 = vadd.f32 %v8861_v20, %v3240_v54  ;;  %v3249_v28 = vadd.f32 %v8861_v20, %v3238_v11  ;;  %v3253_v30 = vadd.f32 %v8861_v20, %v3242_v5  ;;  %v3250_v29 = vadd.f32 %v8861_v20, %v3239_v52  ;;  %v8972_v11 = vpop.eup %6189 }
 0x3d7   : > { %v3255_v63 = vadd.f32 %v8861_v20, %v3244_v53  ;;  %v3252_v55 = vadd.f32 %v8861_v20, %v3241_v4  ;;  %v3254_v17 = vadd.f32 %v8861_v20, %v3243_v36  ;;  %v3256_v18 = vadd.f32 %v8861_v20, %v3245_v44  ;;  %v8974_v7 = vpop.eup %6191 }
 0x3d8   : > { %3269 = vrot.lane.b32.xlu0 %v3251_v8, %s6474_s22  ;;  %3265 = vrot.lane.b32.xlu1 %v3249_v28, %s6474_s22  ;;  %v8968_v45 = vand.u32 2147483647, %v8960_v1  ;;  %6197 = vrcp.f32 %v3063_v40  ;;  %v3083_v32 = vmul.f32 1.0614054, %v8972_v11  ;;  %v3084_v8 = vmul.f32 1.0614054, %v8974_v7  ;;  %v8978_v28 = vpop.eup %6193 }
 0x3d9   : > { %6199 = vrcp.f32 %v3064_v61  ;;  %v8980_v52 = vpop.eup %6195  ;;  %v3085_v24 = vmul.f32 1.0614054, %v8978_v28  ;;  %v3157_v61 = vsub.f32 0.0, %v8937_v33  ;;  %vm3034_vm9 = vcmp.lt.f32.partialorder %v8960_v1, 0.0 }
 0x3da   : > { %v3058_v25 = vmul.f32 0.3275911, %v8968_v45  ;;  %6201 = vrcp.f32 %v3065_v13  ;;  %v3091_v5 = vadd.f32 -1.4531521, %v3083_v32  ;;  %v3092_v57 = vadd.f32 -1.4531521, %v3084_v8 }
 0x3db   : > { %v3086_v53 = vmul.f32 1.0614054, %v8980_v52  ;;  %v3165_v9 = vmul.f32 %v3157_v61, %v8937_v33  ;;  %v3167_v33 = vmul.f32 %v3159_v6, %v8949_v38 }
 0x3dc   : > { %3273 = vrot.lane.b32.xlu0 %v3253_v30, %s6474_s22  ;;  %3267 = vrot.lane.b32.xlu1 %v3250_v29, %s6474_s22  ;;  %v3066_v54 = vadd.f32 1.0, %v3058_v25  ;;  %v3099_v29 = vmul.f32 %v8972_v11, %v3091_v5  ;;  %v3100_v36 = vmul.f32 %v8974_v7, %v3092_v57  ;;  %v3171_v25 = vmul.f32 1.442695, %v3163_v21 }
 0x3dd   : > { %v3094_v44 = vadd.f32 -1.4531521, %v3086_v53  ;;  %v3173_v53 = vmul.f32 1.442695, %v3164_v49  ;;  %v3179_v38 = vmul.f32 1.442695, %v3167_v33 }
 0x3de   : > { %6203 = vrcp.f32 %v3066_v54  ;;  %v3108_v62 = vadd.f32 1.4214138, %v3100_v36 }
 0x3df   : > { %v3102_v39 = vmul.f32 %v8980_v52, %v3094_v44  ;;  %6205 = vpow2.f32 %v3171_v25 }
 0x3e0   : > { %3277 = vrot.lane.b32.xlu0 %v3255_v63, %s6474_s22  ;;  %3271 = vrot.lane.b32.xlu1 %v3252_v55, %s6474_s22  ;;  %v3093_v63 = vadd.f32 -1.4531521, %v3085_v24  ;;  %v3116_v32 = vmul.f32 %v8974_v7, %v3108_v62  ;;  %6207 = vpow2.f32 %v3173_v53  ;;  %v3175_v62 = vmul.f32 1.442695, %v3165_v9 }
 0x3e1   : > { %v3110_v24 = vadd.f32 1.4214138, %v3102_v39  ;;  %v3162_v39 = vsub.f32 0.0, %v8968_v45 }
 0x3e2   : > { %v3101_v51 = vmul.f32 %v8978_v28, %v3093_v63  ;;  %v3166_v63 = vmul.f32 %v3158_v58, %v8940_v34  ;;  %v3124_v44 = vadd.f32 -0.28449672, %v3116_v32  ;;  %v3161_v34 = vsub.f32 0.0, %v8964_v43 }
 0x3e3   : > { %v3118_v21 = vmul.f32 %v8980_v52, %v3110_v24  ;;  %6209 = vpow2.f32 %v3175_v62 }
 0x3e4   : > { %3275 = vrot.lane.b32.xlu1 %v3254_v17, %s6474_s22  ;;  %v3107_v17 = vadd.f32 1.4214138, %v3099_v29  ;;  %v3109_v13 = vadd.f32 1.4214138, %v3101_v51  ;;  %v3132_v49 = vmul.f32 %v8974_v7, %v3124_v44  ;;  %v3169_v32 = vmul.f32 %v3161_v34, %v8964_v43 }
 0x3e5   : > { %v8983_v30 = vpop.eup %6197  ;;  %v3126_v58 = vadd.f32 -0.28449672, %v3118_v21 }
 0x3e6   : > { %v8987_v4 = vpop.eup %6199  ;;  %v3087_v55 = vmul.f32 1.0614054, %v8983_v30  ;;  %v3115_v0 = vmul.f32 %v8972_v11, %v3107_v17  ;;  %v3117_v36 = vmul.f32 %v8978_v28, %v3109_v13  ;;  %v3183_v43 = vmul.f32 1.442695, %v3169_v32 }
 0x3e7   : > { %v8992_v31 = vpop.eup %6201  ;;  %v3134_v6 = vmul.f32 %v8980_v52, %v3126_v58 }
 0x3e8   : > { %3279 = vrot.lane.b32.xlu1 %v3256_v18, %s6474_s22  ;;  %v3088_v18 = vmul.f32 1.0614054, %v8987_v4  ;;  %v3095_v10 = vadd.f32 -1.4531521, %v3087_v55  ;;  %v3089_v19 = vmul.f32 1.0614054, %v8992_v31 }
 0x3e9   : > { %v3123_v5 = vadd.f32 -0.28449672, %v3115_v0  ;;  %v3160_v55 = vsub.f32 0.0, %v8957_v59  ;;  %v3142_v21 = vadd.f32 0.2548296, %v3134_v6 }
 0x3ea   : > { %v3096_v41 = vadd.f32 -1.4531521, %v3088_v18  ;;  %v3103_v54 = vmul.f32 %v8983_v30, %v3095_v10  ;;  %v3097_v8 = vadd.f32 -1.4531521, %v3089_v19  ;;  %v3177_v19 = vmul.f32 1.442695, %v3166_v63 }
 0x3eb   : > { %v8995_v35 = vpop.eup %6203  ;;  %v3131_v50 = vmul.f32 %v8972_v11, %v3123_v5  ;;  %v3168_v0 = vmul.f32 %v3160_v55, %v8957_v59  ;;  %v3170_v59 = vmul.f32 %v3162_v39, %v8968_v45 }
 0x3ec   : > { %v3090_v40 = vmul.f32 1.0614054, %v8995_v35  ;;  %v3104_v57 = vmul.f32 %v8987_v4, %v3096_v41  ;;  %v3111_v17 = vadd.f32 1.4214138, %v3103_v54  ;;  %v3105_v18 = vmul.f32 %v8992_v31, %v3097_v8 }
 0x3ed   : > { %v3125_v41 = vadd.f32 -0.28449672, %v3117_v36  ;;  %v3139_v25 = vadd.f32 0.2548296, %v3131_v50  ;;  %6211 = vpow2.f32 %v3177_v19  ;;  %v3181_v8 = vmul.f32 1.442695, %v3168_v0  ;;  %v6206_v36 = vpop.eup %6205 }
 0x3ee   : > { %v3098_v29 = vadd.f32 -1.4531521, %v3090_v40  ;;  %v3112_v51 = vadd.f32 1.4214138, %v3104_v57  ;;  %v3119_v40 = vmul.f32 %v8983_v30, %v3111_v17  ;;  %v3113_v61 = vadd.f32 1.4214138, %v3105_v18 }
 0x3ef   : > { %v3133_v5 = vmul.f32 %v8978_v28, %v3125_v41  ;;  %v3140_v57 = vadd.f32 0.2548296, %v3132_v49  ;;  %v3147_v53 = vmul.f32 %v8972_v11, %v3139_v25  ;;  %6213 = vpow2.f32 %v3179_v38 }
 0x3f0   : > { %v3106_v10 = vmul.f32 %v8995_v35, %v3098_v29  ;;  %v3120_v13 = vmul.f32 %v8987_v4, %v3112_v51  ;;  %v3127_v24 = vadd.f32 -0.28449672, %v3119_v40  ;;  %v3121_v29 = vmul.f32 %v8992_v31, %v3113_v61 }
 0x3f1   : > { %6215 = vpow2.f32 %v3181_v8  ;;  %v3185_v55 = vmul.f32 1.442695, %v3170_v59  ;;  %v3141_v17 = vadd.f32 0.2548296, %v3133_v5  ;;  %v3148_v44 = vmul.f32 %v8974_v7, %v3140_v57 }
 0x3f2   : > { %v3114_v54 = vadd.f32 1.4214138, %v3106_v10  ;;  %v3128_v9 = vadd.f32 -0.28449672, %v3120_v13  ;;  %v3135_v45 = vmul.f32 %v8983_v30, %v3127_v24  ;;  %v3129_v18 = vadd.f32 -0.28449672, %v3121_v29  ;;  %v6208_v10 = vpop.eup %6207 }
 0x3f3   : > { %v3187_v50 = vmul.f32 %v6206_v36, %v3147_v53  ;;  %6217 = vpow2.f32 %v3183_v43  ;;  %v3149_v33 = vmul.f32 %v8978_v28, %v3141_v17  ;;  %v3188_v62 = vmul.f32 %v6208_v10, %v3148_v44  ;;  %v6210_v40 = vpop.eup %6209 }
 0x3f4   : > { %v3122_v63 = vmul.f32 %v8995_v35, %v3114_v54  ;;  %v3136_v11 = vmul.f32 %v8987_v4, %v3128_v9  ;;  %6219 = vpow2.f32 %v3185_v55  ;;  %v3143_v34 = vadd.f32 0.2548296, %v3135_v45 }
 0x3f5   : > { %v3137_v19 = vmul.f32 %v8992_v31, %v3129_v18  ;;  %v3195_v0 = vsub.f32 1.0, %v3187_v50  ;;  %v3150_v7 = vmul.f32 %v8980_v52, %v3142_v21  ;;  %v3035_v49 = vsel %vm3027_vm2, -1.0, %v11505_v46 }
 0x3f6   : > { %v3130_v51 = vadd.f32 -0.28449672, %v3122_v63  ;;  %v3144_v39 = vadd.f32 0.2548296, %v3136_v11  ;;  %v3189_v22 = vmul.f32 %v6210_v40, %v3149_v33  ;;  %v3151_v25 = vmul.f32 %v8983_v30, %v3143_v34 }
 0x3f7   : > { %v3196_v28 = vsub.f32 1.0, %v3188_v62  ;;  %v3145_v58 = vadd.f32 0.2548296, %v3137_v19  ;;  %v3203_v13 = vmul.f32 %v3195_v0, %v3035_v49  ;;  %v3036_v8 = vsel %vm3028_vm3, -1.0, %v11505_v46 }
 0x3f8   : > { %v3138_v41 = vmul.f32 %v8995_v35, %v3130_v51  ;;  %v3152_v38 = vmul.f32 %v8987_v4, %v3144_v39  ;;  %v3197_v59 = vsub.f32 1.0, %v3189_v22  ;;  %v3011_v9 = vmul.f32 0.5, %v8890_v37 }
 0x3f9   : > { %v3204_v24 = vmul.f32 %v3196_v28, %v3036_v8  ;;  %v3153_v30 = vmul.f32 %v8992_v31, %v3145_v58  ;;  %v3211_v57 = vadd.f32 1.0, %v3203_v13  ;;  %v3012_v18 = vmul.f32 0.5, %v8894_v3 }
 0x3fa   : > { %v6212_v61 = vpop.eup %6211  ;;  %v3146_v32 = vadd.f32 0.2548296, %v3138_v41  ;;  %v3205_v43 = vmul.f32 %v3197_v59, %v3037_v56  ;;  %v3039_v37 = vsel %vm3031_vm6, -1.0, %v11505_v46  ;;  %v3042_v41 = vsel %vm3034_vm9, -1.0, %v11505_v46  ;;  %v9097_v56 = vld [vmem:[%s10915_s1 + $0x60] sm:$0xff] }
 0x3fb   : > { %v3190_v54 = vmul.f32 %v6212_v61, %v3150_v7  ;;  %v3212_v31 = vadd.f32 1.0, %v3204_v24  ;;  %v3219_v17 = vmul.f32 %v3211_v57, %v3011_v9  ;;  %v3013_v7 = vmul.f32 0.5, %v8903_v42  ;;  %v9090_v9 = vld [vmem:[%s10915_s1 + $0x58] sm:$0xff] }
 0x3fc   : > { %v6214_v52 = vpop.eup %6213  ;;  %v3154_v6 = vmul.f32 %v8995_v35, %v3146_v32  ;;  %v3213_v11 = vadd.f32 1.0, %v3205_v43  ;;  %v3015_v13 = vmul.f32 0.5, %v8916_v12  ;;  %v3017_v59 = vmul.f32 0.5, %v8934_v14  ;;  %v9078_v14 = vld [vmem:[%s10915_s1 + $0x48] sm:$0xff]  ;;  %v9114_v43 = vld [vmem:[%s10915_s1 + $0x78] sm:$0xff] }
 0x3fd   : > { %v3191_v5 = vmul.f32 %v6214_v52, %v3151_v25  ;;  %v3198_v29 = vsub.f32 1.0, %v3190_v54  ;;  %v3220_v33 = vmul.f32 %v3212_v31, %v3012_v18  ;;  %v3016_v54 = vmul.f32 0.5, %v8926_v60 }
 0x3fe   : > { %v6216_v47 = vpop.eup %6215  ;;  %v3221_v61 = vmul.f32 %v3213_v11, %v3013_v7  ;;  %v11547_v31 = vmov 2   ;;  %v11548_v18 = vmov 3  }
 0x3ff   : > { %v3192_v53 = vmul.f32 %v6216_v47, %v3152_v38  ;;  %v3199_v55 = vsub.f32 1.0, %v3191_v5  ;;  %v3206_v45 = vmul.f32 %v3198_v29, %v3038_v16  ;;  %v3018_v5 = vmul.f32 0.5, %v8946_v2  ;;  %v9085_v2 = vld [vmem:[%s10915_s1 + $0x50] sm:$0xff]  ;;  %v9102_v16 = vld [vmem:[%s10915_s1 + $0x68] sm:$0xff] }
 0x400   : > { %v6218_v4 = vpop.eup %6217 }
 0x401   : > { %v6220_v63 = vpop.eup %6219  ;;  %v3193_v36 = vmul.f32 %v6218_v4, %v3153_v30  ;;  %v3200_v44 = vsub.f32 1.0, %v3192_v53  ;;  %v3207_v10 = vmul.f32 %v3199_v55, %v3039_v37  ;;  %v3214_v62 = vadd.f32 1.0, %v3206_v45  ;;  %v9073_v4 = vld [vmem:[%s10915_s1 + $0x40] sm:$0xff] }
 0x402   : > { %v3194_v35 = vmul.f32 %v6220_v63, %v3154_v6  ;;  %v9109_v63 = vld [vmem:[%s10915_s1 + $0x70] sm:$0xff]  ;;  %v11546_v55 = vmov 1  }
 0x403   : > { %v3201_v34 = vsub.f32 1.0, %v3193_v36  ;;  %v3208_v3 = vmul.f32 %v3200_v44, %v3040_v27  ;;  %v3215_v40 = vadd.f32 1.0, %v3207_v10  ;;  %v3222_v22 = vmul.f32 %v3214_v62, %v3014_v15  ;;  %v5853_v36 = vpop.f32.mrf.mxu1  ;;  %v6305_v44 = vld [vmem:[%s10917_s3 + $0x1] ss:$0 sm:$0xff] }
 0x404   : > { %v3202_v19 = vsub.f32 1.0, %v3194_v35 }
 0x405   : > { %v3209_v49 = vmul.f32 %v3201_v34, %v3041_v48  ;;  %v3216_v1 = vadd.f32 1.0, %v3208_v3  ;;  %v3223_v32 = vmul.f32 %v3215_v40, %v3015_v13  ;;  %v11550_v13 = vmov 5  }
 0x406   : > { %v3210_v25 = vmul.f32 %v3202_v19, %v3042_v41  ;;  %v11549_v19 = vmov 4  }
 0x407   : > { %v3217_v26 = vadd.f32 1.0, %v3209_v49  ;;  %v3224_v52 = vmul.f32 %v3216_v1, %v3016_v54 }
 0x408   : > { %v3218_v8 = vadd.f32 1.0, %v3210_v25 }
 0x409   : > { %v3225_v29 = vmul.f32 %v3217_v26, %v3017_v59 }
 0x40a   : > { %v3226_v12 = vmul.f32 %v3218_v8, %v3018_v5 }
 0x44a   : > { %v3266_v50 = vpop.permute.xlu1 %3265  ;;  %v3270_v51 = vpop.permute.xlu0 %3269 }
 0x44b   : > { %v3289_v21 = vadd.f32 %v3266_v50, %v3219_v17  ;;  %v3291_v38 = vadd.f32 %v3270_v51, %v3221_v61  ;;  %v6304_v17 = vld [vmem:[%s10917_s3] ss:$0 sm:$0xff]  ;;  %v842_v50 = vpop.f32.mrf.mxu1 }
 0x44c   : > { %v863_v45 = vmul.f32 %v6304_v17, %v5853_v36  ;;  %v862_v27 = vmul.f32 %v6304_v17, %v842_v50 }
 0x44d   : > { %3307 = vperm.xlu0 %6018, %v3289_v21  }
 0x44e   : > { %v3268_v0 = vpop.permute.xlu1 %3267  ;;  %v3274_v28 = vpop.permute.xlu0 %3273  ;;  %v9142_v35 = vadd.f32 %v6305_v44, %v863_v45  ;;  %v9151_v11 = vadd.f32 %v6305_v44, %v862_v27 }
 0x44f   : > { %v3290_v39 = vadd.f32 %v3268_v0, %v3220_v33  ;;  %v3293_v24 = vadd.f32 %v3274_v28, %v3223_v32 }
 0x450   : > { %v9148_v37 = vmul.f32 0.70710677, %v9142_v35  ;;  %v9156_v10 = vmul.f32 0.70710677, %v9151_v11  ;;  %v883_v50 = vmul.f32 0.5, %v9151_v11 }
 0x451   : > { %3312 = vperm.xlu1 %6019, %v3290_v39  }
 0x452   : > { %v3272_v58 = vpop.permute.xlu1 %3271  ;;  %v3278_v57 = vpop.permute.xlu0 %3277  ;;  %v916_v21 = vand.u32 2147483647, %v9148_v37  ;;  %v915_v34 = vand.u32 2147483647, %v9156_v10  ;;  %vm900_vm10 = vcmp.lt.f32.partialorder %v9148_v37, 0.0  ;;  %vm899_vm11 = vcmp.lt.f32.partialorder %v9156_v10, 0.0 }
 0x453   : > { %v3292_v42 = vadd.f32 %v3272_v58, %v3222_v22  ;;  %v3295_v53 = vadd.f32 %v3278_v57, %v3225_v29  ;;  %v907_v17 = vsel %vm899_vm11, -1.0, %v11505_v46 }
 0x454   : > { %v924_v51 = vmul.f32 0.3275911, %v916_v21  ;;  %v923_v62 = vmul.f32 0.3275911, %v915_v34  ;;  %v1028_v0 = vsub.f32 0.0, %v916_v21  ;;  %v1027_v7 = vsub.f32 0.0, %v915_v34 }
 0x455   : > { %3317 = vperm.xlu1 %6019, %v3291_v38   ;;  %3322 = vperm.xlu0 %6018, %v3292_v42  }
 0x456   : > { %v3276_v47 = vpop.permute.xlu1 %3275  ;;  %v932_v33 = vadd.f32 1.0, %v924_v51  ;;  %v931_v3 = vadd.f32 1.0, %v923_v62  ;;  %v1036_v48 = vmul.f32 %v1028_v0, %v916_v21  ;;  %v1035_v39 = vmul.f32 %v1027_v7, %v915_v34 }
 0x457   : > { %v3294_v30 = vadd.f32 %v3276_v47, %v3224_v52  ;;  %v11552_v21 = vmov 7  }
 0x458   : > { %6221 = vrcp.f32 %v932_v33  ;;  %v1051_v15 = vmul.f32 1.442695, %v1036_v48  ;;  %v1049_v61 = vmul.f32 1.442695, %v1035_v39  ;;  %v3303_v48 = vld [vmem:[%s10920_s6 + $0x30] sm:$0xff]  ;;  %v3302_v39 = vld [vmem:[%s10920_s6 + $0x28] sm:$0xff] }
 0x459   : > { %3327 = vperm.xlu1 %6019, %v3293_v24   ;;  %3332 = vperm.xlu0 %6018, %v3294_v30   ;;  %6223 = vrcp.f32 %v931_v3  ;;  %v3304_v3 = vld [vmem:[%s10920_s6 + $0x38] sm:$0xff] }
 0x45a   : > { %v3280_v60 = vpop.permute.xlu1 %3279  ;;  %6225 = vpow2.f32 %v1051_v15 }
 0x45b   : > { %v3296_v6 = vadd.f32 %v3280_v60, %v3226_v12  ;;  %6227 = vpow2.f32 %v1049_v61  ;;  %v908_v12 = vsel %vm900_vm10, -1.0, %v11505_v46  ;;  %v11551_v60 = vmov 6  }
 0x45d   : > { %3337 = vperm.xlu1 %6019, %v3295_v53   ;;  %3342 = vperm.xlu0 %6018, %v3296_v6  }
 0x461   : > { %3372 = vperm.xlu1 %6019, %v9073_v4   ;;  %3377 = vperm.xlu0 %6018, %v9078_v14  }
 0x465   : > { %3382 = vperm.xlu1 %6019, %v9085_v2   ;;  %3387 = vperm.xlu0 %6018, %v9090_v9   ;;  %v6222_v41 = vpop.eup %6221 }
 0x466   : > { %v956_v40 = vmul.f32 1.0614054, %v6222_v41  ;;  %v6224_v22 = vpop.eup %6223 }
 0x467   : > { %v955_v25 = vmul.f32 1.0614054, %v6224_v22  ;;  %v6226_v59 = vpop.eup %6225 }
 0x468   : > { %v964_v49 = vadd.f32 -1.4531521, %v956_v40  ;;  %v6228_v29 = vpop.eup %6227  ;;  %v3301_v40 = vld [vmem:[%s10920_s6 + $0x20] sm:$0xff] }
 0x469   : > { %3392 = vperm.xlu1 %6019, %v9097_v56   ;;  %3397 = vperm.xlu0 %6018, %v9102_v16   ;;  %v963_v58 = vadd.f32 -1.4531521, %v955_v25  ;;  %v3300_v25 = vld [vmem:[%s10920_s6 + $0x18] sm:$0xff] }
 0x46a   : > { %v972_v1 = vmul.f32 %v6222_v41, %v964_v49  ;;  %v11554_v49 = vmov 0.0  }
 0x46b   : > { %v971_v38 = vmul.f32 %v6224_v22, %v963_v58  ;;  %v3299_v58 = vld [vmem:[%s10920_s6 + $0x10] sm:$0xff] }
 0x46c   : > { %v980_v28 = vadd.f32 1.4214138, %v972_v1 }
 0x46d   : > { %3402 = vperm.xlu1 %6019, %v9109_v63   ;;  %3407 = vperm.xlu0 %6018, %v9114_v43   ;;  %v979_v32 = vadd.f32 1.4214138, %v971_v38 }
 0x46e   : > { %v988_v54 = vmul.f32 %v6222_v41, %v980_v28 }
 0x46f   : > { %v987_v52 = vmul.f32 %v6224_v22, %v979_v32 }
 0x470   : > { %v996_v42 = vadd.f32 -0.28449672, %v988_v54 }
 0x471   : > { %6020 = vset.pattern.permute.xlu1 %v11546_v55  ;;  %6021 = vset.pattern.permute.xlu0 %v11546_v55  ;;  %v995_v47 = vadd.f32 -0.28449672, %v987_v52  ;;  %v884_v55 = vmul.f32 0.5, %v9142_v35 }
 0x472   : > { %3435 = vperm.xlu1 %6020, %v9073_v4   ;;  %3439 = vperm.xlu0 %6021, %v9078_v14   ;;  %v1004_v26 = vmul.f32 %v6222_v41, %v996_v42  ;;  %v3298_v42 = vld [vmem:[%s10920_s6 + $0x8] sm:$0xff] }
 0x473   : > { %v1003_v24 = vmul.f32 %v6224_v22, %v995_v47 }
 0x474   : > { %v1012_v8 = vadd.f32 0.2548296, %v1004_v26  ;;  %v3297_v26 = vld [vmem:[%s10920_s6] sm:$0xff] }
 0x475   : > { %v1011_v57 = vadd.f32 0.2548296, %v1003_v24 }
 0x476   : > { %3443 = vperm.xlu1 %6020, %v9085_v2   ;;  %3451 = vperm.xlu0 %6021, %v9097_v56   ;;  %v1020_v5 = vmul.f32 %v6222_v41, %v1012_v8 }
 0x477   : > { %v1019_v6 = vmul.f32 %v6224_v22, %v1011_v57 }
 0x478   : > { %v1060_v30 = vmul.f32 %v6226_v59, %v1020_v5 }
 0x479   : > { %v1059_v36 = vmul.f32 %v6228_v29, %v1019_v6 }
 0x47a   : > { %3447 = vperm.xlu1 %6020, %v9090_v9   ;;  %3459 = vperm.xlu0 %6021, %v9109_v63   ;;  %v1068_v53 = vsub.f32 1.0, %v1060_v30  ;;  %v11559_v30 = vmov 9  }
 0x47b   : > { %v1067_v44 = vsub.f32 1.0, %v1059_v36 }
 0x47d   : > { %v1075_v37 = vmul.f32 %v1067_v44, %v907_v17 }
 0x47e   : > { %3455 = vperm.xlu1 %6020, %v9102_v16   ;;  %6022 = vset.pattern.permute.xlu0 %v11547_v31 }
 0x47f   : > { %3499 = vperm.xlu0 %6022, %v9073_v4   ;;  %v1083_v35 = vadd.f32 1.0, %v1075_v37 }
 0x481   : > { %v1091_v27 = vmul.f32 %v1083_v35, %v883_v50  ;;  %v11568_v35 = vmov 11  }
 0x482   : > { %3463 = vperm.xlu1 %6020, %v9114_v43  }
 0x483   : > { %3511 = vperm.xlu0 %6022, %v9090_v9   ;;  %1099 = vst.msk [vmem:[#allocation2 + $0x88] sm:$0xff] %vm304_vm1, %v1091_v27 }
 0x486   : > { %6023 = vset.pattern.permute.xlu1 %v11547_v31  ;;  %v1076_v31 = vmul.f32 %v1068_v53, %v908_v12 }
 0x487   : > { %3503 = vperm.xlu1 %6023, %v9078_v14   ;;  %3519 = vperm.xlu0 %6022, %v9102_v16  }
 0x488   : > { %v1084_v45 = vadd.f32 1.0, %v1076_v31 }
 0x48b   : > { %3507 = vperm.xlu1 %6023, %v9085_v2   ;;  %3527 = vperm.xlu0 %6022, %v9114_v43  }
 0x48f   : > { %3515 = vperm.xlu1 %6023, %v9097_v56   ;;  %6025 = vset.pattern.permute.xlu0 %v11548_v18 }
 0x490   : > { %3567 = vperm.xlu0 %6025, %v9078_v14  }
 0x493   : > { %3523 = vperm.xlu1 %6023, %v9109_v63  }
 0x494   : > { %3579 = vperm.xlu0 %6025, %v9097_v56  }
 0x497   : > { %6024 = vset.pattern.permute.xlu1 %v11548_v18  ;;  %v1092_v18 = vmul.f32 %v1084_v45, %v884_v55  ;;  %v11563_v55 = vmov 10  }
 0x498   : > { %3563 = vperm.xlu1 %6024, %v9073_v4   ;;  %3587 = vperm.xlu0 %6025, %v9109_v63  }
 0x499   : > { %1100 = vst.msk [vmem:[#allocation2 + $0x90] sm:$0xff] %vm304_vm1, %v1092_v18 }
 0x49c   : > { %3571 = vperm.xlu1 %6024, %v9085_v2   ;;  %6026 = vset.pattern.permute.xlu0 %v11549_v19 }
 0x49d   : > { %3627 = vperm.xlu0 %6026, %v9073_v4  }
 0x4a0   : > { %3575 = vperm.xlu1 %6024, %v9090_v9  }
 0x4a1   : > { %3639 = vperm.xlu0 %6026, %v9090_v9  }
 0x4a4   : > { %3583 = vperm.xlu1 %6024, %v9102_v16  }
 0x4a5   : > { %3647 = vperm.xlu0 %6026, %v9102_v16  }
 0x4a8   : > { %3591 = vperm.xlu1 %6024, %v9114_v43  }
 0x4a9   : > { %3655 = vperm.xlu0 %6026, %v9114_v43  }
 0x4ac   : > { %6027 = vset.pattern.permute.xlu1 %v11549_v19  ;;  %v11553_v19 = vmov 8  }
 0x4ad   : > { %3631 = vperm.xlu1 %6027, %v9078_v14   ;;  %6029 = vset.pattern.permute.xlu0 %v11550_v13 }
 0x4ae   : > { %3695 = vperm.xlu0 %6029, %v9078_v14  }
 0x4b1   : > { %3635 = vperm.xlu1 %6027, %v9085_v2  }
 0x4b2   : > { %3707 = vperm.xlu0 %6029, %v9097_v56  }
 0x4b5   : > { %3643 = vperm.xlu1 %6027, %v9097_v56  }
 0x4b6   : > { %3715 = vperm.xlu0 %6029, %v9109_v63  }
 0x4b9   : > { %3651 = vperm.xlu1 %6027, %v9109_v63  }
 0x4ba   : > { %6030 = vset.pattern.permute.xlu0 %v11551_v60 }
 0x4bb   : > { %3755 = vperm.xlu0 %6030, %v9073_v4  }
 0x4bd   : > { %6028 = vset.pattern.permute.xlu1 %v11550_v13 }
 0x4be   : > { %3691 = vperm.xlu1 %6028, %v9073_v4  }
 0x4bf   : > { %3767 = vperm.xlu0 %6030, %v9090_v9  }
 0x4c2   : > { %3699 = vperm.xlu1 %6028, %v9085_v2  }
 0x4c3   : > { %3775 = vperm.xlu0 %6030, %v9102_v16  }
 0x4c6   : > { %3703 = vperm.xlu1 %6028, %v9090_v9  }
 0x4c7   : > { %3783 = vperm.xlu0 %6030, %v9114_v43  }
 0x4c8   : > { %v3308_v11 = vpop.permute.xlu0 %3307 }
 0x4c9   : > { %v3345_v59 = vmul.f32 %v3308_v11, %v3297_v26 }
 0x4ca   : > { %3711 = vperm.xlu1 %6028, %v9102_v16  }
 0x4cb   : > { %6033 = vset.pattern.permute.xlu0 %v11552_v21 }
 0x4cc   : > { %3823 = vperm.xlu0 %6033, %v9078_v14   ;;  %v3313_v51 = vpop.permute.xlu1 %3312 }
 0x4cd   : > { %v3346_v47 = vmul.f32 %v3313_v51, %v3298_v42  ;;  %v11584_v42 = vmov 15  }
 0x4ce   : > { %3719 = vperm.xlu1 %6028, %v9114_v43  }
 0x4d0   : > { %v3323_v10 = vpop.permute.xlu0 %3322  ;;  %3835 = vperm.xlu0 %6033, %v9097_v56   ;;  %v3318_v33 = vpop.permute.xlu1 %3317 }
 0x4d1   : > { %v3348_v38 = vmul.f32 %v3323_v10, %v3300_v25  ;;  %v3347_v32 = vmul.f32 %v3318_v33, %v3299_v58 }
 0x4d2   : > { %6031 = vset.pattern.permute.xlu1 %v11551_v60 }
 0x4d3   : > { %3759 = vperm.xlu1 %6031, %v9078_v14  }
 0x4d4   : > { %v3333_v34 = vpop.permute.xlu0 %3332  ;;  %3843 = vperm.xlu0 %6033, %v9109_v63   ;;  %v3328_v62 = vpop.permute.xlu1 %3327 }
 0x4d5   : > { %v3350_v1 = vmul.f32 %v3333_v34, %v3302_v39  ;;  %v3349_v28 = vmul.f32 %v3328_v62, %v3301_v40  ;;  %v11573_v34 = vmov 12  }
 0x4d7   : > { %3763 = vperm.xlu1 %6031, %v9085_v2  }
 0x4d8   : > { %6034 = vset.pattern.permute.xlu0 %v11553_v19  ;;  %v3343_v0 = vpop.permute.xlu0 %3342  ;;  %v3338_v7 = vpop.permute.xlu1 %3337 }
 0x4d9   : > { %v3352_v15 = vmul.f32 %v3343_v0, %v3304_v3  ;;  %3883 = vperm.xlu0 %6034, %v9073_v4   ;;  %v3351_v41 = vmul.f32 %v3338_v7, %v3303_v48 }
 0x4db   : > { %3771 = vperm.xlu1 %6031, %v9097_v56   ;;  %5874 = vmatpush3.msra.mxu1 %v3352_v15 }
 0x4dc   : > { %5875 = vmatprep.subr.mxu1 %v11554_v49  ;;  %v9222_v61 = vpop.permute.xlu0 %3377  ;;  %v9224_v22 = vpop.permute.xlu1 %3372 }
 0x4dd   : > { %11555 = vst [vmem:[#allocation32_spill] sm:$0xff] %v9224_v22  ;;  %3895 = vperm.xlu0 %6034, %v9090_v9   ;;  %5876 = vmatpush3.msra.mxu1 %v3351_v41  ;;  %v11579_v41 = vmov 13  }
 0x4de   : > { %5877 = vmatprep.subr.mxu1 %v11554_v49 }
 0x4df   : > { %3779 = vperm.xlu1 %6031, %v9109_v63   ;;  %5878 = vmatpush3.msra.mxu1 %v3350_v1 }
 0x4e0   : > { %v9235_v13 = vpop.permute.xlu0 %3387  ;;  %5879 = vmatprep.subr.mxu1 %v11554_v49  ;;  %v9238_v54 = vpop.permute.xlu1 %3382 }
 0x4e1   : > { %11556 = vst [vmem:[#allocation99_spill] sm:$0xff] %v9235_v13  ;;  %3903 = vperm.xlu0 %6034, %v9102_v16   ;;  %5880 = vmatpush3.msra.mxu1 %v3349_v28  ;;  %v11622_v13 = vmov 21  }
 0x4e2   : > { %5881 = vmatprep.subr.mxu1 %v11554_v49 }
 0x4e3   : > { %6032 = vset.pattern.permute.xlu1 %v11552_v21  ;;  %5882 = vmatpush3.msra.mxu1 %v3348_v38 }
 0x4e4   : > { %3819 = vperm.xlu1 %6032, %v9073_v4   ;;  %v9250_v52 = vpop.permute.xlu0 %3397  ;;  %5883 = vmatprep.subr.mxu1 %v11554_v49  ;;  %v9253_v8 = vpop.permute.xlu1 %3392 }
 0x4e5   : > { %3911 = vperm.xlu0 %6034, %v9114_v43   ;;  %5884 = vmatpush3.msra.mxu1 %v3347_v32 }
 0x4e6   : > { %5885 = vmatprep.subr.mxu1 %v11554_v49 }
 0x4e7   : > { %5886 = vmatpush3.msra.mxu1 %v3346_v47 }
 0x4e8   : > { %3827 = vperm.xlu1 %6032, %v9085_v2   ;;  %v9258_v5 = vpop.permute.xlu0 %3407  ;;  %5887 = vmatprep.subr.mxu1 %v11554_v49  ;;  %v9261_v24 = vpop.permute.xlu1 %3402 }
 0x4e9   : > { %11557 = vst [vmem:[#allocation101_spill] sm:$0xff] %v9258_v5  ;;  %11558 = vst [vmem:[#allocation100_spill] sm:$0xff] %v9261_v24  ;;  %6037 = vset.pattern.permute.xlu0 %v11559_v30  ;;  %5888 = vmatpush3.msra.mxu1 %v3345_v59 }
 0x4ea   : > { %3951 = vperm.xlu0 %6037, %v9078_v14  }
 0x4ec   : > { %3831 = vperm.xlu1 %6032, %v9090_v9  }
 0x4ed   : > { %v9266_v57 = vpop.permute.xlu0 %3439  ;;  %v9268_v29 = vpop.permute.xlu1 %3435 }
 0x4ee   : > { %11560 = vst [vmem:[#allocation107_spill] sm:$0xff] %v9268_v29  ;;  %3963 = vperm.xlu0 %6037, %v9097_v56  }
 0x4f0   : > { %3839 = vperm.xlu1 %6032, %v9102_v16  }
 0x4f1   : > { %v9272_v12 = vpop.permute.xlu0 %3451  ;;  %v9274_v60 = vpop.permute.xlu1 %3443 }
 0x4f2   : > { %3971 = vperm.xlu0 %6037, %v9109_v63  }
 0x4f4   : > { %3847 = vperm.xlu1 %6032, %v9114_v43  }
 0x4f5   : > { %v9278_v53 = vpop.permute.xlu0 %3459  ;;  %v9280_v6 = vpop.permute.xlu1 %3447 }
 0x4f6   : > { %11561 = vst [vmem:[#allocation103_spill] sm:$0xff] %v9278_v53  ;;  %11562 = vst [vmem:[#allocation105_spill] sm:$0xff] %v9280_v6  ;;  %6038 = vset.pattern.permute.xlu0 %v11563_v55  ;;  %v11605_v53 = vmov 17  }
 0x4f7   : > { %4011 = vperm.xlu0 %6038, %v9073_v4  }
 0x4f8   : > { %6035 = vset.pattern.permute.xlu1 %v11553_v19 }
 0x4f9   : > { %3887 = vperm.xlu1 %6035, %v9078_v14   ;;  %v9286_v31 = vpop.permute.xlu1 %3455 }
 0x4fa   : > { %v9288_v36 = vpop.permute.xlu0 %3499 }
 0x4fb   : > { %11564 = vst [vmem:[#allocation109_spill] sm:$0xff] %v9288_v36  ;;  %4023 = vperm.xlu0 %6038, %v9090_v9  }
 0x4fd   : > { %3891 = vperm.xlu1 %6035, %v9085_v2   ;;  %v9292_v17 = vpop.permute.xlu1 %3463 }
 0x4fe   : > { %11565 = vst [vmem:[#allocation27_spill] sm:$0xff] %v9292_v17  ;;  %v9294_v45 = vpop.permute.xlu0 %3511 }
 0x4ff   : > { %11566 = vst [vmem:[#allocation23_spill] sm:$0xff] %v9294_v45  ;;  %4031 = vperm.xlu0 %6038, %v9102_v16  }
 0x501   : > { %3899 = vperm.xlu1 %6035, %v9097_v56  }
 0x502   : > { %v9298_v44 = vpop.permute.xlu0 %3519  ;;  %v9300_v18 = vpop.permute.xlu1 %3503 }
 0x503   : > { %4039 = vperm.xlu0 %6038, %v9114_v43  }
 0x505   : > { %3907 = vperm.xlu1 %6035, %v9109_v63  }
 0x506   : > { %v9304_v50 = vpop.permute.xlu0 %3527  ;;  %v9306_v37 = vpop.permute.xlu1 %3507 }
 0x507   : > { %11567 = vst [vmem:[#allocation29_spill] sm:$0xff] %v9304_v50  ;;  %6041 = vset.pattern.permute.xlu0 %v11568_v35 }
 0x508   : > { %4079 = vperm.xlu0 %6041, %v9078_v14  }
 0x509   : > { %6036 = vset.pattern.permute.xlu1 %v11559_v30  ;;  %v11589_v30 = vmov 14  }
 0x50a   : > { %3947 = vperm.xlu1 %6036, %v9073_v4   ;;  %v9312_v27 = vpop.permute.xlu1 %3515 }
 0x50b   : > { %v9314_v21 = vpop.permute.xlu0 %3567 }
 0x50c   : > { %4091 = vperm.xlu0 %6041, %v9097_v56  }
 0x50e   : > { %3955 = vperm.xlu1 %6036, %v9085_v2   ;;  %v9318_v11 = vpop.permute.xlu1 %3523 }
 0x50f   : > { %11569 = vst [vmem:[#allocation104_spill] sm:$0xff] %v9318_v11  ;;  %v9320_v51 = vpop.permute.xlu0 %3579 }
 0x510   : > { %11570 = vst [vmem:[#allocation106_spill] sm:$0xff] %v9320_v51  ;;  %4099 = vperm.xlu0 %6041, %v9109_v63  }
 0x512   : > { %3959 = vperm.xlu1 %6036, %v9090_v9  }
 0x513   : > { %v9324_v10 = vpop.permute.xlu0 %3587  ;;  %v9326_v33 = vpop.permute.xlu1 %3563 }
 0x514   : > { %11571 = vst [vmem:[#allocation26_spill] sm:$0xff] %v9324_v10  ;;  %11572 = vst [vmem:[#allocation46_spill] sm:$0xff] %v9326_v33  ;;  %6042 = vset.pattern.permute.xlu0 %v11573_v34  ;;  %v11601_v10 = vmov 18   ;;  %v11619_v33 = vmov 25  }
 0x515   : > { %4139 = vperm.xlu0 %6042, %v9073_v4  }
 0x516   : > { %3967 = vperm.xlu1 %6036, %v9102_v16  }
 0x517   : > { %v9331_v62 = vpop.permute.xlu1 %3571 }
 0x518   : > { %v9333_v3 = vpop.permute.xlu0 %3627 }
 0x519   : > { %11574 = vst [vmem:[#allocation108_spill] sm:$0xff] %v9333_v3  ;;  %4151 = vperm.xlu0 %6042, %v9090_v9  }
 0x51a   : > { %3975 = vperm.xlu1 %6036, %v9114_v43  }
 0x51b   : > { %v9337_v19 = vpop.permute.xlu1 %3575 }
 0x51c   : > { %11575 = vst [vmem:[#allocation33_spill] sm:$0xff] %v9337_v19  ;;  %v9339_v0 = vpop.permute.xlu0 %3639 }
 0x51d   : > { %11576 = vst [vmem:[#allocation110_spill] sm:$0xff] %v9339_v0  ;;  %4159 = vperm.xlu0 %6042, %v9102_v16  }
 0x51e   : > { %6039 = vset.pattern.permute.xlu1 %v11563_v55 }
 0x51f   : > { %4015 = vperm.xlu1 %6039, %v9078_v14   ;;  %v9344_v48 = vpop.permute.xlu1 %3583 }
 0x520   : > { %v9346_v7 = vpop.permute.xlu0 %3647 }
 0x521   : > { %4163 = vperm.xlu0 %6042, %v9109_v63  }
 0x523   : > { %4019 = vperm.xlu1 %6039, %v9085_v2   ;;  %v9350_v15 = vpop.permute.xlu1 %3591 }
 0x524   : > { %11577 = vst [vmem:[#allocation116_spill] sm:$0xff] %v9350_v15  ;;  %v9352_v39 = vpop.permute.xlu0 %3655 }
 0x525   : > { %11578 = vst [vmem:[#allocation112_spill] sm:$0xff] %v9352_v39  ;;  %6045 = vset.pattern.permute.xlu0 %v11579_v41  ;;  %v11593_v39 = vmov 16  }
 0x526   : > { %4227 = vperm.xlu0 %6045, %v9109_v63  }
 0x527   : > { %4027 = vperm.xlu1 %6039, %v9097_v56  }
 0x528   : > { %v9357_v40 = vpop.permute.xlu1 %3631 }
 0x529   : > { %v9359_v1 = vpop.permute.xlu0 %3695 }
 0x52a   : > { %11580 = vst [vmem:[#allocation114_spill] sm:$0xff] %v9359_v1  ;;  %4211 = vperm.xlu0 %6045, %v9085_v2   ;;  %v9697_v1 = vld [vmem:[#allocation2 + $0x7d] sm:$0xff] }
 0x52b   : > { %4035 = vperm.xlu1 %6039, %v9109_v63   ;;  %11654 = vst [vmem:[#allocation65_spill] sm:$0xff] %v9697_v1 }
 0x52c   : > { %v9363_v25 = vpop.permute.xlu1 %3635 }
 0x52d   : > { %v9365_v28 = vpop.permute.xlu0 %3707 }
 0x52e   : > { %11581 = vst [vmem:[#allocation113_spill] sm:$0xff] %v9365_v28  ;;  %4207 = vperm.xlu0 %6045, %v9078_v14  }
 0x52f   : > { %6040 = vset.pattern.permute.xlu1 %v11568_v35 }
 0x530   : > { %4075 = vperm.xlu1 %6040, %v9073_v4   ;;  %v9370_v58 = vpop.permute.xlu1 %3643 }
 0x531   : > { %11582 = vst [vmem:[#allocation125_spill] sm:$0xff] %v9370_v58  ;;  %v9372_v38 = vpop.permute.xlu0 %3715 }
 0x532   : > { %11583 = vst [vmem:[#allocation127_spill] sm:$0xff] %v9372_v38  ;;  %6059 = vset.pattern.permute.xlu0 %v11584_v42 }
 0x533   : > { %4351 = vperm.xlu0 %6059, %v9102_v16  }
 0x534   : > { %4083 = vperm.xlu1 %6040, %v9085_v2   ;;  %v9377_v32 = vpop.permute.xlu1 %3651 }
 0x535   : > { %11585 = vst [vmem:[#allocation72_spill] sm:$0xff] %v9377_v32 }
 0x536   : > { %v9379_v26 = vpop.permute.xlu0 %3755 }
 0x537   : > { %11586 = vst [vmem:[#allocation74_spill] sm:$0xff] %v9379_v26  ;;  %4339 = vperm.xlu0 %6059, %v9085_v2  }
 0x538   : > { %4087 = vperm.xlu1 %6040, %v9090_v9  }
 0x539   : > { %v9383_v47 = vpop.permute.xlu1 %3691 }
 0x53a   : > { %11587 = vst [vmem:[#allocation117_spill] sm:$0xff] %v9383_v47  ;;  %v9385_v59 = vpop.permute.xlu0 %3767 }
 0x53b   : > { %11588 = vst [vmem:[#allocation78_spill] sm:$0xff] %v9385_v59  ;;  %6066 = vset.pattern.permute.xlu0 %v11589_v30 }
 0x53c   : > { %4291 = vperm.xlu0 %6066, %v9109_v63   ;;  %4095 = vperm.xlu1 %6040, %v9102_v16  }
 0x53d   : > { %v9390_v55 = vpop.permute.xlu1 %3699 }
 0x53e   : > { %v9392_v35 = vpop.permute.xlu0 %3775 }
 0x540   : > { %4287 = vperm.xlu0 %6066, %v9102_v16   ;;  %4103 = vperm.xlu1 %6040, %v9114_v43  }
 0x541   : > { %v9396_v49 = vpop.permute.xlu1 %3703 }
 0x542   : > { %11590 = vst [vmem:[#allocation48_spill] sm:$0xff] %v9396_v49  ;;  %v9398_v46 = vpop.permute.xlu0 %3783 }
 0x543   : > { %11591 = vst [vmem:[#allocation118_spill] sm:$0xff] %v9398_v46 }
 0x544   : > { %4267 = vperm.xlu0 %6066, %v9073_v4   ;;  %6043 = vset.pattern.permute.xlu1 %v11573_v34 }
 0x545   : > { %4143 = vperm.xlu1 %6043, %v9078_v14   ;;  %v9403_v20 = vpop.permute.xlu1 %3711 }
 0x547   : > { %v9405_v23 = vpop.permute.xlu0 %3823 }
 0x548   : > { %11592 = vst [vmem:[#allocation41_spill] sm:$0xff] %v9405_v23  ;;  %6071 = vset.pattern.permute.xlu0 %v11593_v39  ;;  %v9590_v23 = vld [vmem:[#allocation2 + $0x6d] sm:$0xff] }
 0x549   : > { %4423 = vperm.xlu0 %6071, %v9114_v43   ;;  %4147 = vperm.xlu1 %6043, %v9085_v2   ;;  %v9410_v38 = vpop.permute.xlu1 %3719  ;;  %11643 = vst [vmem:[#allocation34_spill] sm:$0xff] %v9590_v23 }
 0x54a   : > { %11594 = vst [vmem:[#allocation123_spill] sm:$0xff] %v9410_v38 }
 0x54b   : > { %v9412_v15 = vpop.permute.xlu0 %3835 }
 0x54c   : > { %11595 = vst [vmem:[#allocation119_spill] sm:$0xff] %v9412_v15 }
 0x54d   : > { %4415 = vperm.xlu0 %6071, %v9102_v16   ;;  %4155 = vperm.xlu1 %6043, %v9097_v56  }
 0x54e   : > { %v9416_v34 = vpop.permute.xlu1 %3759 }
 0x54f   : > { %11596 = vst [vmem:[#allocation47_spill] sm:$0xff] %v9416_v34  ;;  %v9418_v46 = vpop.permute.xlu0 %3843 }
 0x550   : > { %11597 = vst [vmem:[#allocation120_spill] sm:$0xff] %v9418_v46 }
 0x551   : > { %4411 = vperm.xlu0 %6071, %v9097_v56   ;;  %4167 = vperm.xlu1 %6043, %v9114_v43  }
 0x552   : > { %v9422_v32 = vpop.permute.xlu1 %3763 }
 0x554   : > { %v9424_v50 = vpop.permute.xlu0 %3883 }
 0x555   : > { %11598 = vst [vmem:[#allocation76_spill] sm:$0xff] %v9424_v50  ;;  %4399 = vperm.xlu0 %6071, %v9078_v14   ;;  %6044 = vset.pattern.permute.xlu1 %v11579_v41 }
 0x556   : > { %4231 = vperm.xlu1 %6044, %v9114_v43   ;;  %v9429_v38 = vpop.permute.xlu1 %3771 }
 0x557   : > { %11599 = vst [vmem:[#allocation122_spill] sm:$0xff] %v9429_v38 }
 0x558   : > { %v9431_v5 = vpop.permute.xlu0 %3895 }
 0x559   : > { %11600 = vst [vmem:[#allocation121_spill] sm:$0xff] %v9431_v5  ;;  %6078 = vset.pattern.permute.xlu0 %v11601_v10 }
 0x55a   : > { %4543 = vperm.xlu0 %6078, %v9102_v16   ;;  %6046 = vset.pattern.permute.xlu1 %v11589_v30  ;;  %v9436_v46 = vpop.permute.xlu1 %3779 }
 0x55b   : > { %11602 = vst [vmem:[#allocation64_spill] sm:$0xff] %v9436_v46  ;;  %4295 = vperm.xlu1 %6046, %v9114_v43  }
 0x55c   : > { %v9439_v17 = vpop.permute.xlu0 %3903 }
 0x55e   : > { %4531 = vperm.xlu0 %6078, %v9085_v2  }
 0x55f   : > { %6047 = vset.pattern.permute.xlu1 %v11579_v41  ;;  %v9443_v11 = vpop.permute.xlu1 %3819 }
 0x560   : > { %11603 = vst [vmem:[#allocation68_spill] sm:$0xff] %v9443_v11  ;;  %4223 = vperm.xlu1 %6047, %v9102_v16   ;;  %v9446_v24 = vpop.permute.xlu0 %3911 }
 0x561   : > { %11604 = vst [vmem:[#allocation124_spill] sm:$0xff] %v9446_v24  ;;  %v11609_v24 = vmov 19  }
 0x562   : > { %6085 = vset.pattern.permute.xlu0 %v11605_v53 }
 0x563   : > { %4471 = vperm.xlu0 %6085, %v9090_v9   ;;  %v9450_v5 = vpop.permute.xlu1 %3827 }
 0x564   : > { %6048 = vset.pattern.permute.xlu1 %v11584_v42 }
 0x565   : > { %v9453_v46 = vpop.permute.xlu0 %3951  ;;  %4359 = vperm.xlu1 %6048, %v9114_v43  }
 0x566   : > { %11606 = vst [vmem:[#allocation67_spill] sm:$0xff] %v9453_v46 }
 0x567   : > { %4459 = vperm.xlu0 %6085, %v9073_v4   ;;  %v9457_v50 = vpop.permute.xlu1 %3831 }
 0x568   : > { %11607 = vst [vmem:[#allocation126_spill] sm:$0xff] %v9457_v50 }
 0x569   : > { %v9459_v59 = vpop.permute.xlu0 %3963  ;;  %6049 = vset.pattern.permute.xlu1 %v11579_v41 }
 0x56a   : > { %11608 = vst [vmem:[#allocation128_spill] sm:$0xff] %v9459_v59  ;;  %4219 = vperm.xlu1 %6049, %v9097_v56  }
 0x56b   : > { %6090 = vset.pattern.permute.xlu0 %v11609_v24  ;;  %v9464_v11 = vpop.permute.xlu1 %3839 }
 0x56c   : > { %4615 = vperm.xlu0 %6090, %v9114_v43  }
 0x56d   : > { %v9467_v26 = vpop.permute.xlu0 %3971 }
 0x56e   : > { %11610 = vst [vmem:[#allocation77_spill] sm:$0xff] %v9467_v26  ;;  %6050 = vset.pattern.permute.xlu1 %v11584_v42  ;;  %v11615_v26 = vmov 22  }
 0x56f   : > { %4355 = vperm.xlu1 %6050, %v9109_v63   ;;  %v9471_v49 = vpop.permute.xlu1 %3847 }
 0x570   : > { %11611 = vst [vmem:[#allocation70_spill] sm:$0xff] %v9471_v49  ;;  %4603 = vperm.xlu0 %6090, %v9097_v56  }
 0x572   : > { %v9474_v50 = vpop.permute.xlu0 %4011 }
 0x573   : > { %11612 = vst [vmem:[#allocation63_spill] sm:$0xff] %v9474_v50  ;;  %6051 = vset.pattern.permute.xlu1 %v11579_v41 }
 0x574   : > { %4591 = vperm.xlu0 %6090, %v9078_v14   ;;  %4215 = vperm.xlu1 %6051, %v9090_v9   ;;  %v9479_v0 = vpop.permute.xlu1 %3887 }
 0x575   : > { %11613 = vst [vmem:[#allocation133_spill] sm:$0xff] %v9479_v0  ;;  %v9588_v0 = vld [vmem:[#allocation2 + $0x6b] sm:$0xff] }
 0x576   : > { %v9481_v47 = vpop.permute.xlu0 %4023  ;;  %11642 = vst [vmem:[#allocation28_spill] sm:$0xff] %v9588_v0 }
 0x577   : > { %11614 = vst [vmem:[#allocation49_spill] sm:$0xff] %v9481_v47 }
 0x578   : > { %6097 = vset.pattern.permute.xlu0 %v11615_v26  ;;  %6052 = vset.pattern.permute.xlu1 %v11589_v30  ;;  %v9485_v3 = vpop.permute.xlu1 %3891 }
 0x579   : > { %4807 = vperm.xlu0 %6097, %v9114_v43   ;;  %4283 = vperm.xlu1 %6052, %v9097_v56  }
 0x57a   : > { %v9489_v49 = vpop.permute.xlu0 %4031 }
 0x57c   : > { %v9491_v50 = vpop.permute.xlu1 %3899 }
 0x57d   : > { %11616 = vst [vmem:[#allocation56_spill] sm:$0xff] %v9491_v50  ;;  %4795 = vperm.xlu0 %6097, %v9097_v56   ;;  %6053 = vset.pattern.permute.xlu1 %v11593_v39 }
 0x57e   : > { %4419 = vperm.xlu1 %6053, %v9109_v63   ;;  %v9496_v47 = vpop.permute.xlu0 %4039 }
 0x57f   : > { %11617 = vst [vmem:[#allocation131_spill] sm:$0xff] %v9496_v47 }
 0x580   : > { %v9498_v19 = vpop.permute.xlu1 %3907 }
 0x581   : > { %11618 = vst [vmem:[#allocation55_spill] sm:$0xff] %v9498_v19  ;;  %6102 = vset.pattern.permute.xlu0 %v11619_v33  ;;  %v11626_v33 = vmov 20  }
 0x582   : > { %4999 = vperm.xlu0 %6102, %v9114_v43   ;;  %6054 = vset.pattern.permute.xlu1 %v11605_v53 }
 0x583   : > { %v9503_v45 = vpop.permute.xlu0 %4079  ;;  %4487 = vperm.xlu1 %6054, %v9114_v43  }
 0x584   : > { %11620 = vst [vmem:[#allocation132_spill] sm:$0xff] %v9503_v45  ;;  %v11631_v45 = vmov 24  }
 0x585   : > { %v9506_v36 = vpop.permute.xlu1 %3947 }
 0x586   : > { %11621 = vst [vmem:[#allocation58_spill] sm:$0xff] %v9506_v36  ;;  %6103 = vset.pattern.permute.xlu0 %v11622_v13 }
 0x587   : > { %4735 = vperm.xlu0 %6103, %v9102_v16   ;;  %v9510_v22 = vpop.permute.xlu0 %4091  ;;  %6055 = vset.pattern.permute.xlu1 %v11589_v30 }
 0x588   : > { %11623 = vst [vmem:[#allocation144_spill] sm:$0xff] %v9510_v22  ;;  %4279 = vperm.xlu1 %6055, %v9090_v9  }
 0x589   : > { %v9514_v47 = vpop.permute.xlu1 %3955 }
 0x58b   : > { %4723 = vperm.xlu0 %6103, %v9085_v2   ;;  %v9517_v19 = vpop.permute.xlu0 %4099 }
 0x58c   : > { %11624 = vst [vmem:[#allocation135_spill] sm:$0xff] %v9517_v19  ;;  %6056 = vset.pattern.permute.xlu1 %v11584_v42 }
 0x58d   : > { %4347 = vperm.xlu1 %6056, %v9097_v56   ;;  %v9521_v36 = vpop.permute.xlu1 %3959 }
 0x58e   : > { %11625 = vst [vmem:[#allocation134_spill] sm:$0xff] %v9521_v36 }
 0x58f   : > { %6106 = vset.pattern.permute.xlu0 %v11626_v33 }
 0x590   : > { %4675 = vperm.xlu0 %6106, %v9109_v63   ;;  %v9525_v6 = vpop.permute.xlu0 %4139 }
 0x591   : > { %11627 = vst [vmem:[#allocation143_spill] sm:$0xff] %v9525_v6  ;;  %6057 = vset.pattern.permute.xlu1 %v11605_v53  ;;  %v9528_v29 = vpop.permute.xlu1 %3967 }
 0x592   : > { %4483 = vperm.xlu1 %6057, %v9109_v63  }
 0x594   : > { %4663 = vperm.xlu0 %6106, %v9090_v9   ;;  %v9532_v19 = vpop.permute.xlu0 %4151 }
 0x595   : > { %11628 = vst [vmem:[#allocation137_spill] sm:$0xff] %v9532_v19  ;;  %v9534_v22 = vpop.permute.xlu1 %3975 }
 0x596   : > { %11629 = vst [vmem:[#allocation136_spill] sm:$0xff] %v9534_v22  ;;  %6058 = vset.pattern.permute.xlu1 %v11601_v10 }
 0x597   : > { %4551 = vperm.xlu1 %6058, %v9114_v43  }
 0x598   : > { %4651 = vperm.xlu0 %6106, %v9073_v4   ;;  %v9541_v6 = vpop.permute.xlu0 %4159 }
 0x59a   : > { %v9539_v36 = vpop.permute.xlu1 %4015 }
 0x59b   : > { %11630 = vst [vmem:[#allocation147_spill] sm:$0xff] %v9539_v36  ;;  %6060 = vset.pattern.permute.xlu1 %v11589_v30  ;;  %v11634_v36 = vmov 23  }
 0x59c   : > { %6111 = vset.pattern.permute.xlu0 %v11631_v45  ;;  %4275 = vperm.xlu1 %6060, %v9085_v2   ;;  %v9550_v22 = vpop.permute.xlu0 %4163  ;;  %v9582_v45 = vld [vmem:[#allocation2 + $0x6c] sm:$0xff] }
 0x59d   : > { %4927 = vperm.xlu0 %6111, %v9102_v16   ;;  %11632 = vst [vmem:[#allocation139_spill] sm:$0xff] %v9550_v22  ;;  %11640 = vst [vmem:[#allocation11_spill] sm:$0xff] %v9582_v45 }
 0x59e   : > { %v9547_v19 = vpop.permute.xlu1 %4019 }
 0x5a0   : > { %6061 = vset.pattern.permute.xlu1 %v11584_v42 }
 0x5a1   : > { %4915 = vperm.xlu0 %6111, %v9085_v2   ;;  %4343 = vperm.xlu1 %6061, %v9090_v9   ;;  %v9562_v50 = vpop.permute.xlu0 %4227 }
 0x5a2   : > { %v9554_v59 = vpop.permute.xlu1 %4027  ;;  %11636 = vst [vmem:[#allocation22_spill] sm:$0xff] %v9562_v50 }
 0x5a3   : > { %11633 = vst [vmem:[#allocation138_spill] sm:$0xff] %v9554_v59 }
 0x5a5   : > { %6122 = vset.pattern.permute.xlu0 %v11634_v36  ;;  %6062 = vset.pattern.permute.xlu1 %v11605_v53  ;;  %v9569_v59 = vpop.permute.xlu0 %4211 }
 0x5a6   : > { %4867 = vperm.xlu0 %6122, %v9109_v63   ;;  %4479 = vperm.xlu1 %6062, %v9102_v16   ;;  %v9560_v46 = vpop.permute.xlu1 %4035 }
 0x5a7   : > { %11635 = vst [vmem:[#allocation141_spill] sm:$0xff] %v9560_v46 }
 0x5a9   : > { %v9577_v50 = vpop.permute.xlu0 %4207 }
 0x5aa   : > { %4855 = vperm.xlu0 %6122, %v9090_v9   ;;  %6063 = vset.pattern.permute.xlu1 %v11601_v10  ;;  %11638 = vst [vmem:[#allocation140_spill] sm:$0xff] %v9577_v50  ;;  %v9599_v50 = vld [vmem:[#allocation2 + $0x6f] sm:$0xff] }
 0x5ab   : > { %4547 = vperm.xlu1 %6063, %v9109_v63   ;;  %v9567_v22 = vpop.permute.xlu1 %4075  ;;  %11644 = vst [vmem:[#allocation7_spill] sm:$0xff] %v9599_v50 }
 0x5ac   : > { %11637 = vst [vmem:[#allocation66_spill] sm:$0xff] %v9567_v22  ;;  %v3471_v22 = vmul.f32 %v9286_v31, %v9582_v45  ;;  %v9607_v31 = vld [vmem:[%s10918_s4 + $0x1] ss:$0 sm:$0xff]  ;;  %v3599_v45 = vmul.f32 %v9344_v48, %v9599_v50  ;;  %v3623_v50 = vld [vmem:[#allocation2 + $0x70] sm:$0xff] }
 0x5ad   : > { %v3663_v28 = vmul.f32 %v9346_v7, %v3623_v50  ;;  %v9660_v7 = vld [vmem:[#allocation2 + $0x73] sm:$0xff] }
 0x5ae   : > { %4851 = vperm.xlu0 %6122, %v9085_v2   ;;  %v9601_v38 = vpop.permute.xlu0 %4351  ;;  %11647 = vst [vmem:[#allocation38_spill] sm:$0xff] %v9660_v7 }
 0x5af   : > { %6064 = vset.pattern.permute.xlu1 %v11579_v41  ;;  %v9573_v15 = vpop.permute.xlu1 %4083  ;;  %v11641_v41 = vmov 26  }
 0x5b0   : > { %4203 = vperm.xlu1 %6064, %v9073_v4  }
 0x5b2   : > { %4843 = vperm.xlu0 %6122, %v9073_v4   ;;  %v9636_v34 = vpop.permute.xlu0 %4339 }
 0x5b3   : > { %v9579_v46 = vpop.permute.xlu1 %4087 }
 0x5b4   : > { %11639 = vst [vmem:[#allocation71_spill] sm:$0xff] %v9579_v46  ;;  %6065 = vset.pattern.permute.xlu1 %v11589_v30  ;;  %v3415_v30 = vmul.f32 %v9250_v52, %v9588_v0  ;;  %v3535_v46 = vmul.f32 %v9298_v44, %v9590_v23  ;;  %v9619_v44 = vld [vmem:[%s10918_s4] ss:$0 sm:$0xff] }
 0x5b5   : > { %4271 = vperm.xlu1 %6065, %v9078_v14  }
 0x5b6   : > { %6125 = vset.pattern.permute.xlu0 %v11641_v41  ;;  %v3479_v41 = vmul.f32 %v9607_v31, %v3471_v22  ;;  %v3423_v23 = vmul.f32 %v9619_v44, %v3415_v30  ;;  %v9625_v22 = vld [vmem:[%s10918_s4 + $0x2] ss:$0 sm:$0xff]  ;;  %v3687_v30 = vld [vmem:[#allocation2 + $0x71] sm:$0xff] }
 0x5b7   : > { %5059 = vperm.xlu0 %6125, %v9109_v63   ;;  %v9593_v4 = vpop.permute.xlu1 %4095  ;;  %v3543_v48 = vmul.f32 %v9625_v22, %v3535_v46 }
 0x5b8   : > { %v3487_v0 = vadd.f32 %v3479_v41, %v3423_v23  ;;  %v3727_v23 = vmul.f32 %v9403_v20, %v3687_v30  ;;  %v3791_v30 = vmul.f32 %v9392_v35, %v9660_v7 }
 0x5b9   : > { %6067 = vset.pattern.permute.xlu1 %v11593_v39 }
 0x5ba   : > { %4407 = vperm.xlu1 %6067, %v9090_v9   ;;  %v3551_v46 = vadd.f32 %v3543_v48, %v3487_v0  ;;  %v9662_v48 = vpop.permute.xlu0 %4291 }
 0x5bb   : > { %5055 = vperm.xlu0 %6125, %v9102_v16   ;;  %v9614_v52 = vpop.permute.xlu1 %4103  ;;  %v9631_v16 = vld [vmem:[%s10918_s4 + $0x3] ss:$0 sm:$0xff]  ;;  %11648 = vst [vmem:[#allocation30_spill] sm:$0xff] %v9662_v48 }
 0x5bc   : > { %11645 = vst [vmem:[#allocation142_spill] sm:$0xff] %v9614_v52  ;;  %v3607_v52 = vmul.f32 %v9631_v16, %v3599_v45  ;;  %v9646_v45 = vld [vmem:[%s10918_s4 + $0x4] ss:$0 sm:$0xff] }
 0x5bd   : > { %v3671_v50 = vmul.f32 %v9646_v45, %v3663_v28 }
 0x5be   : > { %6068 = vset.pattern.permute.xlu1 %v11605_v53  ;;  %v3615_v58 = vadd.f32 %v3607_v52, %v3551_v46  ;;  %v3432_v52 = vld [vmem:[#allocation2 + $0x74] sm:$0xff] }
 0x5bf   : > { %5047 = vperm.xlu0 %6125, %v9090_v9   ;;  %4475 = vperm.xlu1 %6068, %v9097_v56   ;;  %v9654_v9 = vld [vmem:[%s10918_s4 + $0x5] ss:$0 sm:$0xff]  ;;  %v3855_v46 = vmul.f32 %v9464_v11, %v3432_v52  ;;  %v9683_v11 = vld [vmem:[%s10918_s4 + $0x7] ss:$0 sm:$0xff]  ;;  %v4288_v52 = vpop.permute.xlu0 %4287 }
 0x5c0   : > { %v9641_v41 = vpop.permute.xlu1 %4143  ;;  %v3735_v20 = vmul.f32 %v9654_v9, %v3727_v23  ;;  %v3679_v28 = vadd.f32 %v3671_v50, %v3615_v58  ;;  %v9677_v58 = vld [vmem:[%s10918_s4 + $0x6] ss:$0 sm:$0xff] }
 0x5c1   : > { %11646 = vst [vmem:[#allocation80_spill] sm:$0xff] %v9641_v41  ;;  %v3799_v35 = vmul.f32 %v9677_v58, %v3791_v30  ;;  %v3863_v50 = vmul.f32 %v9683_v11, %v3855_v46  ;;  %v3433_v46 = vld [vmem:[#allocation2 + $0x7c] sm:$0xff] }
 0x5c2   : > { %v3743_v41 = vadd.f32 %v3735_v20, %v3679_v28  ;;  %v9686_v20 = vld [vmem:[#allocation2 + $0x75] sm:$0xff]  ;;  %v11652_v28 = vmov 0  }
 0x5c3   : > { %5043 = vperm.xlu0 %6125, %v9085_v2   ;;  %6069 = vset.pattern.permute.xlu1 %v11609_v24  ;;  %11651 = vst [vmem:[#allocation37_spill] sm:$0xff] %v9686_v20 }
 0x5c4   : > { %4611 = vperm.xlu1 %6069, %v9109_v63   ;;  %v9658_v0 = vpop.permute.xlu1 %4147  ;;  %v9671_v63 = vld [vmem:[#allocation2 + $0x7b] sm:$0xff]  ;;  %v3807_v48 = vadd.f32 %v3799_v35, %v3743_v41  ;;  %v4047_v41 = vmul.f32 %v9489_v49, %v3433_v46  ;;  %v9723_v49 = vld [vmem:[%s10918_s4 + $0xa] ss:$0 sm:$0xff] }
 0x5c5   : > { %11650 = vst [vmem:[#allocation43_spill] sm:$0xff] %v9671_v63  ;;  %11657 = vst [vmem:[#allocation88_spill] sm:$0xff] %v9723_v49  ;;  %v3561_v46 = vld [vmem:[#allocation2 + $0x7f] sm:$0xff] }
 0x5c6   : > { %v3871_v7 = vadd.f32 %v3863_v50, %v3807_v48 }
 0x5c7   : > { %5039 = vperm.xlu0 %6125, %v9078_v14  }
 0x5c8   : > { %6070 = vset.pattern.permute.xlu1 %v11626_v33  ;;  %v9669_v23 = vpop.permute.xlu1 %4155 }
 0x5c9   : > { %11649 = vst [vmem:[#allocation9_spill] sm:$0xff] %v9669_v23  ;;  %4679 = vperm.xlu1 %6070, %v9114_v43   ;;  %v3919_v43 = vmul.f32 %v9439_v17, %v9686_v20  ;;  %v3983_v23 = vmul.f32 %v9528_v29, %v9671_v63  ;;  %v9709_v29 = vld [vmem:[%s10918_s4 + $0x9] ss:$0 sm:$0xff] }
 0x5cb   : > { %6131 = vset.pattern.permute.xlu0 %v11652_v28  ;;  %v9702_v28 = vld [vmem:[%s10918_s4 + $0x8] ss:$0 sm:$0xff]  ;;  %v3991_v48 = vmul.f32 %v9709_v29, %v3983_v23 }
 0x5cc   : > { %v9693_v30 = vpop.permute.xlu1 %4167  ;;  %v3927_v17 = vmul.f32 %v9702_v28, %v3919_v43  ;;  %v4055_v43 = vmul.f32 %v9723_v49, %v4047_v41  ;;  %v3689_v41 = vld [vmem:[#allocation2 + $0x81] sm:$0xff] }
 0x5cd   : > { %11653 = vst [vmem:[#allocation62_spill] sm:$0xff] %v9693_v30  ;;  %6072 = vset.pattern.permute.xlu1 %v11584_v42  ;;  %v4111_v30 = vmul.f32 %v9593_v4, %v9697_v1  ;;  %v3753_v1 = vld [vmem:[#allocation2 + $0x83] sm:$0xff] }
 0x5ce   : > { %4335 = vperm.xlu1 %6072, %v9078_v14   ;;  %v9712_v14 = vpop.permute.xlu0 %4267  ;;  %v3935_v50 = vadd.f32 %v3927_v17, %v3871_v7  ;;  %v9730_v7 = vld [vmem:[%s10918_s4 + $0xb] ss:$0 sm:$0xff] }
 0x5cf   : > { %11655 = vst [vmem:[#allocation40_spill] sm:$0xff] %v9712_v14  ;;  %v4175_v14 = vmul.f32 %v9541_v6, %v3561_v46  ;;  %v4119_v4 = vmul.f32 %v9730_v7, %v4111_v30  ;;  %v9742_v6 = vld [vmem:[%s10918_s4 + $0xc] ss:$0 sm:$0xff]  ;;  %v4303_v30 = vmul.f32 %v4288_v52, %v3689_v41  ;;  %v9758_v52 = vld [vmem:[%s10918_s4 + $0xe] ss:$0 sm:$0xff] }
 0x5d0   : > { %v3999_v23 = vadd.f32 %v3991_v48, %v3935_v50  ;;  %v4199_v48 = vld [vmem:[#allocation2 + $0x80] sm:$0xff] }
 0x5d1   : > { %v9714_v35 = vpop.permute.xlu1 %4231  ;;  %v4183_v50 = vmul.f32 %v9742_v6, %v4175_v14 }
 0x5d2   : > { %11656 = vst [vmem:[#allocation44_spill] sm:$0xff] %v9714_v35  ;;  %6073 = vset.pattern.permute.xlu1 %v11593_v39  ;;  %v4063_v35 = vadd.f32 %v4055_v43, %v3999_v23  ;;  %v9747_v43 = vld [vmem:[#allocation2 + $0x84] sm:$0xff] }
 0x5d3   : > { %4403 = vperm.xlu1 %6073, %v9085_v2   ;;  %v9735_v2 = vpop.permute.xlu0 %4423  ;;  %11660 = vst [vmem:[#allocation69_spill] sm:$0xff] %v9747_v43  ;;  %v9752_v23 = vld [vmem:[%s10915_s1 + $0x68] sm:$0xff] }
 0x5d4   : > { %11659 = vst [vmem:[#allocation51_spill] sm:$0xff] %v9735_v2  ;;  %v4127_v46 = vadd.f32 %v4119_v4, %v4063_v35  ;;  %v4367_v2 = vmul.f32 %v9601_v38, %v3753_v1  ;;  %11661 = vst [vmem:[#allocation50_spill] sm:$0xff] %v9752_v23  ;;  %v4311_v1 = vmul.f32 %v9758_v52, %v4303_v30  ;;  %v9765_v35 = vld [vmem:[%s10918_s4 + $0xd] ss:$0 sm:$0xff]  ;;  %v9786_v30 = vld [vmem:[%s10915_s1 + $0x78] sm:$0xff] }
 0x5d5   : > { %11664 = vst [vmem:[#allocation61_spill] sm:$0xff] %v9786_v30 }
 0x5d6   : > { %v9733_v17 = vpop.permute.xlu1 %4295  ;;  %v4191_v14 = vadd.f32 %v4183_v50, %v4127_v46  ;;  %v9780_v50 = vld [vmem:[%s10918_s4 + $0x10] ss:$0 sm:$0xff] }
 0x5d7   : > { %11658 = vst [vmem:[#allocation10_spill] sm:$0xff] %v9733_v17  ;;  %6074 = vset.pattern.permute.xlu1 %v11601_v10  ;;  %11663 = vst [vmem:[#allocation79_spill] sm:$0xff] %v9780_v50 }
 0x5d8   : > { %4539 = vperm.xlu1 %6074, %v9097_v56   ;;  %v4416_v56 = vpop.permute.xlu0 %4415 }
 0x5d9   : > { %v4431_v38 = vmul.f32 %v4416_v56, %v9747_v43 }
 0x5db   : > { %v4224_v17 = vpop.permute.xlu1 %4223  ;;  %v4439_v46 = vmul.f32 %v9780_v50, %v4431_v38  ;;  %v9806_v38 = vld [vmem:[%s10915_s1 + $0x50] sm:$0xff] }
 0x5dc   : > { %v4239_v63 = vmul.f32 %v4224_v17, %v4199_v48  ;;  %6075 = vset.pattern.permute.xlu1 %v11609_v24  ;;  %v9771_v17 = vld [vmem:[%s10918_s4 + $0xf] ss:$0 sm:$0xff]  ;;  %11667 = vst [vmem:[#allocation84_spill] sm:$0xff] %v9806_v38  ;;  %v9837_v50 = vld [vmem:[#allocation2 + $0x57] sm:$0xff] }
 0x5dd   : > { %4607 = vperm.xlu1 %6075, %v9752_v23   ;;  %v4375_v41 = vmul.f32 %v9771_v17, %v4367_v2  ;;  %11674 = vst [vmem:[#allocation97_spill] sm:$0xff] %v9837_v50 }
 0x5de   : > { %v4247_v4 = vmul.f32 %v9765_v35, %v4239_v63 }
 0x5e0   : > { %v4255_v48 = vadd.f32 %v4247_v4, %v4191_v14  ;;  %v9774_v20 = vpop.permute.xlu1 %4359  ;;  %v9797_v4 = vld [vmem:[%s10915_s1 + $0x40] sm:$0xff] }
 0x5e1   : > { %11662 = vst [vmem:[#allocation52_spill] sm:$0xff] %v9774_v20  ;;  %6076 = vset.pattern.permute.xlu1 %v11622_v13 }
 0x5e2   : > { %v4319_v63 = vadd.f32 %v4311_v1, %v4255_v48  ;;  %4743 = vperm.xlu1 %6076, %v9786_v30  }
 0x5e4   : > { %v4383_v2 = vadd.f32 %v4375_v41, %v4319_v63  ;;  %v9815_v41 = vld [vmem:[%s10915_s1 + $0x58] sm:$0xff] }
 0x5e5   : > { %v9789_v56 = vpop.permute.xlu1 %4219 }
 0x5e6   : > { %11665 = vst [vmem:[#allocation81_spill] sm:$0xff] %v9789_v56  ;;  %6077 = vset.pattern.permute.xlu1 %v11584_v42  ;;  %v9792_v14 = vadd.f32 %v4439_v46, %v4383_v2  ;;  %v9822_v46 = vld [vmem:[#allocation2 + $0x54] sm:$0xff] }
 0x5e7   : > { %4331 = vperm.xlu1 %6077, %v9797_v4   ;;  %11670 = vst [vmem:[#allocation83_spill] sm:$0xff] %v9822_v46  ;;  %v3468_v63 = vmul.f32 %v9274_v60, %v9822_v46  ;;  %v9826_v2 = vld [vmem:[#allocation2 + $0x53] sm:$0xff] }
 0x5e8   : > { %11671 = vst [vmem:[#allocation16_spill] sm:$0xff] %v9826_v2  ;;  %v9842_v60 = vld [vmem:[%s10915_s1 + $0x70] sm:$0xff] }
 0x5ea   : > { %v9800_v1 = vpop.permute.xlu1 %4355 }
 0x5eb   : > { %11666 = vst [vmem:[#allocation86_spill] sm:$0xff] %v9800_v1  ;;  %6079 = vset.pattern.permute.xlu1 %v11605_v53  ;;  %v9828_v1 = vld [vmem:[#allocation2 + $0x55] sm:$0xff] }
 0x5ec   : > { %4467 = vperm.xlu1 %6079, %v9806_v38   ;;  %11672 = vst [vmem:[#allocation92_spill] sm:$0xff] %v9828_v1  ;;  %v3532_v43 = vmul.f32 %v9306_v37, %v9828_v1 }
 0x5ee   : > { %v3540_v37 = vmul.f32 %v9625_v22, %v3532_v43 }
 0x5ef   : > { %v9809_v42 = vpop.permute.xlu1 %4215 }
 0x5f0   : > { %11668 = vst [vmem:[#allocation19_spill] sm:$0xff] %v9809_v42  ;;  %6080 = vset.pattern.permute.xlu1 %v11601_v10  ;;  %v3412_v42 = vmul.f32 %v9238_v54, %v9826_v2  ;;  %v3620_v54 = vld [vmem:[#allocation2 + $0x58] sm:$0xff] }
 0x5f1   : > { %4535 = vperm.xlu1 %6080, %v9815_v41   ;;  %v3660_v1 = vmul.f32 %v9363_v25, %v3620_v54  ;;  %v9865_v54 = vld [vmem:[#allocation2 + $0x5c] sm:$0xff] }
 0x5f2   : > { %v3420_v56 = vmul.f32 %v9619_v44, %v3412_v42 }
 0x5f3   : > { %v3668_v43 = vmul.f32 %v9646_v45, %v3660_v1  ;;  %v9878_v1 = vld [vmem:[%s10915_s1 + $0x48] sm:$0xff] }
 0x5f4   : > { %v9818_v48 = vpop.permute.xlu1 %4283 }
 0x5f5   : > { %11669 = vst [vmem:[#allocation89_spill] sm:$0xff] %v9818_v48  ;;  %6081 = vset.pattern.permute.xlu1 %v11626_v33  ;;  %v3476_v48 = vmul.f32 %v9607_v31, %v3468_v63 }
 0x5f6   : > { %4671 = vperm.xlu1 %6081, %v9752_v23   ;;  %v9853_v23 = vld [vmem:[#allocation2 + $0x59] sm:$0xff] }
 0x5f7   : > { %11676 = vst [vmem:[#allocation94_spill] sm:$0xff] %v9853_v23  ;;  %v3484_v2 = vadd.f32 %v3476_v48, %v3420_v56  ;;  %v3724_v63 = vmul.f32 %v9390_v55, %v9853_v23  ;;  %v3852_v55 = vmul.f32 %v9450_v5, %v9865_v54  ;;  %v9873_v56 = vld [vmem:[#allocation2 + $0x5d] sm:$0xff] }
 0x5f9   : > { %v9830_v20 = vpop.permute.xlu1 %4419  ;;  %v3548_v42 = vadd.f32 %v3540_v37, %v3484_v2  ;;  %v9884_v2 = vld [vmem:[#allocation2 + $0x63] sm:$0xff] }
 0x5fa   : > { %11673 = vst [vmem:[#allocation39_spill] sm:$0xff] %v9830_v20  ;;  %6082 = vset.pattern.permute.xlu1 %v11622_v13  ;;  %v3596_v20 = vmul.f32 %v9331_v62, %v9837_v50  ;;  %v9860_v62 = vld [vmem:[#allocation2 + $0x5b] sm:$0xff]  ;;  %v3980_v37 = vmul.f32 %v9514_v47, %v9884_v2 }
 0x5fb   : > { %4739 = vperm.xlu1 %6082, %v9842_v60   ;;  %v3788_v25 = vmul.f32 %v9422_v32, %v9860_v62 }
 0x5fc   : > { %v3604_v51 = vmul.f32 %v9631_v16, %v3596_v20  ;;  %v3732_v20 = vmul.f32 %v9654_v9, %v3724_v63 }
 0x5fd   : > { %v3796_v48 = vmul.f32 %v9677_v58, %v3788_v25 }
 0x5fe   : > { %v9851_v46 = vpop.permute.xlu1 %4487 }
 0x5ff   : > { %11675 = vst [vmem:[#allocation91_spill] sm:$0xff] %v9851_v46  ;;  %6083 = vset.pattern.permute.xlu1 %v11593_v39  ;;  %v3612_v39 = vadd.f32 %v3604_v51, %v3548_v42  ;;  %v3916_v51 = vmul.f32 %v9485_v3, %v9873_v56  ;;  %v9891_v42 = vld [vmem:[#allocation2 + $0x64] sm:$0xff] }
 0x600   : > { %4395 = vperm.xlu1 %6083, %v9797_v4   ;;  %v4044_v3 = vmul.f32 %v9547_v19, %v9891_v42  ;;  %v9911_v19 = vld [vmem:[%s10915_s1 + $0x60] sm:$0xff] }
 0x601   : > { %v3676_v32 = vadd.f32 %v3668_v43, %v3612_v39  ;;  %v3924_v25 = vmul.f32 %v9702_v28, %v3916_v51  ;;  %v9898_v39 = vld [vmem:[#allocation2 + $0x65] sm:$0xff] }
 0x602   : > { %11678 = vst [vmem:[#allocation98_spill] sm:$0xff] %v9898_v39  ;;  %v4108_v47 = vmul.f32 %v9573_v15, %v9898_v39 }
 0x603   : > { %v9867_v46 = vpop.permute.xlu1 %4279  ;;  %v3740_v5 = vadd.f32 %v3732_v20, %v3676_v32  ;;  %v4132_v32 = vld [vmem:[#allocation2 + $0x67] sm:$0xff] }
 0x604   : > { %11677 = vst [vmem:[#allocation13_spill] sm:$0xff] %v9867_v46  ;;  %6084 = vset.pattern.permute.xlu1 %v11605_v53  ;;  %v3860_v53 = vmul.f32 %v9683_v11, %v3852_v55  ;;  %v3988_v55 = vmul.f32 %v9709_v29, %v3980_v37  ;;  %v4172_v51 = vmul.f32 %v9658_v0, %v4132_v32  ;;  %v9920_v0 = vpop.permute.xlu0 %4411 }
 0x605   : > { %4463 = vperm.xlu1 %6084, %v9878_v1   ;;  %v3804_v43 = vadd.f32 %v3796_v48, %v3740_v5  ;;  %v4052_v48 = vmul.f32 %v9723_v49, %v4044_v3  ;;  %v4116_v15 = vmul.f32 %v9730_v7, %v4108_v47  ;;  %v4260_v47 = vld [vmem:[#allocation2 + $0x69] sm:$0xff] }
 0x606   : > { %v4180_v37 = vmul.f32 %v9742_v6, %v4172_v51 }
 0x607   : > { %v3868_v20 = vadd.f32 %v3860_v53, %v3804_v43 }
 0x608   : > { %v9889_v63 = vpop.permute.xlu1 %4347 }
 0x609   : > { %6086 = vset.pattern.permute.xlu1 %v11609_v24  ;;  %v3932_v23 = vadd.f32 %v3924_v25, %v3868_v20  ;;  %v9918_v25 = vld [vmem:[#allocation2 + $0x68] sm:$0xff] }
 0x60a   : > { %4599 = vperm.xlu1 %6086, %v9815_v41   ;;  %v4236_v3 = vmul.f32 %v9569_v59, %v9918_v25 }
 0x60b   : > { %v3996_v5 = vadd.f32 %v3988_v55, %v3932_v23  ;;  %v9926_v55 = vld [vmem:[#allocation2 + $0x6b] sm:$0xff] }
 0x60c   : > { %11681 = vst [vmem:[#allocation6_spill] sm:$0xff] %v9926_v55  ;;  %v4364_v51 = vmul.f32 %v9636_v34, %v9926_v55 }
 0x60d   : > { %v9903_v46 = vpop.permute.xlu1 %4483  ;;  %v4060_v53 = vadd.f32 %v4052_v48, %v3996_v5  ;;  %v4244_v48 = vmul.f32 %v9765_v35, %v4236_v3  ;;  %v9940_v3 = vld [vmem:[#allocation2 + $0x4c] sm:$0xff] }
 0x60e   : > { %11679 = vst [vmem:[#allocation42_spill] sm:$0xff] %v9903_v46  ;;  %6087 = vset.pattern.permute.xlu1 %v11626_v33  ;;  %11683 = vst [vmem:[#allocation17_spill] sm:$0xff] %v9940_v3  ;;  %v3555_v46 = vld [vmem:[#allocation2 + $0x4f] sm:$0xff] }
 0x60f   : > { %4667 = vperm.xlu1 %6087, %v9911_v19   ;;  %v4124_v20 = vadd.f32 %v4116_v15, %v4060_v53  ;;  %v4372_v53 = vmul.f32 %v9771_v17, %v4364_v51  ;;  %v9951_v51 = vld [vmem:[#allocation2 + $0x4b] sm:$0xff]  ;;  %v3595_v50 = vmul.f32 %v9314_v21, %v3555_v46 }
 0x610   : > { %11687 = vst [vmem:[#allocation45_spill] sm:$0xff] %v9951_v51 }
 0x611   : > { %v4188_v23 = vadd.f32 %v4180_v37, %v4124_v20 }
 0x612   : > { %v9916_v43 = vpop.permute.xlu1 %4551 }
 0x613   : > { %11680 = vst [vmem:[#allocation15_spill] sm:$0xff] %v9916_v43  ;;  %6088 = vset.pattern.permute.xlu1 %v11615_v26  ;;  %v9932_v43 = vpop.permute.xlu0 %4399  ;;  %v4252_v59 = vadd.f32 %v4244_v48, %v4188_v23  ;;  %v9949_v48 = vld [vmem:[#allocation2 + $0x85] sm:$0xff] }
 0x614   : > { %4803 = vperm.xlu1 %6088, %v9842_v60   ;;  %11686 = vst [vmem:[#allocation53_spill] sm:$0xff] %v9949_v48 }
 0x617   : > { %v4276_v32 = vpop.permute.xlu1 %4275  ;;  %v4544_v23 = vpop.permute.xlu0 %4543 }
 0x618   : > { %v4300_v5 = vmul.f32 %v4276_v32, %v4260_v47  ;;  %6089 = vset.pattern.permute.xlu1 %v11634_v36  ;;  %v3467_v47 = vmul.f32 %v9266_v57, %v9940_v3  ;;  %v9947_v32 = vld [vmem:[#allocation2 + $0x8b] sm:$0xff] }
 0x619   : > { %4871 = vperm.xlu1 %6089, %v9786_v30   ;;  %11685 = vst [vmem:[#allocation31_spill] sm:$0xff] %v9947_v32  ;;  %v3558_v3 = vld [vmem:[#allocation2 + $0x67] sm:$0xff] }
 0x61a   : > { %v4308_v15 = vmul.f32 %v9758_v52, %v4300_v5  ;;  %v9953_v5 = vld [vmem:[#allocation2 + $0x4d] sm:$0xff]  ;;  %v3475_v39 = vmul.f32 %v9607_v31, %v3467_v47 }
 0x61b   : > { %11688 = vst [vmem:[#allocation59_spill] sm:$0xff] %v9953_v5  ;;  %v9978_v47 = vld [vmem:[%s10918_s4 + $0x11] ss:$0 sm:$0xff] }
 0x61c   : > { %v4316_v37 = vadd.f32 %v4308_v15, %v4252_v59  ;;  %v9937_v20 = vpop.permute.xlu1 %4343  ;;  %v4559_v59 = vmul.f32 %v4544_v23, %v9947_v32  ;;  %v3411_v15 = vmul.f32 %v9222_v61, %v9951_v51  ;;  %v3619_v23 = vld [vmem:[#allocation2 + $0x50] sm:$0xff]  ;;  %v9982_v32 = vld [vmem:[#allocation2 + $0x63] sm:$0xff] }
 0x61d   : > { %11682 = vst [vmem:[#allocation18_spill] sm:$0xff] %v9937_v20  ;;  %6091 = vset.pattern.permute.xlu1 %v11601_v10  ;;  %v9963_v20 = vld [vmem:[#allocation2 + $0x64] sm:$0xff]  ;;  %11691 = vst [vmem:[#allocation75_spill] sm:$0xff] %v9982_v32  ;;  %v11694_v51 = vld [vmem:[#allocation106_spill] sm:$0xff] }
 0x61e   : > { %4527 = vperm.xlu1 %6091, %v9878_v1   ;;  %v9943_v34 = vadd.f32 %v4372_v53, %v4316_v37  ;;  %v3531_v53 = vmul.f32 %v9300_v18, %v9953_v5  ;;  %11689 = vst [vmem:[#allocation25_spill] sm:$0xff] %v9963_v20  ;;  %v3470_v61 = vmul.f32 %v9272_v12, %v9963_v20  ;;  %v9972_v18 = vld [vmem:[%s10918_s4 + $0x12] ss:$0 sm:$0xff] }
 0x61f   : > { %11690 = vst [vmem:[#allocation54_spill] sm:$0xff] %v9972_v18  ;;  %v3419_v46 = vmul.f32 %v9619_v44, %v3411_v15  ;;  %v3603_v15 = vmul.f32 %v9631_v16, %v3595_v50 }
 0x620   : > { %11684 = vst [vmem:[#allocation36_spill] sm:$0xff] %v9943_v34  ;;  %v3539_v12 = vmul.f32 %v9625_v22, %v3531_v53  ;;  %v3659_v34 = vmul.f32 %v9357_v40, %v3619_v23  ;;  %v3478_v53 = vmul.f32 %v9607_v31, %v3470_v61  ;;  %v3598_v40 = vmul.f32 %v11694_v51, %v3558_v3  ;;  %v3683_v23 = vld [vmem:[#allocation2 + $0x51] sm:$0xff]  ;;  %v11699_v3 = vld [vmem:[#allocation47_spill] sm:$0xff] }
 0x621   : > { %v4480_v37 = vpop.permute.xlu1 %4479 }
 0x622   : > { %v4495_v57 = vmul.f32 %v4480_v37, %v9949_v48  ;;  %6092 = vset.pattern.permute.xlu1 %v11609_v24  ;;  %v4567_v37 = vmul.f32 %v9972_v18, %v4559_v59  ;;  %v9985_v48 = vld [vmem:[#allocation2 + $0x65] sm:$0xff]  ;;  %v3414_v59 = vmul.f32 %v9253_v8, %v9982_v32 }
 0x623   : > { %4595 = vperm.xlu1 %6092, %v9806_v38   ;;  %11692 = vst [vmem:[#allocation95_spill] sm:$0xff] %v9985_v48  ;;  %v3534_v55 = vmul.f32 %v9312_v27, %v9985_v48  ;;  %v11698_v32 = vld [vmem:[#allocation16_spill] sm:$0xff] }
 0x624   : > { %v4503_v21 = vmul.f32 %v9978_v47, %v4495_v57  ;;  %v3483_v57 = vadd.f32 %v3475_v39, %v3419_v46  ;;  %v3422_v39 = vmul.f32 %v9619_v44, %v3414_v59  ;;  %v11697_v46 = vld [vmem:[#allocation125_spill] sm:$0xff]  ;;  %v3787_v51 = vmul.f32 %v11699_v3, %v11698_v32  ;;  %v11701_v59 = vld [vmem:[#allocation50_spill] sm:$0xff]  ;;  %v11705_v3 = vld [vmem:[#allocation83_spill] sm:$0xff] }
 0x625   : > { %v3542_v50 = vmul.f32 %v9625_v22, %v3534_v55  ;;  %v3662_v48 = vmul.f32 %v11697_v46, %v9918_v25  ;;  %v3686_v25 = vld [vmem:[#allocation2 + $0x69] sm:$0xff] }
 0x626   : > { %v4511_v5 = vadd.f32 %v4503_v21, %v9792_v14  ;;  %v9993_v20 = vpop.permute.xlu1 %4547  ;;  %v3547_v27 = vadd.f32 %v3539_v12, %v3483_v57  ;;  %v3667_v14 = vmul.f32 %v9646_v45, %v3659_v34  ;;  %v11696_v21 = vld [vmem:[#allocation114_spill] sm:$0xff]  ;;  %v11702_v32 = vld [vmem:[#allocation113_spill] sm:$0xff] }
 0x627   : > { %11693 = vst [vmem:[#allocation60_spill] sm:$0xff] %v9993_v20  ;;  %6093 = vset.pattern.permute.xlu1 %v11622_v13  ;;  %v3723_v20 = vmul.f32 %v11696_v21, %v3683_v23  ;;  %v3670_v57 = vmul.f32 %v9646_v45, %v3662_v48  ;;  %v11703_v21 = vld [vmem:[#allocation28_spill] sm:$0xff] }
 0x628   : > { %4731 = vperm.xlu1 %6093, %v9911_v19   ;;  %v10000_v8 = vadd.f32 %v4567_v37, %v4511_v5  ;;  %v3611_v61 = vadd.f32 %v3603_v15, %v3547_v27  ;;  %v3486_v5 = vadd.f32 %v3478_v53, %v3422_v39  ;;  %v3606_v37 = vmul.f32 %v9631_v16, %v3598_v40  ;;  %v11704_v53 = vld [vmem:[#allocation122_spill] sm:$0xff] }
 0x629   : > { %v3731_v12 = vmul.f32 %v9654_v9, %v3723_v20  ;;  %v3795_v15 = vmul.f32 %v9677_v58, %v3787_v51  ;;  %v3726_v27 = vmul.f32 %v11702_v32, %v3686_v25  ;;  %v3790_v39 = vmul.f32 %v11704_v53, %v11703_v21  ;;  %v11707_v20 = vld [vmem:[#allocation92_spill] sm:$0xff]  ;;  %v11711_v25 = vld [vmem:[#allocation11_spill] sm:$0xff]  ;;  %v11713_v53 = vld [vmem:[#allocation34_spill] sm:$0xff] }
 0x62a   : > { %11695 = vst [vmem:[#allocation90_spill] sm:$0xff] %v10000_v8  ;;  %v3675_v34 = vadd.f32 %v3667_v14, %v3611_v61  ;;  %v3550_v55 = vadd.f32 %v3542_v50, %v3486_v5  ;;  %v11706_v14 = vld [vmem:[#allocation41_spill] sm:$0xff]  ;;  %v11709_v50 = vmov 24   ;;  %v11712_v32 = vld [vmem:[#allocation119_spill] sm:$0xff] }
 0x62b   : > { %v10010_v18 = vpop.permute.xlu1 %4203  ;;  %v3851_v61 = vmul.f32 %v11706_v14, %v11705_v3  ;;  %v11708_v8 = vld [vmem:[#allocation133_spill] sm:$0xff]  ;;  %v3734_v5 = vmul.f32 %v9654_v9, %v3726_v27  ;;  %v3854_v21 = vmul.f32 %v11712_v32, %v11711_v25  ;;  %v11714_v14 = vld [vmem:[#allocation56_spill] sm:$0xff] }
 0x62c   : > { %11700 = vst [vmem:[#allocation93_spill] sm:$0xff] %v10010_v18  ;;  %6094 = vset.pattern.permute.xlu1 %v11615_v26  ;;  %v3614_v23 = vadd.f32 %v3606_v37, %v3550_v55  ;;  %v3739_v46 = vadd.f32 %v3731_v12, %v3675_v34  ;;  %v3915_v18 = vmul.f32 %v11708_v8, %v11707_v20 }
 0x62d   : > { %4799 = vperm.xlu1 %6094, %v11701_v59   ;;  %v3798_v37 = vmul.f32 %v9677_v58, %v3790_v39  ;;  %v3859_v55 = vmul.f32 %v9683_v11, %v3851_v61 }
 0x62e   : > { %v3678_v48 = vadd.f32 %v3670_v57, %v3614_v23  ;;  %v3803_v51 = vadd.f32 %v3795_v15, %v3739_v46  ;;  %v3923_v34 = vmul.f32 %v9702_v28, %v3915_v18  ;;  %v3918_v57 = vmul.f32 %v11714_v14, %v11713_v53  ;;  %v4003_v23 = vld [vmem:[#allocation2 + $0x5c] sm:$0xff]  ;;  %v10050_v14 = vld [vmem:[#allocation2 + $0x74] sm:$0xff] }
 0x62f   : > { %v11715_v15 = vld [vmem:[#allocation67_spill] sm:$0xff]  ;;  %11717 = vst [vmem:[#allocation96_spill] sm:$0xff] %v10050_v14 }
 0x630   : > { %v4272_v40 = vpop.permute.xlu1 %4271  ;;  %v3742_v8 = vadd.f32 %v3734_v5, %v3678_v48  ;;  %v3979_v27 = vmul.f32 %v11715_v15, %v9860_v62  ;;  %v3867_v39 = vadd.f32 %v3859_v55, %v3803_v51  ;;  %v11716_v46 = vld [vmem:[#allocation147_spill] sm:$0xff]  ;;  %v3862_v48 = vmul.f32 %v9683_v11, %v3854_v21  ;;  %v11719_v55 = vld [vmem:[#allocation128_spill] sm:$0xff]  ;;  %v11720_v21 = vld [vmem:[#allocation138_spill] sm:$0xff] }
 0x631   : > { %6095 = vset.pattern.permute.xlu1 %v11709_v50  ;;  %v4043_v61 = vmul.f32 %v11716_v46, %v4003_v23  ;;  %v3926_v5 = vmul.f32 %v9702_v28, %v3918_v57  ;;  %v10053_v51 = vld [vmem:[#allocation2 + $0x5f] sm:$0xff]  ;;  %v4046_v23 = vmul.f32 %v11720_v21, %v10050_v14  ;;  %v11729_v14 = vld [vmem:[#allocation81_spill] sm:$0xff] }
 0x632   : > { %4935 = vperm.xlu1 %6095, %v9786_v30   ;;  %v3806_v18 = vadd.f32 %v3798_v37, %v3742_v8  ;;  %v3931_v20 = vadd.f32 %v3923_v34, %v3867_v39  ;;  %v11718_v37 = vld [vmem:[#allocation38_spill] sm:$0xff]  ;;  %v11721_v57 = vld [vmem:[#allocation132_spill] sm:$0xff] }
 0x633   : > { %v4051_v53 = vmul.f32 %v9723_v49, %v4043_v61  ;;  %v3982_v34 = vmul.f32 %v11719_v55, %v11718_v37  ;;  %v4107_v15 = vmul.f32 %v11721_v57, %v9873_v56  ;;  %v11722_v39 = vld [vmem:[#allocation80_spill] sm:$0xff] }
 0x634   : > { %v3870_v8 = vadd.f32 %v3862_v48, %v3806_v18  ;;  %v4171_v46 = vmul.f32 %v11722_v39, %v10053_v51  ;;  %v4054_v48 = vmul.f32 %v9723_v49, %v4046_v23  ;;  %v10082_v23 = vld [vmem:[#allocation2 + $0x78] sm:$0xff] }
 0x635   : > { %v10031_v12 = vpop.permute.xlu1 %4407  ;;  %v3990_v18 = vmul.f32 %v9709_v29, %v3982_v34  ;;  %v4115_v37 = vmul.f32 %v9730_v7, %v4107_v15  ;;  %v11727_v34 = vld [vmem:[#allocation9_spill] sm:$0xff] }
 0x636   : > { %11710 = vst [vmem:[#allocation73_spill] sm:$0xff] %v10031_v12  ;;  %6096 = vset.pattern.permute.xlu1 %v11601_v10  ;;  %v10042_v12 = vpop.permute.xlu0 %4531  ;;  %v3987_v10 = vmul.f32 %v9709_v29, %v3979_v27  ;;  %v3934_v61 = vadd.f32 %v3926_v5, %v3870_v8  ;;  %v4179_v55 = vmul.f32 %v9742_v6, %v4171_v46  ;;  %v10076_v5 = vld [vmem:[#allocation2 + $0x60] sm:$0xff] }
 0x637   : > { %4523 = vperm.xlu1 %6096, %v9797_v4   ;;  %v4262_v46 = vld [vmem:[#allocation2 + $0x79] sm:$0xff] }
 0x638   : > { %v3995_v27 = vadd.f32 %v3987_v10, %v3931_v20  ;;  %v10073_v20 = vld [vmem:[#allocation2 + $0x77] sm:$0xff]  ;;  %v11725_v10 = vld [vmem:[#allocation37_spill] sm:$0xff]  ;;  %v3998_v21 = vadd.f32 %v3990_v18, %v3934_v61 }
 0x639   : > { %v4174_v57 = vmul.f32 %v11727_v34, %v10073_v20  ;;  %v11731_v34 = vld [vmem:[#allocation89_spill] sm:$0xff] }
 0x63a   : > { %v10046_v32 = vpop.permute.xlu1 %4475  ;;  %v4059_v25 = vadd.f32 %v4051_v53, %v3995_v27  ;;  %v10064_v3 = vpop.permute.xlu0 %4471  ;;  %v11726_v53 = vld [vmem:[#allocation144_spill] sm:$0xff] }
 0x63b   : > { %6098 = vset.pattern.permute.xlu1 %v11626_v33  ;;  %11723 = vst [vmem:[#allocation111_spill] sm:$0xff] %v10064_v3  ;;  %v4110_v8 = vmul.f32 %v11726_v53, %v11725_v10  ;;  %v11728_v27 = vld [vmem:[#allocation140_spill] sm:$0xff]  ;;  %v4062_v3 = vadd.f32 %v4054_v48, %v3998_v21  ;;  %v4182_v53 = vmul.f32 %v9742_v6, %v4174_v57 }
 0x63c   : > { %4659 = vperm.xlu1 %6098, %v9806_v38   ;;  %v4235_v15 = vmul.f32 %v11728_v27, %v10076_v5  ;;  %v4123_v39 = vadd.f32 %v4115_v37, %v4059_v25  ;;  %v4238_v38 = vmul.f32 %v11729_v14, %v10082_v23  ;;  %v4302_v25 = vmul.f32 %v11731_v34, %v4262_v46  ;;  %v10098_v14 = vld [vmem:[#allocation2 + $0x7c] sm:$0xff] }
 0x63d   : > { %v4118_v18 = vmul.f32 %v9730_v7, %v4110_v8  ;;  %v4427_v57 = vmul.f32 %v9932_v43, %v9891_v42  ;;  %v3426_v42 = vld [vmem:[#allocation2 + $0x44] sm:$0xff]  ;;  %v11734_v43 = vld [vmem:[#allocation79_spill] sm:$0xff] }
 0x63e   : > { %v4187_v10 = vadd.f32 %v4179_v55, %v4123_v39  ;;  %v10090_v61 = vpop.permute.xlu0 %4459  ;;  %v4243_v48 = vmul.f32 %v9765_v35, %v4235_v15  ;;  %v4310_v46 = vmul.f32 %v9758_v52, %v4302_v25 }
 0x63f   : > { %v10066_v30 = vpop.permute.xlu1 %4611  ;;  %v4126_v37 = vadd.f32 %v4118_v18, %v4062_v3 }
 0x640   : > { %11724 = vst [vmem:[#allocation146_spill] sm:$0xff] %v10066_v30  ;;  %6099 = vset.pattern.permute.xlu1 %v11622_v13  ;;  %v4259_v30 = vld [vmem:[#allocation2 + $0x61] sm:$0xff]  ;;  %v4251_v27 = vadd.f32 %v4243_v48, %v4187_v10 }
 0x641   : > { %4727 = vperm.xlu1 %6099, %v9815_v41   ;;  %v4299_v49 = vmul.f32 %v4272_v40, %v4259_v30  ;;  %v4246_v30 = vmul.f32 %v9765_v35, %v4238_v38  ;;  %v11732_v40 = vld [vmem:[#allocation43_spill] sm:$0xff]  ;;  %v4190_v39 = vadd.f32 %v4182_v53, %v4126_v37  ;;  %v4430_v38 = vmul.f32 %v9920_v0, %v10098_v14 }
 0x642   : > { %v4366_v55 = vmul.f32 %v9889_v63, %v11732_v40  ;;  %v10111_v3 = vpop.permute.xlu0 %4615  ;;  %v4435_v53 = vmul.f32 %v11734_v43, %v4427_v57  ;;  %v11736_v0 = vld [vmem:[#allocation107_spill] sm:$0xff] }
 0x643   : > { %v4307_v21 = vmul.f32 %v9758_v52, %v4299_v49  ;;  %11733 = vst [vmem:[#allocation129_spill] sm:$0xff] %v10111_v3  ;;  %v4254_v49 = vadd.f32 %v4246_v30, %v4190_v39  ;;  %v3466_v40 = vmul.f32 %v11736_v0, %v3426_v42  ;;  %v3354_v30 = vld [vmem:[#allocation2 + $0x43] sm:$0xff] }
 0x644   : > { %v10088_v13 = vpop.permute.xlu1 %4679  ;;  %v4374_v63 = vmul.f32 %v9771_v17, %v4366_v55  ;;  %v11737_v55 = vld [vmem:[#allocation105_spill] sm:$0xff]  ;;  %v4518_v42 = vld [vmem:[#allocation2 + $0x83] sm:$0xff] }
 0x645   : > { %11730 = vst [vmem:[#allocation87_spill] sm:$0xff] %v10088_v13  ;;  %6100 = vset.pattern.permute.xlu1 %v11634_v36  ;;  %v4315_v10 = vadd.f32 %v4307_v21, %v4251_v27  ;;  %v4318_v34 = vadd.f32 %v4310_v46, %v4254_v49  ;;  %v3469_v21 = vmul.f32 %v11737_v55, %v9865_v54  ;;  %v3490_v27 = vld [vmem:[#allocation2 + $0x45] sm:$0xff]  ;;  %v11741_v0 = vld [vmem:[#allocation23_spill] sm:$0xff] }
 0x646   : > { %4863 = vperm.xlu1 %6100, %v11701_v59   ;;  %v3533_v54 = vmul.f32 %v11741_v0, %v9873_v56  ;;  %v3554_v55 = vld [vmem:[#allocation2 + $0x47] sm:$0xff] }
 0x647   : > { %v4382_v39 = vadd.f32 %v4374_v63, %v4318_v34  ;;  %v11742_v13 = vld [vmem:[#allocation69_spill] sm:$0xff]  ;;  %v11743_v34 = vld [vmem:[#allocation46_spill] sm:$0xff] }
 0x649   : > { %v4336_v8 = vpop.permute.xlu1 %4335 }
 0x64a   : > { %v4363_v15 = vmul.f32 %v4336_v8, %v9884_v2  ;;  %6101 = vset.pattern.permute.xlu1 %v11709_v50  ;;  %v11735_v2 = vld [vmem:[#allocation65_spill] sm:$0xff]  ;;  %v4438_v8 = vmul.f32 %v11734_v43, %v4430_v38 }
 0x64b   : > { %4931 = vperm.xlu1 %6101, %v9842_v60   ;;  %v4494_v25 = vmul.f32 %v10046_v32, %v11735_v2  ;;  %v11738_v32 = vld [vmem:[#allocation32_spill] sm:$0xff] }
 0x64c   : > { %v4371_v18 = vmul.f32 %v9771_v17, %v4363_v15  ;;  %v3410_v46 = vmul.f32 %v11738_v32, %v3354_v30  ;;  %v11739_v15 = vld [vmem:[#allocation99_spill] sm:$0xff]  ;;  %v3477_v32 = vmul.f32 %v9607_v31, %v3469_v21  ;;  %v3682_v21 = vld [vmem:[#allocation2 + $0x49] sm:$0xff] }
 0x64d   : > { %v3413_v49 = vmul.f32 %v11739_v15, %v9860_v62  ;;  %v4502_v63 = vmul.f32 %v9978_v47, %v4494_v25  ;;  %v3618_v62 = vld [vmem:[#allocation2 + $0x48] sm:$0xff] }
 0x64e   : > { %v4379_v48 = vadd.f32 %v4371_v18, %v4315_v10  ;;  %v10119_v37 = vpop.permute.xlu1 %4403  ;;  %v11740_v10 = vld [vmem:[#allocation109_spill] sm:$0xff]  ;;  %v3418_v56 = vmul.f32 %v9619_v44, %v3410_v46 }
 0x64f   : > { %6104 = vset.pattern.permute.xlu1 %v11609_v24  ;;  %v3530_v18 = vmul.f32 %v11740_v10, %v3490_v27  ;;  %v4604_v24 = vpop.permute.xlu0 %4603  ;;  %v11744_v27 = vld [vmem:[#allocation33_spill] sm:$0xff]  ;;  %v4446_v10 = vadd.f32 %v4438_v8, %v4382_v39  ;;  %v11746_v39 = vld [vmem:[#allocation54_spill] sm:$0xff] }
 0x650   : > { %4587 = vperm.xlu1 %6104, %v9797_v4   ;;  %v10127_v57 = vadd.f32 %v4435_v53, %v4379_v48  ;;  %v4622_v38 = vmul.f32 %v4604_v24, %v11742_v13  ;;  %v3474_v53 = vmul.f32 %v9607_v31, %v3466_v40  ;;  %v3594_v48 = vmul.f32 %v11743_v34, %v3554_v55  ;;  %v11745_v40 = vld [vmem:[#allocation108_spill] sm:$0xff] }
 0x651   : > { %v3597_v15 = vmul.f32 %v11744_v27, %v10053_v51  ;;  %v3421_v13 = vmul.f32 %v9619_v44, %v3413_v49  ;;  %v3538_v25 = vmul.f32 %v9625_v22, %v3530_v18  ;;  %v3658_v24 = vmul.f32 %v11745_v40, %v3618_v62  ;;  %v10152_v51 = vld [vmem:[%s10918_s4 + $0x13] ss:$0 sm:$0xff] }
 0x652   : > { %v3541_v31 = vmul.f32 %v9625_v22, %v3533_v54  ;;  %v4510_v8 = vadd.f32 %v4502_v63, %v4446_v10  ;;  %v3482_v44 = vadd.f32 %v3474_v53, %v3418_v56  ;;  %v3602_v49 = vmul.f32 %v9631_v16, %v3594_v48  ;;  %v11747_v18 = vld [vmem:[#allocation117_spill] sm:$0xff]  ;;  %v11748_v22 = vld [vmem:[#allocation110_spill] sm:$0xff]  ;;  %v3685_v63 = vld [vmem:[#allocation2 + $0x61] sm:$0xff] }
 0x653   : > { %v4540_v30 = vpop.permute.xlu1 %4539  ;;  %v3485_v0 = vadd.f32 %v3477_v32, %v3421_v13  ;;  %v3605_v55 = vmul.f32 %v9631_v16, %v3597_v15  ;;  %v3661_v54 = vmul.f32 %v11748_v22, %v10076_v5  ;;  %v11749_v32 = vld [vmem:[#allocation48_spill] sm:$0xff]  ;;  %v10170_v5 = vpop.permute.xlu0 %4591  ;;  %v11750_v13 = vld [vmem:[#allocation45_spill] sm:$0xff] }
 0x654   : > { %v4558_v3 = vmul.f32 %v4540_v30, %v4518_v42  ;;  %6105 = vset.pattern.permute.xlu1 %v11626_v33  ;;  %v4630_v33 = vmul.f32 %v10152_v51, %v4622_v38  ;;  %v3722_v42 = vmul.f32 %v11747_v18, %v3682_v21  ;;  %v3546_v62 = vadd.f32 %v3538_v25, %v3482_v44  ;;  %v11751_v25 = vld [vmem:[#allocation74_spill] sm:$0xff]  ;;  %v11754_v18 = vld [vmem:[#allocation75_spill] sm:$0xff]  ;;  %v11756_v22 = vld [vmem:[#allocation25_spill] sm:$0xff] }
 0x655   : > { %4655 = vperm.xlu1 %6105, %v9878_v1   ;;  %v3666_v38 = vmul.f32 %v9646_v45, %v3658_v24  ;;  %v3725_v27 = vmul.f32 %v11749_v32, %v3685_v63  ;;  %v3669_v10 = vmul.f32 %v9646_v45, %v3661_v54  ;;  %v3786_v40 = vmul.f32 %v11751_v25, %v11750_v13  ;;  %v11752_v24 = vld [vmem:[#allocation17_spill] sm:$0xff]  ;;  %v11757_v54 = vld [vmem:[#allocation126_spill] sm:$0xff]  ;;  %v11758_v63 = vld [vmem:[#allocation59_spill] sm:$0xff] }
 0x656   : > { %v4566_v46 = vmul.f32 %v11746_v39, %v4558_v3  ;;  %v3549_v3 = vadd.f32 %v3541_v31, %v3485_v0  ;;  %v3610_v48 = vadd.f32 %v3602_v49, %v3546_v62  ;;  %v3730_v16 = vmul.f32 %v9654_v9, %v3722_v42  ;;  %v11753_v31 = vld [vmem:[#allocation68_spill] sm:$0xff]  ;;  %v11755_v42 = vld [vmem:[#allocation78_spill] sm:$0xff]  ;;  %v10190_v62 = vld [vmem:[#allocation2 + $0x6c] sm:$0xff] }
 0x657   : > { %v3850_v21 = vmul.f32 %v11753_v31, %v11752_v24  ;;  %v10181_v44 = vpop.permute.xlu0 %4807  ;;  %v3794_v45 = vmul.f32 %v9677_v58, %v3786_v40  ;;  %v3789_v0 = vmul.f32 %v11755_v42, %v11754_v18  ;;  %v11765_v18 = vld [vmem:[#allocation134_spill] sm:$0xff] }
 0x658   : > { %v4574_v34 = vadd.f32 %v4566_v46, %v4510_v8  ;;  %v10161_v30 = vpop.permute.xlu1 %4607  ;;  %v3613_v15 = vadd.f32 %v3605_v55, %v3549_v3  ;;  %v3674_v56 = vadd.f32 %v3666_v38, %v3610_v48  ;;  %v3733_v46 = vmul.f32 %v9654_v9, %v3725_v27  ;;  %v11759_v48 = vld [vmem:[#allocation76_spill] sm:$0xff]  ;;  %v3938_v27 = vld [vmem:[#allocation2 + $0x53] sm:$0xff] }
 0x659   : > { %6107 = vset.pattern.permute.xlu1 %v11615_v26  ;;  %v3858_v55 = vmul.f32 %v9683_v11, %v3850_v21  ;;  %v4428_v9 = vmul.f32 %v10190_v62, %v10119_v37  ;;  %v3797_v13 = vmul.f32 %v9677_v58, %v3789_v0  ;;  %v11762_v21 = vld [vmem:[#allocation95_spill] sm:$0xff] }
 0x65a   : > { %4791 = vperm.xlu1 %6107, %v9815_v41   ;;  %v10166_v53 = vadd.f32 %v4630_v33, %v4574_v34  ;;  %v3738_v33 = vadd.f32 %v3730_v16, %v3674_v56  ;;  %v3677_v49 = vadd.f32 %v3669_v10, %v3613_v15  ;;  %v3853_v34 = vmul.f32 %v11757_v54, %v11756_v22  ;;  %v11761_v10 = vld [vmem:[#allocation58_spill] sm:$0xff] }
 0x65b   : > { %v3914_v16 = vmul.f32 %v11759_v48, %v11758_v63  ;;  %v11760_v15 = vmov 25   ;;  %v3978_v56 = vmul.f32 %v11761_v10, %v3938_v27  ;;  %v10203_v37 = vpop.permute.xlu0 %4795  ;;  %v4436_v24 = vmul.f32 %v11734_v43, %v4428_v9  ;;  %v4069_v22 = vld [vmem:[#allocation2 + $0x6d] sm:$0xff]  ;;  %v4066_v63 = vld [vmem:[#allocation2 + $0x55] sm:$0xff] }
 0x65c   : > { %v3741_v3 = vadd.f32 %v3733_v46, %v3677_v49  ;;  %v3802_v32 = vadd.f32 %v3794_v45, %v3738_v33  ;;  %v3861_v40 = vmul.f32 %v9683_v11, %v3853_v34  ;;  %v11763_v33 = vld [vmem:[#allocation121_spill] sm:$0xff]  ;;  %v11764_v45 = vld [vmem:[#allocation6_spill] sm:$0xff] }
 0x65d   : > { %v10177_v8 = vpop.permute.xlu1 %4743  ;;  %v3922_v31 = vmul.f32 %v9702_v28, %v3914_v16  ;;  %v3917_v46 = vmul.f32 %v11763_v33, %v11762_v21  ;;  %v3981_v42 = vmul.f32 %v11765_v18, %v11764_v45  ;;  %v3986_v58 = vmul.f32 %v9709_v29, %v3978_v56  ;;  %v11767_v48 = vld [vmem:[#allocation61_spill] sm:$0xff]  ;;  %v11768_v16 = vld [vmem:[#allocation83_spill] sm:$0xff]  ;;  %v11770_v27 = vld [vmem:[#allocation66_spill] sm:$0xff] }
 0x65e   : > { %6108 = vset.pattern.permute.xlu1 %v11634_v36  ;;  %v3866_v25 = vadd.f32 %v3858_v55, %v3802_v32  ;;  %v3805_v49 = vadd.f32 %v3797_v13, %v3741_v3  ;;  %v11766_v55 = vmov 26   ;;  %v11769_v3 = vld [vmem:[#allocation63_spill] sm:$0xff]  ;;  %v4106_v10 = vmul.f32 %v11770_v27, %v4066_v63  ;;  %v11771_v13 = vld [vmem:[#allocation36_spill] sm:$0xff] }
 0x65f   : > { %4859 = vperm.xlu1 %6108, %v9911_v19   ;;  %v4042_v32 = vmul.f32 %v11769_v3, %v11768_v16  ;;  %v4444_v21 = vadd.f32 %v4436_v24, %v11771_v13  ;;  %v3925_v56 = vmul.f32 %v9702_v28, %v3917_v46  ;;  %v10222_v45 = vpop.permute.xlu0 %4999  ;;  %v11772_v18 = vld [vmem:[#allocation11_spill] sm:$0xff]  ;;  %v11775_v3 = vmov 21  }
 0x660   : > { %v3869_v34 = vadd.f32 %v3861_v40, %v3805_v49  ;;  %v3930_v9 = vadd.f32 %v3922_v31, %v3866_v25  ;;  %v11774_v16 = vld [vmem:[#allocation71_spill] sm:$0xff] }
 0x661   : > { %v4109_v24 = vmul.f32 %v11774_v16, %v4069_v22 }
 0x662   : > { %v10194_v38 = vpop.permute.xlu1 %4331  ;;  %v3994_v40 = vadd.f32 %v3986_v58, %v3930_v9  ;;  %v3933_v63 = vadd.f32 %v3925_v56, %v3869_v34  ;;  %v4194_v58 = vld [vmem:[#allocation2 + $0x58] sm:$0xff] }
 0x663   : > { %6109 = vset.pattern.permute.xlu1 %v11760_v15  ;;  %v11778_v9 = vld [vmem:[#allocation143_spill] sm:$0xff]  ;;  %v10241_v56 = vpop.permute.xlu0 %4735 }
 0x664   : > { %4995 = vperm.xlu1 %6109, %v9842_v60   ;;  %v4516_v60 = vld [vmem:[#allocation2 + $0x73] sm:$0xff] }
 0x665   : > { %v4556_v11 = vmul.f32 %v10042_v12, %v4516_v60  ;;  %v3989_v12 = vmul.f32 %v9709_v29, %v3981_v42  ;;  %v4114_v29 = vmul.f32 %v9730_v7, %v4106_v10 }
 0x667   : > { %v4468_v54 = vpop.permute.xlu1 %4467  ;;  %v4564_v25 = vmul.f32 %v11746_v39, %v4556_v11  ;;  %v3997_v42 = vadd.f32 %v3989_v12, %v3933_v63  ;;  %v11777_v11 = vld [vmem:[#allocation97_spill] sm:$0xff] }
 0x668   : > { %v4492_v0 = vmul.f32 %v4468_v54, %v4069_v22  ;;  %6110 = vset.pattern.permute.xlu1 %v11766_v55  ;;  %v11773_v54 = vld [vmem:[#allocation49_spill] sm:$0xff]  ;;  %v4170_v27 = vmul.f32 %v11778_v9, %v11777_v11 }
 0x669   : > { %5063 = vperm.xlu1 %6110, %v11767_v48   ;;  %v4045_v48 = vmul.f32 %v11773_v54, %v11772_v18  ;;  %v11781_v12 = vld [vmem:[#allocation137_spill] sm:$0xff] }
 0x66a   : > { %v4500_v33 = vmul.f32 %v9978_v47, %v4492_v0  ;;  %v11776_v0 = vld [vmem:[#allocation88_spill] sm:$0xff]  ;;  %v10248_v54 = vld [vmem:[#allocation2 + $0x70] sm:$0xff]  ;;  %v4178_v63 = vmul.f32 %v9742_v6, %v4170_v27 }
 0x66b   : > { %v4050_v28 = vmul.f32 %v11776_v0, %v4042_v32  ;;  %v4053_v22 = vmul.f32 %v11776_v0, %v4045_v48  ;;  %v11783_v48 = vld [vmem:[#allocation19_spill] sm:$0xff]  ;;  %v10255_v0 = vld [vmem:[#allocation2 + $0x71] sm:$0xff] }
 0x66c   : > { %v4508_v31 = vadd.f32 %v4500_v33, %v4444_v21  ;;  %v10225_v49 = vpop.permute.xlu1 %4535  ;;  %v11779_v21 = vld [vmem:[#allocation93_spill] sm:$0xff]  ;;  %v4117_v33 = vmul.f32 %v9730_v7, %v4109_v24  ;;  %v4237_v7 = vmul.f32 %v11783_v48, %v10248_v54  ;;  %11784 = vst [vmem:[#allocation14_spill] sm:$0xff] %v10255_v0  ;;  %v11789_v48 = vld [vmem:[#allocation96_spill] sm:$0xff] }
 0x66d   : > { %6112 = vset.pattern.permute.xlu1 %v11775_v3  ;;  %v4058_v13 = vadd.f32 %v4050_v28, %v3994_v40  ;;  %v4234_v34 = vmul.f32 %v11779_v21, %v4194_v58  ;;  %v4061_v18 = vadd.f32 %v4053_v22, %v3997_v42  ;;  %v11782_v40 = vld [vmem:[#allocation84_spill] sm:$0xff]  ;;  %v4322_v28 = vld [vmem:[#allocation2 + $0x5b] sm:$0xff]  ;;  %v11787_v42 = vld [vmem:[#allocation13_spill] sm:$0xff] }
 0x66e   : > { %4719 = vperm.xlu1 %6112, %v9878_v1   ;;  %v10234_v46 = vadd.f32 %v4564_v25, %v4508_v31  ;;  %v11780_v25 = vld [vmem:[#allocation7_spill] sm:$0xff]  ;;  %v11786_v58 = vld [vmem:[#allocation40_spill] sm:$0xff]  ;;  %v4301_v9 = vmul.f32 %v11787_v42, %v10255_v0  ;;  %v4362_v21 = vmul.f32 %v10194_v38, %v4322_v28  ;;  %v11790_v28 = vld [vmem:[#allocation73_spill] sm:$0xff] }
 0x66f   : > { %v4122_v10 = vadd.f32 %v4114_v29, %v4058_v13  ;;  %v4173_v31 = vmul.f32 %v11781_v12, %v11780_v25  ;;  %v4242_v16 = vmul.f32 %v9765_v35, %v4234_v34  ;;  %v4125_v24 = vadd.f32 %v4117_v33, %v4061_v18  ;;  %v11785_v29 = vld [vmem:[#allocation94_spill] sm:$0xff]  ;;  %v10265_v25 = vpop.permute.xlu0 %4723 }
 0x670   : > { %v4298_v11 = vmul.f32 %v11786_v58, %v11785_v29  ;;  %v4245_v34 = vmul.f32 %v9765_v35, %v4237_v7  ;;  %v11788_v33 = vld [vmem:[#allocation18_spill] sm:$0xff]  ;;  %v4309_v38 = vmul.f32 %v9758_v52, %v4301_v9  ;;  %v4386_v58 = vld [vmem:[#allocation2 + $0x5c] sm:$0xff] }
 0x671   : > { %v10243_v32 = vpop.permute.xlu1 %4671  ;;  %v4186_v13 = vadd.f32 %v4178_v63, %v4122_v10  ;;  %v4181_v27 = vmul.f32 %v9742_v6, %v4173_v31  ;;  %v4365_v12 = vmul.f32 %v4516_v60, %v11788_v33  ;;  %v4450_v63 = vld [vmem:[#allocation2 + $0x5d] sm:$0xff]  ;;  %v4429_v6 = vmul.f32 %v11790_v28, %v11789_v48 }
 0x672   : > { %6113 = vset.pattern.permute.xlu1 %v11615_v26  ;;  %v4306_v10 = vmul.f32 %v9758_v52, %v4298_v11  ;;  %v4370_v31 = vmul.f32 %v9771_v17, %v4362_v21  ;;  %v4490_v29 = vmul.f32 %v10090_v61, %v4450_v63  ;;  %v4517_v11 = vld [vmem:[#allocation2 + $0x7b] sm:$0xff] }
 0x673   : > { %4787 = vperm.xlu1 %6113, %v11782_v40   ;;  %v4250_v18 = vadd.f32 %v4242_v16, %v4186_v13  ;;  %v4189_v40 = vadd.f32 %v4181_v27, %v4125_v24  ;;  %v4373_v60 = vmul.f32 %v9771_v17, %v4365_v12  ;;  %v10279_v24 = vpop.permute.xlu0 %4675  ;;  %v10282_v52 = vld [vmem:[#allocation2 + $0x75] sm:$0xff]  ;;  %v4437_v13 = vmul.f32 %v11734_v43, %v4429_v6 }
 0x674   : > { %11791 = vst [vmem:[#allocation102_spill] sm:$0xff] %v10282_v52  ;;  %v11792_v27 = vld [vmem:[#allocation111_spill] sm:$0xff]  ;;  %v4557_v12 = vmul.f32 %v10225_v49, %v4517_v11  ;;  %v6335_v11 = vld [vmem:[#allocation2 + $0x74] sm:$0xff] }
 0x675   : > { %v4253_v7 = vadd.f32 %v4245_v34, %v4189_v40  ;;  %v4314_v16 = vadd.f32 %v4306_v10, %v4250_v18  ;;  %v4493_v17 = vmul.f32 %v11792_v27, %v10282_v52  ;;  %v4498_v34 = vmul.f32 %v9978_v47, %v4490_v29 }
 0x676   : > { %v10262_v22 = vpop.permute.xlu1 %4739  ;;  %v4565_v48 = vmul.f32 %v11746_v39, %v4557_v12  ;;  %v4619_v12 = vmul.f32 %v10170_v5, %v10190_v62 }
 0x677   : > { %6114 = vset.pattern.permute.xlu1 %v11709_v50  ;;  %v4317_v9 = vadd.f32 %v4309_v38, %v4253_v7  ;;  %v4378_v61 = vadd.f32 %v4370_v31, %v4314_v16  ;;  %v4664_v63 = vpop.permute.xlu0 %4663 }
 0x678   : > { %4923 = vperm.xlu1 %6114, %v9911_v19   ;;  %v4685_v38 = vmul.f32 %v4664_v63, %v11735_v2 }
 0x679   : > { %v4381_v33 = vadd.f32 %v4373_v60, %v4317_v9  ;;  %v11793_v60 = vld [vmem:[#allocation98_spill] sm:$0xff]  ;;  %v11794_v9 = vld [vmem:[#allocation103_spill] sm:$0xff] }
 0x67b   : > { %v4396_v35 = vpop.permute.xlu1 %4395 }
 0x67c   : > { %v4426_v42 = vmul.f32 %v4396_v35, %v4386_v58  ;;  %6115 = vset.pattern.permute.xlu1 %v11760_v15 }
 0x67d   : > { %4991 = vperm.xlu1 %6115, %v11701_v59   ;;  %v4445_v59 = vadd.f32 %v4437_v13, %v4381_v33  ;;  %v3472_v13 = vmul.f32 %v6335_v11, %v11794_v9  ;;  %v11802_v9 = vld [vmem:[#allocation101_spill] sm:$0xff] }
 0x67e   : > { %v4434_v21 = vmul.f32 %v11734_v43, %v4426_v42  ;;  %v4501_v43 = vmul.f32 %v9978_v47, %v4493_v17  ;;  %v6336_v17 = vld [vmem:[#allocation2 + $0x73] sm:$0xff] }
 0x680   : > { %v4442_v18 = vadd.f32 %v4434_v21, %v4378_v61  ;;  %v4464_v40 = vpop.permute.xlu1 %4463  ;;  %v4509_v6 = vadd.f32 %v4501_v43, %v4445_v59  ;;  %v10322_v21 = vld [vmem:[#allocation2 + $0x6b] sm:$0xff]  ;;  %v3361_v59 = vld [vmem:[#allocation2 + $0x7b] sm:$0xff] }
 0x681   : > { %6116 = vset.pattern.permute.xlu1 %v11775_v3  ;;  %v10303_v3 = vld [vmem:[%s10918_s4 + $0x14] ss:$0 sm:$0xff]  ;;  %v4491_v16 = vmul.f32 %v4464_v40, %v11793_v60  ;;  %11795 = vst [vmem:[#allocation24_spill] sm:$0xff] %v10322_v21  ;;  %v10334_v43 = vld [vmem:[#allocation2 + $0x7d] sm:$0xff] }
 0x682   : > { %4715 = vperm.xlu1 %6116, %v9797_v4   ;;  %v10292_v10 = vadd.f32 %v4498_v34, %v4442_v18  ;;  %v4693_v31 = vmul.f32 %v10303_v3, %v4685_v38  ;;  %v4573_v29 = vadd.f32 %v4565_v48, %v4509_v6  ;;  %v11796_v34 = vld [vmem:[#allocation100_spill] sm:$0xff]  ;;  %v3560_v38 = vld [vmem:[#allocation2 + $0x77] sm:$0xff] }
 0x683   : > { %v4499_v61 = vmul.f32 %v9978_v47, %v4491_v16  ;;  %v3416_v33 = vmul.f32 %v6336_v17, %v11796_v34  ;;  %v6338_v47 = vld [vmem:[%s10918_s4 + $0x1] ss:$0 sm:$0xff]  ;;  %v11799_v6 = vld [vmem:[#allocation26_spill] sm:$0xff]  ;;  %v6341_v17 = vld [vmem:[%s10918_s4 + $0x2] ss:$0 sm:$0xff] }
 0x684   : > { %v3480_v63 = vmul.f32 %v6338_v47, %v3472_v13  ;;  %v10338_v48 = vld [vmem:[#allocation2 + $0x7c] sm:$0xff]  ;;  %v3417_v13 = vmul.f32 %v11802_v9, %v3361_v59 }
 0x685   : > { %v4600_v28 = vpop.permute.xlu1 %4599  ;;  %v4507_v5 = vadd.f32 %v4499_v61, %v10127_v57  ;;  %v10348_v57 = vld [vmem:[#allocation2 + $0x74] sm:$0xff]  ;;  %v11803_v61 = vld [vmem:[#allocation29_spill] sm:$0xff]  ;;  %v11806_v9 = vld [vmem:[#allocation127_spill] sm:$0xff] }
 0x686   : > { %v4621_v49 = vmul.f32 %v4600_v28, %v10098_v14  ;;  %6117 = vset.pattern.permute.xlu1 %v11615_v26  ;;  %11801 = vst [vmem:[#allocation20_spill] sm:$0xff] %v10348_v57 }
 0x687   : > { %4783 = vperm.xlu1 %6117, %v9878_v1  }
 0x688   : > { %v4629_v2 = vmul.f32 %v10152_v51, %v4621_v49  ;;  %v3600_v49 = vmul.f32 %v11799_v6, %v3560_v38  ;;  %v6342_v38 = vld [vmem:[%s10918_s4 + $0x3] ss:$0 sm:$0xff]  ;;  %v3688_v6 = vld [vmem:[#allocation2 + $0x79] sm:$0xff] }
 0x68a   : > { %v4637_v58 = vadd.f32 %v4629_v2, %v4573_v29  ;;  %v4668_v35 = vpop.permute.xlu1 %4667  ;;  %v4627_v2 = vmul.f32 %v10152_v51, %v4619_v12 }
 0x68b   : > { %6118 = vset.pattern.permute.xlu1 %v11709_v50 }
 0x68c   : > { %4919 = vperm.xlu1 %6118, %v9815_v41   ;;  %v10309_v14 = vadd.f32 %v4693_v31, %v4637_v58  ;;  %v6340_v31 = vld [vmem:[%s10918_s4] ss:$0 sm:$0xff]  ;;  %v11800_v58 = vld [vmem:[#allocation53_spill] sm:$0xff] }
 0x68d   : > { %v3424_v29 = vmul.f32 %v6340_v31, %v3416_v33  ;;  %v4686_v60 = vmul.f32 %v4668_v35, %v11800_v58  ;;  %v11804_v35 = vld [vmem:[#allocation72_spill] sm:$0xff] }
 0x68e   : > { %v10367_v58 = vld [vmem:[#allocation2 + $0x88] sm:$0xff] }
 0x68f   : > { %v10311_v7 = vpop.permute.xlu1 %4803  ;;  %v3488_v12 = vadd.f32 %v3480_v63, %v3424_v29  ;;  %v4710_v29 = vld [vmem:[#allocation2 + $0x87] sm:$0xff] }
 0x690   : > { %6119 = vset.pattern.permute.xlu1 %v11760_v15 }
 0x691   : > { %4987 = vperm.xlu1 %6119, %v9911_v19  }
 0x694   : > { %v10316_v42 = vpop.permute.xlu1 %4871 }
 0x695   : > { %6120 = vset.pattern.permute.xlu1 %v11615_v26  ;;  %v6337_v26 = vld [vmem:[#allocation2 + $0x75] sm:$0xff] }
 0x696   : > { %4779 = vperm.xlu1 %6120, %v9797_v4   ;;  %v11797_v4 = vld [vmem:[#allocation104_spill] sm:$0xff] }
 0x697   : > { %v3536_v40 = vmul.f32 %v6337_v26, %v11797_v4 }
 0x699   : > { %v4528_v27 = vpop.permute.xlu1 %4527  ;;  %v3544_v34 = vmul.f32 %v6341_v17, %v3536_v40  ;;  %v11805_v40 = vld [vmem:[#allocation116_spill] sm:$0xff] }
 0x69a   : > { %v4555_v18 = vmul.f32 %v4528_v27, %v10322_v21  ;;  %6121 = vset.pattern.permute.xlu1 %v11634_v36  ;;  %v11798_v36 = vld [vmem:[#allocation27_spill] sm:$0xff]  ;;  %v3537_v27 = vmul.f32 %v11803_v61, %v10334_v43  ;;  %v3728_v61 = vmul.f32 %v11806_v9, %v3688_v6 }
 0x69b   : > { %4847 = vperm.xlu1 %6121, %v9878_v1   ;;  %v3473_v28 = vmul.f32 %v10338_v48, %v11798_v36  ;;  %v6350_v9 = vld [vmem:[#allocation2 + $0x83] sm:$0xff] }
 0x69c   : > { %v4563_v62 = vmul.f32 %v11746_v39, %v4555_v18  ;;  %v3664_v18 = vmul.f32 %v11804_v35, %v10082_v23  ;;  %v3625_v23 = vld [vmem:[#allocation2 + $0x80] sm:$0xff] }
 0x69d   : > { %v3481_v4 = vmul.f32 %v6338_v47, %v3473_v28  ;;  %v4694_v47 = vmul.f32 %v10303_v3, %v4686_v60  ;;  %v3425_v28 = vmul.f32 %v6340_v31, %v3417_v13  ;;  %v11807_v31 = vld [vmem:[#allocation112_spill] sm:$0xff] }
 0x69e   : > { %v4571_v16 = vadd.f32 %v4563_v62, %v4507_v5  ;;  %v4596_v11 = vpop.permute.xlu1 %4595  ;;  %v3608_v5 = vmul.f32 %v6342_v38, %v3600_v49  ;;  %v6343_v62 = vld [vmem:[#allocation2 + $0x7f] sm:$0xff]  ;;  %v3665_v13 = vmul.f32 %v11807_v31, %v3625_v23 }
 0x69f   : > { %v4620_v33 = vmul.f32 %v4596_v11, %v10348_v57  ;;  %6123 = vset.pattern.permute.xlu1 %v11760_v15  ;;  %v3601_v36 = vmul.f32 %v6343_v62, %v11805_v40  ;;  %v6351_v31 = vld [vmem:[#allocation2 + $0x84] sm:$0xff]  ;;  %v11838_v57 = vld [vmem:[#allocation129_spill] sm:$0xff] }
 0x6a0   : > { %4983 = vperm.xlu1 %6123, %v9815_v41   ;;  %v10361_v26 = vadd.f32 %v4627_v2, %v4571_v16  ;;  %v4814_v41 = vmul.f32 %v10203_v37, %v10367_v58  ;;  %v3545_v2 = vmul.f32 %v6341_v17, %v3537_v27  ;;  %v3552_v16 = vadd.f32 %v3544_v34, %v3488_v12  ;;  %v10387_v17 = vld [vmem:[%s10918_s4 + $0x16] ss:$0 sm:$0xff] }
 0x6a1   : > { %v4628_v63 = vmul.f32 %v10152_v51, %v4620_v33  ;;  %v6344_v33 = vld [vmem:[%s10918_s4 + $0x4] ss:$0 sm:$0xff]  ;;  %v3489_v37 = vadd.f32 %v3481_v4, %v3425_v28  ;;  %v3609_v60 = vmul.f32 %v6342_v38, %v3601_v36  ;;  %v4702_v12 = vadd.f32 %v4694_v47, %v10166_v53  ;;  %v6348_v36 = vld [vmem:[%s10918_s4 + $0x5] ss:$0 sm:$0xff] }
 0x6a2   : > { %v3672_v35 = vmul.f32 %v6344_v33, %v3664_v18  ;;  %v3616_v40 = vadd.f32 %v3608_v5, %v3552_v16  ;;  %v4822_v34 = vmul.f32 %v10387_v17, %v4814_v41  ;;  %v10394_v18 = vld [vmem:[%s10918_s4 + $0x15] ss:$0 sm:$0xff]  ;;  %v11809_v5 = vld [vmem:[#allocation123_spill] sm:$0xff]  ;;  %v3736_v6 = vmul.f32 %v6348_v36, %v3728_v61  ;;  %v11810_v47 = vld [vmem:[#allocation120_spill] sm:$0xff] }
 0x6a3   : > { %v10374_v49 = vadd.f32 %v4628_v63, %v10234_v46  ;;  %v4732_v11 = vpop.permute.xlu1 %4731  ;;  %v11808_v46 = vld [vmem:[#allocation64_spill] sm:$0xff]  ;;  %v3553_v38 = vadd.f32 %v3545_v2, %v3489_v37  ;;  %v3673_v41 = vmul.f32 %v6344_v33, %v3665_v13  ;;  %v3856_v28 = vmul.f32 %v10338_v48, %v11810_v47  ;;  %v11811_v61 = vld [vmem:[#allocation118_spill] sm:$0xff]  ;;  %v11812_v33 = vld [vmem:[#allocation55_spill] sm:$0xff] }
 0x6a4   : > { %v4750_v62 = vmul.f32 %v4732_v11, %v4710_v29  ;;  %6124 = vset.pattern.permute.xlu1 %v11766_v55  ;;  %v3792_v27 = vmul.f32 %v11808_v46, %v3361_v59  ;;  %v3680_v63 = vadd.f32 %v3672_v35, %v3616_v40  ;;  %v6349_v2 = vld [vmem:[%s10918_s4 + $0x6] ss:$0 sm:$0xff]  ;;  %v3793_v35 = vmul.f32 %v6350_v9, %v11811_v61  ;;  %v11813_v48 = vld [vmem:[#allocation70_spill] sm:$0xff] }
 0x6a5   : > { %5051 = vperm.xlu1 %6124, %v9911_v19   ;;  %v6347_v19 = vld [vmem:[#allocation2 + $0x81] sm:$0xff]  ;;  %v3617_v53 = vadd.f32 %v3609_v60, %v3553_v38  ;;  %v3920_v40 = vmul.f32 %v11812_v33, %v10334_v43  ;;  %v3857_v13 = vmul.f32 %v6351_v31, %v11813_v48  ;;  %v6353_v43 = vld [vmem:[%s10915_s1 + $0x50] sm:$0xff] }
 0x6a6   : > { %v4758_v4 = vmul.f32 %v10394_v18, %v4750_v62  ;;  %v3729_v59 = vmul.f32 %v6347_v19, %v11809_v5  ;;  %v3800_v16 = vmul.f32 %v6349_v2, %v3792_v27  ;;  %v3744_v37 = vadd.f32 %v3736_v6, %v3680_v63  ;;  %v11814_v19 = vld [vmem:[#allocation77_spill] sm:$0xff]  ;;  %v11815_v6 = vld [vmem:[#allocation124_spill] sm:$0xff]  ;;  %v11817_v33 = vld [vmem:[#allocation31_spill] sm:$0xff] }
 0x6a7   : > { %v3681_v60 = vadd.f32 %v3673_v41, %v3617_v53  ;;  %v3984_v5 = vmul.f32 %v6350_v9, %v11814_v19  ;;  %v11816_v41 = vld [vmem:[#allocation141_spill] sm:$0xff]  ;;  %v6355_v9 = vld [vmem:[%s10918_s4 + $0x9] ss:$0 sm:$0xff] }
 0x6a8   : > { %v4766_v29 = vadd.f32 %v4758_v4, %v4702_v12  ;;  %v10401_v23 = vpop.permute.xlu1 %4799  ;;  %v3737_v62 = vmul.f32 %v6348_v36, %v3729_v59  ;;  %v3881_v12 = vld [vmem:[#allocation2 + $0x85] sm:$0xff]  ;;  %v3801_v4 = vmul.f32 %v6349_v2, %v3793_v35  ;;  %v4048_v47 = vmul.f32 %v6351_v31, %v11816_v41 }
 0x6a9   : > { %6126 = vset.pattern.permute.xlu1 %v11709_v50  ;;  %v6354_v59 = vld [vmem:[%s10918_s4 + $0x8] ss:$0 sm:$0xff]  ;;  %v3921_v63 = vmul.f32 %v11815_v6, %v3881_v12  ;;  %v3992_v35 = vmul.f32 %v6355_v9, %v3984_v5  ;;  %v6356_v31 = vld [vmem:[%s10915_s1 + $0x40] sm:$0xff] }
 0x6aa   : > { %4911 = vperm.xlu1 %6126, %v9878_v1   ;;  %v10410_v11 = vadd.f32 %v4822_v34, %v4766_v29  ;;  %v6352_v1 = vld [vmem:[%s10918_s4 + $0x7] ss:$0 sm:$0xff]  ;;  %v3808_v34 = vadd.f32 %v3800_v16, %v3744_v37  ;;  %v3745_v38 = vadd.f32 %v3737_v62, %v3681_v60  ;;  %v3928_v36 = vmul.f32 %v6354_v59, %v3920_v40  ;;  %v10435_v62 = vld [vmem:[#allocation2 + $0x8c] sm:$0xff] }
 0x6ab   : > { %v3864_v27 = vmul.f32 %v6352_v1, %v3856_v28  ;;  %v3865_v29 = vmul.f32 %v6352_v1, %v3857_v13  ;;  %v4514_v28 = vld [vmem:[#allocation2 + $0x63] sm:$0xff]  ;;  %v3929_v48 = vmul.f32 %v6354_v59, %v3921_v63  ;;  %v10442_v1 = vpop.permute.xlu0 %4651 }
 0x6ac   : > { %v3809_v16 = vadd.f32 %v3801_v4, %v3745_v38  ;;  %v11818_v40 = vld [vmem:[#allocation136_spill] sm:$0xff] }
 0x6ad   : > { %v10416_v46 = vpop.permute.xlu1 %4935  ;;  %v3872_v53 = vadd.f32 %v3864_v27, %v3808_v34  ;;  %v3985_v60 = vmul.f32 %v11818_v40, %v11817_v33  ;;  %v11819_v27 = vld [vmem:[#allocation135_spill] sm:$0xff]  ;;  %v6357_v4 = vld [vmem:[%s10918_s4 + $0xa] ss:$0 sm:$0xff]  ;;  %v10474_v40 = vld [vmem:[#allocation2 + $0x90] sm:$0xff] }
 0x6ae   : > { %6127 = vset.pattern.permute.xlu1 %v11760_v15  ;;  %v3873_v13 = vadd.f32 %v3865_v29, %v3809_v16  ;;  %v4112_v34 = vmul.f32 %v11819_v27, %v3881_v12  ;;  %v4056_v38 = vmul.f32 %v6357_v4, %v4048_v47  ;;  %v4136_v5 = vld [vmem:[#allocation2 + $0x87] sm:$0xff] }
 0x6af   : > { %4979 = vperm.xlu1 %6127, %v6353_v43   ;;  %v3936_v37 = vadd.f32 %v3928_v36, %v3872_v53  ;;  %v11820_v43 = vld [vmem:[#allocation131_spill] sm:$0xff]  ;;  %v3993_v6 = vmul.f32 %v6355_v9, %v3985_v60  ;;  %v10454_v29 = vld [vmem:[#allocation2 + $0x8d] sm:$0xff]  ;;  %v10460_v41 = vpop.permute.xlu0 %4927  ;;  %v6359_v47 = vld [vmem:[%s10918_s4 + $0xb] ss:$0 sm:$0xff] }
 0x6b0   : > { %v4049_v19 = vmul.f32 %v11820_v43, %v10435_v62  ;;  %v3937_v53 = vadd.f32 %v3929_v48, %v3873_v13  ;;  %v11822_v9 = vld [vmem:[#allocation142_spill] sm:$0xff] }
 0x6b1   : > { %v4000_v63 = vadd.f32 %v3992_v35, %v3936_v37  ;;  %v4113_v35 = vmul.f32 %v11822_v9, %v10454_v29 }
 0x6b2   : > { %v4524_v2 = vpop.permute.xlu1 %4523  ;;  %v4057_v37 = vmul.f32 %v6357_v4, %v4049_v19  ;;  %v4001_v33 = vadd.f32 %v3993_v6, %v3937_v53  ;;  %v11824_v4 = vld [vmem:[#allocation22_spill] sm:$0xff] }
 0x6b3   : > { %v4554_v61 = vmul.f32 %v4524_v2, %v4514_v28  ;;  %6128 = vset.pattern.permute.xlu1 %v11709_v50  ;;  %v4120_v28 = vmul.f32 %v6359_v47, %v4112_v34  ;;  %v11821_v2 = vld [vmem:[#allocation139_spill] sm:$0xff]  ;;  %v4240_v19 = vmul.f32 %v11824_v4, %v10367_v58  ;;  %v10485_v6 = vld [vmem:[#allocation2 + $0x91] sm:$0xff]  ;;  %v10491_v53 = vpop.permute.xlu0 %4915 }
 0x6b4   : > { %4907 = vperm.xlu1 %6128, %v6356_v31   ;;  %v4176_v16 = vmul.f32 %v11821_v2, %v4136_v5  ;;  %v4065_v2 = vadd.f32 %v4057_v37, %v4001_v33 }
 0x6b5   : > { %v4562_v50 = vmul.f32 %v11746_v39, %v4554_v61  ;;  %v4748_v39 = vmul.f32 %v10265_v25, %v10073_v20  ;;  %v4064_v20 = vadd.f32 %v4056_v38, %v4000_v63  ;;  %v10469_v25 = vld [vmem:[#allocation2 + $0x8f] sm:$0xff]  ;;  %v4709_v61 = vld [vmem:[#allocation2 + $0x7f] sm:$0xff]  ;;  %v6360_v38 = vld [vmem:[%s10918_s4 + $0xc] ss:$0 sm:$0xff] }
 0x6b6   : > { %v4184_v43 = vmul.f32 %v6360_v38, %v4176_v16  ;;  %v11826_v16 = vld [vmem:[#allocation30_spill] sm:$0xff] }
 0x6b7   : > { %v10452_v36 = vadd.f32 %v4562_v50, %v10292_v10  ;;  %v4660_v59 = vpop.permute.xlu1 %4659  ;;  %v6358_v10 = vld [vmem:[%s10915_s1 + $0x48] sm:$0xff]  ;;  %v4756_v60 = vmul.f32 %v10394_v18, %v4748_v39  ;;  %v11823_v50 = vld [vmem:[#allocation62_spill] sm:$0xff]  ;;  %v4128_v5 = vadd.f32 %v4120_v28, %v4064_v20 }
 0x6b8   : > { %v4684_v12 = vmul.f32 %v4660_v59, %v10282_v52  ;;  %6129 = vset.pattern.permute.xlu1 %v11760_v15  ;;  %v4177_v27 = vmul.f32 %v11823_v50, %v10469_v25  ;;  %v4264_v59 = vld [vmem:[#allocation2 + $0x89] sm:$0xff]  ;;  %v11827_v28 = vld [vmem:[#allocation10_spill] sm:$0xff] }
 0x6b9   : > { %4975 = vperm.xlu1 %6129, %v6358_v10   ;;  %v11825_v39 = vld [vmem:[#allocation44_spill] sm:$0xff]  ;;  %v4305_v20 = vmul.f32 %v11827_v28, %v10485_v6  ;;  %v4192_v33 = vadd.f32 %v4184_v43, %v4128_v5  ;;  %v10518_v5 = vld [vmem:[#allocation2 + $0x95] sm:$0xff] }
 0x6ba   : > { %v4692_v15 = vmul.f32 %v10303_v3, %v4684_v12  ;;  %v4241_v12 = vmul.f32 %v11825_v39, %v10474_v40  ;;  %v4185_v58 = vmul.f32 %v6360_v38, %v4177_v27  ;;  %v6362_v27 = vld [vmem:[#allocation2 + $0x8b] sm:$0xff]  ;;  %v4393_v38 = vld [vmem:[#allocation2 + $0x94] sm:$0xff] }
 0x6bc   : > { %v4700_v48 = vadd.f32 %v4692_v15, %v10374_v49  ;;  %v4728_v13 = vpop.permute.xlu1 %4727  ;;  %v4121_v49 = vmul.f32 %v6359_v47, %v4113_v35  ;;  %v10494_v15 = vld [vmem:[#allocation2 + $0x93] sm:$0xff]  ;;  %v6361_v35 = vld [vmem:[%s10918_s4 + $0xd] ss:$0 sm:$0xff] }
 0x6bd   : > { %v4749_v34 = vmul.f32 %v4728_v13, %v4709_v61  ;;  %4971 = vperm.xlu1 %6129, %v6356_v31   ;;  %v4304_v61 = vmul.f32 %v11826_v16, %v4264_v59  ;;  %v4248_v37 = vmul.f32 %v6361_v35, %v4240_v19  ;;  %v11828_v13 = vld [vmem:[#allocation52_spill] sm:$0xff] }
 0x6be   : > { %v10487_v63 = vadd.f32 %v4756_v60, %v4700_v48  ;;  %v4129_v60 = vadd.f32 %v4121_v49, %v4065_v2  ;;  %v4249_v48 = vmul.f32 %v6361_v35, %v4241_v12  ;;  %v4369_v50 = vmul.f32 %v11828_v13, %v10494_v15  ;;  %v11832_v2 = vld [vmem:[#allocation51_spill] sm:$0xff]  ;;  %v11833_v35 = vld [vmem:[#allocation42_spill] sm:$0xff] }
 0x6bf   : > { %v4757_v10 = vmul.f32 %v10394_v18, %v4749_v34  ;;  %v11829_v34 = vld [vmem:[#allocation86_spill] sm:$0xff]  ;;  %v4256_v43 = vadd.f32 %v4248_v37, %v4192_v33  ;;  %v11831_v12 = vmov 0   ;;  %v4433_v16 = vmul.f32 %v11832_v2, %v4393_v38  ;;  %v11834_v13 = vld [vmem:[#allocation91_spill] sm:$0xff] }
 0x6c0   : > { %v4193_v59 = vadd.f32 %v4185_v58, %v4129_v60  ;;  %v4496_v37 = vmul.f32 %v11833_v35, %v10454_v29  ;;  %v10529_v33 = vld [vmem:[#allocation2 + $0x9b] sm:$0xff] }
 0x6c1   : > { %v10500_v9 = vadd.f32 %v4757_v10, %v10309_v14  ;;  %6130 = vset.pattern.permute.xlu1 %v11766_v55  ;;  %v10503_v47 = vpop.permute.xlu1 %4863  ;;  %v4368_v14 = vmul.f32 %v6362_v27, %v11829_v34  ;;  %v6363_v55 = vld [vmem:[%s10918_s4 + $0xe] ss:$0 sm:$0xff]  ;;  %v10514_v10 = vpop.permute.xlu0 %4867  ;;  %v4497_v27 = vmul.f32 %v11834_v13, %v10518_v5 }
 0x6c2   : > { %5035 = vperm.xlu1 %6130, %v6356_v31   ;;  %v4312_v4 = vmul.f32 %v6363_v55, %v4304_v61  ;;  %v4313_v39 = vmul.f32 %v6363_v55, %v4305_v20  ;;  %v11830_v31 = vld [vmem:[#allocation39_spill] sm:$0xff]  ;;  %v4257_v28 = vadd.f32 %v4249_v48, %v4193_v59  ;;  %v6364_v61 = vld [vmem:[%s10918_s4 + $0xf] ss:$0 sm:$0xff]  ;;  %v6365_v48 = vld [vmem:[%s10918_s4 + $0x10] ss:$0 sm:$0xff] }
 0x6c3   : > { %v4432_v19 = vmul.f32 %v11830_v31, %v10435_v62  ;;  %v4377_v58 = vmul.f32 %v6364_v61, %v4369_v50  ;;  %v4376_v20 = vmul.f32 %v6364_v61, %v4368_v14  ;;  %v11835_v55 = vld [vmem:[#allocation60_spill] sm:$0xff]  ;;  %v4441_v50 = vmul.f32 %v6365_v48, %v4433_v16 }
 0x6c4   : > { %v4320_v62 = vadd.f32 %v4312_v4, %v4256_v43  ;;  %v4321_v60 = vadd.f32 %v4313_v39, %v4257_v28  ;;  %v4560_v59 = vmul.f32 %v11835_v55, %v10494_v15  ;;  %v4578_v4 = vld [vmem:[#allocation2 + $0x64] sm:$0xff]  ;;  %v10540_v43 = vld [vmem:[#allocation2 + $0x9c] sm:$0xff]  ;;  %v6366_v28 = vld [vmem:[%s10918_s4 + $0x11] ss:$0 sm:$0xff] }
 0x6c5   : > { %v4440_v34 = vmul.f32 %v6365_v48, %v4432_v19  ;;  %v4856_v61 = vpop.permute.xlu0 %4855  ;;  %v4504_v35 = vmul.f32 %v6366_v28, %v4496_v37  ;;  %v6367_v19 = vld [vmem:[#allocation2 + $0x65] sm:$0xff]  ;;  %v11837_v55 = vld [vmem:[#allocation146_spill] sm:$0xff]  ;;  %v4625_v37 = vmul.f32 %v11838_v57, %v10540_v43  ;;  %v11839_v57 = vld [vmem:[#allocation87_spill] sm:$0xff] }
 0x6c6   : > { %v10520_v49 = vpop.permute.xlu1 %4931  ;;  %6132 = vset.pattern.permute.xlu1 %v11831_v12  ;;  %v4385_v14 = vadd.f32 %v4377_v58, %v4321_v60  ;;  %v4384_v31 = vadd.f32 %v4376_v20, %v4320_v62  ;;  %v11836_v12 = vld [vmem:[#allocation15_spill] sm:$0xff]  ;;  %v4682_v13 = vmul.f32 %v6367_v19, %v10442_v1  ;;  %v4624_v16 = vmul.f32 %v11837_v55, %v4393_v38  ;;  %v6368_v60 = vld [vmem:[%s10918_s4 + $0x12] ss:$0 sm:$0xff] }
 0x6c7   : > { %v4561_v2 = vmul.f32 %v11836_v12, %v10529_v33  ;;  %v4505_v20 = vmul.f32 %v6366_v28, %v4497_v27  ;;  %v4568_v48 = vmul.f32 %v6368_v60, %v4560_v59  ;;  %v10550_v12 = vld [vmem:[#allocation2 + $0x9d] sm:$0xff]  ;;  %v4688_v1 = vmul.f32 %v10279_v24, %v10518_v5  ;;  %v10560_v28 = vld [vmem:[#allocation2 + $0x6d] sm:$0xff] }
 0x6c8   : > { %v4448_v62 = vadd.f32 %v4440_v34, %v4384_v31  ;;  %v4449_v52 = vadd.f32 %v4441_v50, %v4385_v14  ;;  %v4690_v34 = vmul.f32 %v10303_v3, %v4682_v13  ;;  %v4632_v31 = vmul.f32 %v10152_v51, %v4624_v16  ;;  %v4776_v24 = vld [vmem:[#allocation2 + $0x98] sm:$0xff] }
 0x6c9   : > { %v4569_v38 = vmul.f32 %v6368_v60, %v4561_v2  ;;  %v4689_v50 = vmul.f32 %v10550_v12, %v11839_v57  ;;  %v4633_v16 = vmul.f32 %v10152_v51, %v4625_v37  ;;  %v4696_v60 = vmul.f32 %v10303_v3, %v4688_v1 }
 0x6ca   : > { %v4512_v27 = vadd.f32 %v4504_v35, %v4448_v62  ;;  %v4513_v55 = vadd.f32 %v4505_v20, %v4449_v52  ;;  %v4777_v20 = vld [vmem:[#allocation2 + $0xa0] sm:$0xff]  ;;  %v4816_v0 = vmul.f32 %v10311_v7, %v4776_v24 }
 0x6cb   : > { %v4588_v39 = vpop.permute.xlu1 %4587 }
 0x6cc   : > { %v4618_v58 = vmul.f32 %v4588_v39, %v4578_v4  ;;  %v4712_v4 = vld [vmem:[#allocation2 + $0x97] sm:$0xff]  ;;  %v4713_v39 = vld [vmem:[#allocation2 + $0x9f] sm:$0xff]  ;;  %v4576_v2 = vadd.f32 %v4568_v48, %v4512_v27  ;;  %v4697_v48 = vmul.f32 %v10303_v3, %v4689_v50 }
 0x6cd   : > { %v4752_v35 = vmul.f32 %v10262_v22, %v4712_v4  ;;  %v4753_v62 = vmul.f32 %v10177_v8, %v4713_v39  ;;  %v4841_v27 = vld [vmem:[#allocation2 + $0xa1] sm:$0xff]  ;;  %v4817_v39 = vmul.f32 %v10181_v44, %v4777_v20  ;;  %v10591_v44 = vld [vmem:[%s10918_s4 + $0x17] ss:$0 sm:$0xff] }
 0x6ce   : > { %v4626_v21 = vmul.f32 %v10152_v51, %v4618_v58  ;;  %v10562_v58 = vpop.permute.xlu0 %4851  ;;  %v4640_v57 = vadd.f32 %v4632_v31, %v4576_v2  ;;  %v6369_v8 = vld [vmem:[#allocation2 + $0x80] sm:$0xff] }
 0x6cf   : > { %v4761_v7 = vmul.f32 %v10394_v18, %v4753_v62  ;;  %v4905_v50 = vld [vmem:[#allocation2 + $0xa3] sm:$0xff] }
 0x6d0   : > { %v4634_v59 = vadd.f32 %v4626_v21, %v10452_v36  ;;  %v4656_v19 = vpop.permute.xlu1 %4655  ;;  %v4577_v21 = vadd.f32 %v4569_v38, %v4513_v55  ;;  %v4837_v36 = vld [vmem:[#allocation2 + $0x81] sm:$0xff]  ;;  %v4760_v38 = vmul.f32 %v10394_v18, %v4752_v35  ;;  %v4704_v55 = vadd.f32 %v4696_v60, %v4640_v57 }
 0x6d1   : > { %v4683_v14 = vmul.f32 %v4656_v19, %v10560_v28  ;;  %v4840_v19 = vld [vmem:[#allocation2 + $0x99] sm:$0xff]  ;;  %v4877_v37 = vmul.f32 %v4856_v61, %v4837_v36  ;;  %v4969_v62 = vld [vmem:[#allocation2 + $0xa4] sm:$0xff] }
 0x6d2   : > { %v10568_v13 = vadd.f32 %v4690_v34, %v4634_v59  ;;  %v10581_v59 = vpop.permute.xlu0 %4843  ;;  %v4641_v1 = vadd.f32 %v4633_v16, %v4577_v21  ;;  %v4880_v31 = vmul.f32 %v10514_v10, %v4840_v19  ;;  %v4768_v35 = vadd.f32 %v4760_v38, %v4704_v55 }
 0x6d3   : > { %v4691_v52 = vmul.f32 %v10303_v3, %v4683_v14  ;;  %v4881_v14 = vmul.f32 %v10316_v42, %v4841_v27  ;;  %v4885_v2 = vmul.f32 %v10591_v44, %v4877_v37  ;;  %v4944_v10 = vmul.f32 %v10520_v49, %v10529_v33 }
 0x6d4   : > { %v4705_v24 = vadd.f32 %v4697_v48, %v4641_v1  ;;  %v4825_v21 = vmul.f32 %v10387_v17, %v4817_v39  ;;  %v4945_v42 = vmul.f32 %v10416_v46, %v4905_v50  ;;  %v5009_v46 = vmul.f32 %v10222_v45, %v4969_v62  ;;  %v10621_v39 = vld [vmem:[#allocation2 + $0x8c] sm:$0xff]  ;;  %v10626_v45 = vld [vmem:[%s10918_s4 + $0x19] ss:$0 sm:$0xff] }
 0x6d5   : > { %v10577_v22 = vadd.f32 %v4691_v52, %v10361_v26  ;;  %v4792_v4 = vpop.permute.xlu1 %4791  ;;  %v4824_v26 = vmul.f32 %v10387_v17, %v4816_v0  ;;  %v4888_v52 = vmul.f32 %v10591_v44, %v4880_v31  ;;  %v4889_v19 = vmul.f32 %v10591_v44, %v4881_v14  ;;  %v5033_v31 = vld [vmem:[#allocation2 + $0xa5] sm:$0xff] }
 0x6d6   : > { %v4813_v34 = vmul.f32 %v6369_v8, %v4792_v4  ;;  %v4769_v36 = vadd.f32 %v4761_v7, %v4705_v24  ;;  %v5060_v57 = vpop.permute.xlu0 %5059 }
 0x6d7   : > { %v4832_v20 = vadd.f32 %v4824_v26, %v4768_v35  ;;  %v5072_v49 = vmul.f32 %v5060_v57, %v10550_v12  ;;  %v10618_v12 = vld [vmem:[%s10918_s4 + $0x1a] ss:$0 sm:$0xff] }
 0x6d8   : > { %v4821_v61 = vmul.f32 %v10387_v17, %v4813_v34  ;;  %v4833_v48 = vadd.f32 %v4825_v21, %v4769_v36  ;;  %v4707_v36 = vld [vmem:[#allocation2 + $0x6f] sm:$0xff] }
 0x6d9   : > { %v4896_v38 = vadd.f32 %v4888_v52, %v4832_v20  ;;  %v5080_v34 = vmul.f32 %v10618_v12, %v5072_v49  ;;  %v4751_v52 = vmul.f32 %v10241_v56, %v10469_v25  ;;  %v6374_v25 = vld [vmem:[#allocation2 + $0x79] sm:$0xff] }
 0x6da   : > { %v4829_v16 = vadd.f32 %v4821_v61, %v10500_v9  ;;  %v10597_v0 = vpop.permute.xlu1 %4859  ;;  %v10609_v9 = vld [vmem:[%s10918_s4 + $0x18] ss:$0 sm:$0xff]  ;;  %v4897_v8 = vadd.f32 %v4889_v19, %v4833_v48  ;;  %v4623_v61 = vmul.f32 %v10161_v30, %v10621_v39 }
 0x6db   : > { %v4952_v33 = vmul.f32 %v10609_v9, %v4944_v10  ;;  %v4953_v4 = vmul.f32 %v10609_v9, %v4945_v42  ;;  %v4759_v49 = vmul.f32 %v10394_v18, %v4751_v52 }
 0x6dc   : > { %v10602_v60 = vadd.f32 %v4885_v2, %v4829_v16  ;;  %v4687_v2 = vmul.f32 %v10243_v32, %v10454_v29  ;;  %v4631_v21 = vmul.f32 %v10152_v51, %v4623_v61  ;;  %v11840_v29 = vld [vmem:[#allocation90_spill] sm:$0xff]  ;;  %v4815_v51 = vmul.f32 %v10401_v23, %v10474_v40 }
 0x6dd   : > { %v4960_v1 = vadd.f32 %v4952_v33, %v4896_v38  ;;  %v4961_v55 = vadd.f32 %v4953_v4, %v4897_v8  ;;  %v4879_v4 = vmul.f32 %v10503_v47, %v10485_v6  ;;  %v6375_v38 = vld [vmem:[#allocation2 + $0x7b] sm:$0xff] }
 0x6de   : > { %v4695_v20 = vmul.f32 %v10303_v3, %v4687_v2  ;;  %v4639_v19 = vadd.f32 %v4631_v21, %v11840_v29  ;;  %v4876_v3 = vmul.f32 %v6374_v25, %v10562_v58  ;;  %v4823_v23 = vmul.f32 %v10387_v17, %v4815_v51 }
 0x6df   : > { %v4996_v37 = vpop.permute.xlu1 %4995  ;;  %v4887_v58 = vmul.f32 %v10591_v44, %v4879_v4 }
 0x6e0   : > { %v5008_v27 = vmul.f32 %v4996_v37, %v10540_v43  ;;  %v5017_v43 = vmul.f32 %v10626_v45, %v5009_v46  ;;  %v4772_v46 = vld [vmem:[#allocation2 + $0x78] sm:$0xff]  ;;  %v4703_v48 = vadd.f32 %v4695_v20, %v4639_v19  ;;  %v4884_v8 = vmul.f32 %v10591_v44, %v4876_v3 }
 0x6e2   : > { %v5016_v7 = vmul.f32 %v10626_v45, %v5008_v27  ;;  %v5025_v10 = vadd.f32 %v5017_v43, %v4961_v55  ;;  %v4940_v27 = vmul.f32 %v6375_v38, %v10491_v53 }
 0x6e4   : > { %v5024_v26 = vadd.f32 %v5016_v7, %v4960_v1  ;;  %v5064_v50 = vpop.permute.xlu1 %5063  ;;  %v4948_v6 = vmul.f32 %v10609_v9, %v4940_v27 }
 0x6e5   : > { %v5073_v24 = vmul.f32 %v5064_v50, %v5033_v31  ;;  %v4967_v50 = vld [vmem:[#allocation2 + $0x94] sm:$0xff] }
 0x6e6   : > { %v5088_v14 = vadd.f32 %v5080_v34, %v5024_v26  ;;  %v4767_v34 = vadd.f32 %v4759_v49, %v4703_v48  ;;  %v5056_v26 = vpop.permute.xlu0 %5055 }
 0x6e7   : > { %v5081_v35 = vmul.f32 %v10618_v12, %v5073_v24 }
 0x6e8   : > { %v5108_v16 = vsel %vm304_vm1, %v5088_v14, 0.0  ;;  %v4831_v47 = vadd.f32 %v4823_v23, %v4767_v34 }
 0x6e9   : > { %5109 = vadd.xlane.f32.xlu1 %v5108_v16  ;;  %v4720_v42 = vpop.permute.xlu1 %4719  ;;  %v5089_v62 = vadd.f32 %v5081_v35, %v5025_v10 }
 0x6ea   : > { %v4747_v30 = vmul.f32 %v4720_v42, %v4707_v36  ;;  %v4895_v43 = vadd.f32 %v4887_v58, %v4831_v47  ;;  %v4706_v42 = vld [vmem:[#allocation2 + $0x67] sm:$0xff]  ;;  %v5048_v27 = vpop.permute.xlu0 %5047 }
 0x6eb   : > { %v5111_v57 = vsel %vm304_vm1, %v5089_v62, 0.0 }
 0x6ec   : > { %v4755_v32 = vmul.f32 %v10394_v18, %v4747_v30  ;;  %5112 = vadd.xlane.f32.xlu0 %v5111_v57  ;;  %v6376_v57 = vld [vmem:[#allocation2 + $0x69] sm:$0xff] }
 0x6ee   : > { %v10647_v33 = vadd.f32 %v4755_v32, %v10577_v22  ;;  %v4788_v56 = vpop.permute.xlu1 %4787  ;;  %v4943_v22 = vmul.f32 %v10460_v41, %v10494_v15  ;;  %v5071_v15 = vmul.f32 %v5056_v26, %v10518_v5  ;;  %v4770_v5 = vld [vmem:[#allocation2 + $0x68] sm:$0xff]  ;;  %v4874_v32 = vmul.f32 %v6376_v57, %v10581_v59 }
 0x6ef   : > { %v4812_v37 = vmul.f32 %v4788_v56, %v4772_v46  ;;  %v4838_v46 = vld [vmem:[#allocation2 + $0x89] sm:$0xff] }
 0x6f0   : > { %v4951_v53 = vmul.f32 %v10609_v9, %v4943_v22  ;;  %v4882_v49 = vmul.f32 %v10591_v44, %v4874_v32  ;;  %v6377_v56 = vld [vmem:[#allocation2 + $0x83] sm:$0xff]  ;;  %v4878_v4 = vmul.f32 %v10597_v0, %v4838_v46 }
 0x6f1   : > { %v4820_v40 = vmul.f32 %v10387_v17, %v4812_v37 }
 0x6f2   : > { %v4959_v24 = vadd.f32 %v4951_v53, %v4895_v43  ;;  %v5030_v43 = vld [vmem:[#allocation2 + $0x8d] sm:$0xff] }
 0x6f3   : > { %v4828_v1 = vadd.f32 %v4820_v40, %v10487_v63  ;;  %v4924_v7 = vpop.permute.xlu1 %4923  ;;  %v5079_v63 = vmul.f32 %v10618_v12, %v5071_v15  ;;  %v4965_v40 = vld [vmem:[#allocation2 + $0x84] sm:$0xff] }
 0x6f5   : > { %v4892_v31 = vadd.f32 %v4884_v8, %v4828_v1  ;;  %v6378_v8 = vld [vmem:[#allocation2 + $0x85] sm:$0xff] }
 0x6f6   : > { %v5069_v34 = vmul.f32 %v6378_v8, %v5048_v27  ;;  %v4962_v27 = vld [vmem:[#allocation2 + $0x6c] sm:$0xff] }
 0x6f7   : > { %v10662_v55 = vadd.f32 %v4948_v6, %v4892_v31 }
 0x6f8   : > { %v4992_v41 = vpop.permute.xlu1 %4991  ;;  %v5077_v31 = vmul.f32 %v10618_v12, %v5069_v34 }
 0x6f9   : > { %v5007_v61 = vmul.f32 %v4992_v41, %v4967_v50 }
 0x6fb   : > { %v5015_v14 = vmul.f32 %v10626_v45, %v5007_v61 }
 0x6fd   : > { %v5023_v2 = vadd.f32 %v5015_v14, %v4959_v24  ;;  %v4716_v35 = vpop.permute.xlu1 %4715 }
 0x6fe   : > { %v4746_v62 = vmul.f32 %v4716_v35, %v4706_v42 }
 0x6ff   : > { %v5087_v10 = vadd.f32 %v5079_v63, %v5023_v2  ;;  %v5044_v63 = vpop.permute.xlu0 %5043  ;;  %v4964_v2 = vld [vmem:[#allocation2 + $0x7c] sm:$0xff] }
 0x700   : > { %v4754_v30 = vmul.f32 %v10394_v18, %v4746_v62  ;;  %v4902_v18 = vld [vmem:[#allocation2 + $0x8b] sm:$0xff]  ;;  %v11841_v62 = vld [vmem:[#allocation14_spill] sm:$0xff] }
 0x701   : > { %v5105_v16 = vsel %vm304_vm1, %v5087_v10, 0.0  ;;  %v4942_v38 = vmul.f32 %v4924_v7, %v4902_v18  ;;  %v6379_v10 = vld [vmem:[#allocation2 + $0x7d] sm:$0xff] }
 0x702   : > { %5106 = vadd.xlane.f32.xlu0 %v5105_v16  ;;  %v4784_v21 = vpop.permute.xlu1 %4783  ;;  %v4762_v19 = vadd.f32 %v4754_v30, %v10568_v13  ;;  %v4886_v13 = vmul.f32 %v10591_v44, %v4878_v4  ;;  %v5068_v16 = vmul.f32 %v6379_v10, %v5044_v63  ;;  %v5338_v63 = vld [vmem:[%s6614_s24 + $0x40] sm:$0xff] }
 0x703   : > { %v4950_v1 = vmul.f32 %v10609_v9, %v4942_v38  ;;  %v5040_v46 = vpop.permute.xlu0 %5039  ;;  %v11844_v38 = vld [vmem:[#allocation24_spill] sm:$0xff] }
 0x704   : > { %v4894_v7 = vadd.f32 %v4886_v13, %v10410_v11 }
 0x706   : > { %v4958_v26 = vadd.f32 %v4950_v1, %v4894_v7 }
 0x707   : > { %v4920_v36 = vpop.permute.xlu1 %4919 }
 0x708   : > { %v4941_v25 = vmul.f32 %v6377_v56, %v4920_v36  ;;  %v4811_v36 = vmul.f32 %v4784_v21, %v10248_v54 }
 0x70a   : > { %v4949_v59 = vmul.f32 %v10609_v9, %v4941_v25  ;;  %v4819_v57 = vmul.f32 %v10387_v17, %v4811_v36  ;;  %v5339_v36 = vld [vmem:[%s6614_s24 + $0x48] sm:$0xff] }
 0x70c   : > { %v4988_v52 = vpop.permute.xlu1 %4987  ;;  %v4957_v0 = vadd.f32 %v4949_v59, %v10602_v60  ;;  %v4827_v54 = vadd.f32 %v4819_v57, %v10647_v33  ;;  %v10745_v57 = vld [vmem:[%s10919_s5] ss:$0 sm:$0xff] }
 0x70d   : > { %v5006_v23 = vmul.f32 %v4988_v52, %v10621_v39 }
 0x70f   : > { %v5014_v47 = vmul.f32 %v10626_v45, %v5006_v23 }
 0x711   : > { %v4780_v20 = vpop.permute.xlu1 %4779  ;;  %v5022_v15 = vadd.f32 %v5014_v47, %v4958_v26  ;;  %v11846_v26 = vld [vmem:[#allocation21_spill] sm:$0xff] }
 0x712   : > { %v4810_v29 = vmul.f32 %v4780_v20, %v4770_v5  ;;  %v4899_v5 = vld [vmem:[#allocation2 + $0x73] sm:$0xff]  ;;  %v5076_v20 = vmul.f32 %v10618_v12, %v5068_v16 }
 0x714   : > { %v4818_v51 = vmul.f32 %v10387_v17, %v4810_v29  ;;  %v11843_v17 = vld [vmem:[#allocation20_spill] sm:$0xff] }
 0x716   : > { %v4826_v3 = vadd.f32 %v4818_v51, %v4762_v19  ;;  %v4848_v48 = vpop.permute.xlu1 %4847 }
 0x717   : > { %v4875_v52 = vmul.f32 %v4848_v48, %v11841_v62 }
 0x718   : > { %v10674_v37 = vadd.f32 %v4882_v49, %v4826_v3  ;;  %v11842_v3 = vld [vmem:[#allocation102_spill] sm:$0xff] }
 0x719   : > { %v4883_v51 = vmul.f32 %v10591_v44, %v4875_v52  ;;  %v5067_v48 = vmul.f32 %v5040_v46, %v11842_v3 }
 0x71b   : > { %v4984_v22 = vpop.permute.xlu1 %4983  ;;  %v4891_v4 = vadd.f32 %v4883_v51, %v4827_v54  ;;  %v5075_v33 = vmul.f32 %v10618_v12, %v5067_v48 }
 0x71c   : > { %v5005_v58 = vmul.f32 %v4984_v22, %v4965_v40 }
 0x71e   : > { %v5013_v6 = vmul.f32 %v10626_v45, %v5005_v58 }
 0x720   : > { %v5021_v53 = vadd.f32 %v5013_v6, %v4957_v0  ;;  %v5052_v39 = vpop.permute.xlu1 %5051 }
 0x721   : > { %v5070_v50 = vmul.f32 %v5052_v39, %v5030_v43  ;;  %v5343_v39 = vld [vmem:[%s6614_s24 + $0x68] sm:$0xff] }
 0x722   : > { %v5085_v41 = vadd.f32 %v5077_v31, %v5021_v53  ;;  %v11845_v53 = vld [vmem:[#allocation8_spill] sm:$0xff] }
 0x723   : > { %v5078_v61 = vmul.f32 %v10618_v12, %v5070_v50  ;;  %v5342_v50 = vld [vmem:[%s6614_s24 + $0x60] sm:$0xff]  ;;  %v5346_v16 = vmul.f32 %v5338_v63, %v11845_v53  ;;  %v5347_v52 = vmul.f32 %v5339_v36, %v11845_v53 }
 0x724   : > { %v5099_v24 = vsel %vm304_vm1, %v5085_v41, 0.0  ;;  %v5350_v41 = vmul.f32 %v5342_v50, %v11845_v53 }
 0x725   : > { %5100 = vadd.xlane.f32.xlu1 %v5099_v24  ;;  %v4912_v60 = vpop.permute.xlu1 %4911  ;;  %v5086_v14 = vadd.f32 %v5078_v61, %v5022_v15  ;;  %v5344_v15 = vld [vmem:[%s6614_s24 + $0x70] sm:$0xff]  ;;  %v5354_v62 = vadd.f32 %v5346_v16, %v11846_v26 }
 0x726   : > { %v4939_v32 = vmul.f32 %v4912_v60, %v4899_v5  ;;  %v5340_v61 = vld [vmem:[%s6614_s24 + $0x50] sm:$0xff]  ;;  %v5358_v24 = vadd.f32 %v5350_v41, %v11846_v26  ;;  %v5352_v60 = vmul.f32 %v5344_v15, %v11845_v53 }
 0x727   : > { %v5102_v11 = vsel %vm304_vm1, %v5086_v14, 0.0  ;;  %v5348_v14 = vmul.f32 %v5340_v61, %v11845_v53 }
 0x728   : > { %5103 = vadd.xlane.f32.xlu0 %v5102_v11  ;;  %v4947_v21 = vmul.f32 %v10609_v9, %v4939_v32  ;;  %v5341_v11 = vld [vmem:[%s6614_s24 + $0x58] sm:$0xff] }
 0x729   : > { %v5349_v10 = vmul.f32 %v5341_v11, %v11845_v53 }
 0x72a   : > { %v4980_v35 = vpop.permute.xlu1 %4979  ;;  %v4955_v59 = vadd.f32 %v4947_v21, %v4891_v4 }
 0x72b   : > { %v5004_v42 = vmul.f32 %v4980_v35, %v4964_v2  ;;  %v5360_v2 = vadd.f32 %v5352_v60, %v11846_v26  ;;  %v5356_v35 = vadd.f32 %v5348_v14, %v11846_v26 }
 0x72d   : > { %v5012_v30 = vmul.f32 %v10626_v45, %v5004_v42  ;;  %v5357_v42 = vadd.f32 %v5349_v10, %v11846_v26 }
 0x72f   : > { %v5020_v29 = vadd.f32 %v5012_v30, %v10662_v55  ;;  %v4908_v19 = vpop.permute.xlu1 %4907  ;;  %v5355_v30 = vadd.f32 %v5347_v52, %v11846_v26 }
 0x730   : > { %v4938_v55 = vmul.f32 %v4908_v19, %v11844_v38 }
 0x731   : > { %v5084_v49 = vadd.f32 %v5076_v20, %v5020_v29 }
 0x732   : > { %v4946_v22 = vmul.f32 %v10609_v9, %v4938_v55 }
 0x733   : > { %v5096_v56 = vsel %vm304_vm1, %v5084_v49, 0.0 }
 0x734   : > { %5097 = vadd.xlane.f32.xlu0 %v5096_v56  ;;  %v4976_v25 = vpop.permute.xlu1 %4975  ;;  %v4954_v0 = vadd.f32 %v4946_v22, %v10674_v37 }
 0x735   : > { %v5003_v18 = vmul.f32 %v4976_v25, %v11843_v17 }
 0x737   : > { %v5011_v44 = vmul.f32 %v10626_v45, %v5003_v18 }
 0x738   : > { %v4972_v13 = vpop.permute.xlu1 %4971 }
 0x739   : > { %v5019_v23 = vadd.f32 %v5011_v44, %v4955_v59  ;;  %v5002_v40 = vmul.f32 %v4972_v13, %v4962_v27 }
 0x73b   : > { %v5083_v8 = vadd.f32 %v5075_v33, %v5019_v23  ;;  %v5010_v34 = vmul.f32 %v10626_v45, %v5002_v40  ;;  %v5345_v45 = vld [vmem:[%s6614_s24 + $0x78] sm:$0xff] }
 0x73c   : > { %v5353_v43 = vmul.f32 %v5345_v45, %v11845_v53 }
 0x73d   : > { %v5036_v58 = vpop.permute.xlu1 %5035  ;;  %v5093_v1 = vsel %vm304_vm1, %v5083_v8, 0.0  ;;  %v5018_v7 = vadd.f32 %v5010_v34, %v4954_v0 }
 0x73e   : > { %v5066_v6 = vmul.f32 %v5036_v58, %v10560_v28  ;;  %5094 = vadd.xlane.f32.xlu1 %v5093_v1  ;;  %v5361_v37 = vadd.f32 %v5353_v43, %v11846_v26  ;;  %v5351_v28 = vmul.f32 %v5343_v39, %v11845_v53 }
 0x740   : > { %v5074_v47 = vmul.f32 %v10618_v12, %v5066_v6  ;;  %v5359_v12 = vadd.f32 %v5351_v28, %v11846_v26 }
 0x742   : > { %v5082_v31 = vadd.f32 %v5074_v47, %v5018_v7 }
 0x744   : > { %v5090_v9 = vsel %vm304_vm1, %v5082_v31, 0.0 }
 0x745   : > { %5091 = vadd.xlane.f32.xlu0 %v5090_v9 }
 0x74f   : > { %5384 = vrot.lane.b32.xlu1 %v5361_v37, %s6474_s22 }
 0x753   : > { %5380 = vrot.lane.b32.xlu1 %v5359_v12, %s6474_s22 }
 0x757   : > { %5378 = vrot.lane.b32.xlu1 %v5358_v24, %s6474_s22 }
 0x75b   : > { %5382 = vrot.lane.b32.xlu0 %v5360_v2, %s6474_s22  ;;  %5374 = vrot.lane.b32.xlu1 %v5356_v35, %s6474_s22 }
 0x75f   : > { %5376 = vrot.lane.b32.xlu0 %v5357_v42, %s6474_s22  ;;  %5370 = vrot.lane.b32.xlu1 %v5354_v62, %s6474_s22 }
 0x763   : > { %5372 = vrot.lane.b32.xlu0 %v5355_v30, %s6474_s22  ;;  %s5647_s22 = scalar_lea.hbm %s10922_s8, %s5768_s12 }
 0x772   : > { %v5110_v20 = vpop.xlane.xlu1 %5109 }
 0x773   : > { %v10754_v19 = vadd.f32 %v10745_v57, %v5110_v20 }
 0x775   : > { %v5113_v5 = vpop.xlane.xlu0 %5112  ;;  %v10758_v49 = vmul.f32 0.70710677, %v10754_v19 }
 0x776   : > { %v10748_v32 = vadd.f32 %v10745_v57, %v5113_v5 }
 0x777   : > { %v5160_v54 = vand.u32 2147483647, %v10758_v49  ;;  %vm5144_vm12 = vcmp.lt.f32.partialorder %v10758_v49, 0.0 }
 0x778   : > { %v10751_v29 = vmul.f32 0.70710677, %v10748_v32 }
 0x779   : > { %v5168_v56 = vmul.f32 0.3275911, %v5160_v54  ;;  %v5272_v7 = vsub.f32 0.0, %v5160_v54 }
 0x77a   : > { %v5161_v51 = vand.u32 2147483647, %v10751_v29  ;;  %vm5145_vm1 = vcmp.lt.f32.partialorder %v10751_v29, 0.0 }
 0x77b   : > { %v5176_v25 = vadd.f32 1.0, %v5168_v56  ;;  %v5280_v53 = vmul.f32 %v5272_v7, %v5160_v54 }
 0x77c   : > { %v5169_v46 = vmul.f32 0.3275911, %v5161_v51  ;;  %v5273_v23 = vsub.f32 0.0, %v5161_v51 }
 0x77d   : > { %v5294_v50 = vmul.f32 1.442695, %v5280_v53  ;;  %v5129_v53 = vmul.f32 0.5, %v10748_v32 }
 0x77e   : > { %v5177_v21 = vadd.f32 1.0, %v5169_v46  ;;  %v5281_v34 = vmul.f32 %v5273_v23, %v5161_v51 }
 0x780   : > { %6229 = vrcp.f32 %v5177_v21  ;;  %v5296_v47 = vmul.f32 1.442695, %v5281_v34 }
 0x781   : > { %6231 = vrcp.f32 %v5176_v25 }
 0x78b   : > { %v5107_v3 = vpop.xlane.xlu0 %5106 }
 0x78c   : > { %v10762_v48 = vadd.f32 %v10745_v57, %v5107_v3 }
 0x78d   : > { %v6230_v38 = vpop.eup %6229 }
 0x78e   : > { %v10765_v4 = vmul.f32 0.70710677, %v10762_v48  ;;  %v5201_v59 = vmul.f32 1.0614054, %v6230_v38  ;;  %v6232_v44 = vpop.eup %6231 }
 0x78f   : > { %v5200_v13 = vmul.f32 1.0614054, %v6232_v44 }
 0x790   : > { %v5159_v17 = vand.u32 2147483647, %v10765_v4  ;;  %v5209_v27 = vadd.f32 -1.4531521, %v5201_v59  ;;  %v11847_v59 = vmov 1.0   ;;  %vm5143_vm13 = vcmp.lt.f32.partialorder %v10765_v4, 0.0 }
 0x791   : > { %v5208_v40 = vadd.f32 -1.4531521, %v5200_v13 }
 0x792   : > { %v5167_v18 = vmul.f32 0.3275911, %v5159_v17  ;;  %v5217_v33 = vmul.f32 %v6230_v38, %v5209_v27  ;;  %v5271_v43 = vsub.f32 0.0, %v5159_v17  ;;  %v5153_v27 = vsel %vm5145_vm1, -1.0, %v11847_v59 }
 0x793   : > { %v5216_v1 = vmul.f32 %v6232_v44, %v5208_v40 }
 0x794   : > { %v5175_v55 = vadd.f32 1.0, %v5167_v18  ;;  %v5225_v22 = vadd.f32 1.4214138, %v5217_v33  ;;  %v5279_v12 = vmul.f32 %v5271_v43, %v5159_v17 }
 0x795   : > { %v5224_v9 = vadd.f32 1.4214138, %v5216_v1 }
 0x796   : > { %6233 = vrcp.f32 %v5175_v55  ;;  %v5233_v0 = vmul.f32 %v6230_v38, %v5225_v22  ;;  %v5292_v63 = vmul.f32 1.442695, %v5279_v12 }
 0x797   : > { %6235 = vpow2.f32 %v5296_v47  ;;  %v5232_v26 = vmul.f32 %v6232_v44, %v5224_v9 }
 0x798   : > { %v5241_v45 = vadd.f32 -0.28449672, %v5233_v0  ;;  %6237 = vpow2.f32 %v5294_v50 }
 0x799   : > { %v5240_v60 = vadd.f32 -0.28449672, %v5232_v26  ;;  %6239 = vpow2.f32 %v5292_v63 }
 0x79a   : > { %v5249_v28 = vmul.f32 %v6230_v38, %v5241_v45  ;;  %v5152_v45 = vsel %vm5144_vm12, -1.0, %v11847_v59 }
 0x79b   : > { %v5248_v36 = vmul.f32 %v6232_v44, %v5240_v60  ;;  %v5151_v60 = vsel %vm5143_vm13, -1.0, %v11847_v59 }
 0x79c   : > { %v5257_v11 = vadd.f32 0.2548296, %v5249_v28 }
 0x79d   : > { %v5256_v51 = vadd.f32 0.2548296, %v5248_v36 }
 0x79e   : > { %v5265_v62 = vmul.f32 %v6230_v38, %v5257_v11 }
 0x79f   : > { %v5264_v25 = vmul.f32 %v6232_v44, %v5256_v51 }
 0x7a3   : > { %v6234_v8 = vpop.eup %6233 }
 0x7a4   : > { %v5199_v58 = vmul.f32 1.0614054, %v6234_v8  ;;  %v6236_v5 = vpop.eup %6235 }
 0x7a5   : > { %v5305_v54 = vmul.f32 %v6236_v5, %v5265_v62  ;;  %v6238_v38 = vpop.eup %6237 }
 0x7a6   : > { %v5207_v6 = vadd.f32 -1.4531521, %v5199_v58  ;;  %v5304_v33 = vmul.f32 %v6238_v38, %v5264_v25  ;;  %v6240_v34 = vpop.eup %6239 }
 0x7a7   : > { %v5313_v17 = vsub.f32 1.0, %v5305_v54 }
 0x7a8   : > { %v5215_v31 = vmul.f32 %v6234_v8, %v5207_v6  ;;  %v5312_v1 = vsub.f32 1.0, %v5304_v33 }
 0x7a9   : > { %v5321_v22 = vmul.f32 %v5313_v17, %v5153_v27 }
 0x7aa   : > { %v5223_v39 = vadd.f32 1.4214138, %v5215_v31  ;;  %v5320_v26 = vmul.f32 %v5312_v1, %v5152_v45 }
 0x7ab   : > { %v5329_v47 = vadd.f32 1.0, %v5321_v22 }
 0x7ac   : > { %v5231_v24 = vmul.f32 %v6234_v8, %v5223_v39 }
 0x7ad   : > { %v5337_v12 = vmul.f32 %v5329_v47, %v5129_v53 }
 0x7ae   : > { %v5101_v37 = vpop.xlane.xlu1 %5100  ;;  %v5239_v16 = vadd.f32 -0.28449672, %v5231_v24 }
 0x7af   : > { %v10769_v41 = vadd.f32 %v10745_v57, %v5101_v37 }
 0x7b0   : > { %v5247_v20 = vmul.f32 %v6234_v8, %v5239_v16 }
 0x7b1   : > { %v10772_v15 = vmul.f32 0.70710677, %v10769_v41  ;;  %v5104_v61 = vpop.xlane.xlu0 %5103 }
 0x7b2   : > { %v10775_v14 = vadd.f32 %v10745_v57, %v5104_v61  ;;  %v5255_v56 = vadd.f32 0.2548296, %v5247_v20 }
 0x7b3   : > { %v5157_v2 = vand.u32 2147483647, %v10772_v15  ;;  %vm5141_vm14 = vcmp.lt.f32.partialorder %v10772_v15, 0.0 }
 0x7b4   : > { %v10779_v35 = vmul.f32 0.70710677, %v10775_v14  ;;  %v5263_v13 = vmul.f32 %v6234_v8, %v5255_v56 }
 0x7b5   : > { %v5165_v10 = vmul.f32 0.3275911, %v5157_v2  ;;  %v5269_v18 = vsub.f32 0.0, %v5157_v2 }
 0x7b6   : > { %v5158_v42 = vand.u32 2147483647, %v10779_v35  ;;  %v5303_v58 = vmul.f32 %v6240_v34, %v5263_v13  ;;  %vm5142_vm15 = vcmp.lt.f32.partialorder %v10779_v35, 0.0  ;;  %v5126_v35 = vmul.f32 0.5, %v10775_v14 }
 0x7b7   : > { %v5173_v52 = vadd.f32 1.0, %v5165_v10  ;;  %v5277_v44 = vmul.f32 %v5269_v18, %v5157_v2  ;;  %v5328_v10 = vadd.f32 1.0, %v5320_v26 }
 0x7b8   : > { %v5166_v30 = vmul.f32 0.3275911, %v5158_v42  ;;  %v5270_v23 = vsub.f32 0.0, %v5158_v42  ;;  %v5311_v39 = vsub.f32 1.0, %v5303_v58 }
 0x7b9   : > { %6241 = vrcp.f32 %v5173_v52  ;;  %v5288_v31 = vmul.f32 1.442695, %v5277_v44 }
 0x7ba   : > { %v5174_v46 = vadd.f32 1.0, %v5166_v30  ;;  %v5278_v6 = vmul.f32 %v5270_v23, %v5158_v42  ;;  %v5319_v2 = vmul.f32 %v5311_v39, %v5151_v60  ;;  %v5128_v30 = vmul.f32 0.5, %v10754_v19 }
 0x7bb   : > { %v5127_v19 = vmul.f32 0.5, %v10762_v48 }
 0x7bc   : > { %6243 = vrcp.f32 %v5174_v46  ;;  %v5290_v28 = vmul.f32 1.442695, %v5278_v6  ;;  %v5336_v56 = vmul.f32 %v5328_v10, %v5128_v30 }
 0x7bd   : > { %v5098_v21 = vpop.xlane.xlu0 %5097 }
 0x7be   : > { %v10784_v3 = vadd.f32 %v10745_v57, %v5098_v21  ;;  %v5327_v21 = vadd.f32 1.0, %v5319_v2 }
 0x7c0   : > { %v10787_v55 = vmul.f32 0.70710677, %v10784_v3  ;;  %v5335_v34 = vmul.f32 %v5327_v21, %v5127_v19 }
 0x7c2   : > { %v5156_v40 = vand.u32 2147483647, %v10787_v55  ;;  %vm5140_vm0 = vcmp.lt.f32.partialorder %v10787_v55, 0.0 }
 0x7c4   : > { %v5164_v29 = vmul.f32 0.3275911, %v5156_v40  ;;  %v5268_v36 = vsub.f32 0.0, %v5156_v40 }
 0x7c6   : > { %v10792_v0 = vpop.eup %6241  ;;  %v5172_v7 = vadd.f32 1.0, %v5164_v29  ;;  %v5276_v17 = vmul.f32 %v5268_v36, %v5156_v40 }
 0x7c7   : > { %v5095_v9 = vpop.xlane.xlu1 %5094  ;;  %v5197_v8 = vmul.f32 1.0614054, %v10792_v0 }
 0x7c8   : > { %6245 = vrcp.f32 %v5172_v7  ;;  %v10798_v43 = vadd.f32 %v10745_v57, %v5095_v9  ;;  %v5286_v58 = vmul.f32 1.442695, %v5276_v17 }
 0x7c9   : > { %v10800_v49 = vpop.eup %6243  ;;  %v5205_v37 = vadd.f32 -1.4531521, %v5197_v8  ;;  %6247 = vpow2.f32 %v5288_v31 }
 0x7ca   : > { %v10804_v50 = vmul.f32 0.70710677, %v10798_v43  ;;  %v5198_v61 = vmul.f32 1.0614054, %v10800_v49  ;;  %6249 = vpow2.f32 %v5290_v28 }
 0x7cb   : > { %v5385_v32 = vpop.permute.xlu1 %5384  ;;  %v5213_v24 = vmul.f32 %v10792_v0, %v5205_v37  ;;  %v5149_v37 = vsel %vm5141_vm14, -1.0, %v11847_v59 }
 0x7cc   : > { %v5155_v11 = vand.u32 2147483647, %v10804_v50  ;;  %v5401_v63 = vadd.f32 %v5385_v32, %v5337_v12  ;;  %v5206_v4 = vadd.f32 -1.4531521, %v5198_v61  ;;  %vm5139_vm2 = vcmp.lt.f32.partialorder %v10804_v50, 0.0 }
 0x7cd   : > { %v5221_v16 = vadd.f32 1.4214138, %v5213_v24 }
 0x7ce   : > { %v5163_v42 = vmul.f32 0.3275911, %v5155_v11  ;;  %v5092_v62 = vpop.xlane.xlu0 %5091  ;;  %5447 = vperm.xlu0 %6131, %v5401_v63   ;;  %v5214_v52 = vmul.f32 %v10800_v49, %v5206_v4  ;;  %v5267_v31 = vsub.f32 0.0, %v5155_v11  ;;  %v5125_v63 = vmul.f32 0.5, %v10769_v41 }
 0x7cf   : > { %v10813_v5 = vadd.f32 %v10745_v57, %v5092_v62  ;;  %v5229_v20 = vmul.f32 %v10792_v0, %v5221_v16  ;;  %v5381_v33 = vpop.permute.xlu1 %5380  ;;  %v5150_v4 = vsel %vm5142_vm15, -1.0, %v11847_v59 }
 0x7d0   : > { %v5171_v51 = vadd.f32 1.0, %v5163_v42  ;;  %v5222_v46 = vadd.f32 1.4214138, %v5214_v52  ;;  %v5399_v7 = vadd.f32 %v5381_v33, %v5335_v34 }
 0x7d1   : > { %v10817_v54 = vmul.f32 0.70710677, %v10813_v5  ;;  %v5237_v25 = vadd.f32 -0.28449672, %v5229_v20 }
 0x7d2   : > { %6251 = vrcp.f32 %v5171_v51  ;;  %v5383_v18 = vpop.permute.xlu0 %5382  ;;  %v5230_v38 = vmul.f32 %v10800_v49, %v5222_v46 }
 0x7d3   : > { %v5154_v57 = vand.u32 2147483647, %v10817_v54  ;;  %v5400_v27 = vadd.f32 %v5383_v18, %v5336_v56  ;;  %v5245_v13 = vmul.f32 %v10792_v0, %v5237_v25  ;;  %v5379_v25 = vpop.permute.xlu1 %5378  ;;  %vm5138_vm3 = vcmp.lt.f32.partialorder %v10817_v54, 0.0 }
 0x7d4   : > { %v5238_v23 = vadd.f32 -0.28449672, %v5230_v38  ;;  %v11848_v54 = vmov 0.0  }
 0x7d5   : > { %v6246_v22 = vpop.eup %6245  ;;  %v5162_v44 = vmul.f32 0.3275911, %v5154_v57  ;;  %5442 = vperm.xlu1 %6132, %v5400_v27   ;;  %v5253_v29 = vadd.f32 0.2548296, %v5245_v13  ;;  %v5266_v2 = vsub.f32 0.0, %v5154_v57  ;;  %5889 = vmatprep.mubr.msk.f32.mxu1 %vm6476_vm4, %v11848_v54 }
 0x7d6   : > { %v5246_v40 = vmul.f32 %v10800_v49, %v5238_v23  ;;  %v5196_v1 = vmul.f32 1.0614054, %v6246_v22  ;;  %v6248_v47 = vpop.eup %6247  ;;  %v5377_v52 = vpop.permute.xlu0 %5376  ;;  %5870 = vmatprep.mubr.msk.f32.mxu0 %vm6476_vm4, %v11848_v54 }
 0x7d7   : > { %v5170_v6 = vadd.f32 1.0, %v5162_v44  ;;  %v5261_v48 = vmul.f32 %v10792_v0, %v5253_v29  ;;  %v6250_v26 = vpop.eup %6249  ;;  %v5275_v0 = vmul.f32 %v5267_v31, %v5155_v11  ;;  %v5274_v51 = vmul.f32 %v5266_v2, %v5154_v57 }
 0x7d8   : > { %v5254_v9 = vadd.f32 0.2548296, %v5246_v40  ;;  %v5204_v8 = vadd.f32 -1.4531521, %v5196_v1  ;;  %v5148_v29 = vsel %vm5140_vm0, -1.0, %v11847_v59 }
 0x7d9   : > { %6253 = vrcp.f32 %v5170_v6  ;;  %v5301_v45 = vmul.f32 %v6248_v47, %v5261_v48  ;;  %5437 = vperm.xlu1 %6132, %v5399_v7   ;;  %v5284_v10 = vmul.f32 1.442695, %v5275_v0  ;;  %v5282_v13 = vmul.f32 1.442695, %v5274_v51  ;;  %v5407_v51 = vld [vmem:[%s10920_s6 + $0x68] sm:$0xff] }
 0x7da   : > { %6255 = vpow2.f32 %v5286_v58  ;;  %v5262_v53 = vmul.f32 %v10800_v49, %v5254_v9  ;;  %v5212_v39 = vmul.f32 %v6246_v22, %v5204_v8  ;;  %v5375_v8 = vpop.permute.xlu1 %5374 }
 0x7db   : > { %v5309_v28 = vsub.f32 1.0, %v5301_v45  ;;  %6257 = vpow2.f32 %v5284_v10  ;;  %v5122_v10 = vmul.f32 0.5, %v10813_v5  ;;  %v5409_v5 = vld [vmem:[%s10920_s6 + $0x78] sm:$0xff] }
 0x7dc   : > { %v5302_v12 = vmul.f32 %v6250_v26, %v5262_v53  ;;  %v5220_v61 = vadd.f32 1.4214138, %v5212_v39  ;;  %6259 = vpow2.f32 %v5282_v13 }
 0x7dd   : > { %v5317_v15 = vmul.f32 %v5309_v28, %v5149_v37  ;;  %v5147_v28 = vsel %vm5139_vm2, -1.0, %v11847_v59 }
 0x7de   : > { %v5310_v32 = vsub.f32 1.0, %v5302_v12  ;;  %v5228_v24 = vmul.f32 %v6246_v22, %v5220_v61 }
 0x7df   : > { %v6252_v60 = vpop.eup %6251  ;;  %v5325_v49 = vadd.f32 1.0, %v5317_v15  ;;  %v5123_v15 = vmul.f32 0.5, %v10798_v43 }
 0x7e0   : > { %v5318_v16 = vmul.f32 %v5310_v32, %v5150_v4  ;;  %v5236_v36 = vadd.f32 -0.28449672, %v5228_v24  ;;  %v5195_v42 = vmul.f32 1.0614054, %v6252_v60  ;;  %v5146_v4 = vsel %vm5138_vm3, -1.0, %v11847_v59 }
 0x7e1   : > { %v5333_v62 = vmul.f32 %v5325_v49, %v5125_v63  ;;  %v5373_v63 = vpop.permute.xlu0 %5372 }
 0x7e2   : > { %v5326_v11 = vadd.f32 1.0, %v5318_v16  ;;  %v5244_v30 = vmul.f32 %v6246_v22, %v5236_v36  ;;  %v5203_v20 = vadd.f32 -1.4531521, %v5195_v42  ;;  %v3353_v36 = vld [vmem:[%s10921_s7] sm:$0x3]  ;;  %v5371_v42 = vpop.permute.xlu1 %5370 }
 0x7e3   : > { %v5397_v46 = vadd.f32 %v5377_v52, %v5333_v62  ;;  %5890 = vmatmul.mubr.msk.f32.vlgmr.msra.gmra.mxu1 %vm5461_vm5, %v3353_v36  ;;  %v5408_v52 = vld [vmem:[%s10920_s6 + $0x70] sm:$0xff] }
 0x7e4   : > { %v5334_v21 = vmul.f32 %v5326_v11, %v5126_v35  ;;  %v5252_v41 = vadd.f32 0.2548296, %v5244_v30  ;;  %v5211_v56 = vmul.f32 %v6252_v60, %v5203_v20 }
 0x7e5   : > { %5427 = vperm.xlu1 %6132, %v5397_v46  }
 0x7e6   : > { %v6254_v17 = vpop.eup %6253  ;;  %v5398_v18 = vadd.f32 %v5379_v25, %v5334_v21  ;;  %v5260_v38 = vmul.f32 %v6246_v22, %v5252_v41  ;;  %v5219_v19 = vadd.f32 1.4214138, %v5211_v56  ;;  %v5124_v22 = vmul.f32 0.5, %v10784_v3  ;;  %v5406_v41 = vld [vmem:[%s10920_s6 + $0x60] sm:$0xff]  ;;  %v5405_v56 = vld [vmem:[%s10920_s6 + $0x58] sm:$0xff] }
 0x7e7   : > { %v6256_v27 = vpop.eup %6255  ;;  %v5194_v33 = vmul.f32 1.0614054, %v6254_v17 }
 0x7e8   : > { %v5300_v14 = vmul.f32 %v6256_v27, %v5260_v38  ;;  %v5227_v23 = vmul.f32 %v6252_v60, %v5219_v19  ;;  %5432 = vperm.xlu0 %6131, %v5398_v18   ;;  %v6258_v9 = vpop.eup %6257  ;;  %v5404_v19 = vld [vmem:[%s10920_s6 + $0x50] sm:$0xff] }
 0x7e9   : > { %v5202_v57 = vadd.f32 -1.4531521, %v5194_v33  ;;  %v6260_v61 = vpop.eup %6259  ;;  %v5403_v33 = vld [vmem:[%s10920_s6 + $0x48] sm:$0xff] }
 0x7ea   : > { %v5308_v44 = vsub.f32 1.0, %v5300_v14  ;;  %v5235_v34 = vadd.f32 -0.28449672, %v5227_v23 }
 0x7eb   : > { %v5210_v58 = vmul.f32 %v6254_v17, %v5202_v57  ;;  %v5402_v57 = vld [vmem:[%s10920_s6 + $0x40] sm:$0xff] }
 0x7ec   : > { %v5316_v40 = vmul.f32 %v5308_v44, %v5148_v29  ;;  %v5243_v1 = vmul.f32 %v6252_v60, %v5235_v34 }
 0x7ed   : > { %v5218_v6 = vadd.f32 1.4214138, %v5210_v58 }
 0x7ee   : > { %v5324_v7 = vadd.f32 1.0, %v5316_v40  ;;  %v5251_v48 = vadd.f32 0.2548296, %v5243_v1 }
 0x7ef   : > { %v5226_v47 = vmul.f32 %v6254_v17, %v5218_v6 }
 0x7f0   : > { %v5332_v31 = vmul.f32 %v5324_v7, %v5124_v22  ;;  %v5259_v55 = vmul.f32 %v6252_v60, %v5251_v48 }
 0x7f1   : > { %v5234_v45 = vadd.f32 -0.28449672, %v5226_v47 }
 0x7f2   : > { %v5396_v53 = vadd.f32 %v5375_v8, %v5332_v31  ;;  %v5299_v39 = vmul.f32 %v6258_v9, %v5259_v55 }
 0x7f3   : > { %v5242_v26 = vmul.f32 %v6254_v17, %v5234_v45 }
 0x7f4   : > { %v5307_v37 = vsub.f32 1.0, %v5299_v39  ;;  %5422 = vperm.xlu0 %6131, %v5396_v53  }
 0x7f5   : > { %v5250_v0 = vadd.f32 0.2548296, %v5242_v26 }
 0x7f6   : > { %v5315_v12 = vmul.f32 %v5307_v37, %v5147_v28 }
 0x7f7   : > { %v5258_v3 = vmul.f32 %v6254_v17, %v5250_v0 }
 0x7f8   : > { %v5323_v32 = vadd.f32 1.0, %v5315_v12 }
 0x7f9   : > { %v5298_v24 = vmul.f32 %v6260_v61, %v5258_v3 }
 0x7fa   : > { %v5331_v60 = vmul.f32 %v5323_v32, %v5123_v15 }
 0x7fb   : > { %v5306_v50 = vsub.f32 1.0, %v5298_v24 }
 0x7fc   : > { %v5395_v2 = vadd.f32 %v5373_v63, %v5331_v60 }
 0x7fd   : > { %v5314_v49 = vmul.f32 %v5306_v50, %v5146_v4 }
 0x7fe   : > { %5417 = vperm.xlu1 %6132, %v5395_v2  }
 0x7ff   : > { %v5322_v16 = vadd.f32 1.0, %v5314_v49 }
 0x801   : > { %v5330_v43 = vmul.f32 %v5322_v16, %v5122_v10 }
 0x802   : > { %5459 = vrot.lane.b32.xlu1 %v3353_v36, %s6475_s20  ;;  %s6381_s20 = scalar_lea.vmem %s5650_s17, 32 }
 0x803   : > { %v5394_v62 = vadd.f32 %v5371_v42, %v5330_v43  ;;  %p6382_p11 = scmp.ne.s32.totalorder %s5650_s17, %s6381_s20  ;;  %p6389_p1 = scmp.lt.s32.totalorder %s6387_s23, %s6381_s20 }
 0x805   : > { %5412 = vperm.xlu0 %6131, %v5394_v62   ;;  %p6383_p12 = pnand %p6382_p11, %p6561_p5  ;;  %p6390_p2 = por %p6389_p1, %p6388_p0 }
 0x807   : > { %p6384_p13 = pneg %p6383_p12 }
 0x809   : > { %p6391_p3 = pnand %p6390_p2, %p6384_p13 }
 0x849   : > { %v5448_v35 = vpop.permute.xlu0 %5447 }
 0x84a   : > { %v5457_v11 = vmul.f32 %v5448_v35, %v5409_v5 }
 0x84c   : > { %5855 = vmatpush3.msra.mxu0 %v5457_v11 }
 0x84d   : > { %5856 = vmatprep.subr.mxu0 %v11848_v54 }
 0x850   : > { %v5443_v30 = vpop.permute.xlu1 %5442 }
 0x851   : > { %v5456_v20 = vmul.f32 %v5443_v30, %v5408_v52 }
 0x853   : > { %5857 = vmatpush3.msra.mxu0 %v5456_v20 }
 0x854   : > { %v5438_v46 = vpop.permute.xlu1 %5437  ;;  %5858 = vmatprep.subr.mxu0 %v11848_v54 }
 0x855   : > { %v5455_v21 = vmul.f32 %v5438_v46, %v5407_v51 }
 0x857   : > { %5859 = vmatpush3.msra.mxu0 %v5455_v21 }
 0x858   : > { %5860 = vmatprep.subr.mxu0 %v11848_v54 }
 0x860   : > { %v5428_v25 = vpop.permute.xlu1 %5427 }
 0x861   : > { %v5453_v38 = vmul.f32 %v5428_v25, %v5405_v56 }
 0x863   : > { %v5433_v17 = vpop.permute.xlu0 %5432 }
 0x864   : > { %v5454_v18 = vmul.f32 %v5433_v17, %v5406_v41 }
 0x866   : > { %5861 = vmatpush3.msra.mxu0 %v5454_v18 }
 0x867   : > { %5862 = vmatprep.subr.mxu0 %v11848_v54 }
 0x868   : > { %5863 = vmatpush3.msra.mxu0 %v5453_v38 }
 0x869   : > { %5864 = vmatprep.subr.mxu0 %v11848_v54 }
 0x86f   : > { %v5423_v27 = vpop.permute.xlu0 %5422 }
 0x870   : > { %v5452_v13 = vmul.f32 %v5423_v27, %v5404_v19 }
 0x872   : > { %5865 = vmatpush3.msra.mxu0 %v5452_v13 }
 0x873   : > { %5866 = vmatprep.subr.mxu0 %v11848_v54 }
 0x879   : > { %v5418_v14 = vpop.permute.xlu1 %5417 }
 0x87a   : > { %v5451_v23 = vmul.f32 %v5418_v14, %v5403_v33 }
 0x87c   : > { %5867 = vmatpush3.msra.mxu0 %v5451_v23 }
 0x87d   : > { %5868 = vmatprep.subr.mxu0 %v11848_v54  ;;  %v5460_v29 = vpop.permute.xlu1 %5459 }
 0x880   : > { %v5413_v44 = vpop.permute.xlu0 %5412 }
 0x881   : > { %v5450_v34 = vmul.f32 %v5413_v44, %v5402_v57 }
 0x883   : > { %5869 = vmatpush3.msra.mxu0 %v5450_v34 }
 0x884   : > { %5871 = vmatmul.mubr.msk.f32.vlgmr.msra.gmra.mxu0 %vm5461_vm5, %v5460_v29 }
 0x8a3   : > { %v5602_v58 = vpop.f32.mrf.mxu1 }
 0x8a5   : > { %v5891_v40 = vpop.f32.mrf.mxu1 }
 0x944   : > { %v5530_v1 = vpop.f32.mrf.mxu0 }
 0x945   : > { %v5603_v6 = vadd.f32 %v5602_v58, %v5530_v1 }
 0x946   : > { %v5872_v22 = vpop.f32.mrf.mxu0 }
 0x947   : > { %v5607_v7 = vmul.f32 0.70710677, %v5603_v6  ;;  %v5606_v50 = vmul.f32 0.5, %v5603_v6 }
 0x949   : > { %v5610_v48 = vand.u32 2147483647, %v5607_v7  ;;  %vm5608_vm6 = vcmp.lt.f32.partialorder %v5607_v7, 0.0 }
 0x94a   : > { %v5609_v60 = vsel %vm5608_vm6, -1.0, %v11847_v59 }
 0x94b   : > { %v5611_v47 = vmul.f32 0.3275911, %v5610_v48  ;;  %v5624_v55 = vsub.f32 0.0, %v5610_v48 }
 0x94d   : > { %v5612_v31 = vadd.f32 1.0, %v5611_v47  ;;  %v5625_v9 = vmul.f32 %v5624_v55, %v5610_v48 }
 0x94f   : > { %6261 = vrcp.f32 %v5612_v31  ;;  %v5626_v53 = vmul.f32 1.442695, %v5625_v9 }
 0x951   : > { %6263 = vpow2.f32 %v5626_v53 }
 0x95c   : > { %v6262_v8 = vpop.eup %6261 }
 0x95d   : > { %v5615_v45 = vmul.f32 1.0614054, %v6262_v8 }
 0x95e   : > { %v6264_v15 = vpop.eup %6263 }
 0x95f   : > { %v5616_v39 = vadd.f32 -1.4531521, %v5615_v45 }
 0x961   : > { %v5617_v26 = vmul.f32 %v6262_v8, %v5616_v39 }
 0x963   : > { %v5618_v37 = vadd.f32 1.4214138, %v5617_v26 }
 0x965   : > { %v5619_v28 = vmul.f32 %v6262_v8, %v5618_v37 }
 0x967   : > { %v5620_v0 = vadd.f32 -0.28449672, %v5619_v28 }
 0x969   : > { %v5621_v12 = vmul.f32 %v6262_v8, %v5620_v0 }
 0x96b   : > { %v5622_v3 = vadd.f32 0.2548296, %v5621_v12 }
 0x96d   : > { %v5623_v61 = vmul.f32 %v6262_v8, %v5622_v3 }
 0x96f   : > { %v5628_v32 = vmul.f32 %v6264_v15, %v5623_v61 }
 0x971   : > { %v5629_v24 = vsub.f32 1.0, %v5628_v32 }
 0x973   : > { %v5630_v63 = vmul.f32 %v5629_v24, %v5609_v60 }
 0x975   : > { %v5631_v4 = vadd.f32 1.0, %v5630_v63 }
 0x977   : > { %v5632_v2 = vmul.f32 %v5631_v4, %v5606_v50 }
 0x979   : > { %5634 = vst.msk [vmem:[%s298_s13] sm:$0x3] %vm5633_vm7, %v5632_v2 }
 0x97a   : > { %6394 = shalt.err (!%p6391_p3)
}
 0x97b   : > { %s6395_s25 = scalar_lea.hbm %s5647_s22, 32  ;;  %s6399_s12 = scalar_lea.hbm %s10922_s8, 64 }
 0x97c   : > { %p6396_p4 = scmp.ne.s32.totalorder %s5647_s22, %s6395_s25  ;;  %p6400_p9 = scmp.lt.s32.totalorder %s5647_s22, %s10922_s8 }
 0x97d   : > { %p6401_p10 = scmp.lt.s32.totalorder %s6399_s12, %s6395_s25 }
 0x97e   : > { %p6397_p7 = pnand %p6396_p4, %p6561_p5 }
 0x97f   : > { %p6402_p11 = por %p6401_p10, %p6400_p9 }
 0x980   : > { %p6398_p8 = pneg %p6397_p7 }
 0x982   : > { %p6403_p12 = pnand %p6402_p11, %p6398_p8 }
 0x984   : > { %6406 = shalt.err (!%p6403_p12)
}
 0x985   : > { %5892 = dma.vmem_to_hbm [thread:$0]  (%p6561_p5), %s5650_s17, 32, %s5647_s22, %s5636_s19  }
 0x986 PF: > { %p5898_p13 = scmp.ge.s32.totalorder %s6441_s30, 2  ;;  %s5661_s18 = sand.u32 1, %s6429_s27  }
 0x987   : > { %s5662_s20 = scalar_lea.sflag [#allocation4], %s5661_s18 }
 0x988   : > { %p5895_p0 = pnand %p5898_p13, %p6565_p6 }
 0x98a   : > { %p5896_p1 = pneg %p5895_p0 }
 0x98c   : > { %6424 = dma.done.wait (%p5896_p1), %s5662_s20, 32  }
 0x98d   : > { %6426 = vsyncadd (%p5896_p1), %s5662_s20, 4294967264  ;;  %p18_p2 = scmp.ge.s32.totalorder %s6548_s11, 4   ;;  %s11849_s27 = smov %s6433_s28 }
 0x98e   : > { %s11850_s28 = smov %s6437_s29  ;;  %s11851_s29 = smov %s6559_s14 }
 0x98f   : > { %s11852_s30 = smov %s6548_s11  ;;  %20 = sbr.rel (!%p18_p2) target bundleno = 3 (0x3), region = 87 }
 0x994   :  { %5667 = vsyncpa [#allocation4], 1 }
 0x995   :  { %5669 = vsyncpa [#allocation4 + $0x1], 1 }

</bundles_post_ra>
